<compile_context>
chip_gen: v7x
topology: tpu7x:2x2x1
jax: 0.10.0
libtpu: 0.0.40
codegen_flags: <defaults>
</compile_context>

<pallas_src>
import functools

import jax
import jax.numpy as jnp
from jax.experimental import pallas as pl
from jax.experimental.pallas import tpu as pltpu

INPUT_SIZE = 784
HIDDEN1_SIZE = 500
HIDDEN2_SIZE = 200

# f32 x tile at 1024x784 ~= 3.2 MB; with double-buffering plus resident bf16 weights
# and the f32 hidden intermediate this stays far under every generation's scoped
# VMEM limit (including v7x's 64 MiB physical VMEM).
_TB_CAP = 1024


def _round_up(n, m):
    return ((n + m - 1) // m) * m


def _tpu_kind():
    try:
        return jax.devices()[0].device_kind.lower()
    except Exception:
        return ""


def _pick_batch_tile(batch, num_tc):
    """Largest batch tile that keeps >= num_tc grid steps (and respects VMEM cap)."""
    b8 = _round_up(max(batch, 8), 8)
    if num_tc > 1:
        tb = _round_up(pl.cdiv(b8, num_tc), 8)   # keep >= 2 parallel steps on v7x
    else:
        tb = b8                                  # single TC: collapse to one step
    return int(min(tb, _TB_CAP))


def mlp_kernel(x_ref, w1_ref, b1_ref, w2_ref, b2_ref, o_ref, *, bf16_epilogue):
    # Matmul 1: f32 x tile cast to bf16 in-kernel (VPU), bf16 MXU, f32 accumulation.
    h = jnp.dot(x_ref[...].astype(jnp.bfloat16), w1_ref[...],
                preferred_element_type=jnp.float32)
    if bf16_epilogue:
        # v6e/v7x: bf16-native VPU -> halve the (tb, 512) intermediate's vreg/VMEM
        # pressure; b1 is stored bf16 in this mode.
        hb = jnp.maximum(h.astype(jnp.bfloat16) + b1_ref[...], 0)
    else:
        # v5e: no bf16 VPU path; keep bias+ReLU in f32, cast once for the MXU.
        hb = jnp.maximum(h + b1_ref[...], 0.0).astype(jnp.bfloat16)
    # Matmul 2: bf16 MXU, f32 accumulation; bias add in f32, store in output dtype.
    out = jnp.dot(hb, w2_ref[...], preferred_element_type=jnp.float32)
    o_ref[...] = (out + b2_ref[...]).astype(o_ref.dtype)


def make_neural_net_forward(w1, b1, w2, b2, *, out_dtype=jnp.bfloat16):
    """Pads/casts the weights ONCE and returns a jitted forward(x) closure."""
    D_in, H1 = w1.shape
    H2 = w2.shape[1]
    H1p = _round_up(H1, 128)   # 500 -> 512 (lane-dense, MXU-native N)
    H2p = _round_up(H2, 128)   # 200 -> 256

    kind = _tpu_kind()
    num_tc = 2 if "v7" in kind else 1
    bf16_epilogue = ("v6" in kind) or ("v7" in kind)

    # Hoisted, one-time padding + casts (exact zero padding keeps padded hidden
    # channels exactly zero through the ReLU and second matmul).
    w1p = jnp.pad(w1, ((0, 0), (0, H1p - H1))).astype(jnp.bfloat16)
    b1p = jnp.pad(b1.reshape(1, H1), ((0, 0), (0, H1p - H1))).astype(
        jnp.bfloat16 if bf16_epilogue else jnp.float32)
    w2p = jnp.pad(w2, ((0, H1p - H1), (0, H2p - H2))).astype(jnp.bfloat16)
    b2p = jnp.pad(b2.reshape(1, H2), ((0, 0), (0, H2p - H2))).astype(jnp.float32)

    kernel = functools.partial(mlp_kernel, bf16_epilogue=bf16_epilogue)

    @jax.jit
    def forward(x):
        B = x.shape[0]
        tb = _pick_batch_tile(B, num_tc)
        Bp = _round_up(B, tb)
        xp = x if Bp == B else jnp.pad(x, ((0, Bp - B), (0, 0)))   # rarely needed

        flops = 2 * Bp * (D_in * H1p + H1p * H2p)
        bytes_accessed = (xp.size * 4 + w1p.size * 2 + w2p.size * 2
                          + b1p.size * b1p.dtype.itemsize + b2p.size * 4
                          + Bp * H2p * jnp.dtype(out_dtype).itemsize)

        out_padded = pl.pallas_call(
            kernel,
            out_shape=jax.ShapeDtypeStruct((Bp, H2p), out_dtype),
            grid_spec=pltpu.PrefetchScalarGridSpec(
                num_scalar_prefetch=0,
                grid=(Bp // tb,),
                in_specs=[
                    pl.BlockSpec((tb, D_in), lambda i: (i, 0)),    # x tile over batch
                    pl.BlockSpec((D_in, H1p), lambda i: (0, 0)),   # W1 resident
                    pl.BlockSpec((1, H1p), lambda i: (0, 0)),      # b1
                    pl.BlockSpec((H1p, H2p), lambda i: (0, 0)),    # W2 resident
                    pl.BlockSpec((1, H2p), lambda i: (0, 0)),      # b2
                ],
                out_specs=pl.BlockSpec((tb, H2p), lambda i: (i, 0)),
            ),
            compiler_params=pltpu.CompilerParams(
                dimension_semantics=("parallel",),
            ),
            cost_estimate=pl.CostEstimate(
                flops=flops, transcendentals=0, bytes_accessed=bytes_accessed),
        )(xp, w1p, b1p, w2p, b2p)

        # Slice exact-zero padding back off. If the consumer can take the padded
        # (Bp, 256) slab directly, drop this slice at the call site instead.
        return out_padded[:B, :H2]

    return forward


def reference_forward(x, w1, b1, w2, b2):
    h = jnp.maximum(x @ w1 + b1, 0.0)
    return h @ w2 + b2


if __name__ == "__main__":
    key = jax.random.PRNGKey(0)
    kx, kw1, kb1, kw2, kb2 = jax.random.split(key, 5)

    # batch=512: single grid step on v5e/v6e (tb=512), two "parallel" steps (tb=256)
    # on dual-TensorCore v7x.
    batch = 512
    # PyTorch nn.Linear uses U(-1/sqrt(fan_in), 1/sqrt(fan_in)); mirror that here.
    bound1 = 1.0 / (INPUT_SIZE ** 0.5)
    bound2 = 1.0 / (HIDDEN1_SIZE ** 0.5)

    x = jax.random.normal(kx, (batch, INPUT_SIZE), dtype=jnp.float32)
    w1 = jax.random.uniform(kw1, (INPUT_SIZE, HIDDEN1_SIZE), jnp.float32, -bound1, bound1)
    b1 = jax.random.uniform(kb1, (1, HIDDEN1_SIZE), jnp.float32, -bound1, bound1)
    w2 = jax.random.uniform(kw2, (HIDDEN1_SIZE, HIDDEN2_SIZE), jnp.float32, -bound2, bound2)
    b2 = jax.random.uniform(kb2, (1, HIDDEN2_SIZE), jnp.float32, -bound2, bound2)

    forward = make_neural_net_forward(w1, b1, w2, b2)   # one-time weight pad/cast
    out = forward(x)
    out = jax.block_until_ready(out)

    ref = reference_forward(x, w1, b1, w2, b2)
    assert out.shape == (batch, HIDDEN2_SIZE), out.shape
    # bf16 MXU inputs + bf16 output with f32 accumulation -> loosen tolerance vs the
    # f32 reference.
    assert jnp.allclose(out.astype(jnp.float32), ref, atol=3e-2, rtol=3e-2), \
        "mismatch vs reference"

    print("KERNEL_OK")
</pallas_src>

<mosaic_0001>
module attributes {stable_mosaic.version = 11 : i64} {
  func.func @mlp_kernel(%arg0: i32, %arg1: memref<512x784xf32, #tpu.memory_space<vmem>>, %arg2: memref<784x512xbf16, #tpu.memory_space<vmem>>, %arg3: memref<1x512xf32, #tpu.memory_space<vmem>>, %arg4: memref<512x256xbf16, #tpu.memory_space<vmem>>, %arg5: memref<1x256xf32, #tpu.memory_space<vmem>>, %arg6: memref<512x256xbf16, #tpu.memory_space<vmem>>) attributes {dimension_semantics = [#tpu.dimension_semantics<parallel>], iteration_bounds = array<i64: 1>, scalar_prefetch = 0 : i64, scratch_operands = 0 : i64, tpu.core_type = #tpu.core_type<tc>, window_params = [{transform_indices = @transform_0, window_bounds = array<i64: 512, 784>}, {pipeline_mode = #tpu.pipeline_mode<synchronous>, transform_indices = @transform_1, window_bounds = array<i64: 784, 512>}, {pipeline_mode = #tpu.pipeline_mode<synchronous>, transform_indices = @transform_2, window_bounds = array<i64: 1, 512>}, {pipeline_mode = #tpu.pipeline_mode<synchronous>, transform_indices = @transform_3, window_bounds = array<i64: 512, 256>}, {pipeline_mode = #tpu.pipeline_mode<synchronous>, transform_indices = @transform_4, window_bounds = array<i64: 1, 256>}, {transform_indices = @transform_5, window_bounds = array<i64: 512, 256>}]} {
    %c0 = arith.constant 0 : index
    %c0_0 = arith.constant 0 : index
    %0 = vector.load %arg1[%c0, %c0_0] : memref<512x784xf32, #tpu.memory_space<vmem>>, vector<512x784xf32>
    %1 = arith.truncf %0 : vector<512x784xf32> to vector<512x784xbf16>
    %c0_1 = arith.constant 0 : index
    %c0_2 = arith.constant 0 : index
    %2 = vector.load %arg2[%c0_1, %c0_2] : memref<784x512xbf16, #tpu.memory_space<vmem>>, vector<784x512xbf16>
    %cst = arith.constant dense<0.000000e+00> : vector<512x512xf32>
    %3 = tpu.matmul %1, %2, %cst {dimension_numbers = #tpu.dot_dimension_numbers<[1], [0], [0], [1], [0, 0, 1, 1], [], []>} : vector<512x784xbf16>, vector<784x512xbf16>, vector<512x512xf32> -> vector<512x512xf32>
    %c0_3 = arith.constant 0 : index
    %c0_4 = arith.constant 0 : index
    %4 = vector.load %arg3[%c0_3, %c0_4] : memref<1x512xf32, #tpu.memory_space<vmem>>, vector<1x512xf32>
    %5 = vector.broadcast %4 : vector<1x512xf32> to vector<512x512xf32>
    %6 = arith.addf %3, %5 : vector<512x512xf32>
    %cst_5 = arith.constant 0.000000e+00 : f32
    %7 = vector.broadcast %cst_5 : f32 to vector<512x512xf32>
    %8 = arith.maximumf %6, %7 : vector<512x512xf32>
    %9 = arith.truncf %8 : vector<512x512xf32> to vector<512x512xbf16>
    %c0_6 = arith.constant 0 : index
    %c0_7 = arith.constant 0 : index
    %10 = vector.load %arg4[%c0_6, %c0_7] : memref<512x256xbf16, #tpu.memory_space<vmem>>, vector<512x256xbf16>
    %cst_8 = arith.constant dense<0.000000e+00> : vector<512x256xf32>
    %11 = tpu.matmul %9, %10, %cst_8 {dimension_numbers = #tpu.dot_dimension_numbers<[1], [0], [0], [1], [0, 0, 1, 1], [], []>} : vector<512x512xbf16>, vector<512x256xbf16>, vector<512x256xf32> -> vector<512x256xf32>
    %c0_9 = arith.constant 0 : index
    %c0_10 = arith.constant 0 : index
    %12 = vector.load %arg5[%c0_9, %c0_10] : memref<1x256xf32, #tpu.memory_space<vmem>>, vector<1x256xf32>
    %13 = vector.broadcast %12 : vector<1x256xf32> to vector<512x256xf32>
    %14 = arith.addf %11, %13 : vector<512x256xf32>
    %15 = arith.truncf %14 : vector<512x256xf32> to vector<512x256xbf16>
    %c0_11 = arith.constant 0 : index
    %c0_12 = arith.constant 0 : index
    %16 = vector.load %arg6[%c0_11, %c0_12] : memref<512x256xbf16, #tpu.memory_space<vmem>>, vector<512x256xbf16>
    tpu.vector_store %arg6[%c0_11, %c0_12], %15 {strides = array<i32>} : memref<512x256xbf16, #tpu.memory_space<vmem>>, vector<512x256xbf16>,
    return
  }
  func.func @transform_0(%arg0: i32) -> (i32, i32) {
    %c0_i32 = arith.constant 0 : i32
    %c0_i32_0 = arith.constant 0 : i32
    return %arg0, %c0_i32 : i32, i32
  }
  func.func @transform_1(%arg0: i32) -> (i32, i32) {
    %c0_i32 = arith.constant 0 : i32
    %c0_i32_0 = arith.constant 0 : i32
    %c0_i32_1 = arith.constant 0 : i32
    return %c0_i32, %c0_i32_0 : i32, i32
  }
  func.func @transform_2(%arg0: i32) -> (i32, i32) {
    %c0_i32 = arith.constant 0 : i32
    %c0_i32_0 = arith.constant 0 : i32
    %c0_i32_1 = arith.constant 0 : i32
    return %c0_i32, %c0_i32_0 : i32, i32
  }
  func.func @transform_3(%arg0: i32) -> (i32, i32) {
    %c0_i32 = arith.constant 0 : i32
    %c0_i32_0 = arith.constant 0 : i32
    %c0_i32_1 = arith.constant 0 : i32
    return %c0_i32, %c0_i32_0 : i32, i32
  }
  func.func @transform_4(%arg0: i32) -> (i32, i32) {
    %c0_i32 = arith.constant 0 : i32
    %c0_i32_0 = arith.constant 0 : i32
    %c0_i32_1 = arith.constant 0 : i32
    return %c0_i32, %c0_i32_0 : i32, i32
  }
  func.func @transform_5(%arg0: i32) -> (i32, i32) {
    %c0_i32 = arith.constant 0 : i32
    %c0_i32_0 = arith.constant 0 : i32
    return %arg0, %c0_i32 : i32, i32
  }
}

</mosaic_0001>

<bundles_post_ra>
// kernel: forward.1
= control target key start
LH: loop header
LB: loop body
LE: loop exit
PB: predicated region body
PF: predicated region fallthrough
CT: control target
= control target key end

     0   :  { %vm1891_vm0 = vcmask 130048   ;;  %s13222_s1 = inlined_call_operand.vmem [shape: bf16[784,512], index: 1, kind: input, shape index: {}]   ;;  %s13223_s0 = inlined_call_operand.vmem [shape: f32[512,784], index: 0, kind: input, shape index: {}]   ;;  %s13224_s3 = inlined_call_operand.vmem [shape: bf16[512,256], index: 3, kind: input, shape index: {}]   ;;  %s13225_s2 = inlined_call_operand.vmem [shape: f32[1,512], index: 2, kind: input, shape index: {}]   ;;  %s13226_s4 = inlined_call_operand.vmem [shape: f32[1,256], index: 4, kind: input, shape index: {}]   ;;  %s13227_s5 = inlined_call_operand.vmem [shape: bf16[512,256], index: 5, kind: output, shape index: {}]  }
   0x1   :  { %v8483_v0 = vld [vmem:[%s13222_s1 + $0x4] ss:$16 sps:$4 sm:$0xff]   ;;  %v8487_v2 = vld [vmem:[%s13222_s1] ss:$16 sps:$4 sm:$0xff]   ;;  %v22_v46 = vld [vmem:[%s13223_s0 + $0x8] sm:$0xff] }
   0x2   :  { %v8485_v1 = vld [vmem:[%s13222_s1 + $0x204] ss:$16 sps:$4 sm:$0xff]   ;;  %1988 = vmatprep.subr.bf16.mxu1 %v8483_v0  ;;  %v8488_v3 = vld [vmem:[%s13222_s1 + $0x200] ss:$16 sps:$4 sm:$0xff]   ;;  %v24_v48 = vld [vmem:[%s13223_s0 + $0x18] sm:$0xff] }
   0x3   :  { %2341 = vmatprep.subr.bf16.mxu0 %v8485_v1  ;;  %v8489_v4 = vld [vmem:[%s13222_s1 + $0x24] ss:$16 sps:$4 sm:$0xff]   ;;  %1989 = vmatpush1.bf16.msra.mxu1 %v8487_v2  ;;  %v8493_v6 = vld [vmem:[%s13222_s1 + $0x20] ss:$16 sps:$4 sm:$0xff]  }
   0x4   :  { %2342 = vmatpush1.bf16.msra.mxu0 %v8488_v3  ;;  %v8491_v5 = vld [vmem:[%s13222_s1 + $0x224] ss:$16 sps:$4 sm:$0xff]   ;;  %1990 = vmatprep.subr.bf16.mxu1 %v8489_v4  ;;  %v8494_v7 = vld [vmem:[%s13222_s1 + $0x220] ss:$16 sps:$4 sm:$0xff]  }
   0x5   :  { %2343 = vmatprep.subr.bf16.mxu0 %v8491_v5  ;;  %v8495_v8 = vld [vmem:[%s13222_s1 + $0x44] ss:$16 sps:$4 sm:$0xff]   ;;  %v8499_v10 = vld [vmem:[%s13222_s1 + $0x40] ss:$16 sps:$4 sm:$0xff]  }
   0x6   :  { %v8497_v9 = vld [vmem:[%s13222_s1 + $0x244] ss:$16 sps:$4 sm:$0xff]   ;;  %v8500_v11 = vld [vmem:[%s13222_s1 + $0x240] ss:$16 sps:$4 sm:$0xff]  }
   0x7   :  { %1991 = vmatpush1.bf16.msra.mxu1 %v8493_v6  ;;  %v8501_v12 = vld [vmem:[%s13222_s1 + $0x64] ss:$16 sps:$4 sm:$0xff]   ;;  %v8505_v14 = vld [vmem:[%s13222_s1 + $0x60] ss:$16 sps:$4 sm:$0xff]  }
   0x8   :  { %2344 = vmatpush1.bf16.msra.mxu0 %v8494_v7  ;;  %1992 = vmatprep.subr.bf16.mxu1 %v8495_v8  ;;  %v8503_v13 = vld [vmem:[%s13222_s1 + $0x264] ss:$16 sps:$4 sm:$0xff]   ;;  %v8506_v15 = vld [vmem:[%s13222_s1 + $0x260] ss:$16 sps:$4 sm:$0xff]   ;;  %v28_v7 = vld [vmem:[%s13223_s0 + $0x38] sm:$0xff] }
   0x9   :  { %2345 = vmatprep.subr.bf16.mxu0 %v8497_v9  ;;  %v8507_v16 = vld [vmem:[%s13222_s1 + $0x84] ss:$16 sps:$4 sm:$0xff]   ;;  %v8511_v18 = vld [vmem:[%s13222_s1 + $0x80] ss:$16 sps:$4 sm:$0xff]   ;;  %v30_v9 = vld [vmem:[%s13223_s0 + $0x48] sm:$0xff] }
   0xa   :  { %v8509_v17 = vld [vmem:[%s13222_s1 + $0x284] ss:$16 sps:$4 sm:$0xff]   ;;  %v8512_v19 = vld [vmem:[%s13222_s1 + $0x280] ss:$16 sps:$4 sm:$0xff]  }
   0xb   :  { %1993 = vmatpush1.bf16.msra.mxu1 %v8499_v10  ;;  %v8513_v20 = vld [vmem:[%s13222_s1 + $0xa4] ss:$16 sps:$4 sm:$0xff]   ;;  %v8517_v22 = vld [vmem:[%s13222_s1 + $0xa0] ss:$16 sps:$4 sm:$0xff]   ;;  %v8581_v10 = vld [vmem:[%s13222_s1 + $0xc] ss:$16 sps:$4 sm:$0xff]  }
   0xc   :  { %2346 = vmatpush1.bf16.msra.mxu0 %v8500_v11  ;;  %1994 = vmatprep.subr.bf16.mxu1 %v8501_v12  ;;  %v8515_v21 = vld [vmem:[%s13222_s1 + $0x2a4] ss:$16 sps:$4 sm:$0xff]   ;;  %v8518_v23 = vld [vmem:[%s13222_s1 + $0x2a0] ss:$16 sps:$4 sm:$0xff]   ;;  %v36_v11 = vld [vmem:[%s13223_s0 + $0x78] sm:$0xff] }
   0xd   :  { %2347 = vmatprep.subr.bf16.mxu0 %v8503_v13  ;;  %v8519_v24 = vld [vmem:[%s13222_s1 + $0xc4] ss:$16 sps:$4 sm:$0xff]   ;;  %v8523_v26 = vld [vmem:[%s13222_s1 + $0xc0] ss:$16 sps:$4 sm:$0xff]   ;;  %v38_v13 = vld [vmem:[%s13223_s0 + $0x88] sm:$0xff] }
   0xe   :  { %v8521_v25 = vld [vmem:[%s13222_s1 + $0x2c4] ss:$16 sps:$4 sm:$0xff]   ;;  %v8524_v27 = vld [vmem:[%s13222_s1 + $0x2c0] ss:$16 sps:$4 sm:$0xff]  }
   0xf   :  { %1995 = vmatpush1.bf16.msra.mxu1 %v8505_v14  ;;  %v8525_v28 = vld [vmem:[%s13222_s1 + $0xe4] ss:$16 sps:$4 sm:$0xff]   ;;  %v8529_v30 = vld [vmem:[%s13222_s1 + $0xe0] ss:$16 sps:$4 sm:$0xff]  }
  0x10   :  { %2348 = vmatpush1.bf16.msra.mxu0 %v8506_v15  ;;  %1996 = vmatprep.subr.bf16.mxu1 %v8507_v16  ;;  %v8527_v29 = vld [vmem:[%s13222_s1 + $0x2e4] ss:$16 sps:$4 sm:$0xff]   ;;  %v8530_v31 = vld [vmem:[%s13222_s1 + $0x2e0] ss:$16 sps:$4 sm:$0xff]  }
  0x11   :  { %2349 = vmatprep.subr.bf16.mxu0 %v8509_v17  ;;  %v8531_v32 = vld [vmem:[%s13222_s1 + $0x104] ss:$16 sps:$4 sm:$0xff]   ;;  %v8535_v34 = vld [vmem:[%s13222_s1 + $0x100] ss:$16 sps:$4 sm:$0xff]   ;;  %v8579_v17 = vld [vmem:[%s13222_s1 + $0x8] ss:$16 sps:$4 sm:$0xff]  }
  0x12   :  { %v8533_v33 = vld [vmem:[%s13222_s1 + $0x304] ss:$16 sps:$4 sm:$0xff]   ;;  %v8536_v35 = vld [vmem:[%s13222_s1 + $0x300] ss:$16 sps:$4 sm:$0xff]  }
  0x13   :  { %1997 = vmatpush1.bf16.msra.mxu1 %v8511_v18  ;;  %v8537_v36 = vld [vmem:[%s13222_s1 + $0x124] ss:$16 sps:$4 sm:$0xff]   ;;  %v8541_v38 = vld [vmem:[%s13222_s1 + $0x120] ss:$16 sps:$4 sm:$0xff]  }
  0x14   :  { %2350 = vmatpush1.bf16.msra.mxu0 %v8512_v19  ;;  %1998 = vmatprep.subr.bf16.mxu1 %v8513_v20  ;;  %v8539_v37 = vld [vmem:[%s13222_s1 + $0x324] ss:$16 sps:$4 sm:$0xff]   ;;  %v8542_v39 = vld [vmem:[%s13222_s1 + $0x320] ss:$16 sps:$4 sm:$0xff]   ;;  %v8584_v20 = vld [vmem:[%s13222_s1 + $0x2c] ss:$16 sps:$4 sm:$0xff]  }
  0x15   :  { %2351 = vmatprep.subr.bf16.mxu0 %v8515_v21  ;;  %v8543_v40 = vld [vmem:[%s13222_s1 + $0x144] ss:$16 sps:$4 sm:$0xff]   ;;  %v8547_v42 = vld [vmem:[%s13222_s1 + $0x140] ss:$16 sps:$4 sm:$0xff]  }
  0x16   :  { %v8545_v41 = vld [vmem:[%s13222_s1 + $0x344] ss:$16 sps:$4 sm:$0xff]   ;;  %v8548_v43 = vld [vmem:[%s13222_s1 + $0x340] ss:$16 sps:$4 sm:$0xff]  }
  0x17   :  { %1999 = vmatpush1.bf16.msra.mxu1 %v8517_v22  ;;  %v8549_v44 = vld [vmem:[%s13222_s1 + $0x164] ss:$16 sps:$4 sm:$0xff]   ;;  %v8553_v50 = vld [vmem:[%s13222_s1 + $0x160] ss:$16 sps:$4 sm:$0xff]   ;;  %v42_v22 = vld [vmem:[%s13223_s0 + $0xa8] sm:$0xff] }
  0x18   :  { %2352 = vmatpush1.bf16.msra.mxu0 %v8518_v23  ;;  %2000 = vmatprep.subr.bf16.mxu1 %v8519_v24  ;;  %v8551_v45 = vld [vmem:[%s13222_s1 + $0x364] ss:$16 sps:$4 sm:$0xff]   ;;  %v8554_v51 = vld [vmem:[%s13222_s1 + $0x360] ss:$16 sps:$4 sm:$0xff]   ;;  %v44_v24 = vld [vmem:[%s13223_s0 + $0xb8] sm:$0xff] }
  0x19   :  { %2353 = vmatprep.subr.bf16.mxu0 %v8521_v25  ;;  %v29_v47 = vld [vmem:[%s13223_s0 + $0x40] sm:$0xff]  ;;  %v31_v49 = vld [vmem:[%s13223_s0 + $0x50] sm:$0xff]  ;;  %v50_v25 = vld [vmem:[%s13223_s0 + $0xe8] sm:$0xff] }
  0x1a   :  { %v8555_v52 = vld [vmem:[%s13222_s1 + $0x184] ss:$16 sps:$4 sm:$0xff]   ;;  %v9064_v53 = vpack.c.bf16 %v29_v47, %v22_v46  ;;  %v9066_v54 = vpack.c.bf16 %v31_v49, %v24_v48  ;;  %v8559_v56 = vld [vmem:[%s13222_s1 + $0x180] ss:$16 sps:$4 sm:$0xff]   ;;  %v8593_v46 = vld [vmem:[%s13222_s1 + $0x8c] ss:$16 sps:$4 sm:$0xff]  }
  0x1b   :  { %2001 = vmatpush1.bf16.msra.mxu1 %v8523_v26  ;;  %v8557_v55 = vld [vmem:[%s13222_s1 + $0x384] ss:$16 sps:$4 sm:$0xff]   ;;  %v8560_v57 = vld [vmem:[%s13222_s1 + $0x380] ss:$16 sps:$4 sm:$0xff]  }
  0x1c   :  { %2354 = vmatpush1.bf16.msra.mxu0 %v8524_v27  ;;  %2002 = vmatprep.subr.bf16.mxu1 %v8525_v28  ;;  %13406 = vst [vmem:[#allocation2_spill] sm:$0xff] %v9066_v54  ;;  %v8561_v58 = vld [vmem:[%s13222_s1 + $0x1a4] ss:$16 sps:$4 sm:$0xff]   ;;  %v8565_v60 = vld [vmem:[%s13222_s1 + $0x1a0] ss:$16 sps:$4 sm:$0xff]   ;;  %v52_v28 = vld [vmem:[%s13223_s0 + $0xf8] sm:$0xff] }
  0x1d   :  { %2355 = vmatprep.subr.bf16.mxu0 %v8527_v29  ;;  %2020 = vmatprep.mubr.bf16.mxu1 %v9064_v53  ;;  %v8563_v59 = vld [vmem:[%s13222_s1 + $0x3a4] ss:$16 sps:$4 sm:$0xff]   ;;  %v8566_v61 = vld [vmem:[%s13222_s1 + $0x3a0] ss:$16 sps:$4 sm:$0xff]   ;;  %v8582_v27 = vld [vmem:[%s13222_s1 + $0x28] ss:$16 sps:$4 sm:$0xff]  }
  0x1e   :  { %2373 = vmatprep.mubr.bf16.mxu0 %v9066_v54  ;;  %v8567_v62 = vld [vmem:[%s13222_s1 + $0x1c4] ss:$16 sps:$4 sm:$0xff]   ;;  %v8571_v0 = vld [vmem:[%s13222_s1 + $0x1c0] ss:$16 sps:$4 sm:$0xff]  }
  0x1f   :  { %2003 = vmatpush1.bf16.msra.mxu1 %v8529_v30  ;;  %v8569_v63 = vld [vmem:[%s13222_s1 + $0x3c4] ss:$16 sps:$4 sm:$0xff]   ;;  %v8572_v1 = vld [vmem:[%s13222_s1 + $0x3c0] ss:$16 sps:$4 sm:$0xff]   ;;  %v8587_v30 = vld [vmem:[%s13222_s1 + $0x4c] ss:$16 sps:$4 sm:$0xff]  }
  0x20   :  { %2356 = vmatpush1.bf16.msra.mxu0 %v8530_v31  ;;  %2004 = vmatprep.subr.bf16.mxu1 %v8531_v32  ;;  %v8573_v2 = vld [vmem:[%s13222_s1 + $0x1e4] ss:$16 sps:$4 sm:$0xff]   ;;  %v8577_v4 = vld [vmem:[%s13222_s1 + $0x1e0] ss:$16 sps:$4 sm:$0xff]  }
  0x21   :  { %2357 = vmatprep.subr.bf16.mxu0 %v8533_v33  ;;  %v8575_v3 = vld [vmem:[%s13222_s1 + $0x3e4] ss:$16 sps:$4 sm:$0xff]   ;;  %v8578_v5 = vld [vmem:[%s13222_s1 + $0x3e0] ss:$16 sps:$4 sm:$0xff]  }
  0x22   :  { %v21_v6 = vld [vmem:[%s13223_s0] sm:$0xff]  ;;  %v23_v8 = vld [vmem:[%s13223_s0 + $0x10] sm:$0xff] }
  0x23   :  { %2005 = vmatpush1.bf16.msra.mxu1 %v8535_v34  ;;  %v43_v12 = vld [vmem:[%s13223_s0 + $0xb0] sm:$0xff]  ;;  %v45_v14 = vld [vmem:[%s13223_s0 + $0xc0] sm:$0xff]  ;;  %v9142_v15 = vpack.c.bf16 %v28_v7, %v21_v6  ;;  %v9144_v16 = vpack.c.bf16 %v30_v9, %v23_v8  ;;  %v84_v7 = vld [vmem:[%s13223_s0 + $0x1f8] sm:$0xff] }
  0x24   :  { %2358 = vmatpush1.bf16.msra.mxu0 %v8536_v35  ;;  %2006 = vmatprep.subr.bf16.mxu1 %v8537_v36  ;;  %v9149_v18 = vpack.c.bf16 %v43_v12, %v36_v11  ;;  %v9151_v19 = vpack.c.bf16 %v45_v14, %v38_v13  ;;  %v35_v21 = vld [vmem:[%s13223_s0 + $0x70] sm:$0xff]  ;;  %v37_v23 = vld [vmem:[%s13223_s0 + $0x80] sm:$0xff]  ;;  %v8585_v35 = vld [vmem:[%s13222_s1 + $0x48] ss:$16 sps:$4 sm:$0xff]  }
  0x25   :  { %2359 = vmatprep.subr.bf16.mxu0 %v8539_v37  ;;  %13407 = vst [vmem:[#allocation3_spill] sm:$0xff] %v9144_v16  ;;  %v57_v26 = vld [vmem:[%s13223_s0 + $0x120] sm:$0xff]  ;;  %v59_v29 = vld [vmem:[%s13223_s0 + $0x130] sm:$0xff]  ;;  %v9190_v31 = vpack.c.bf16 %v42_v22, %v35_v21  ;;  %v9192_v32 = vpack.c.bf16 %v44_v24, %v37_v23  ;;  %v8590_v36 = vld [vmem:[%s13222_s1 + $0x6c] ss:$16 sps:$4 sm:$0xff]  }
  0x26   :  { %13408 = vst [vmem:[#allocation4_spill] sm:$0xff] %v9151_v19  ;;  %v9194_v33 = vpack.c.bf16 %v57_v26, %v50_v25  ;;  %v9196_v34 = vpack.c.bf16 %v59_v29, %v52_v28  ;;  %v49_v37 = vld [vmem:[%s13223_s0 + $0xe0] sm:$0xff]  ;;  %v79_v8 = vld [vmem:[%s13223_s0 + $0x1d0] sm:$0xff]  ;;  %v86_v9 = vld [vmem:[%s13223_s0 + $0x208] sm:$0xff] }
  0x27   :  { %2007 = vmatpush1.bf16.msra.mxu1 %v8541_v38  ;;  %13409 = vst [vmem:[#allocation5_spill] sm:$0xff] %v9192_v32  ;;  %v56_v38 = vld [vmem:[%s13223_s0 + $0x118] sm:$0xff]  ;;  %v77_v6 = vld [vmem:[%s13223_s0 + $0x1c0] sm:$0xff]  ;;  %v99_v11 = vld [vmem:[%s13223_s0 + $0x270] sm:$0xff]  ;;  %v9333_v21 = vpack.c.bf16 %v86_v9, %v79_v8 }
  0x28   :  { %2360 = vmatpush1.bf16.msra.mxu0 %v8542_v39  ;;  %2008 = vmatprep.subr.bf16.mxu1 %v8543_v40  ;;  %13410 = vst [vmem:[#allocation6_spill] sm:$0xff] %v9196_v34  ;;  %v51_v39 = vld [vmem:[%s13223_s0 + $0xf0] sm:$0xff]  ;;  %v58_v40 = vld [vmem:[%s13223_s0 + $0x128] sm:$0xff]  ;;  %v9238_v47 = vpack.c.bf16 %v56_v38, %v49_v37  ;;  %v101_v13 = vld [vmem:[%s13223_s0 + $0x280] sm:$0xff] }
  0x29   :  { %2361 = vmatprep.subr.bf16.mxu0 %v8545_v41  ;;  %v64_v41 = vld [vmem:[%s13223_s0 + $0x158] sm:$0xff]  ;;  %v9240_v48 = vpack.c.bf16 %v58_v40, %v51_v39  ;;  %v94_v12 = vld [vmem:[%s13223_s0 + $0x248] sm:$0xff]  ;;  %13415 = vst [vmem:[#allocation11_spill] sm:$0xff] %v9333_v21  ;;  %v91_v24 = vld [vmem:[%s13223_s0 + $0x230] sm:$0xff] }
  0x2a   :  { %v8600_v14 = vld [vmem:[%s13222_s1 + $0xe8] ss:$16 sps:$4 sm:$0xff]   ;;  %v9337_v23 = vpack.c.bf16 %v101_v13, %v94_v12  ;;  %v93_v28 = vld [vmem:[%s13223_s0 + $0x240] sm:$0xff]  ;;  %v115_v37 = vld [vmem:[%s13223_s0 + $0x2f0] sm:$0xff] }
  0x2b   :  { %2009 = vmatpush1.bf16.msra.mxu1 %v8547_v42  ;;  %v71_v42 = vld [vmem:[%s13223_s0 + $0x190] sm:$0xff]  ;;  %13411 = vst [vmem:[#allocation7_spill] sm:$0xff] %v9240_v48  ;;  %v98_v25 = vld [vmem:[%s13223_s0 + $0x268] sm:$0xff]  ;;  %v100_v29 = vld [vmem:[%s13223_s0 + $0x278] sm:$0xff] }
  0x2c   :  { %2362 = vmatpush1.bf16.msra.mxu0 %v8548_v43  ;;  %2010 = vmatprep.subr.bf16.mxu1 %v8549_v44  ;;  %v66_v43 = vld [vmem:[%s13223_s0 + $0x168] sm:$0xff]  ;;  %v73_v44 = vld [vmem:[%s13223_s0 + $0x1a0] sm:$0xff]  ;;  %v9242_v49 = vpack.c.bf16 %v71_v42, %v64_v41  ;;  %13416 = vst [vmem:[#allocation12_spill] sm:$0xff] %v9337_v23  ;;  %v9373_v38 = vpack.c.bf16 %v98_v25, %v91_v24 }
  0x2d   :  { %2363 = vmatprep.subr.bf16.mxu0 %v8551_v45  ;;  %v8588_v45 = vld [vmem:[%s13222_s1 + $0x68] ss:$16 sps:$4 sm:$0xff]   ;;  %v9375_v39 = vpack.c.bf16 %v100_v29, %v93_v28  ;;  %v141_v9 = vld [vmem:[%s13223_s0 + $0x3c0] sm:$0xff]  ;;  %v135_v28 = vld [vmem:[%s13223_s0 + $0x390] sm:$0xff] }
  0x2e   :  { %v8603_v26 = vld [vmem:[%s13222_s1 + $0x108] ss:$16 sps:$4 sm:$0xff]   ;;  %v385_v54 = vld [vmem:[%s13223_s0 + $0xb60] sm:$0xff] }
  0x2f   :  { %2011 = vmatpush1.bf16.msra.mxu1 %v8553_v50  ;;  %v9244_v50 = vpack.c.bf16 %v73_v44, %v66_v43  ;;  %13417 = vst [vmem:[#allocation13_spill] sm:$0xff] %v9375_v39  ;;  %v8606_v42 = vld [vmem:[%s13222_s1 + $0x128] ss:$16 sps:$4 sm:$0xff]   ;;  %v8608_v43 = vld [vmem:[%s13222_s1 + $0x12c] ss:$16 sps:$4 sm:$0xff]   ;;  %v105_v44 = vld [vmem:[%s13223_s0 + $0x2a0] sm:$0xff] }
  0x30   :  { %2364 = vmatpush1.bf16.msra.mxu0 %v8554_v51  ;;  %2012 = vmatprep.subr.bf16.mxu1 %v8555_v52  ;;  %v8591_v51 = vld [vmem:[%s13222_s1 + $0x88] ss:$16 sps:$4 sm:$0xff]   ;;  %v63_v52 = vld [vmem:[%s13223_s0 + $0x150] sm:$0xff] }
  0x31   :  { %2365 = vmatprep.subr.bf16.mxu0 %v8557_v55  ;;  %13412 = vst [vmem:[#allocation8_spill] sm:$0xff] %v9244_v50  ;;  %v70_v55 = vld [vmem:[%s13223_s0 + $0x188] sm:$0xff] }
  0x32   :  { %v134_v8 = vld [vmem:[%s13223_s0 + $0x388] sm:$0xff] }
  0x33   :  { %2013 = vmatpush1.bf16.msra.mxu1 %v8559_v56  ;;  %v8596_v56 = vld [vmem:[%s13222_s1 + $0xac] ss:$16 sps:$4 sm:$0xff]   ;;  %v9467_v24 = vpack.c.bf16 %v141_v9, %v134_v8  ;;  %v171_v8 = vld [vmem:[%s13223_s0 + $0x4b0] sm:$0xff] }
  0x34   :  { %2366 = vmatpush1.bf16.msra.mxu0 %v8560_v57  ;;  %2014 = vmatprep.subr.bf16.mxu1 %v8561_v58  ;;  %v65_v57 = vld [vmem:[%s13223_s0 + $0x160] sm:$0xff]  ;;  %v72_v58 = vld [vmem:[%s13223_s0 + $0x198] sm:$0xff]  ;;  %v142_v29 = vld [vmem:[%s13223_s0 + $0x3c8] sm:$0xff] }
  0x35   :  { %2367 = vmatprep.subr.bf16.mxu0 %v8563_v59  ;;  %v78_v59 = vld [vmem:[%s13223_s0 + $0x1c8] sm:$0xff]  ;;  %v8621_v9 = vld [vmem:[%s13222_s1 + $0x420] ss:$16 sps:$4 sm:$0xff]  }
  0x37   :  { %2015 = vmatpush1.bf16.msra.mxu1 %v8565_v60  ;;  %v85_v60 = vld [vmem:[%s13223_s0 + $0x200] sm:$0xff] }
  0x38   :  { %2368 = vmatpush1.bf16.msra.mxu0 %v8566_v61  ;;  %2016 = vmatprep.subr.bf16.mxu1 %v8567_v62  ;;  %v80_v61 = vld [vmem:[%s13223_s0 + $0x1d8] sm:$0xff]  ;;  %v87_v62 = vld [vmem:[%s13223_s0 + $0x210] sm:$0xff] }
  0x39   :  { %2369 = vmatprep.subr.bf16.mxu0 %v8569_v63  ;;  %v8594_v63 = vld [vmem:[%s13222_s1 + $0xa8] ss:$16 sps:$4 sm:$0xff]  }
  0x3b   :  { %2017 = vmatpush1.bf16.msra.mxu1 %v8571_v0  ;;  %v8599_v0 = vld [vmem:[%s13222_s1 + $0xcc] ss:$16 sps:$4 sm:$0xff]  }
  0x3c   :  { %2370 = vmatpush1.bf16.msra.mxu0 %v8572_v1  ;;  %2018 = vmatprep.subr.bf16.mxu1 %v8573_v2  ;;  %v9286_v1 = vpack.c.bf16 %v70_v55, %v63_v52  ;;  %v9288_v2 = vpack.c.bf16 %v72_v58, %v65_v57  ;;  %v120_v52 = vld [vmem:[%s13223_s0 + $0x318] sm:$0xff]  ;;  %v127_v55 = vld [vmem:[%s13223_s0 + $0x350] sm:$0xff]  ;;  %v129_v57 = vld [vmem:[%s13223_s0 + $0x360] sm:$0xff] }
  0x3d   :  { %2371 = vmatprep.subr.bf16.mxu0 %v8575_v3  ;;  %v9290_v3 = vpack.c.bf16 %v85_v60, %v78_v59  ;;  %v9419_v60 = vpack.c.bf16 %v127_v55, %v120_v52  ;;  %v154_v52 = vld [vmem:[%s13223_s0 + $0x428] sm:$0xff]  ;;  %v8615_v55 = vld [vmem:[%s13222_s1 + $0x400] ss:$16 sps:$4 sm:$0xff]  }
  0x3e   :  { %13413 = vst [vmem:[#allocation9_spill] sm:$0xff] %v9288_v2 }
  0x3f   :  { %2019 = vmatpush1.bf16.msra.mxu1 %v8577_v4  ;;  %v9292_v4 = vpack.c.bf16 %v87_v62, %v80_v61  ;;  %v8611_v62 = vld [vmem:[%s13222_s1 + $0x14c] ss:$16 sps:$4 sm:$0xff]  }
  0x40   :  { %2372 = vmatpush1.bf16.msra.mxu0 %v8578_v5  ;;  %3400 = vmatprep.subr.bf16.mxu1 %v8581_v10  ;;  %v8597_v5 = vld [vmem:[%s13222_s1 + $0xc8] ss:$16 sps:$4 sm:$0xff]  }
  0x41   :  { %13414 = vst [vmem:[#allocation10_spill] sm:$0xff] %v9292_v4  ;;  %v92_v10 = vld [vmem:[%s13223_s0 + $0x238] sm:$0xff] }
  0x42   :  { %2021 = vmatmul.mubr.bf16.vlgmr.msra.gmra.mrb[0].mxu1 %v9142_v15  ;;  %v9335_v22 = vpack.c.bf16 %v99_v11, %v92_v10  ;;  %v136_v10 = vld [vmem:[%s13223_s0 + $0x398] sm:$0xff]  ;;  %v143_v11 = vld [vmem:[%s13223_s0 + $0x3d0] sm:$0xff] }
  0x43   :  { %2374 = vmatmul.mubr.bf16.vlgmr.msra.gmra.mrb[0].mxu0 %v9144_v16  ;;  %3401 = vmatpush1.bf16.msra.mxu1 %v8579_v17  ;;  %v8602_v17 = vld [vmem:[%s13222_s1 + $0xec] ss:$16 sps:$4 sm:$0xff]   ;;  %v9469_v25 = vpack.c.bf16 %v143_v11, %v136_v10 }
  0x44   :  { %2030 = vmatprep.mubr.bf16.mxu1 %v9149_v18  ;;  %2383 = vmatprep.mubr.bf16.mxu0 %v9151_v19  ;;  %v371_v19 = vld [vmem:[%s13223_s0 + $0xaf0] sm:$0xff]  ;;  %v378_v16 = vld [vmem:[%s13223_s0 + $0xb28] sm:$0xff] }
  0x45   :  { %3402 = vmatprep.subr.bf16.mxu1 %v8584_v20  ;;  %v9331_v20 = vpack.c.bf16 %v84_v7, %v77_v6  ;;  %v121_v6 = vld [vmem:[%s13223_s0 + $0x320] sm:$0xff]  ;;  %v128_v7 = vld [vmem:[%s13223_s0 + $0x358] sm:$0xff]  ;;  %13422 = vst [vmem:[#allocation18_spill] sm:$0xff] %v9469_v25 }
  0x46   :  { %v9459_v13 = vpack.c.bf16 %v128_v7, %v121_v6  ;;  %v169_v6 = vld [vmem:[%s13223_s0 + $0x4a0] sm:$0xff]  ;;  %v164_v7 = vld [vmem:[%s13223_s0 + $0x478] sm:$0xff] }
  0x47   :  { %3403 = vmatpush1.bf16.msra.mxu1 %v8582_v27  ;;  %v8605_v27 = vld [vmem:[%s13222_s1 + $0x10c] ss:$16 sps:$4 sm:$0xff]  }
  0x48   :  { %3404 = vmatprep.subr.bf16.mxu1 %v8587_v30  ;;  %v106_v30 = vld [vmem:[%s13223_s0 + $0x2a8] sm:$0xff]  ;;  %13421 = vst [vmem:[#allocation17_spill] sm:$0xff] %v9459_v13 }
  0x4a   :  { %2031 = vmatmul.mubr.bf16.gmra.mrb[4].mxu1 %v9190_v31 }
  0x4b   :  { %2384 = vmatmul.mubr.bf16.gmra.mrb[4].mxu0 %v9192_v32  ;;  %2040 = vmatprep.mubr.bf16.mxu1 %v9194_v33  ;;  %v364_v32 = vld [vmem:[%s13223_s0 + $0xab8] sm:$0xff] }
  0x4c   :  { %2393 = vmatprep.mubr.bf16.mxu0 %v9196_v34  ;;  %3405 = vmatpush1.bf16.msra.mxu1 %v8585_v35  ;;  %v113_v35 = vld [vmem:[%s13223_s0 + $0x2e0] sm:$0xff] }
  0x4d   :  { %3406 = vmatprep.subr.bf16.mxu1 %v8590_v36  ;;  %v108_v36 = vld [vmem:[%s13223_s0 + $0x2b8] sm:$0xff]  ;;  %v9377_v40 = vpack.c.bf16 %v113_v35, %v106_v30  ;;  %v155_v35 = vld [vmem:[%s13223_s0 + $0x430] sm:$0xff]  ;;  %v357_v34 = vld [vmem:[%s13223_s0 + $0xa80] sm:$0xff] }
  0x4e   :  { %v9379_v41 = vpack.c.bf16 %v115_v37, %v108_v36  ;;  %v148_v30 = vld [vmem:[%s13223_s0 + $0x3f8] sm:$0xff]  ;;  %v150_v36 = vld [vmem:[%s13223_s0 + $0x408] sm:$0xff]  ;;  %v157_v37 = vld [vmem:[%s13223_s0 + $0x440] sm:$0xff] }
  0x50   :  { %3407 = vmatpush1.bf16.msra.mxu1 %v8588_v45  ;;  %13418 = vst [vmem:[#allocation14_spill] sm:$0xff] %v9379_v41  ;;  %v112_v45 = vld [vmem:[%s13223_s0 + $0x2d8] sm:$0xff] }
  0x51   :  { %3408 = vmatprep.subr.bf16.mxu1 %v8593_v46  ;;  %v107_v46 = vld [vmem:[%s13223_s0 + $0x2b0] sm:$0xff]  ;;  %v9415_v58 = vpack.c.bf16 %v112_v45, %v105_v44  ;;  %v9503_v44 = vpack.c.bf16 %v155_v35, %v148_v30  ;;  %v9505_v45 = vpack.c.bf16 %v157_v37, %v150_v36  ;;  %v170_v35 = vld [vmem:[%s13223_s0 + $0x4a8] sm:$0xff]  ;;  %v176_v37 = vld [vmem:[%s13223_s0 + $0x4d8] sm:$0xff] }
  0x52   :  { %2041 = vmatmul.mubr.bf16.gmra.mrb[8].mxu1 %v9238_v47  ;;  %v163_v30 = vld [vmem:[%s13223_s0 + $0x470] sm:$0xff] }
  0x53   :  { %2394 = vmatmul.mubr.bf16.gmra.mrb[8].mxu0 %v9240_v48  ;;  %2050 = vmatprep.mubr.bf16.mxu1 %v9242_v49  ;;  %13424 = vst [vmem:[#allocation20_spill] sm:$0xff] %v9505_v45  ;;  %v8629_v36 = vld [vmem:[%s13222_s1 + $0x464] ss:$16 sps:$4 sm:$0xff]   ;;  %v350_v48 = vld [vmem:[%s13223_s0 + $0xa48] sm:$0xff] }
  0x54   :  { %2403 = vmatprep.mubr.bf16.mxu0 %v9244_v50  ;;  %3409 = vmatpush1.bf16.msra.mxu1 %v8591_v51  ;;  %v114_v51 = vld [vmem:[%s13223_s0 + $0x2e8] sm:$0xff]  ;;  %v343_v50 = vld [vmem:[%s13223_s0 + $0xa10] sm:$0xff] }
  0x55   :  { %3410 = vmatprep.subr.bf16.mxu1 %v8596_v56  ;;  %v122_v56 = vld [vmem:[%s13223_s0 + $0x328] sm:$0xff]  ;;  %v9417_v59 = vpack.c.bf16 %v114_v51, %v107_v46  ;;  %v8617_v46 = vld [vmem:[%s13222_s1 + $0x404] ss:$16 sps:$4 sm:$0xff]  }
  0x56   :  { %v9421_v61 = vpack.c.bf16 %v129_v57, %v122_v56  ;;  %v147_v51 = vld [vmem:[%s13223_s0 + $0x3f0] sm:$0xff]  ;;  %v149_v56 = vld [vmem:[%s13223_s0 + $0x400] sm:$0xff]  ;;  %v8618_v57 = vld [vmem:[%s13222_s1 + $0x188] ss:$16 sps:$4 sm:$0xff]   ;;  %2694 = vmatprep.subr.bf16.mxu0 %v8617_v46 }
  0x57   :  { %13419 = vst [vmem:[#allocation15_spill] sm:$0xff] %v9417_v59  ;;  %2695 = vmatpush1.bf16.msra.mxu0 %v8615_v55  ;;  %v9553_v10 = vpack.c.bf16 %v154_v52, %v147_v51  ;;  %v183_v46 = vld [vmem:[%s13223_s0 + $0x510] sm:$0xff]  ;;  %v178_v51 = vld [vmem:[%s13223_s0 + $0x4e8] sm:$0xff]  ;;  %v185_v52 = vld [vmem:[%s13223_s0 + $0x520] sm:$0xff] }
  0x58   :  { %3411 = vmatpush1.bf16.msra.mxu1 %v8594_v63  ;;  %13420 = vst [vmem:[#allocation16_spill] sm:$0xff] %v9421_v61  ;;  %v8609_v63 = vld [vmem:[%s13222_s1 + $0x148] ss:$16 sps:$4 sm:$0xff]   ;;  %v8627_v55 = vld [vmem:[%s13222_s1 + $0x460] ss:$16 sps:$4 sm:$0xff]  }
  0x59   :  { %3412 = vmatprep.subr.bf16.mxu1 %v8599_v0  ;;  %v119_v0 = vld [vmem:[%s13223_s0 + $0x310] sm:$0xff] }
  0x5a   :  { %2051 = vmatmul.mubr.bf16.gmra.mrb[12].mxu1 %v9286_v1 }
  0x5b   :  { %2404 = vmatmul.mubr.bf16.gmra.mrb[12].mxu0 %v9288_v2  ;;  %2060 = vmatprep.mubr.bf16.mxu1 %v9290_v3  ;;  %v336_v2 = vld [vmem:[%s13223_s0 + $0x9d8] sm:$0xff] }
  0x5c   :  { %2413 = vmatprep.mubr.bf16.mxu0 %v9292_v4  ;;  %3413 = vmatpush1.bf16.msra.mxu1 %v8597_v5  ;;  %v126_v5 = vld [vmem:[%s13223_s0 + $0x348] sm:$0xff]  ;;  %v329_v4 = vld [vmem:[%s13223_s0 + $0x9a0] sm:$0xff] }
  0x5d   :  { %3414 = vmatprep.subr.bf16.mxu1 %v8602_v17  ;;  %v9457_v12 = vpack.c.bf16 %v126_v5, %v119_v0  ;;  %v8614_v17 = vld [vmem:[%s13222_s1 + $0x16c] ss:$16 sps:$4 sm:$0xff]   ;;  %v8623_v5 = vld [vmem:[%s13222_s1 + $0x424] ss:$16 sps:$4 sm:$0xff]  }
  0x5e   :  { %v162_v0 = vld [vmem:[%s13223_s0 + $0x468] sm:$0xff]  ;;  %2696 = vmatprep.subr.bf16.mxu0 %v8623_v5  ;;  %v175_v5 = vld [vmem:[%s13223_s0 + $0x4d0] sm:$0xff] }
  0x5f   :  { %2697 = vmatpush1.bf16.msra.mxu0 %v8621_v9  ;;  %v8630_v9 = vld [vmem:[%s13222_s1 + $0x480] ss:$16 sps:$4 sm:$0xff]  }
  0x60   :  { %3415 = vmatpush1.bf16.msra.mxu1 %v8600_v14  ;;  %v8612_v14 = vld [vmem:[%s13222_s1 + $0x168] ss:$16 sps:$4 sm:$0xff]  }
  0x61   :  { %3416 = vmatprep.subr.bf16.mxu1 %v8605_v27  ;;  %v140_v27 = vld [vmem:[%s13223_s0 + $0x3b8] sm:$0xff] }
  0x62   :  { %2061 = vmatmul.mubr.bf16.gmra.mrb[16].mxu1 %v9331_v20 }
  0x63   :  { %2414 = vmatmul.mubr.bf16.gmra.mrb[16].mxu0 %v9333_v21  ;;  %2070 = vmatprep.mubr.bf16.mxu1 %v9335_v22  ;;  %v322_v21 = vld [vmem:[%s13223_s0 + $0x968] sm:$0xff] }
  0x64   :  { %2423 = vmatprep.mubr.bf16.mxu0 %v9337_v23  ;;  %3417 = vmatpush1.bf16.msra.mxu1 %v8603_v26  ;;  %v133_v26 = vld [vmem:[%s13223_s0 + $0x380] sm:$0xff]  ;;  %v315_v23 = vld [vmem:[%s13223_s0 + $0x930] sm:$0xff] }
  0x65   :  { %3418 = vmatprep.subr.bf16.mxu1 %v8608_v43  ;;  %v9501_v43 = vpack.c.bf16 %v142_v29, %v135_v28  ;;  %v168_v28 = vld [vmem:[%s13223_s0 + $0x498] sm:$0xff]  ;;  %v8624_v29 = vld [vmem:[%s13222_s1 + $0x440] ss:$16 sps:$4 sm:$0xff]  }
  0x67   :  { %13423 = vst [vmem:[#allocation19_spill] sm:$0xff] %v9501_v43 }
  0x68   :  { %3419 = vmatpush1.bf16.msra.mxu1 %v8606_v42  ;;  %v9499_v42 = vpack.c.bf16 %v140_v27, %v133_v26  ;;  %v8626_v26 = vld [vmem:[%s13222_s1 + $0x444] ss:$16 sps:$4 sm:$0xff]  }
  0x69   :  { %3420 = vmatprep.subr.bf16.mxu1 %v8611_v62  ;;  %v8620_v62 = vld [vmem:[%s13222_s1 + $0x18c] ss:$16 sps:$4 sm:$0xff]   ;;  %v161_v27 = vld [vmem:[%s13223_s0 + $0x460] sm:$0xff]  ;;  %2698 = vmatprep.subr.bf16.mxu0 %v8626_v26 }
  0x6a   :  { %2071 = vmatmul.mubr.bf16.gmra.mrb[20].mxu1 %v9373_v38  ;;  %2699 = vmatpush1.bf16.msra.mxu0 %v8624_v29  ;;  %v190_v26 = vld [vmem:[%s13223_s0 + $0x548] sm:$0xff] }
  0x6b   :  { %2424 = vmatmul.mubr.bf16.gmra.mrb[20].mxu0 %v9375_v39  ;;  %2080 = vmatprep.mubr.bf16.mxu1 %v9377_v40  ;;  %v8633_v29 = vld [vmem:[%s13222_s1 + $0x1a8] ss:$16 sps:$4 sm:$0xff]  }
  0x6c   :  { %2433 = vmatprep.mubr.bf16.mxu0 %v9379_v41  ;;  %3421 = vmatpush1.bf16.msra.mxu1 %v8609_v63  ;;  %v156_v63 = vld [vmem:[%s13223_s0 + $0x438] sm:$0xff]  ;;  %v301_v41 = vld [vmem:[%s13223_s0 + $0x8c0] sm:$0xff] }
  0x6d   :  { %3422 = vmatprep.subr.bf16.mxu1 %v8614_v17  ;;  %v9555_v11 = vpack.c.bf16 %v156_v63, %v149_v56  ;;  %v9559_v17 = vpack.c.bf16 %v171_v8, %v164_v7  ;;  %v9601_v56 = vpack.c.bf16 %v168_v28, %v161_v27  ;;  %2700 = vmatprep.subr.bf16.mxu0 %v8629_v36  ;;  %v177_v7 = vld [vmem:[%s13223_s0 + $0x4e0] sm:$0xff]  ;;  %v184_v8 = vld [vmem:[%s13223_s0 + $0x518] sm:$0xff] }
  0x6e   :  { %v9607_v63 = vpack.c.bf16 %v185_v52, %v178_v51  ;;  %2701 = vmatpush1.bf16.msra.mxu0 %v8627_v55  ;;  %v197_v27 = vld [vmem:[%s13223_s0 + $0x580] sm:$0xff]  ;;  %v192_v28 = vld [vmem:[%s13223_s0 + $0x558] sm:$0xff]  ;;  %v9657_v51 = vpack.c.bf16 %v184_v8, %v177_v7  ;;  %v198_v7 = vld [vmem:[%s13223_s0 + $0x588] sm:$0xff] }
  0x6f   :  { %13425 = vst [vmem:[#allocation21_spill] sm:$0xff] %v9555_v11  ;;  %13426 = vst [vmem:[#allocation22_spill] sm:$0xff] %v9559_v17  ;;  %v8638_v36 = vld [vmem:[%s13222_s1 + $0x4a4] ss:$16 sps:$4 sm:$0xff]   ;;  %v9659_v52 = vpack.c.bf16 %v197_v27, %v190_v26  ;;  %v8639_v8 = vld [vmem:[%s13222_s1 + $0x4c0] ss:$16 sps:$4 sm:$0xff]  }
  0x70   :  { %3423 = vmatpush1.bf16.msra.mxu1 %v8612_v14  ;;  %v9557_v14 = vpack.c.bf16 %v169_v6, %v162_v0  ;;  %13428 = vst [vmem:[#allocation24_spill] sm:$0xff] %v9607_v63  ;;  %v8632_v0 = vld [vmem:[%s13222_s1 + $0x484] ss:$16 sps:$4 sm:$0xff]   ;;  %v182_v6 = vld [vmem:[%s13223_s0 + $0x508] sm:$0xff]  ;;  %13429 = vst [vmem:[#allocation25_spill] sm:$0xff] %v9657_v51 }
  0x71   :  { %3424 = vmatprep.subr.bf16.mxu1 %v8620_v62  ;;  %v9605_v62 = vpack.c.bf16 %v183_v46, %v176_v37  ;;  %2702 = vmatprep.subr.bf16.mxu0 %v8632_v0  ;;  %v8636_v37 = vld [vmem:[%s13222_s1 + $0x4a0] ss:$16 sps:$4 sm:$0xff]   ;;  %v9655_v46 = vpack.c.bf16 %v182_v6, %v175_v5  ;;  %v8641_v0 = vld [vmem:[%s13222_s1 + $0x4c4] ss:$16 sps:$4 sm:$0xff]   ;;  %v196_v5 = vld [vmem:[%s13223_s0 + $0x578] sm:$0xff] }
  0x72   :  { %2081 = vmatmul.mubr.bf16.gmra.mrb[24].mxu1 %v9415_v58  ;;  %2703 = vmatpush1.bf16.msra.mxu0 %v8630_v9  ;;  %v189_v9 = vld [vmem:[%s13223_s0 + $0x540] sm:$0xff]  ;;  %v191_v6 = vld [vmem:[%s13223_s0 + $0x550] sm:$0xff]  ;;  %v204_v26 = vld [vmem:[%s13223_s0 + $0x5b8] sm:$0xff] }
  0x73   :  { %2434 = vmatmul.mubr.bf16.gmra.mrb[24].mxu0 %v9417_v59  ;;  %2090 = vmatprep.mubr.bf16.mxu1 %v9419_v60  ;;  %v211_v27 = vld [vmem:[%s13223_s0 + $0x5f0] sm:$0xff]  ;;  %v294_v59 = vld [vmem:[%s13223_s0 + $0x888] sm:$0xff]  ;;  %v308_v39 = vld [vmem:[%s13223_s0 + $0x8f8] sm:$0xff] }
  0x74   :  { %2443 = vmatprep.mubr.bf16.mxu0 %v9421_v61  ;;  %3425 = vmatpush1.bf16.msra.mxu1 %v8618_v57  ;;  %v9603_v57 = vpack.c.bf16 %v170_v35, %v163_v30  ;;  %v8635_v30 = vld [vmem:[%s13222_s1 + $0x1ac] ss:$16 sps:$4 sm:$0xff]   ;;  %v199_v35 = vld [vmem:[%s13223_s0 + $0x590] sm:$0xff] }
  0x75   :  { %3426 = vmatprep.subr.bf16.mxu1 %v8635_v30  ;;  %2704 = vmatprep.subr.bf16.mxu0 %v8638_v36  ;;  %v9661_v55 = vpack.c.bf16 %v199_v35, %v192_v28  ;;  %v206_v28 = vld [vmem:[%s13223_s0 + $0x5c8] sm:$0xff]  ;;  %v8644_v30 = vld [vmem:[%s13222_s1 + $0x4e4] ss:$16 sps:$4 sm:$0xff]   ;;  %v8642_v35 = vld [vmem:[%s13222_s1 + $0x4e0] ss:$16 sps:$4 sm:$0xff]   ;;  %v9703_v36 = vpack.c.bf16 %v196_v5, %v189_v9 }
  0x76   :  { %13427 = vst [vmem:[#allocation23_spill] sm:$0xff] %v9603_v57  ;;  %2705 = vmatpush1.bf16.msra.mxu0 %v8636_v37  ;;  %v9705_v37 = vpack.c.bf16 %v198_v7, %v191_v6  ;;  %v210_v9 = vld [vmem:[%s13223_s0 + $0x5e8] sm:$0xff]  ;;  %v205_v5 = vld [vmem:[%s13223_s0 + $0x5c0] sm:$0xff]  ;;  %v212_v6 = vld [vmem:[%s13223_s0 + $0x5f8] sm:$0xff] }
  0x77   :  { %13430 = vst [vmem:[#allocation26_spill] sm:$0xff] %v9661_v55  ;;  %2706 = vmatprep.subr.bf16.mxu0 %v8641_v0  ;;  %v8647_v0 = vld [vmem:[%s13222_s1 + $0x504] ss:$16 sps:$4 sm:$0xff]   ;;  %v8645_v7 = vld [vmem:[%s13222_s1 + $0x500] ss:$16 sps:$4 sm:$0xff]  }
  0x78   :  { %3427 = vmatpush1.bf16.msra.mxu1 %v8633_v29  ;;  %v213_v29 = vld [vmem:[%s13223_s0 + $0x600] sm:$0xff]  ;;  %13431 = vst [vmem:[#allocation27_spill] sm:$0xff] %v9705_v37 }
  0x7a   :  { %2091 = vmatmul.mubr.bf16.gmra.mrb[28].mxu1 %v9457_v12  ;;  %2707 = vmatpush1.bf16.msra.mxu0 %v8639_v8  ;;  %v203_v8 = vld [vmem:[%s13223_s0 + $0x5b0] sm:$0xff] }
  0x7b   :  { %2444 = vmatmul.mubr.bf16.gmra.mrb[28].mxu0 %v9459_v13  ;;  %2100 = vmatprep.mubr.bf16.mxu1 %v9467_v24 }
  0x7c   :  { %2453 = vmatprep.mubr.bf16.mxu0 %v9469_v25  ;;  %2708 = vmatprep.subr.bf16.mxu0 %v8644_v30  ;;  %v8648_v30 = vld [vmem:[%s13222_s1 + $0x1c8] ss:$16 sps:$4 sm:$0xff]  }
  0x7e   :  { %2709 = vmatpush1.bf16.msra.mxu0 %v8642_v35  ;;  %v8650_v35 = vld [vmem:[%s13222_s1 + $0x1cc] ss:$16 sps:$4 sm:$0xff]  }
  0x7f   :  { %2710 = vmatprep.subr.bf16.mxu0 %v8647_v0  ;;  %3428 = vmatprep.subr.bf16.mxu1 %v8650_v35  ;;  %v8656_v0 = vld [vmem:[%s13222_s1 + $0x544] ss:$16 sps:$4 sm:$0xff]  }
  0x80   :  { %3429 = vmatpush1.bf16.msra.mxu1 %v8648_v30 }
  0x82   :  { %2101 = vmatmul.mubr.bf16.gmra.mrb[32].mxu1 %v9499_v42  ;;  %2711 = vmatpush1.bf16.msra.mxu0 %v8645_v7  ;;  %v217_v7 = vld [vmem:[%s13223_s0 + $0x620] sm:$0xff] }
  0x83   :  { %2454 = vmatmul.mubr.bf16.gmra.mrb[32].mxu0 %v9501_v43  ;;  %2110 = vmatprep.mubr.bf16.mxu1 %v9503_v44 }
  0x84   :  { %2463 = vmatprep.mubr.bf16.mxu0 %v9505_v45 }
  0x8a   :  { %2111 = vmatmul.mubr.bf16.gmra.mrb[36].mxu1 %v9553_v10 }
  0x8b   :  { %2464 = vmatmul.mubr.bf16.gmra.mrb[36].mxu0 %v9555_v11  ;;  %2120 = vmatprep.mubr.bf16.mxu1 %v9557_v14 }
  0x8c   :  { %2473 = vmatprep.mubr.bf16.mxu0 %v9559_v17  ;;  %v9759_v17 = vpack.c.bf16 %v212_v6, %v205_v5  ;;  %v8654_v5 = vld [vmem:[%s13222_s1 + $0x540] ss:$16 sps:$4 sm:$0xff]   ;;  %v232_v6 = vld [vmem:[%s13223_s0 + $0x698] sm:$0xff] }
  0x8e   :  { %13433 = vst [vmem:[#allocation29_spill] sm:$0xff] %v9759_v17 }
  0x92   :  { %2121 = vmatmul.mubr.bf16.gmra.mrb[40].mxu1 %v9601_v56 }
  0x93   :  { %2474 = vmatmul.mubr.bf16.gmra.mrb[40].mxu0 %v9603_v57  ;;  %2130 = vmatprep.mubr.bf16.mxu1 %v9605_v62  ;;  %v9757_v57 = vpack.c.bf16 %v210_v9, %v203_v8  ;;  %v224_v8 = vld [vmem:[%s13223_s0 + $0x658] sm:$0xff]  ;;  %v226_v9 = vld [vmem:[%s13223_s0 + $0x668] sm:$0xff] }
  0x94   :  { %2483 = vmatprep.mubr.bf16.mxu0 %v9607_v63  ;;  %v9709_v63 = vpack.c.bf16 %v213_v29, %v206_v28  ;;  %v220_v28 = vld [vmem:[%s13223_s0 + $0x638] sm:$0xff]  ;;  %v227_v29 = vld [vmem:[%s13223_s0 + $0x670] sm:$0xff]  ;;  %v9805_v30 = vpack.c.bf16 %v224_v8, %v217_v7  ;;  %v238_v7 = vld [vmem:[%s13223_s0 + $0x6c8] sm:$0xff] }
  0x95   :  { %v233_v8 = vld [vmem:[%s13223_s0 + $0x6a0] sm:$0xff] }
  0x96   :  { %13432 = vst [vmem:[#allocation28_spill] sm:$0xff] %v9709_v63 }
  0x9a   :  { %2131 = vmatmul.mubr.bf16.gmra.mrb[44].mxu1 %v9655_v46 }
  0x9b   :  { %2484 = vmatmul.mubr.bf16.gmra.mrb[44].mxu0 %v9657_v51  ;;  %2140 = vmatprep.mubr.bf16.mxu1 %v9659_v52  ;;  %v9707_v51 = vpack.c.bf16 %v211_v27, %v204_v26  ;;  %v218_v26 = vld [vmem:[%s13223_s0 + $0x628] sm:$0xff]  ;;  %v225_v27 = vld [vmem:[%s13223_s0 + $0x660] sm:$0xff] }
  0x9c   :  { %2493 = vmatprep.mubr.bf16.mxu0 %v9661_v55  ;;  %v8651_v55 = vld [vmem:[%s13222_s1 + $0x520] ss:$16 sps:$4 sm:$0xff]   ;;  %v9761_v11 = vpack.c.bf16 %v225_v27, %v218_v26 }
  0x9d   :  { %v239_v26 = vld [vmem:[%s13223_s0 + $0x6d0] sm:$0xff]  ;;  %v241_v27 = vld [vmem:[%s13223_s0 + $0x6e0] sm:$0xff] }
  0xa2   :  { %2141 = vmatmul.mubr.bf16.gmra.mrb[48].mxu1 %v9703_v36 }
  0xa3   :  { %2494 = vmatmul.mubr.bf16.gmra.mrb[48].mxu0 %v9705_v37  ;;  %2150 = vmatprep.mubr.bf16.mxu1 %v9707_v51  ;;  %v8653_v37 = vld [vmem:[%s13222_s1 + $0x524] ss:$16 sps:$4 sm:$0xff]  }
  0xa4   :  { %2503 = vmatprep.mubr.bf16.mxu0 %v9709_v63  ;;  %2712 = vmatprep.subr.bf16.mxu0 %v8653_v37  ;;  %v9763_v63 = vpack.c.bf16 %v227_v29, %v220_v28  ;;  %v219_v37 = vld [vmem:[%s13223_s0 + $0x630] sm:$0xff] }
  0xa5   :  { %2713 = vmatpush1.bf16.msra.mxu0 %v8651_v55  ;;  %v234_v55 = vld [vmem:[%s13223_s0 + $0x6a8] sm:$0xff]  ;;  %v8659_v28 = vld [vmem:[%s13222_s1 + $0x564] ss:$16 sps:$4 sm:$0xff]   ;;  %v8657_v29 = vld [vmem:[%s13222_s1 + $0x560] ss:$16 sps:$4 sm:$0xff]   ;;  %v9807_v35 = vpack.c.bf16 %v226_v9, %v219_v37 }
  0xa6   :  { %13434 = vst [vmem:[#allocation30_spill] sm:$0xff] %v9763_v63  ;;  %2714 = vmatprep.subr.bf16.mxu0 %v8656_v0  ;;  %v9811_v45 = vpack.c.bf16 %v241_v27, %v234_v55  ;;  %v8662_v0 = vld [vmem:[%s13222_s1 + $0x584] ss:$16 sps:$4 sm:$0xff]   ;;  %v240_v37 = vld [vmem:[%s13223_s0 + $0x6d8] sm:$0xff]  ;;  %v8660_v9 = vld [vmem:[%s13222_s1 + $0x580] ss:$16 sps:$4 sm:$0xff]  }
  0xa7   :  { %13435 = vst [vmem:[#allocation31_spill] sm:$0xff] %v9807_v35  ;;  %v248_v55 = vld [vmem:[%s13223_s0 + $0x718] sm:$0xff]  ;;  %v255_v27 = vld [vmem:[%s13223_s0 + $0x750] sm:$0xff]  ;;  %v9861_v25 = vpack.c.bf16 %v240_v37, %v233_v8 }
  0xa8   :  { %13436 = vst [vmem:[#allocation32_spill] sm:$0xff] %v9811_v45  ;;  %v8669_v8 = vld [vmem:[%s13222_s1 + $0x5c0] ss:$16 sps:$4 sm:$0xff]   ;;  %v260_v37 = vld [vmem:[%s13223_s0 + $0x778] sm:$0xff] }
  0xa9   :  { %2715 = vmatpush1.bf16.msra.mxu0 %v8654_v5  ;;  %v231_v5 = vld [vmem:[%s13223_s0 + $0x690] sm:$0xff]  ;;  %13437 = vst [vmem:[#allocation33_spill] sm:$0xff] %v9861_v25 }
  0xaa   :  { %2151 = vmatmul.mubr.bf16.gmra.mrb[52].mxu1 %v9757_v57  ;;  %2716 = vmatprep.subr.bf16.mxu0 %v8659_v28  ;;  %v8663_v28 = vld [vmem:[%s13222_s1 + $0x1e8] ss:$16 sps:$4 sm:$0xff]   ;;  %v9859_v43 = vpack.c.bf16 %v238_v7, %v231_v5 }
  0xab   :  { %2504 = vmatmul.mubr.bf16.gmra.mrb[52].mxu0 %v9759_v17  ;;  %2160 = vmatprep.mubr.bf16.mxu1 %v9761_v11  ;;  %v9809_v17 = vpack.c.bf16 %v239_v26, %v232_v6  ;;  %v246_v6 = vld [vmem:[%s13223_s0 + $0x708] sm:$0xff]  ;;  %v253_v26 = vld [vmem:[%s13223_s0 + $0x740] sm:$0xff]  ;;  %v252_v5 = vld [vmem:[%s13223_s0 + $0x738] sm:$0xff] }
  0xac   :  { %2513 = vmatprep.mubr.bf16.mxu0 %v9763_v63  ;;  %v8666_v63 = vld [vmem:[%s13222_s1 + $0x5a0] ss:$16 sps:$4 sm:$0xff]   ;;  %v9863_v13 = vpack.c.bf16 %v253_v26, %v246_v6  ;;  %v254_v7 = vld [vmem:[%s13223_s0 + $0x748] sm:$0xff] }
  0xad   :  { %2717 = vmatpush1.bf16.msra.mxu0 %v8657_v29  ;;  %v8665_v29 = vld [vmem:[%s13222_s1 + $0x1ec] ss:$16 sps:$4 sm:$0xff]   ;;  %v267_v6 = vld [vmem:[%s13223_s0 + $0x7b0] sm:$0xff]  ;;  %v269_v26 = vld [vmem:[%s13223_s0 + $0x7c0] sm:$0xff] }
  0xae   :  { %2718 = vmatprep.subr.bf16.mxu0 %v8662_v0  ;;  %3430 = vmatprep.subr.bf16.mxu1 %v8665_v29  ;;  %v8671_v0 = vld [vmem:[%s13222_s1 + $0x5c4] ss:$16 sps:$4 sm:$0xff]  }
  0xaf   :  { %3431 = vmatpush1.bf16.msra.mxu1 %v8663_v28 }
  0xb1   :  { %2719 = vmatpush1.bf16.msra.mxu0 %v8660_v9  ;;  %v245_v9 = vld [vmem:[%s13223_s0 + $0x700] sm:$0xff] }
  0xb2   :  { %2161 = vmatmul.mubr.bf16.gmra.mrb[56].mxu1 %v9805_v30  ;;  %v9907_v28 = vpack.c.bf16 %v252_v5, %v245_v9  ;;  %v266_v9 = vld [vmem:[%s13223_s0 + $0x7a8] sm:$0xff] }
  0xb3   :  { %2514 = vmatmul.mubr.bf16.gmra.mrb[56].mxu0 %v9807_v35  ;;  %2170 = vmatprep.mubr.bf16.mxu1 %v9809_v17  ;;  %v8668_v35 = vld [vmem:[%s13222_s1 + $0x5a4] ss:$16 sps:$4 sm:$0xff]   ;;  %v8677_v5 = vld [vmem:[%s13222_s1 + $0x20c] ss:$16 sps:$4 sm:$0xff]  }
  0xb4   :  { %2523 = vmatprep.mubr.bf16.mxu0 %v9811_v45  ;;  %2720 = vmatprep.subr.bf16.mxu0 %v8668_v35  ;;  %v9865_v45 = vpack.c.bf16 %v255_v27, %v248_v55  ;;  %v247_v35 = vld [vmem:[%s13223_s0 + $0x710] sm:$0xff] }
  0xb5   :  { %2721 = vmatpush1.bf16.msra.mxu0 %v8666_v63  ;;  %v262_v63 = vld [vmem:[%s13223_s0 + $0x788] sm:$0xff]  ;;  %v8674_v55 = vld [vmem:[%s13222_s1 + $0x5e4] ss:$16 sps:$4 sm:$0xff]   ;;  %v8672_v27 = vld [vmem:[%s13222_s1 + $0x5e0] ss:$16 sps:$4 sm:$0xff]   ;;  %v9909_v29 = vpack.c.bf16 %v254_v7, %v247_v35  ;;  %3753 = vmatprep.subr.bf16.mxu1 %v8677_v5 }
  0xb6   :  { %13438 = vst [vmem:[#allocation34_spill] sm:$0xff] %v9865_v45  ;;  %2722 = vmatprep.subr.bf16.mxu0 %v8671_v0  ;;  %v9913_v61 = vpack.c.bf16 %v269_v26, %v262_v63  ;;  %v259_v0 = vld [vmem:[%s13223_s0 + $0x770] sm:$0xff]  ;;  %v261_v35 = vld [vmem:[%s13223_s0 + $0x780] sm:$0xff]  ;;  %v268_v7 = vld [vmem:[%s13223_s0 + $0x7b8] sm:$0xff] }
  0xb7   :  { %13439 = vst [vmem:[#allocation35_spill] sm:$0xff] %v9909_v29  ;;  %v283_v63 = vld [vmem:[%s13223_s0 + $0x830] sm:$0xff]  ;;  %v9946_v26 = vpack.c.bf16 %v266_v9, %v259_v0  ;;  %v280_v5 = vld [vmem:[%s13223_s0 + $0x818] sm:$0xff]  ;;  %v282_v9 = vld [vmem:[%s13223_s0 + $0x828] sm:$0xff] }
  0xb8   :  { %13440 = vst [vmem:[#allocation36_spill] sm:$0xff] %v9913_v61  ;;  %v275_v0 = vld [vmem:[%s13223_s0 + $0x7f0] sm:$0xff] }
  0xb9   :  { %2723 = vmatpush1.bf16.msra.mxu0 %v8669_v8  ;;  %v274_v8 = vld [vmem:[%s13223_s0 + $0x7e8] sm:$0xff] }
  0xba   :  { %2171 = vmatmul.mubr.bf16.gmra.mrb[60].mxu1 %v9859_v43  ;;  %2724 = vmatprep.subr.bf16.mxu0 %v8674_v55  ;;  %v9948_v55 = vpack.c.bf16 %v268_v7, %v261_v35  ;;  %v288_v35 = vld [vmem:[%s13223_s0 + $0x858] sm:$0xff]  ;;  %v295_v7 = vld [vmem:[%s13223_s0 + $0x890] sm:$0xff] }
  0xbb   :  { %2524 = vmatmul.mubr.bf16.gmra.mrb[60].mxu0 %v9861_v25  ;;  %2180 = vmatprep.mubr.bf16.mxu1 %v9863_v13  ;;  %v9911_v25 = vpack.c.bf16 %v267_v6, %v260_v37  ;;  %v281_v37 = vld [vmem:[%s13223_s0 + $0x820] sm:$0xff]  ;;  %v276_v6 = vld [vmem:[%s13223_s0 + $0x7f8] sm:$0xff] }
  0xbc   :  { %2533 = vmatprep.mubr.bf16.mxu0 %v9865_v45  ;;  %13441 = vst [vmem:[#allocation37_spill] sm:$0xff] %v9948_v55  ;;  %v287_v45 = vld [vmem:[%s13223_s0 + $0x850] sm:$0xff] }
  0xbd   :  { %2725 = vmatpush1.bf16.msra.mxu0 %v8672_v27  ;;  %v9950_v27 = vpack.c.bf16 %v281_v37, %v274_v8  ;;  %v290_v8 = vld [vmem:[%s13223_s0 + $0x868] sm:$0xff]  ;;  %v297_v37 = vld [vmem:[%s13223_s0 + $0x8a0] sm:$0xff] }
  0xc2   :  { %2181 = vmatmul.mubr.bf16.gmra.mrb[64].mxu1 %v9907_v28 }
  0xc3   :  { %2534 = vmatmul.mubr.bf16.gmra.mrb[64].mxu0 %v9909_v29  ;;  %2190 = vmatprep.mubr.bf16.mxu1 %v9911_v25  ;;  %v273_v29 = vld [vmem:[%s13223_s0 + $0x7e0] sm:$0xff] }
  0xc4   :  { %2543 = vmatprep.mubr.bf16.mxu0 %v9913_v61  ;;  %v9952_v61 = vpack.c.bf16 %v283_v63, %v276_v6  ;;  %v9982_v6 = vpack.c.bf16 %v280_v5, %v273_v29  ;;  %v9984_v63 = vpack.c.bf16 %v282_v9, %v275_v0  ;;  %v289_v29 = vld [vmem:[%s13223_s0 + $0x860] sm:$0xff]  ;;  %v296_v5 = vld [vmem:[%s13223_s0 + $0x898] sm:$0xff]  ;;  %v302_v0 = vld [vmem:[%s13223_s0 + $0x8c8] sm:$0xff] }
  0xc5   :  { %v309_v9 = vld [vmem:[%s13223_s0 + $0x900] sm:$0xff] }
  0xc6   :  { %13442 = vst [vmem:[#allocation38_spill] sm:$0xff] %v9952_v61  ;;  %13443 = vst [vmem:[#allocation39_spill] sm:$0xff] %v9984_v63 }
  0xca   :  { %2191 = vmatmul.mubr.bf16.gmra.mrb[68].mxu1 %v9946_v26 }
  0xcb   :  { %2544 = vmatmul.mubr.bf16.gmra.mrb[68].mxu0 %v9948_v55  ;;  %2200 = vmatprep.mubr.bf16.mxu1 %v9950_v27  ;;  %v9988_v55 = vpack.c.bf16 %v297_v37, %v290_v8  ;;  %v10018_v8 = vpack.c.bf16 %v294_v59, %v287_v45  ;;  %v10020_v37 = vpack.c.bf16 %v296_v5, %v289_v29  ;;  %v303_v59 = vld [vmem:[%s13223_s0 + $0x8d0] sm:$0xff]  ;;  %v310_v45 = vld [vmem:[%s13223_s0 + $0x908] sm:$0xff]  ;;  %v316_v29 = vld [vmem:[%s13223_s0 + $0x938] sm:$0xff] }
  0xcc   :  { %2553 = vmatprep.mubr.bf16.mxu0 %v9952_v61  ;;  %v9986_v61 = vpack.c.bf16 %v295_v7, %v288_v35  ;;  %v304_v35 = vld [vmem:[%s13223_s0 + $0x8d8] sm:$0xff]  ;;  %v311_v7 = vld [vmem:[%s13223_s0 + $0x910] sm:$0xff] }
  0xcd   :  { %13444 = vst [vmem:[#allocation40_spill] sm:$0xff] %v9988_v55  ;;  %13445 = vst [vmem:[#allocation41_spill] sm:$0xff] %v10020_v37  ;;  %v323_v5 = vld [vmem:[%s13223_s0 + $0x970] sm:$0xff] }
  0xd2   :  { %2201 = vmatmul.mubr.bf16.gmra.mrb[72].mxu1 %v9982_v6 }
  0xd3   :  { %2554 = vmatmul.mubr.bf16.gmra.mrb[72].mxu0 %v9984_v63  ;;  %2210 = vmatprep.mubr.bf16.mxu1 %v9986_v61  ;;  %v10024_v63 = vpack.c.bf16 %v311_v7, %v304_v35  ;;  %v10054_v35 = vpack.c.bf16 %v308_v39, %v301_v41  ;;  %v10056_v7 = vpack.c.bf16 %v310_v45, %v303_v59  ;;  %v317_v39 = vld [vmem:[%s13223_s0 + $0x940] sm:$0xff]  ;;  %v324_v41 = vld [vmem:[%s13223_s0 + $0x978] sm:$0xff]  ;;  %v330_v59 = vld [vmem:[%s13223_s0 + $0x9a8] sm:$0xff] }
  0xd4   :  { %2563 = vmatprep.mubr.bf16.mxu0 %v9988_v55  ;;  %v10022_v55 = vpack.c.bf16 %v309_v9, %v302_v0  ;;  %v318_v0 = vld [vmem:[%s13223_s0 + $0x948] sm:$0xff]  ;;  %v325_v9 = vld [vmem:[%s13223_s0 + $0x980] sm:$0xff] }
  0xd5   :  { %13446 = vst [vmem:[#allocation42_spill] sm:$0xff] %v10024_v63  ;;  %13447 = vst [vmem:[#allocation43_spill] sm:$0xff] %v10056_v7  ;;  %v337_v45 = vld [vmem:[%s13223_s0 + $0x9e0] sm:$0xff] }
  0xda   :  { %2211 = vmatmul.mubr.bf16.gmra.mrb[76].mxu1 %v10018_v8 }
  0xdb   :  { %2564 = vmatmul.mubr.bf16.gmra.mrb[76].mxu0 %v10020_v37  ;;  %2220 = vmatprep.mubr.bf16.mxu1 %v10022_v55  ;;  %v10060_v37 = vpack.c.bf16 %v325_v9, %v318_v0  ;;  %v10090_v0 = vpack.c.bf16 %v322_v21, %v315_v23  ;;  %v10092_v9 = vpack.c.bf16 %v324_v41, %v317_v39  ;;  %v331_v21 = vld [vmem:[%s13223_s0 + $0x9b0] sm:$0xff]  ;;  %v338_v23 = vld [vmem:[%s13223_s0 + $0x9e8] sm:$0xff]  ;;  %v344_v39 = vld [vmem:[%s13223_s0 + $0xa18] sm:$0xff] }
  0xdc   :  { %2573 = vmatprep.mubr.bf16.mxu0 %v10024_v63  ;;  %v10058_v63 = vpack.c.bf16 %v323_v5, %v316_v29  ;;  %v332_v29 = vld [vmem:[%s13223_s0 + $0x9b8] sm:$0xff]  ;;  %v339_v5 = vld [vmem:[%s13223_s0 + $0x9f0] sm:$0xff] }
  0xdd   :  { %13448 = vst [vmem:[#allocation44_spill] sm:$0xff] %v10060_v37  ;;  %13449 = vst [vmem:[#allocation45_spill] sm:$0xff] %v10092_v9  ;;  %v351_v41 = vld [vmem:[%s13223_s0 + $0xa50] sm:$0xff] }
  0xe2   :  { %2221 = vmatmul.mubr.bf16.gmra.mrb[80].mxu1 %v10054_v35 }
  0xe3   :  { %2574 = vmatmul.mubr.bf16.gmra.mrb[80].mxu0 %v10056_v7  ;;  %2230 = vmatprep.mubr.bf16.mxu1 %v10058_v63  ;;  %v10096_v7 = vpack.c.bf16 %v339_v5, %v332_v29  ;;  %v10126_v29 = vpack.c.bf16 %v336_v2, %v329_v4  ;;  %v10128_v5 = vpack.c.bf16 %v338_v23, %v331_v21  ;;  %v345_v2 = vld [vmem:[%s13223_s0 + $0xa20] sm:$0xff]  ;;  %v352_v4 = vld [vmem:[%s13223_s0 + $0xa58] sm:$0xff]  ;;  %v358_v21 = vld [vmem:[%s13223_s0 + $0xa88] sm:$0xff] }
  0xe4   :  { %2583 = vmatprep.mubr.bf16.mxu0 %v10060_v37  ;;  %v10094_v37 = vpack.c.bf16 %v337_v45, %v330_v59  ;;  %v346_v59 = vld [vmem:[%s13223_s0 + $0xa28] sm:$0xff]  ;;  %v353_v45 = vld [vmem:[%s13223_s0 + $0xa60] sm:$0xff] }
  0xe5   :  { %13450 = vst [vmem:[#allocation46_spill] sm:$0xff] %v10096_v7  ;;  %13451 = vst [vmem:[#allocation47_spill] sm:$0xff] %v10128_v5  ;;  %v365_v23 = vld [vmem:[%s13223_s0 + $0xac0] sm:$0xff] }
  0xea   :  { %2231 = vmatmul.mubr.bf16.gmra.mrb[84].mxu1 %v10090_v0 }
  0xeb   :  { %2584 = vmatmul.mubr.bf16.gmra.mrb[84].mxu0 %v10092_v9  ;;  %2240 = vmatprep.mubr.bf16.mxu1 %v10094_v37  ;;  %v10132_v9 = vpack.c.bf16 %v353_v45, %v346_v59  ;;  %v10162_v59 = vpack.c.bf16 %v350_v48, %v343_v50  ;;  %v10164_v45 = vpack.c.bf16 %v352_v4, %v345_v2  ;;  %v359_v48 = vld [vmem:[%s13223_s0 + $0xa90] sm:$0xff]  ;;  %v366_v50 = vld [vmem:[%s13223_s0 + $0xac8] sm:$0xff]  ;;  %v372_v2 = vld [vmem:[%s13223_s0 + $0xaf8] sm:$0xff] }
  0xec   :  { %2593 = vmatprep.mubr.bf16.mxu0 %v10096_v7  ;;  %v10130_v7 = vpack.c.bf16 %v351_v41, %v344_v39  ;;  %v360_v39 = vld [vmem:[%s13223_s0 + $0xa98] sm:$0xff]  ;;  %v367_v41 = vld [vmem:[%s13223_s0 + $0xad0] sm:$0xff] }
  0xed   :  { %13452 = vst [vmem:[#allocation48_spill] sm:$0xff] %v10132_v9  ;;  %13453 = vst [vmem:[#allocation49_spill] sm:$0xff] %v10164_v45  ;;  %v379_v4 = vld [vmem:[%s13223_s0 + $0xb30] sm:$0xff] }
  0xf2   :  { %2241 = vmatmul.mubr.bf16.gmra.mrb[88].mxu1 %v10126_v29 }
  0xf3   :  { %2594 = vmatmul.mubr.bf16.gmra.mrb[88].mxu0 %v10128_v5  ;;  %2250 = vmatprep.mubr.bf16.mxu1 %v10130_v7  ;;  %v10168_v5 = vpack.c.bf16 %v367_v41, %v360_v39  ;;  %v10198_v39 = vpack.c.bf16 %v364_v32, %v357_v34  ;;  %v10200_v41 = vpack.c.bf16 %v366_v50, %v359_v48  ;;  %v373_v32 = vld [vmem:[%s13223_s0 + $0xb00] sm:$0xff]  ;;  %v380_v34 = vld [vmem:[%s13223_s0 + $0xb38] sm:$0xff]  ;;  %v386_v48 = vld [vmem:[%s13223_s0 + $0xb68] sm:$0xff] }
  0xf4   :  { %2603 = vmatprep.mubr.bf16.mxu0 %v10132_v9  ;;  %v10166_v9 = vpack.c.bf16 %v365_v23, %v358_v21  ;;  %v374_v21 = vld [vmem:[%s13223_s0 + $0xb08] sm:$0xff]  ;;  %v381_v23 = vld [vmem:[%s13223_s0 + $0xb40] sm:$0xff] }
  0xf5   :  { %13455 = vst [vmem:[#allocation51_spill] sm:$0xff] %v10168_v5  ;;  %13456 = vst [vmem:[#allocation52_spill] sm:$0xff] %v10198_v39  ;;  %v393_v50 = vld [vmem:[%s13223_s0 + $0xba0] sm:$0xff] }
  0xf6   :  { %13454 = vst [vmem:[#allocation50_spill] sm:$0xff] %v10166_v9  ;;  %13457 = vst [vmem:[#allocation53_spill] sm:$0xff] %v10200_v41 }
  0xfa   :  { %2251 = vmatmul.mubr.bf16.gmra.mrb[92].mxu1 %v10162_v59 }
  0xfb   :  { %2604 = vmatmul.mubr.bf16.gmra.mrb[92].mxu0 %v10164_v45  ;;  %2260 = vmatprep.mubr.bf16.mxu1 %v10166_v9  ;;  %v10204_v45 = vpack.c.bf16 %v381_v23, %v374_v21  ;;  %v10234_v21 = vpack.c.bf16 %v378_v16, %v371_v19  ;;  %v10236_v23 = vpack.c.bf16 %v380_v34, %v373_v32  ;;  %v387_v16 = vld [vmem:[%s13223_s0 + $0xb70] sm:$0xff]  ;;  %v394_v19 = vld [vmem:[%s13223_s0 + $0xba8] sm:$0xff]  ;;  %v400_v32 = vld [vmem:[%s13223_s0 + $0xbd8] sm:$0xff] }
  0xfc   :  { %2613 = vmatprep.mubr.bf16.mxu0 %v10168_v5  ;;  %v10202_v5 = vpack.c.bf16 %v379_v4, %v372_v2  ;;  %v388_v2 = vld [vmem:[%s13223_s0 + $0xb78] sm:$0xff]  ;;  %v395_v4 = vld [vmem:[%s13223_s0 + $0xbb0] sm:$0xff] }
  0xfd   :  { %13459 = vst [vmem:[#allocation55_spill] sm:$0xff] %v10204_v45  ;;  %13460 = vst [vmem:[#allocation56_spill] sm:$0xff] %v10234_v21  ;;  %v407_v34 = vld [vmem:[%s13223_s0 + $0xc10] sm:$0xff] }
  0xfe   :  { %13458 = vst [vmem:[#allocation54_spill] sm:$0xff] %v10202_v5  ;;  %13461 = vst [vmem:[#allocation57_spill] sm:$0xff] %v10236_v23 }
 0x102   :  { %2261 = vmatmul.mubr.bf16.gmra.mrb[96].mxu1 %v10198_v39 }
 0x103   :  { %2614 = vmatmul.mubr.bf16.gmra.mrb[96].mxu0 %v10200_v41  ;;  %2270 = vmatprep.mubr.bf16.mxu1 %v10202_v5  ;;  %v10240_v41 = vpack.c.bf16 %v395_v4, %v388_v2  ;;  %v392_v5 = vld [vmem:[%s13223_s0 + $0xb98] sm:$0xff]  ;;  %v10272_v4 = vpack.c.bf16 %v394_v19, %v387_v16  ;;  %v414_v16 = vld [vmem:[%s13223_s0 + $0xc48] sm:$0xff]  ;;  %v421_v19 = vld [vmem:[%s13223_s0 + $0xc80] sm:$0xff] }
 0x104   :  { %2623 = vmatprep.mubr.bf16.mxu0 %v10204_v45  ;;  %v10238_v45 = vpack.c.bf16 %v393_v50, %v386_v48  ;;  %v402_v48 = vld [vmem:[%s13223_s0 + $0xbe8] sm:$0xff]  ;;  %v409_v50 = vld [vmem:[%s13223_s0 + $0xc20] sm:$0xff]  ;;  %v10270_v2 = vpack.c.bf16 %v392_v5, %v385_v54  ;;  %v408_v5 = vld [vmem:[%s13223_s0 + $0xc18] sm:$0xff] }
 0x105   :  { %13463 = vst [vmem:[#allocation59_spill] sm:$0xff] %v10240_v41  ;;  %13465 = vst [vmem:[#allocation61_spill] sm:$0xff] %v10272_v4  ;;  %v401_v54 = vld [vmem:[%s13223_s0 + $0xbe0] sm:$0xff] }
 0x106   :  { %13462 = vst [vmem:[#allocation58_spill] sm:$0xff] %v10238_v45  ;;  %13464 = vst [vmem:[#allocation60_spill] sm:$0xff] %v10270_v2 }
 0x10a   :  { %2271 = vmatmul.mubr.bf16.gmra.mrb[100].mxu1 %v10234_v21  ;;  %v406_v21 = vld [vmem:[%s13223_s0 + $0xc08] sm:$0xff] }
 0x10b   :  { %2624 = vmatmul.mubr.bf16.gmra.mrb[100].mxu0 %v10236_v23  ;;  %2280 = vmatprep.mubr.bf16.mxu1 %v10238_v45  ;;  %v10276_v23 = vpack.c.bf16 %v409_v50, %v402_v48  ;;  %v399_v45 = vld [vmem:[%s13223_s0 + $0xbd0] sm:$0xff] }
 0x10c   :  { %2633 = vmatprep.mubr.bf16.mxu0 %v10240_v41  ;;  %v10274_v41 = vpack.c.bf16 %v407_v34, %v400_v32  ;;  %v416_v32 = vld [vmem:[%s13223_s0 + $0xc58] sm:$0xff]  ;;  %v423_v34 = vld [vmem:[%s13223_s0 + $0xc90] sm:$0xff] }
 0x10d   :  { %13467 = vst [vmem:[#allocation63_spill] sm:$0xff] %v10276_v23  ;;  %v10318_v39 = vpack.c.bf16 %v423_v34, %v416_v32  ;;  %v437_v32 = vld [vmem:[%s13223_s0 + $0xd00] sm:$0xff] }
 0x10e   :  { %13466 = vst [vmem:[#allocation62_spill] sm:$0xff] %v10274_v41 }
 0x10f   :  { %13474 = vst [vmem:[#allocation70_spill] sm:$0xff] %v10318_v39 }
 0x112   :  { %2281 = vmatmul.mubr.bf16.gmra.mrb[104].mxu1 %v10270_v2  ;;  %v10316_v2 = vpack.c.bf16 %v421_v19, %v414_v16  ;;  %v435_v16 = vld [vmem:[%s13223_s0 + $0xcf0] sm:$0xff]  ;;  %v430_v19 = vld [vmem:[%s13223_s0 + $0xcc8] sm:$0xff] }
 0x113   :  { %2634 = vmatmul.mubr.bf16.gmra.mrb[104].mxu0 %v10272_v4  ;;  %2290 = vmatprep.mubr.bf16.mxu1 %v10274_v41  ;;  %v10312_v4 = vpack.c.bf16 %v408_v5, %v401_v54  ;;  %v422_v54 = vld [vmem:[%s13223_s0 + $0xc88] sm:$0xff]  ;;  %v428_v5 = vld [vmem:[%s13223_s0 + $0xcb8] sm:$0xff] }
 0x114   :  { %2643 = vmatprep.mubr.bf16.mxu0 %v10276_v23  ;;  %v10310_v23 = vpack.c.bf16 %v406_v21, %v399_v45  ;;  %13473 = vst [vmem:[#allocation69_spill] sm:$0xff] %v10316_v2  ;;  %v420_v45 = vld [vmem:[%s13223_s0 + $0xc78] sm:$0xff]  ;;  %v415_v21 = vld [vmem:[%s13223_s0 + $0xc50] sm:$0xff] }
 0x115   :  { %v10306_v48 = vpop.f32.mrb[0].mxu1  ;;  %13471 = vst [vmem:[#allocation67_spill] sm:$0xff] %v10312_v4 }
 0x116   :  { %13468 = vst [vmem:[#allocation64_spill] sm:$0xff] %v10306_v48  ;;  %v10308_v50 = vpop.f32.mrb[1].mxu1  ;;  %13470 = vst [vmem:[#allocation66_spill] sm:$0xff] %v10310_v23  ;;  %v10360_v48 = vpack.c.bf16 %v435_v16, %v428_v5  ;;  %v449_v5 = vld [vmem:[%s13223_s0 + $0xd60] sm:$0xff]  ;;  %v444_v16 = vld [vmem:[%s13223_s0 + $0xd38] sm:$0xff] }
 0x117   :  { %13469 = vst [vmem:[#allocation65_spill] sm:$0xff] %v10308_v50  ;;  %v10314_v41 = vpop.f32.mrb[2].mxu1  ;;  %v413_v50 = vld [vmem:[%s13223_s0 + $0xc40] sm:$0xff] }
 0x118   :  { %13472 = vst [vmem:[#allocation68_spill] sm:$0xff] %v10314_v41  ;;  %v10320_v9 = vpop.f32.mrb[3].mxu1  ;;  %13481 = vst [vmem:[#allocation77_spill] sm:$0xff] %v10360_v48 }
 0x119   :  { %13475 = vst [vmem:[#allocation71_spill] sm:$0xff] %v10320_v9  ;;  %v10356_v9 = vpack.c.bf16 %v422_v54, %v415_v21  ;;  %v436_v21 = vld [vmem:[%s13223_s0 + $0xcf8] sm:$0xff]  ;;  %v442_v54 = vld [vmem:[%s13223_s0 + $0xd28] sm:$0xff] }
 0x11a   :  { %2291 = vmatmul.mubr.bf16.gmra.mrb[108].mxu1 %v10310_v23 }
 0x11b   :  { %2644 = vmatmul.mubr.bf16.gmra.mrb[108].mxu0 %v10312_v4  ;;  %2300 = vmatprep.mubr.bf16.mxu1 %v10316_v2  ;;  %v10354_v4 = vpack.c.bf16 %v420_v45, %v413_v50  ;;  %13479 = vst [vmem:[#allocation75_spill] sm:$0xff] %v10356_v9  ;;  %v10362_v2 = vpack.c.bf16 %v437_v32, %v430_v19  ;;  %v434_v50 = vld [vmem:[%s13223_s0 + $0xce8] sm:$0xff]  ;;  %v429_v45 = vld [vmem:[%s13223_s0 + $0xcc0] sm:$0xff]  ;;  %v451_v19 = vld [vmem:[%s13223_s0 + $0xd70] sm:$0xff] }
 0x11c   :  { %2653 = vmatprep.mubr.bf16.mxu0 %v10318_v39 }
 0x11d   :  { %v10350_v34 = vpop.f32.mrb[4].mxu1  ;;  %13478 = vst [vmem:[#allocation74_spill] sm:$0xff] %v10354_v4  ;;  %13482 = vst [vmem:[#allocation78_spill] sm:$0xff] %v10362_v2 }
 0x11e   :  { %13476 = vst [vmem:[#allocation72_spill] sm:$0xff] %v10350_v34  ;;  %v10352_v39 = vpop.f32.mrb[5].mxu1  ;;  %v10404_v34 = vpack.c.bf16 %v449_v5, %v442_v54  ;;  %v463_v54 = vld [vmem:[%s13223_s0 + $0xdd0] sm:$0xff]  ;;  %v458_v5 = vld [vmem:[%s13223_s0 + $0xda8] sm:$0xff] }
 0x11f   :  { %13477 = vst [vmem:[#allocation73_spill] sm:$0xff] %v10352_v39  ;;  %v10358_v41 = vpop.f32.mrb[6].mxu1  ;;  %v427_v39 = vld [vmem:[%s13223_s0 + $0xcb0] sm:$0xff] }
 0x120   :  { %13480 = vst [vmem:[#allocation76_spill] sm:$0xff] %v10358_v41  ;;  %v10364_v23 = vpop.f32.mrb[7].mxu1  ;;  %13489 = vst [vmem:[#allocation85_spill] sm:$0xff] %v10404_v34 }
 0x121   :  { %13483 = vst [vmem:[#allocation79_spill] sm:$0xff] %v10364_v23  ;;  %v10400_v23 = vpack.c.bf16 %v436_v21, %v429_v45  ;;  %v450_v45 = vld [vmem:[%s13223_s0 + $0xd68] sm:$0xff]  ;;  %v456_v21 = vld [vmem:[%s13223_s0 + $0xd98] sm:$0xff] }
 0x122   :  { %2301 = vmatmul.mubr.bf16.gmra.mrb[112].mxu1 %v10354_v4 }
 0x123   :  { %2654 = vmatmul.mubr.bf16.gmra.mrb[112].mxu0 %v10356_v9  ;;  %2310 = vmatprep.mubr.bf16.mxu1 %v10360_v48  ;;  %v10398_v9 = vpack.c.bf16 %v434_v50, %v427_v39  ;;  %13487 = vst [vmem:[#allocation83_spill] sm:$0xff] %v10400_v23  ;;  %v10406_v48 = vpack.c.bf16 %v451_v19, %v444_v16  ;;  %v448_v39 = vld [vmem:[%s13223_s0 + $0xd58] sm:$0xff]  ;;  %v443_v50 = vld [vmem:[%s13223_s0 + $0xd30] sm:$0xff]  ;;  %v465_v16 = vld [vmem:[%s13223_s0 + $0xde0] sm:$0xff] }
 0x124   :  { %2663 = vmatprep.mubr.bf16.mxu0 %v10362_v2 }
 0x125   :  { %v10394_v32 = vpop.f32.mrb[8].mxu1  ;;  %13486 = vst [vmem:[#allocation82_spill] sm:$0xff] %v10398_v9  ;;  %13490 = vst [vmem:[#allocation86_spill] sm:$0xff] %v10406_v48 }
 0x126   :  { %13484 = vst [vmem:[#allocation80_spill] sm:$0xff] %v10394_v32  ;;  %v10396_v2 = vpop.f32.mrb[9].mxu1  ;;  %v10448_v32 = vpack.c.bf16 %v463_v54, %v456_v21  ;;  %v33_v21 = vld [vmem:[%s13223_s0 + $0x60] sm:$0xff] }
 0x127   :  { %13485 = vst [vmem:[#allocation81_spill] sm:$0xff] %v10396_v2  ;;  %v10402_v41 = vpop.f32.mrb[10].mxu1  ;;  %v441_v2 = vld [vmem:[%s13223_s0 + $0xd20] sm:$0xff] }
 0x128   :  { %13488 = vst [vmem:[#allocation84_spill] sm:$0xff] %v10402_v41  ;;  %v10408_v4 = vpop.f32.mrb[11].mxu1 }
 0x129   :  { %13491 = vst [vmem:[#allocation87_spill] sm:$0xff] %v10408_v4  ;;  %v10444_v4 = vpack.c.bf16 %v450_v45, %v443_v50  ;;  %v464_v50 = vld [vmem:[%s13223_s0 + $0xdd8] sm:$0xff]  ;;  %v26_v45 = vld [vmem:[%s13223_s0 + $0x28] sm:$0xff] }
 0x12a   :  { %2311 = vmatmul.mubr.bf16.gmra.mrb[116].mxu1 %v10398_v9 }
 0x12b   :  { %2664 = vmatmul.mubr.bf16.gmra.mrb[116].mxu0 %v10400_v23  ;;  %2320 = vmatprep.mubr.bf16.mxu1 %v10404_v34  ;;  %v10442_v23 = vpack.c.bf16 %v448_v39, %v441_v2  ;;  %13493 = vst [vmem:[#allocation89_spill] sm:$0xff] %v10444_v4  ;;  %v10450_v34 = vpack.c.bf16 %v465_v16, %v458_v5  ;;  %v462_v2 = vld [vmem:[%s13223_s0 + $0xdc8] sm:$0xff]  ;;  %v457_v39 = vld [vmem:[%s13223_s0 + $0xda0] sm:$0xff] }
 0x12c   :  { %2673 = vmatprep.mubr.bf16.mxu0 %v10406_v48 }
 0x12d   :  { %v10438_v19 = vpop.f32.mrb[12].mxu1  ;;  %13495 = vst [vmem:[#allocation91_spill] sm:$0xff] %v10450_v34 }
 0x12e   :  { %v10440_v48 = vpop.f32.mrb[13].mxu1 }
 0x12f   :  { %13492 = vst [vmem:[#allocation88_spill] sm:$0xff] %v10440_v48  ;;  %v10446_v41 = vpop.f32.mrb[14].mxu1  ;;  %v455_v48 = vld [vmem:[%s13223_s0 + $0xd90] sm:$0xff] }
 0x130   :  { %13494 = vst [vmem:[#allocation90_spill] sm:$0xff] %v10446_v41  ;;  %v10452_v9 = vpop.f32.mrb[15].mxu1  ;;  %v10480_v16 = vpack.c.bf16 %v462_v2, %v455_v48  ;;  %v25_v48 = vld [vmem:[%s13223_s0 + $0x20] sm:$0xff]  ;;  %v32_v2 = vld [vmem:[%s13223_s0 + $0x58] sm:$0xff] }
 0x131   :  { %13496 = vst [vmem:[#allocation92_spill] sm:$0xff] %v10452_v9  ;;  %v10486_v9 = vpack.c.bf16 %v33_v21, %v26_v45 }
 0x132   :  { %2321 = vmatmul.mubr.bf16.gmra.mrb[120].mxu1 %v10442_v23 }
 0x133   :  { %2674 = vmatmul.mubr.bf16.gmra.mrb[120].mxu0 %v10444_v4  ;;  %2330 = vmatprep.mubr.bf16.mxu1 %v10448_v32  ;;  %13500 = vst [vmem:[#allocation96_spill] sm:$0xff] %v10486_v9 }
 0x134   :  { %2683 = vmatprep.mubr.bf16.mxu0 %v10450_v34  ;;  %v10482_v34 = vpack.c.bf16 %v464_v50, %v457_v39  ;;  %v40_v39 = vld [vmem:[%s13223_s0 + $0x98] sm:$0xff]  ;;  %v47_v50 = vld [vmem:[%s13223_s0 + $0xd0] sm:$0xff] }
 0x135   :  { %v10476_v54 = vpop.f32.mrb[16].mxu1 }
 0x136   :  { %v10478_v5 = vpop.f32.mrb[17].mxu1  ;;  %13498 = vst [vmem:[#allocation94_spill] sm:$0xff] %v10482_v34 }
 0x137   :  { %13497 = vst [vmem:[#allocation93_spill] sm:$0xff] %v10478_v5  ;;  %v10484_v4 = vpop.f32.mrb[18].mxu1  ;;  %v8680_v5 = vld [vmem:[%s13222_s1 + $0x22c] ss:$16 sps:$4 sm:$0xff]  }
 0x138   :  { %13499 = vst [vmem:[#allocation95_spill] sm:$0xff] %v10484_v4  ;;  %v10488_v41 = vpop.f32.mrb[19].mxu1 }
 0x139   :  { %13501 = vst [vmem:[#allocation97_spill] sm:$0xff] %v10488_v41  ;;  %v10517_v41 = vpack.c.bf16 %v47_v50, %v40_v39  ;;  %v8678_v39 = vld [vmem:[%s13222_s1 + $0x228] ss:$16 sps:$4 sm:$0xff]   ;;  %v8683_v50 = vld [vmem:[%s13222_s1 + $0x24c] ss:$16 sps:$4 sm:$0xff]  }
 0x13a   :  { %2331 = vmatmul.mubr.bf16.gmra.mrb[124].mxu1 %v10480_v16 }
 0x13b   :  { %2684 = vmatmul.mubr.bf16.gmra.mrb[124].mxu0 %v10482_v34  ;;  %3432 = vmatprep.mubr.bf16.mxu1 %v9064_v53  ;;  %v10510_v53 = vpack.c.bf16 %v32_v2, %v25_v48  ;;  %v8675_v34 = vld [vmem:[%s13222_s1 + $0x208] ss:$16 sps:$4 sm:$0xff]   ;;  %13505 = vst [vmem:[#allocation101_spill] sm:$0xff] %v10517_v41  ;;  %v39_v48 = vld [vmem:[%s13223_s0 + $0x90] sm:$0xff] }
 0x13c   :  { %2726 = vmatprep.mubr.bf16.mxu0 %v10486_v9  ;;  %v46_v2 = vld [vmem:[%s13223_s0 + $0xc8] sm:$0xff] }
 0x13d   :  { %v10506_v45 = vpop.f32.mrb[20].mxu1  ;;  %13503 = vst [vmem:[#allocation99_spill] sm:$0xff] %v10510_v53 }
 0x13e   :  { %v10508_v21 = vpop.f32.mrb[21].mxu1 }
 0x13f   :  { %13502 = vst [vmem:[#allocation98_spill] sm:$0xff] %v10508_v21  ;;  %v10512_v9 = vpop.f32.mrb[22].mxu1 }
 0x140   :  { %13504 = vst [vmem:[#allocation100_spill] sm:$0xff] %v10512_v9  ;;  %v10519_v4 = vpop.f32.mrb[23].mxu1 }
 0x141   :  { %13506 = vst [vmem:[#allocation102_spill] sm:$0xff] %v10519_v4  ;;  %v10550_v4 = vpack.c.bf16 %v46_v2, %v39_v48  ;;  %v53_v48 = vld [vmem:[%s13223_s0 + $0x100] sm:$0xff]  ;;  %v60_v2 = vld [vmem:[%s13223_s0 + $0x138] sm:$0xff] }
 0x142   :  { %3433 = vmatmul.mubr.bf16.vlgmr.msra.gmra.mrb[128].mxu1 %v9142_v15  ;;  %v54_v15 = vld [vmem:[%s13223_s0 + $0x108] sm:$0xff] }
 0x143   :  { %2727 = vmatmul.mubr.bf16.vlgmr.msra.gmra.mrb[0].mxu0 %v10510_v53  ;;  %3754 = vmatpush1.bf16.msra.mxu1 %v8675_v34  ;;  %v61_v34 = vld [vmem:[%s13223_s0 + $0x140] sm:$0xff]  ;;  %13508 = vst [vmem:[#allocation104_spill] sm:$0xff] %v10550_v4 }
 0x144   :  { %2736 = vmatprep.mubr.bf16.mxu0 %v10517_v41  ;;  %3442 = vmatprep.mubr.bf16.mxu1 %v9149_v18  ;;  %v10554_v9 = vpack.c.bf16 %v61_v34, %v54_v15  ;;  %v8689_v34 = vld [vmem:[%s13222_s1 + $0x28c] ss:$16 sps:$4 sm:$0xff]  }
 0x145   :  { %3755 = vmatprep.subr.bf16.mxu1 %v8680_v5  ;;  %v10546_v41 = vpop.f32.mrb[24].mxu1  ;;  %v8681_v5 = vld [vmem:[%s13222_s1 + $0x248] ss:$16 sps:$4 sm:$0xff]  }
 0x146   :  { %13507 = vst [vmem:[#allocation103_spill] sm:$0xff] %v10546_v41  ;;  %v10548_v53 = vpop.f32.mrb[25].mxu1  ;;  %13509 = vst [vmem:[#allocation105_spill] sm:$0xff] %v10554_v9  ;;  %v8686_v41 = vld [vmem:[%s13222_s1 + $0x26c] ss:$16 sps:$4 sm:$0xff]  }
 0x147   :  { %v10552_v18 = vpop.f32.mrb[26].mxu1  ;;  %3756 = vmatpush1.bf16.msra.mxu1 %v8678_v39  ;;  %v68_v39 = vld [vmem:[%s13223_s0 + $0x178] sm:$0xff] }
 0x148   :  { %v10556_v21 = vpop.f32.mrb[27].mxu1  ;;  %3757 = vmatprep.subr.bf16.mxu1 %v8683_v50 }
 0x149   :  { %13510 = vst [vmem:[#allocation106_spill] sm:$0xff] %v10556_v21 }
 0x14a   :  { %3443 = vmatmul.mubr.bf16.gmra.mrb[132].mxu1 %v9190_v31  ;;  %v75_v31 = vld [vmem:[%s13223_s0 + $0x1b0] sm:$0xff] }
 0x14b   :  { %2737 = vmatmul.mubr.bf16.gmra.mrb[4].mxu0 %v10550_v4  ;;  %3452 = vmatprep.mubr.bf16.mxu1 %v9194_v33  ;;  %v8684_v33 = vld [vmem:[%s13222_s1 + $0x268] ss:$16 sps:$4 sm:$0xff]   ;;  %v10594_v21 = vpack.c.bf16 %v75_v31, %v68_v39 }
 0x14c   :  { %2746 = vmatprep.mubr.bf16.mxu0 %v10554_v9  ;;  %3758 = vmatpush1.bf16.msra.mxu1 %v8681_v5  ;;  %v10590_v9 = vpack.c.bf16 %v60_v2, %v53_v48  ;;  %v67_v48 = vld [vmem:[%s13223_s0 + $0x170] sm:$0xff]  ;;  %v74_v2 = vld [vmem:[%s13223_s0 + $0x1a8] sm:$0xff] }
 0x14d   :  { %v10583_v15 = vpop.f32.mrb[28].mxu1  ;;  %3759 = vmatprep.subr.bf16.mxu1 %v8686_v41  ;;  %13513 = vst [vmem:[#allocation109_spill] sm:$0xff] %v10594_v21  ;;  %v8692_v41 = vld [vmem:[%s13222_s1 + $0x2ac] ss:$16 sps:$4 sm:$0xff]  }
 0x14e   :  { %13511 = vst [vmem:[#allocation107_spill] sm:$0xff] %v10583_v15  ;;  %v10588_v50 = vpop.f32.mrb[29].mxu1  ;;  %13512 = vst [vmem:[#allocation108_spill] sm:$0xff] %v10590_v9  ;;  %v8687_v15 = vld [vmem:[%s13222_s1 + $0x288] ss:$16 sps:$4 sm:$0xff]  }
 0x14f   :  { %v10592_v4 = vpop.f32.mrb[30].mxu1  ;;  %v82_v39 = vld [vmem:[%s13223_s0 + $0x1e8] sm:$0xff] }
 0x150   :  { %v10596_v5 = vpop.f32.mrb[31].mxu1  ;;  %3760 = vmatpush1.bf16.msra.mxu1 %v8684_v33  ;;  %v8695_v33 = vld [vmem:[%s13222_s1 + $0x2cc] ss:$16 sps:$4 sm:$0xff]  }
 0x151   :  { %13514 = vst [vmem:[#allocation110_spill] sm:$0xff] %v10596_v5  ;;  %3761 = vmatprep.subr.bf16.mxu1 %v8689_v34 }
 0x152   :  { %3453 = vmatmul.mubr.bf16.gmra.mrb[136].mxu1 %v9238_v47  ;;  %v89_v47 = vld [vmem:[%s13223_s0 + $0x220] sm:$0xff] }
 0x153   :  { %2747 = vmatmul.mubr.bf16.gmra.mrb[8].mxu0 %v10590_v9  ;;  %3462 = vmatprep.mubr.bf16.mxu1 %v9242_v49  ;;  %v8690_v49 = vld [vmem:[%s13222_s1 + $0x2a8] ss:$16 sps:$4 sm:$0xff]   ;;  %v10634_v5 = vpack.c.bf16 %v89_v47, %v82_v39 }
 0x154   :  { %2756 = vmatprep.mubr.bf16.mxu0 %v10594_v21  ;;  %3762 = vmatpush1.bf16.msra.mxu1 %v8687_v15  ;;  %v10630_v21 = vpack.c.bf16 %v74_v2, %v67_v48  ;;  %v81_v48 = vld [vmem:[%s13223_s0 + $0x1e0] sm:$0xff]  ;;  %v88_v2 = vld [vmem:[%s13223_s0 + $0x218] sm:$0xff] }
 0x155   :  { %v10623_v31 = vpop.f32.mrb[32].mxu1  ;;  %3763 = vmatprep.subr.bf16.mxu1 %v8692_v41  ;;  %13517 = vst [vmem:[#allocation113_spill] sm:$0xff] %v10634_v5  ;;  %v8698_v41 = vld [vmem:[%s13222_s1 + $0x2ec] ss:$16 sps:$4 sm:$0xff]  }
 0x156   :  { %13515 = vst [vmem:[#allocation111_spill] sm:$0xff] %v10623_v31  ;;  %v10628_v34 = vpop.f32.mrb[33].mxu1  ;;  %13516 = vst [vmem:[#allocation112_spill] sm:$0xff] %v10630_v21  ;;  %v8693_v31 = vld [vmem:[%s13222_s1 + $0x2c8] ss:$16 sps:$4 sm:$0xff]  }
 0x157   :  { %v10632_v9 = vpop.f32.mrb[34].mxu1  ;;  %v96_v39 = vld [vmem:[%s13223_s0 + $0x258] sm:$0xff] }
 0x158   :  { %v10636_v15 = vpop.f32.mrb[35].mxu1  ;;  %3764 = vmatpush1.bf16.msra.mxu1 %v8690_v49  ;;  %v8701_v49 = vld [vmem:[%s13222_s1 + $0x30c] ss:$16 sps:$4 sm:$0xff]  }
 0x159   :  { %13518 = vst [vmem:[#allocation114_spill] sm:$0xff] %v10636_v15  ;;  %3765 = vmatprep.subr.bf16.mxu1 %v8695_v33 }
 0x15a   :  { %3463 = vmatmul.mubr.bf16.gmra.mrb[140].mxu1 %v9286_v1  ;;  %v103_v1 = vld [vmem:[%s13223_s0 + $0x290] sm:$0xff] }
 0x15b   :  { %2757 = vmatmul.mubr.bf16.gmra.mrb[12].mxu0 %v10630_v21  ;;  %3472 = vmatprep.mubr.bf16.mxu1 %v9290_v3  ;;  %v8696_v3 = vld [vmem:[%s13222_s1 + $0x2e8] ss:$16 sps:$4 sm:$0xff]   ;;  %v10674_v15 = vpack.c.bf16 %v103_v1, %v96_v39 }
 0x15c   :  { %2766 = vmatprep.mubr.bf16.mxu0 %v10634_v5  ;;  %3766 = vmatpush1.bf16.msra.mxu1 %v8693_v31  ;;  %v10670_v5 = vpack.c.bf16 %v88_v2, %v81_v48  ;;  %v95_v48 = vld [vmem:[%s13223_s0 + $0x250] sm:$0xff]  ;;  %v102_v2 = vld [vmem:[%s13223_s0 + $0x288] sm:$0xff] }
 0x15d   :  { %v10663_v47 = vpop.f32.mrb[36].mxu1  ;;  %3767 = vmatprep.subr.bf16.mxu1 %v8698_v41  ;;  %13521 = vst [vmem:[#allocation117_spill] sm:$0xff] %v10674_v15  ;;  %v8704_v41 = vld [vmem:[%s13222_s1 + $0x32c] ss:$16 sps:$4 sm:$0xff]  }
 0x15e   :  { %13519 = vst [vmem:[#allocation115_spill] sm:$0xff] %v10663_v47  ;;  %v10668_v33 = vpop.f32.mrb[37].mxu1  ;;  %13520 = vst [vmem:[#allocation116_spill] sm:$0xff] %v10670_v5  ;;  %v8699_v47 = vld [vmem:[%s13222_s1 + $0x308] ss:$16 sps:$4 sm:$0xff]  }
 0x15f   :  { %v10672_v21 = vpop.f32.mrb[38].mxu1  ;;  %v110_v39 = vld [vmem:[%s13223_s0 + $0x2c8] sm:$0xff] }
 0x160   :  { %v10676_v31 = vpop.f32.mrb[39].mxu1  ;;  %3768 = vmatpush1.bf16.msra.mxu1 %v8696_v3  ;;  %v8707_v3 = vld [vmem:[%s13222_s1 + $0x34c] ss:$16 sps:$4 sm:$0xff]  }
 0x161   :  { %13522 = vst [vmem:[#allocation118_spill] sm:$0xff] %v10676_v31  ;;  %3769 = vmatprep.subr.bf16.mxu1 %v8701_v49 }
 0x162   :  { %3473 = vmatmul.mubr.bf16.gmra.mrb[144].mxu1 %v9331_v20  ;;  %v117_v20 = vld [vmem:[%s13223_s0 + $0x300] sm:$0xff] }
 0x163   :  { %2767 = vmatmul.mubr.bf16.gmra.mrb[16].mxu0 %v10670_v5  ;;  %3482 = vmatprep.mubr.bf16.mxu1 %v9335_v22  ;;  %v8702_v22 = vld [vmem:[%s13222_s1 + $0x328] ss:$16 sps:$4 sm:$0xff]   ;;  %v10714_v31 = vpack.c.bf16 %v117_v20, %v110_v39 }
 0x164   :  { %2776 = vmatprep.mubr.bf16.mxu0 %v10674_v15  ;;  %3770 = vmatpush1.bf16.msra.mxu1 %v8699_v47  ;;  %v10710_v15 = vpack.c.bf16 %v102_v2, %v95_v48  ;;  %v116_v48 = vld [vmem:[%s13223_s0 + $0x2f8] sm:$0xff] }
 0x165   :  { %v10703_v1 = vpop.f32.mrb[40].mxu1  ;;  %3771 = vmatprep.subr.bf16.mxu1 %v8704_v41  ;;  %13524 = vst [vmem:[#allocation120_spill] sm:$0xff] %v10714_v31  ;;  %v109_v41 = vld [vmem:[%s13223_s0 + $0x2c0] sm:$0xff]  ;;  %v124_v2 = vld [vmem:[%s13223_s0 + $0x338] sm:$0xff] }
 0x166   :  { %13523 = vst [vmem:[#allocation119_spill] sm:$0xff] %v10703_v1  ;;  %v10708_v49 = vpop.f32.mrb[41].mxu1  ;;  %v8705_v1 = vld [vmem:[%s13222_s1 + $0x348] ss:$16 sps:$4 sm:$0xff]   ;;  %v10741_v20 = vpack.c.bf16 %v116_v48, %v109_v41  ;;  %v123_v41 = vld [vmem:[%s13223_s0 + $0x330] sm:$0xff] }
 0x167   :  { %v10712_v5 = vpop.f32.mrb[42].mxu1  ;;  %v138_v48 = vld [vmem:[%s13223_s0 + $0x3a8] sm:$0xff] }
 0x168   :  { %v10716_v47 = vpop.f32.mrb[43].mxu1  ;;  %3772 = vmatpush1.bf16.msra.mxu1 %v8702_v22  ;;  %13526 = vst [vmem:[#allocation122_spill] sm:$0xff] %v10741_v20 }
 0x169   :  { %3773 = vmatprep.subr.bf16.mxu1 %v8707_v3 }
 0x16a   :  { %3483 = vmatmul.mubr.bf16.gmra.mrb[148].mxu1 %v9373_v38  ;;  %v131_v38 = vld [vmem:[%s13223_s0 + $0x370] sm:$0xff] }
 0x16b   :  { %2777 = vmatmul.mubr.bf16.gmra.mrb[20].mxu0 %v10710_v15  ;;  %3492 = vmatprep.mubr.bf16.mxu1 %v9377_v40  ;;  %v10745_v3 = vpack.c.bf16 %v131_v38, %v124_v2  ;;  %v145_v2 = vld [vmem:[%s13223_s0 + $0x3e0] sm:$0xff] }
 0x16c   :  { %2786 = vmatprep.mubr.bf16.mxu0 %v10714_v31  ;;  %3774 = vmatpush1.bf16.msra.mxu1 %v8705_v1  ;;  %v8708_v1 = vld [vmem:[%s13222_s1 + $0x368] ss:$16 sps:$4 sm:$0xff]  }
 0x16d   :  { %v10737_v39 = vpop.f32.mrb[44].mxu1  ;;  %13528 = vst [vmem:[#allocation124_spill] sm:$0xff] %v10745_v3 }
 0x16e   :  { %v10739_v40 = vpop.f32.mrb[45].mxu1 }
 0x16f   :  { %13525 = vst [vmem:[#allocation121_spill] sm:$0xff] %v10739_v40  ;;  %v10743_v22 = vpop.f32.mrb[46].mxu1  ;;  %v8710_v40 = vld [vmem:[%s13222_s1 + $0x36c] ss:$16 sps:$4 sm:$0xff]  }
 0x170   :  { %13527 = vst [vmem:[#allocation123_spill] sm:$0xff] %v10743_v22  ;;  %v10747_v31 = vpop.f32.mrb[47].mxu1  ;;  %3775 = vmatprep.subr.bf16.mxu1 %v8710_v40  ;;  %v137_v40 = vld [vmem:[%s13223_s0 + $0x3a0] sm:$0xff] }
 0x171   :  { %13529 = vst [vmem:[#allocation125_spill] sm:$0xff] %v10747_v31  ;;  %3776 = vmatpush1.bf16.msra.mxu1 %v8708_v1  ;;  %v10779_v31 = vpack.c.bf16 %v145_v2, %v138_v48  ;;  %v144_v1 = vld [vmem:[%s13223_s0 + $0x3d8] sm:$0xff] }
 0x172   :  { %3493 = vmatmul.mubr.bf16.gmra.mrb[152].mxu1 %v9415_v58  ;;  %v130_v58 = vld [vmem:[%s13223_s0 + $0x368] sm:$0xff] }
 0x173   :  { %2787 = vmatmul.mubr.bf16.gmra.mrb[24].mxu0 %v10741_v20  ;;  %3502 = vmatprep.mubr.bf16.mxu1 %v9419_v60  ;;  %13531 = vst [vmem:[#allocation127_spill] sm:$0xff] %v10779_v31 }
 0x174   :  { %2796 = vmatprep.mubr.bf16.mxu0 %v10745_v3  ;;  %v10775_v3 = vpack.c.bf16 %v130_v58, %v123_v41  ;;  %v152_v41 = vld [vmem:[%s13223_s0 + $0x418] sm:$0xff] }
 0x175   :  { %v10771_v38 = vpop.f32.mrb[48].mxu1 }
 0x176   :  { %v10773_v60 = vpop.f32.mrb[49].mxu1  ;;  %13530 = vst [vmem:[#allocation126_spill] sm:$0xff] %v10775_v3 }
 0x177   :  { %v10777_v20 = vpop.f32.mrb[50].mxu1 }
 0x178   :  { %v10781_v22 = vpop.f32.mrb[51].mxu1 }
 0x179   :  { %13532 = vst [vmem:[#allocation128_spill] sm:$0xff] %v10781_v22  ;;  %v8711_v22 = vld [vmem:[%s13222_s1 + $0x388] ss:$16 sps:$4 sm:$0xff]  }
 0x17a   :  { %3503 = vmatmul.mubr.bf16.gmra.mrb[156].mxu1 %v9457_v12  ;;  %v159_v12 = vld [vmem:[%s13223_s0 + $0x450] sm:$0xff] }
 0x17b   :  { %2797 = vmatmul.mubr.bf16.gmra.mrb[28].mxu0 %v10775_v3  ;;  %3512 = vmatprep.mubr.bf16.mxu1 %v9467_v24  ;;  %v10803_v24 = vpack.c.bf16 %v144_v1, %v137_v40  ;;  %v151_v40 = vld [vmem:[%s13223_s0 + $0x410] sm:$0xff]  ;;  %v166_v1 = vld [vmem:[%s13223_s0 + $0x488] sm:$0xff] }
 0x17c   :  { %2806 = vmatprep.mubr.bf16.mxu0 %v10779_v31  ;;  %v10807_v31 = vpack.c.bf16 %v159_v12, %v152_v41  ;;  %v173_v41 = vld [vmem:[%s13223_s0 + $0x4c0] sm:$0xff] }
 0x17d   :  { %v10799_v58 = vpop.f32.mrb[52].mxu1  ;;  %13534 = vst [vmem:[#allocation130_spill] sm:$0xff] %v10803_v24 }
 0x17e   :  { %v10801_v48 = vpop.f32.mrb[53].mxu1  ;;  %13536 = vst [vmem:[#allocation132_spill] sm:$0xff] %v10807_v31 }
 0x17f   :  { %13533 = vst [vmem:[#allocation129_spill] sm:$0xff] %v10801_v48  ;;  %v10805_v2 = vpop.f32.mrb[54].mxu1  ;;  %v8713_v48 = vld [vmem:[%s13222_s1 + $0x38c] ss:$16 sps:$4 sm:$0xff]  }
 0x180   :  { %13535 = vst [vmem:[#allocation131_spill] sm:$0xff] %v10805_v2  ;;  %v10809_v3 = vpop.f32.mrb[55].mxu1  ;;  %3777 = vmatprep.subr.bf16.mxu1 %v8713_v48  ;;  %v172_v48 = vld [vmem:[%s13223_s0 + $0x4b8] sm:$0xff] }
 0x181   :  { %13537 = vst [vmem:[#allocation133_spill] sm:$0xff] %v10809_v3  ;;  %3778 = vmatpush1.bf16.msra.mxu1 %v8711_v22  ;;  %v10841_v3 = vpack.c.bf16 %v173_v41, %v166_v1  ;;  %v165_v22 = vld [vmem:[%s13223_s0 + $0x480] sm:$0xff] }
 0x182   :  { %3513 = vmatmul.mubr.bf16.gmra.mrb[160].mxu1 %v9499_v42  ;;  %v158_v42 = vld [vmem:[%s13223_s0 + $0x448] sm:$0xff] }
 0x183   :  { %2807 = vmatmul.mubr.bf16.gmra.mrb[32].mxu0 %v10803_v24  ;;  %3522 = vmatprep.mubr.bf16.mxu1 %v9503_v44  ;;  %13539 = vst [vmem:[#allocation135_spill] sm:$0xff] %v10841_v3 }
 0x184   :  { %2816 = vmatprep.mubr.bf16.mxu0 %v10807_v31  ;;  %v10837_v31 = vpack.c.bf16 %v158_v42, %v151_v40  ;;  %v180_v40 = vld [vmem:[%s13223_s0 + $0x4f8] sm:$0xff] }
 0x185   :  { %v10833_v12 = vpop.f32.mrb[56].mxu1 }
 0x186   :  { %v10835_v44 = vpop.f32.mrb[57].mxu1  ;;  %13538 = vst [vmem:[#allocation134_spill] sm:$0xff] %v10837_v31 }
 0x187   :  { %v10839_v24 = vpop.f32.mrb[58].mxu1 }
 0x188   :  { %v10843_v2 = vpop.f32.mrb[59].mxu1 }
 0x189   :  { %13540 = vst [vmem:[#allocation136_spill] sm:$0xff] %v10843_v2  ;;  %v8714_v2 = vld [vmem:[%s13222_s1 + $0x3a8] ss:$16 sps:$4 sm:$0xff]  }
 0x18a   :  { %3523 = vmatmul.mubr.bf16.gmra.mrb[164].mxu1 %v9553_v10  ;;  %v187_v10 = vld [vmem:[%s13223_s0 + $0x530] sm:$0xff] }
 0x18b   :  { %2817 = vmatmul.mubr.bf16.gmra.mrb[36].mxu0 %v10837_v31  ;;  %3532 = vmatprep.mubr.bf16.mxu1 %v9557_v14  ;;  %v10865_v14 = vpack.c.bf16 %v172_v48, %v165_v22  ;;  %v179_v22 = vld [vmem:[%s13223_s0 + $0x4f0] sm:$0xff]  ;;  %v194_v48 = vld [vmem:[%s13223_s0 + $0x568] sm:$0xff] }
 0x18c   :  { %2826 = vmatprep.mubr.bf16.mxu0 %v10841_v3  ;;  %v10869_v3 = vpack.c.bf16 %v187_v10, %v180_v40  ;;  %v201_v40 = vld [vmem:[%s13223_s0 + $0x5a0] sm:$0xff] }
 0x18d   :  { %v10861_v42 = vpop.f32.mrb[60].mxu1  ;;  %13542 = vst [vmem:[#allocation138_spill] sm:$0xff] %v10865_v14 }
 0x18e   :  { %v10863_v1 = vpop.f32.mrb[61].mxu1  ;;  %13544 = vst [vmem:[#allocation140_spill] sm:$0xff] %v10869_v3 }
 0x18f   :  { %13541 = vst [vmem:[#allocation137_spill] sm:$0xff] %v10863_v1  ;;  %v10867_v41 = vpop.f32.mrb[62].mxu1  ;;  %v8716_v1 = vld [vmem:[%s13222_s1 + $0x3ac] ss:$16 sps:$4 sm:$0xff]  }
 0x190   :  { %13543 = vst [vmem:[#allocation139_spill] sm:$0xff] %v10867_v41  ;;  %v10871_v31 = vpop.f32.mrb[63].mxu1  ;;  %3779 = vmatprep.subr.bf16.mxu1 %v8716_v1  ;;  %v8717_v1 = vld [vmem:[%s13222_s1 + $0x600] ss:$16 sps:$4 sm:$0xff]  }
 0x191   :  { %13545 = vst [vmem:[#allocation141_spill] sm:$0xff] %v10871_v31  ;;  %3780 = vmatpush1.bf16.msra.mxu1 %v8714_v2  ;;  %v10903_v31 = vpack.c.bf16 %v201_v40, %v194_v48  ;;  %v8719_v2 = vld [vmem:[%s13222_s1 + $0x604] ss:$16 sps:$4 sm:$0xff]  }
 0x192   :  { %3533 = vmatmul.mubr.bf16.gmra.mrb[168].mxu1 %v9601_v56  ;;  %v186_v56 = vld [vmem:[%s13223_s0 + $0x528] sm:$0xff]  ;;  %v215_v48 = vld [vmem:[%s13223_s0 + $0x610] sm:$0xff]  ;;  %3047 = vmatprep.subr.bf16.mxu0 %v8719_v2 }
 0x193   :  { %2827 = vmatmul.mubr.bf16.gmra.mrb[40].mxu0 %v10865_v14  ;;  %3542 = vmatprep.mubr.bf16.mxu1 %v9605_v62  ;;  %13548 = vst [vmem:[#allocation144_spill] sm:$0xff] %v10903_v31  ;;  %v8720_v2 = vld [vmem:[%s13222_s1 + $0x3c8] ss:$16 sps:$4 sm:$0xff]  }
 0x194   :  { %2836 = vmatprep.mubr.bf16.mxu0 %v10869_v3  ;;  %v10899_v3 = vpack.c.bf16 %v186_v56, %v179_v22  ;;  %v193_v22 = vld [vmem:[%s13223_s0 + $0x560] sm:$0xff]  ;;  %v208_v56 = vld [vmem:[%s13223_s0 + $0x5d8] sm:$0xff]  ;;  %3048 = vmatpush1.bf16.msra.mxu0 %v8717_v1 }
 0x195   :  { %v10895_v10 = vpop.f32.mrb[64].mxu1  ;;  %v8722_v1 = vld [vmem:[%s13222_s1 + $0x3cc] ss:$16 sps:$4 sm:$0xff]  }
 0x196   :  { %v10897_v62 = vpop.f32.mrb[65].mxu1  ;;  %13546 = vst [vmem:[#allocation142_spill] sm:$0xff] %v10899_v3  ;;  %3781 = vmatprep.subr.bf16.mxu1 %v8722_v1  ;;  %v228_v1 = vld [vmem:[%s13223_s0 + $0x678] sm:$0xff] }
 0x197   :  { %v10901_v14 = vpop.f32.mrb[66].mxu1  ;;  %3782 = vmatpush1.bf16.msra.mxu1 %v8720_v2  ;;  %v221_v2 = vld [vmem:[%s13223_s0 + $0x640] sm:$0xff] }
 0x198   :  { %13547 = vst [vmem:[#allocation143_spill] sm:$0xff] %v10901_v14  ;;  %v10905_v41 = vpop.f32.mrb[67].mxu1 }
 0x199   :  { %13549 = vst [vmem:[#allocation145_spill] sm:$0xff] %v10905_v41  ;;  %v10937_v41 = vpack.c.bf16 %v215_v48, %v208_v56  ;;  %v229_v56 = vld [vmem:[%s13223_s0 + $0x680] sm:$0xff] }
 0x19a   :  { %3543 = vmatmul.mubr.bf16.gmra.mrb[172].mxu1 %v9655_v46  ;;  %v200_v46 = vld [vmem:[%s13223_s0 + $0x598] sm:$0xff] }
 0x19b   :  { %2837 = vmatmul.mubr.bf16.gmra.mrb[44].mxu0 %v10899_v3  ;;  %3552 = vmatprep.mubr.bf16.mxu1 %v9659_v52  ;;  %13552 = vst [vmem:[#allocation148_spill] sm:$0xff] %v10937_v41 }
 0x19c   :  { %2846 = vmatprep.mubr.bf16.mxu0 %v10903_v31  ;;  %v10933_v31 = vpack.c.bf16 %v200_v46, %v193_v22  ;;  %v207_v22 = vld [vmem:[%s13223_s0 + $0x5d0] sm:$0xff]  ;;  %v222_v46 = vld [vmem:[%s13223_s0 + $0x648] sm:$0xff] }
 0x19d   :  { %v10929_v40 = vpop.f32.mrb[68].mxu1 }
 0x19e   :  { %v10931_v52 = vpop.f32.mrb[69].mxu1  ;;  %13550 = vst [vmem:[#allocation146_spill] sm:$0xff] %v10933_v31 }
 0x19f   :  { %v10935_v3 = vpop.f32.mrb[70].mxu1 }
 0x1a0   :  { %13551 = vst [vmem:[#allocation147_spill] sm:$0xff] %v10935_v3  ;;  %v10939_v14 = vpop.f32.mrb[71].mxu1 }
 0x1a1   :  { %13553 = vst [vmem:[#allocation149_spill] sm:$0xff] %v10939_v14  ;;  %v10971_v14 = vpack.c.bf16 %v229_v56, %v222_v46 }
 0x1a2   :  { %3553 = vmatmul.mubr.bf16.gmra.mrb[176].mxu1 %v9703_v36  ;;  %v214_v36 = vld [vmem:[%s13223_s0 + $0x608] sm:$0xff] }
 0x1a3   :  { %2847 = vmatmul.mubr.bf16.gmra.mrb[48].mxu0 %v10933_v31  ;;  %3562 = vmatprep.mubr.bf16.mxu1 %v9707_v51  ;;  %13555 = vst [vmem:[#allocation151_spill] sm:$0xff] %v10971_v14 }
 0x1a4   :  { %2856 = vmatprep.mubr.bf16.mxu0 %v10937_v41  ;;  %v10967_v41 = vpack.c.bf16 %v214_v36, %v207_v22  ;;  %v236_v22 = vld [vmem:[%s13223_s0 + $0x6b8] sm:$0xff] }
 0x1a5   :  { %v10963_v48 = vpop.f32.mrb[72].mxu1 }
 0x1a6   :  { %v10965_v51 = vpop.f32.mrb[73].mxu1  ;;  %13554 = vst [vmem:[#allocation150_spill] sm:$0xff] %v10967_v41 }
 0x1a7   :  { %v10969_v31 = vpop.f32.mrb[74].mxu1 }
 0x1a8   :  { %v10973_v3 = vpop.f32.mrb[75].mxu1 }
 0x1a9   :  { %13556 = vst [vmem:[#allocation152_spill] sm:$0xff] %v10973_v3  ;;  %v8723_v3 = vld [vmem:[%s13222_s1 + $0x3e8] ss:$16 sps:$4 sm:$0xff]  }
 0x1aa   :  { %3563 = vmatmul.mubr.bf16.gmra.mrb[180].mxu1 %v9757_v57  ;;  %v243_v57 = vld [vmem:[%s13223_s0 + $0x6f0] sm:$0xff] }
 0x1ab   :  { %2857 = vmatmul.mubr.bf16.gmra.mrb[52].mxu0 %v10967_v41  ;;  %3572 = vmatprep.mubr.bf16.mxu1 %v9761_v11  ;;  %v10995_v11 = vpack.c.bf16 %v228_v1, %v221_v2  ;;  %v235_v2 = vld [vmem:[%s13223_s0 + $0x6b0] sm:$0xff]  ;;  %v250_v1 = vld [vmem:[%s13223_s0 + $0x728] sm:$0xff] }
 0x1ac   :  { %2866 = vmatprep.mubr.bf16.mxu0 %v10971_v14  ;;  %v10999_v14 = vpack.c.bf16 %v243_v57, %v236_v22  ;;  %v257_v22 = vld [vmem:[%s13223_s0 + $0x760] sm:$0xff] }
 0x1ad   :  { %v10991_v36 = vpop.f32.mrb[76].mxu1  ;;  %13558 = vst [vmem:[#allocation154_spill] sm:$0xff] %v10995_v11 }
 0x1ae   :  { %v10993_v46 = vpop.f32.mrb[77].mxu1  ;;  %13560 = vst [vmem:[#allocation156_spill] sm:$0xff] %v10999_v14 }
 0x1af   :  { %13557 = vst [vmem:[#allocation153_spill] sm:$0xff] %v10993_v46  ;;  %v10997_v56 = vpop.f32.mrb[78].mxu1  ;;  %v8725_v46 = vld [vmem:[%s13222_s1 + $0x3ec] ss:$16 sps:$4 sm:$0xff]  }
 0x1b0   :  { %13559 = vst [vmem:[#allocation155_spill] sm:$0xff] %v10997_v56  ;;  %v11001_v41 = vpop.f32.mrb[79].mxu1  ;;  %3783 = vmatprep.subr.bf16.mxu1 %v8725_v46  ;;  %v256_v46 = vld [vmem:[%s13223_s0 + $0x758] sm:$0xff] }
 0x1b1   :  { %13561 = vst [vmem:[#allocation157_spill] sm:$0xff] %v11001_v41  ;;  %3784 = vmatpush1.bf16.msra.mxu1 %v8723_v3  ;;  %v11033_v41 = vpack.c.bf16 %v257_v22, %v250_v1  ;;  %v249_v3 = vld [vmem:[%s13223_s0 + $0x720] sm:$0xff] }
 0x1b2   :  { %3573 = vmatmul.mubr.bf16.gmra.mrb[184].mxu1 %v9805_v30  ;;  %v242_v30 = vld [vmem:[%s13223_s0 + $0x6e8] sm:$0xff] }
 0x1b3   :  { %2867 = vmatmul.mubr.bf16.gmra.mrb[56].mxu0 %v10995_v11  ;;  %3582 = vmatprep.mubr.bf16.mxu1 %v9809_v17  ;;  %13563 = vst [vmem:[#allocation159_spill] sm:$0xff] %v11033_v41 }
 0x1b4   :  { %2876 = vmatprep.mubr.bf16.mxu0 %v10999_v14  ;;  %v11029_v14 = vpack.c.bf16 %v242_v30, %v235_v2  ;;  %v264_v2 = vld [vmem:[%s13223_s0 + $0x798] sm:$0xff] }
 0x1b5   :  { %v11025_v57 = vpop.f32.mrb[80].mxu1 }
 0x1b6   :  { %v11027_v17 = vpop.f32.mrb[81].mxu1  ;;  %13562 = vst [vmem:[#allocation158_spill] sm:$0xff] %v11029_v14 }
 0x1b7   :  { %v11031_v11 = vpop.f32.mrb[82].mxu1 }
 0x1b8   :  { %v11035_v56 = vpop.f32.mrb[83].mxu1 }
 0x1b9   :  { %13564 = vst [vmem:[#allocation160_spill] sm:$0xff] %v11035_v56  ;;  %v8728_v56 = vld [vmem:[%s13222_s1 + $0x40c] ss:$16 sps:$4 sm:$0xff]  }
 0x1ba   :  { %3583 = vmatmul.mubr.bf16.gmra.mrb[188].mxu1 %v9859_v43  ;;  %v271_v43 = vld [vmem:[%s13223_s0 + $0x7d0] sm:$0xff]  ;;  %4106 = vmatprep.subr.bf16.mxu1 %v8728_v56  ;;  %v277_v56 = vld [vmem:[%s13223_s0 + $0x800] sm:$0xff] }
 0x1bb   :  { %2877 = vmatmul.mubr.bf16.gmra.mrb[60].mxu0 %v11029_v14  ;;  %3592 = vmatprep.mubr.bf16.mxu1 %v9863_v13  ;;  %v11057_v13 = vpack.c.bf16 %v256_v46, %v249_v3  ;;  %v263_v3 = vld [vmem:[%s13223_s0 + $0x790] sm:$0xff]  ;;  %v270_v46 = vld [vmem:[%s13223_s0 + $0x7c8] sm:$0xff] }
 0x1bc   :  { %2886 = vmatprep.mubr.bf16.mxu0 %v11033_v41  ;;  %v11061_v41 = vpack.c.bf16 %v271_v43, %v264_v2  ;;  %v285_v2 = vld [vmem:[%s13223_s0 + $0x840] sm:$0xff] }
 0x1bd   :  { %v11053_v30 = vpop.f32.mrb[84].mxu1  ;;  %13567 = vst [vmem:[#allocation163_spill] sm:$0xff] %v11057_v13 }
 0x1be   :  { %13565 = vst [vmem:[#allocation161_spill] sm:$0xff] %v11053_v30  ;;  %v11055_v1 = vpop.f32.mrb[85].mxu1  ;;  %13569 = vst [vmem:[#allocation165_spill] sm:$0xff] %v11061_v41 }
 0x1bf   :  { %13566 = vst [vmem:[#allocation162_spill] sm:$0xff] %v11055_v1  ;;  %v11059_v22 = vpop.f32.mrb[86].mxu1 }
 0x1c0   :  { %13568 = vst [vmem:[#allocation164_spill] sm:$0xff] %v11059_v22  ;;  %v11063_v14 = vpop.f32.mrb[87].mxu1 }
 0x1c1   :  { %13570 = vst [vmem:[#allocation166_spill] sm:$0xff] %v11063_v14 }
 0x1c2   :  { %3593 = vmatmul.mubr.bf16.gmra.mrb[192].mxu1 %v9907_v28  ;;  %v278_v28 = vld [vmem:[%s13223_s0 + $0x808] sm:$0xff] }
 0x1c3   :  { %2887 = vmatmul.mubr.bf16.gmra.mrb[64].mxu0 %v11057_v13  ;;  %3602 = vmatprep.mubr.bf16.mxu1 %v9911_v25  ;;  %v11092_v14 = vpack.c.bf16 %v285_v2, %v278_v28 }
 0x1c4   :  { %2896 = vmatprep.mubr.bf16.mxu0 %v11061_v41  ;;  %v11088_v41 = vpack.c.bf16 %v270_v46, %v263_v3  ;;  %v284_v3 = vld [vmem:[%s13223_s0 + $0x838] sm:$0xff] }
 0x1c5   :  { %v11084_v43 = vpop.f32.mrb[88].mxu1  ;;  %13575 = vst [vmem:[#allocation171_spill] sm:$0xff] %v11092_v14  ;;  %v292_v46 = vld [vmem:[%s13223_s0 + $0x878] sm:$0xff] }
 0x1c6   :  { %13571 = vst [vmem:[#allocation167_spill] sm:$0xff] %v11084_v43  ;;  %v11086_v25 = vpop.f32.mrb[89].mxu1  ;;  %13573 = vst [vmem:[#allocation169_spill] sm:$0xff] %v11088_v41 }
 0x1c7   :  { %13572 = vst [vmem:[#allocation168_spill] sm:$0xff] %v11086_v25  ;;  %v11090_v13 = vpop.f32.mrb[90].mxu1 }
 0x1c8   :  { %13574 = vst [vmem:[#allocation170_spill] sm:$0xff] %v11090_v13  ;;  %v11094_v22 = vpop.f32.mrb[91].mxu1 }
 0x1c9   :  { %13576 = vst [vmem:[#allocation172_spill] sm:$0xff] %v11094_v22 }
 0x1ca   :  { %3603 = vmatmul.mubr.bf16.gmra.mrb[196].mxu1 %v9946_v26  ;;  %v299_v26 = vld [vmem:[%s13223_s0 + $0x8b0] sm:$0xff] }
 0x1cb   :  { %2897 = vmatmul.mubr.bf16.gmra.mrb[68].mxu0 %v11088_v41  ;;  %3612 = vmatprep.mubr.bf16.mxu1 %v9950_v27  ;;  %v11116_v27 = vpack.c.bf16 %v284_v3, %v277_v56  ;;  %v11120_v41 = vpack.c.bf16 %v299_v26, %v292_v46  ;;  %v298_v56 = vld [vmem:[%s13223_s0 + $0x8a8] sm:$0xff] }
 0x1cc   :  { %2906 = vmatprep.mubr.bf16.mxu0 %v11092_v14  ;;  %v306_v3 = vld [vmem:[%s13223_s0 + $0x8e8] sm:$0xff] }
 0x1cd   :  { %v11112_v28 = vpop.f32.mrb[92].mxu1  ;;  %13579 = vst [vmem:[#allocation175_spill] sm:$0xff] %v11116_v27  ;;  %13581 = vst [vmem:[#allocation177_spill] sm:$0xff] %v11120_v41 }
 0x1ce   :  { %13577 = vst [vmem:[#allocation173_spill] sm:$0xff] %v11112_v28  ;;  %v11114_v2 = vpop.f32.mrb[93].mxu1 }
 0x1cf   :  { %13578 = vst [vmem:[#allocation174_spill] sm:$0xff] %v11114_v2  ;;  %v11118_v14 = vpop.f32.mrb[94].mxu1  ;;  %v291_v2 = vld [vmem:[%s13223_s0 + $0x870] sm:$0xff] }
 0x1d0   :  { %13580 = vst [vmem:[#allocation176_spill] sm:$0xff] %v11118_v14  ;;  %v11122_v22 = vpop.f32.mrb[95].mxu1 }
 0x1d1   :  { %13582 = vst [vmem:[#allocation178_spill] sm:$0xff] %v11122_v22 }
 0x1d2   :  { %3613 = vmatmul.mubr.bf16.gmra.mrb[200].mxu1 %v9982_v6  ;;  %v313_v6 = vld [vmem:[%s13223_s0 + $0x920] sm:$0xff] }
 0x1d3   :  { %2907 = vmatmul.mubr.bf16.gmra.mrb[72].mxu0 %v11116_v27  ;;  %3622 = vmatprep.mubr.bf16.mxu1 %v9986_v61  ;;  %v11144_v61 = vpack.c.bf16 %v298_v56, %v291_v2  ;;  %v11148_v27 = vpack.c.bf16 %v313_v6, %v306_v3  ;;  %v312_v2 = vld [vmem:[%s13223_s0 + $0x918] sm:$0xff] }
 0x1d4   :  { %2916 = vmatprep.mubr.bf16.mxu0 %v11120_v41  ;;  %v320_v56 = vld [vmem:[%s13223_s0 + $0x958] sm:$0xff] }
 0x1d5   :  { %v11140_v46 = vpop.f32.mrb[96].mxu1  ;;  %13585 = vst [vmem:[#allocation181_spill] sm:$0xff] %v11144_v61  ;;  %13587 = vst [vmem:[#allocation183_spill] sm:$0xff] %v11148_v27 }
 0x1d6   :  { %13583 = vst [vmem:[#allocation179_spill] sm:$0xff] %v11140_v46  ;;  %v11142_v26 = vpop.f32.mrb[97].mxu1 }
 0x1d7   :  { %13584 = vst [vmem:[#allocation180_spill] sm:$0xff] %v11142_v26  ;;  %v11146_v41 = vpop.f32.mrb[98].mxu1  ;;  %v305_v26 = vld [vmem:[%s13223_s0 + $0x8e0] sm:$0xff] }
 0x1d8   :  { %13586 = vst [vmem:[#allocation182_spill] sm:$0xff] %v11146_v41  ;;  %v11150_v22 = vpop.f32.mrb[99].mxu1 }
 0x1d9   :  { %13588 = vst [vmem:[#allocation184_spill] sm:$0xff] %v11150_v22 }
 0x1da   :  { %3623 = vmatmul.mubr.bf16.gmra.mrb[204].mxu1 %v10018_v8  ;;  %v327_v8 = vld [vmem:[%s13223_s0 + $0x990] sm:$0xff] }
 0x1db   :  { %2917 = vmatmul.mubr.bf16.gmra.mrb[76].mxu0 %v11144_v61  ;;  %3632 = vmatprep.mubr.bf16.mxu1 %v10022_v55  ;;  %v11172_v55 = vpack.c.bf16 %v312_v2, %v305_v26  ;;  %v11176_v61 = vpack.c.bf16 %v327_v8, %v320_v56  ;;  %v326_v26 = vld [vmem:[%s13223_s0 + $0x988] sm:$0xff] }
 0x1dc   :  { %2926 = vmatprep.mubr.bf16.mxu0 %v11148_v27  ;;  %v334_v2 = vld [vmem:[%s13223_s0 + $0x9c8] sm:$0xff] }
 0x1dd   :  { %v11168_v3 = vpop.f32.mrb[100].mxu1  ;;  %13591 = vst [vmem:[#allocation187_spill] sm:$0xff] %v11172_v55  ;;  %13593 = vst [vmem:[#allocation189_spill] sm:$0xff] %v11176_v61 }
 0x1de   :  { %13589 = vst [vmem:[#allocation185_spill] sm:$0xff] %v11168_v3  ;;  %v11170_v6 = vpop.f32.mrb[101].mxu1 }
 0x1df   :  { %13590 = vst [vmem:[#allocation186_spill] sm:$0xff] %v11170_v6  ;;  %v11174_v27 = vpop.f32.mrb[102].mxu1  ;;  %v319_v6 = vld [vmem:[%s13223_s0 + $0x950] sm:$0xff] }
 0x1e0   :  { %13592 = vst [vmem:[#allocation188_spill] sm:$0xff] %v11174_v27  ;;  %v11178_v22 = vpop.f32.mrb[103].mxu1 }
 0x1e1   :  { %13594 = vst [vmem:[#allocation190_spill] sm:$0xff] %v11178_v22 }
 0x1e2   :  { %3633 = vmatmul.mubr.bf16.gmra.mrb[208].mxu1 %v10054_v35  ;;  %v341_v35 = vld [vmem:[%s13223_s0 + $0xa00] sm:$0xff] }
 0x1e3   :  { %2927 = vmatmul.mubr.bf16.gmra.mrb[80].mxu0 %v11172_v55  ;;  %3642 = vmatprep.mubr.bf16.mxu1 %v10058_v63  ;;  %v11200_v63 = vpack.c.bf16 %v326_v26, %v319_v6  ;;  %v11204_v55 = vpack.c.bf16 %v341_v35, %v334_v2  ;;  %v340_v6 = vld [vmem:[%s13223_s0 + $0x9f8] sm:$0xff] }
 0x1e4   :  { %2936 = vmatprep.mubr.bf16.mxu0 %v11176_v61  ;;  %v348_v26 = vld [vmem:[%s13223_s0 + $0xa38] sm:$0xff] }
 0x1e5   :  { %v11196_v56 = vpop.f32.mrb[104].mxu1  ;;  %13597 = vst [vmem:[#allocation193_spill] sm:$0xff] %v11200_v63  ;;  %13599 = vst [vmem:[#allocation195_spill] sm:$0xff] %v11204_v55 }
 0x1e6   :  { %13595 = vst [vmem:[#allocation191_spill] sm:$0xff] %v11196_v56  ;;  %v11198_v8 = vpop.f32.mrb[105].mxu1 }
 0x1e7   :  { %13596 = vst [vmem:[#allocation192_spill] sm:$0xff] %v11198_v8  ;;  %v11202_v61 = vpop.f32.mrb[106].mxu1  ;;  %v333_v8 = vld [vmem:[%s13223_s0 + $0x9c0] sm:$0xff] }
 0x1e8   :  { %13598 = vst [vmem:[#allocation194_spill] sm:$0xff] %v11202_v61  ;;  %v11206_v22 = vpop.f32.mrb[107].mxu1 }
 0x1e9   :  { %13600 = vst [vmem:[#allocation196_spill] sm:$0xff] %v11206_v22 }
 0x1ea   :  { %3643 = vmatmul.mubr.bf16.gmra.mrb[212].mxu1 %v10090_v0  ;;  %v355_v0 = vld [vmem:[%s13223_s0 + $0xa70] sm:$0xff] }
 0x1eb   :  { %2937 = vmatmul.mubr.bf16.gmra.mrb[84].mxu0 %v11200_v63  ;;  %3652 = vmatprep.mubr.bf16.mxu1 %v10094_v37  ;;  %v11228_v37 = vpack.c.bf16 %v340_v6, %v333_v8  ;;  %v11232_v63 = vpack.c.bf16 %v355_v0, %v348_v26  ;;  %v354_v8 = vld [vmem:[%s13223_s0 + $0xa68] sm:$0xff] }
 0x1ec   :  { %2946 = vmatprep.mubr.bf16.mxu0 %v11204_v55  ;;  %v362_v6 = vld [vmem:[%s13223_s0 + $0xaa8] sm:$0xff] }
 0x1ed   :  { %v11224_v2 = vpop.f32.mrb[108].mxu1  ;;  %13603 = vst [vmem:[#allocation199_spill] sm:$0xff] %v11228_v37  ;;  %13605 = vst [vmem:[#allocation201_spill] sm:$0xff] %v11232_v63 }
 0x1ee   :  { %13601 = vst [vmem:[#allocation197_spill] sm:$0xff] %v11224_v2  ;;  %v11226_v35 = vpop.f32.mrb[109].mxu1  ;;  %v13741_v2 = vld [vmem:[#allocation71_spill] sm:$0xff] }
 0x1ef   :  { %13602 = vst [vmem:[#allocation198_spill] sm:$0xff] %v11226_v35  ;;  %v11230_v55 = vpop.f32.mrb[110].mxu1  ;;  %v347_v35 = vld [vmem:[%s13223_s0 + $0xa30] sm:$0xff] }
 0x1f0   :  { %13604 = vst [vmem:[#allocation200_spill] sm:$0xff] %v11230_v55  ;;  %v11234_v22 = vpop.f32.mrb[111].mxu1  ;;  %v13613_v55 = vld [vmem:[#allocation50_spill] sm:$0xff] }
 0x1f1   :  { %13606 = vst [vmem:[#allocation202_spill] sm:$0xff] %v11234_v22 }
 0x1f2   :  { %3653 = vmatmul.mubr.bf16.gmra.mrb[216].mxu1 %v10126_v29  ;;  %v369_v29 = vld [vmem:[%s13223_s0 + $0xae0] sm:$0xff] }
 0x1f3   :  { %2947 = vmatmul.mubr.bf16.gmra.mrb[88].mxu0 %v11228_v37  ;;  %3662 = vmatprep.mubr.bf16.mxu1 %v10130_v7  ;;  %v11256_v7 = vpack.c.bf16 %v354_v8, %v347_v35  ;;  %v11260_v37 = vpack.c.bf16 %v369_v29, %v362_v6  ;;  %v368_v35 = vld [vmem:[%s13223_s0 + $0xad8] sm:$0xff] }
 0x1f4   :  { %2956 = vmatprep.mubr.bf16.mxu0 %v11232_v63  ;;  %v376_v8 = vld [vmem:[%s13223_s0 + $0xb18] sm:$0xff] }
 0x1f5   :  { %v11252_v26 = vpop.f32.mrb[112].mxu1  ;;  %13609 = vst [vmem:[#allocation205_spill] sm:$0xff] %v11256_v7  ;;  %13611 = vst [vmem:[#allocation207_spill] sm:$0xff] %v11260_v37 }
 0x1f6   :  { %13607 = vst [vmem:[#allocation203_spill] sm:$0xff] %v11252_v26  ;;  %v11254_v0 = vpop.f32.mrb[113].mxu1  ;;  %v13621_v26 = vld [vmem:[#allocation54_spill] sm:$0xff] }
 0x1f7   :  { %13608 = vst [vmem:[#allocation204_spill] sm:$0xff] %v11254_v0  ;;  %v11258_v63 = vpop.f32.mrb[114].mxu1  ;;  %v361_v0 = vld [vmem:[%s13223_s0 + $0xaa0] sm:$0xff] }
 0x1f8   :  { %13610 = vst [vmem:[#allocation206_spill] sm:$0xff] %v11258_v63  ;;  %v11262_v22 = vpop.f32.mrb[115].mxu1  ;;  %v13620_v63 = vld [vmem:[#allocation52_spill] sm:$0xff] }
 0x1f9   :  { %13612 = vst [vmem:[#allocation208_spill] sm:$0xff] %v11262_v22 }
 0x1fa   :  { %3663 = vmatmul.mubr.bf16.gmra.mrb[220].mxu1 %v10162_v59  ;;  %v383_v59 = vld [vmem:[%s13223_s0 + $0xb50] sm:$0xff] }
 0x1fb   :  { %2957 = vmatmul.mubr.bf16.gmra.mrb[92].mxu0 %v11256_v7  ;;  %3672 = vmatprep.mubr.bf16.mxu1 %v13613_v55  ;;  %v11284_v55 = vpack.c.bf16 %v368_v35, %v361_v0  ;;  %v11288_v7 = vpack.c.bf16 %v383_v59, %v376_v8  ;;  %v382_v0 = vld [vmem:[%s13223_s0 + $0xb48] sm:$0xff] }
 0x1fc   :  { %2966 = vmatprep.mubr.bf16.mxu0 %v11260_v37  ;;  %v390_v35 = vld [vmem:[%s13223_s0 + $0xb88] sm:$0xff] }
 0x1fd   :  { %v11280_v6 = vpop.f32.mrb[116].mxu1  ;;  %13616 = vst [vmem:[#allocation210_spill] sm:$0xff] %v11284_v55  ;;  %13618 = vst [vmem:[#allocation212_spill] sm:$0xff] %v11288_v7 }
 0x1fe   :  { %13614 = vst [vmem:[#allocation50_spill] sm:$0xff] %v11280_v6  ;;  %v11282_v29 = vpop.f32.mrb[117].mxu1  ;;  %v13629_v6 = vld [vmem:[#allocation58_spill] sm:$0xff] }
 0x1ff   :  { %13615 = vst [vmem:[#allocation209_spill] sm:$0xff] %v11282_v29  ;;  %v11286_v37 = vpop.f32.mrb[118].mxu1  ;;  %v375_v29 = vld [vmem:[%s13223_s0 + $0xb10] sm:$0xff] }
 0x200   :  { %13617 = vst [vmem:[#allocation211_spill] sm:$0xff] %v11286_v37  ;;  %v11290_v22 = vpop.f32.mrb[119].mxu1  ;;  %v13628_v37 = vld [vmem:[#allocation56_spill] sm:$0xff] }
 0x201   :  { %13619 = vst [vmem:[#allocation213_spill] sm:$0xff] %v11290_v22 }
 0x202   :  { %3673 = vmatmul.mubr.bf16.gmra.mrb[224].mxu1 %v13620_v63  ;;  %v397_v63 = vld [vmem:[%s13223_s0 + $0xbc0] sm:$0xff] }
 0x203   :  { %2967 = vmatmul.mubr.bf16.gmra.mrb[96].mxu0 %v11284_v55  ;;  %3682 = vmatprep.mubr.bf16.mxu1 %v13621_v26  ;;  %v11312_v26 = vpack.c.bf16 %v382_v0, %v375_v29  ;;  %v11316_v55 = vpack.c.bf16 %v397_v63, %v390_v35  ;;  %v396_v29 = vld [vmem:[%s13223_s0 + $0xbb8] sm:$0xff] }
 0x204   :  { %2976 = vmatprep.mubr.bf16.mxu0 %v11288_v7  ;;  %v404_v0 = vld [vmem:[%s13223_s0 + $0xbf8] sm:$0xff] }
 0x205   :  { %v11308_v8 = vpop.f32.mrb[120].mxu1  ;;  %13624 = vst [vmem:[#allocation214_spill] sm:$0xff] %v11312_v26  ;;  %13626 = vst [vmem:[#allocation216_spill] sm:$0xff] %v11316_v55 }
 0x206   :  { %13622 = vst [vmem:[#allocation52_spill] sm:$0xff] %v11308_v8  ;;  %v11310_v59 = vpop.f32.mrb[121].mxu1  ;;  %v13637_v8 = vld [vmem:[#allocation62_spill] sm:$0xff] }
 0x207   :  { %13623 = vst [vmem:[#allocation54_spill] sm:$0xff] %v11310_v59  ;;  %v11314_v7 = vpop.f32.mrb[122].mxu1  ;;  %v389_v59 = vld [vmem:[%s13223_s0 + $0xb80] sm:$0xff] }
 0x208   :  { %13625 = vst [vmem:[#allocation215_spill] sm:$0xff] %v11314_v7  ;;  %v11318_v22 = vpop.f32.mrb[123].mxu1  ;;  %v13636_v7 = vld [vmem:[#allocation60_spill] sm:$0xff] }
 0x209   :  { %13627 = vst [vmem:[#allocation217_spill] sm:$0xff] %v11318_v22 }
 0x20a   :  { %3683 = vmatmul.mubr.bf16.gmra.mrb[228].mxu1 %v13628_v37  ;;  %v411_v37 = vld [vmem:[%s13223_s0 + $0xc30] sm:$0xff] }
 0x20b   :  { %2977 = vmatmul.mubr.bf16.gmra.mrb[100].mxu0 %v11312_v26  ;;  %3692 = vmatprep.mubr.bf16.mxu1 %v13629_v6  ;;  %v11340_v6 = vpack.c.bf16 %v396_v29, %v389_v59  ;;  %v11344_v26 = vpack.c.bf16 %v411_v37, %v404_v0  ;;  %v410_v59 = vld [vmem:[%s13223_s0 + $0xc28] sm:$0xff] }
 0x20c   :  { %2986 = vmatprep.mubr.bf16.mxu0 %v11316_v55  ;;  %v418_v29 = vld [vmem:[%s13223_s0 + $0xc68] sm:$0xff] }
 0x20d   :  { %v11336_v35 = vpop.f32.mrb[124].mxu1  ;;  %13632 = vst [vmem:[#allocation218_spill] sm:$0xff] %v11340_v6  ;;  %13634 = vst [vmem:[#allocation220_spill] sm:$0xff] %v11344_v26 }
 0x20e   :  { %13630 = vst [vmem:[#allocation56_spill] sm:$0xff] %v11336_v35  ;;  %v11338_v63 = vpop.f32.mrb[125].mxu1 }
 0x20f   :  { %13631 = vst [vmem:[#allocation58_spill] sm:$0xff] %v11338_v63  ;;  %v11342_v55 = vpop.f32.mrb[126].mxu1  ;;  %v403_v63 = vld [vmem:[%s13223_s0 + $0xbf0] sm:$0xff] }
 0x210   :  { %13633 = vst [vmem:[#allocation219_spill] sm:$0xff] %v11342_v55  ;;  %v11346_v22 = vpop.f32.mrb[127].mxu1  ;;  %v11364_v0 = vpack.c.bf16 %v410_v59, %v403_v63  ;;  %v432_v63 = vld [vmem:[%s13223_s0 + $0xcd8] sm:$0xff]  ;;  %v439_v59 = vld [vmem:[%s13223_s0 + $0xd10] sm:$0xff] }
 0x211   :  { %13635 = vst [vmem:[#allocation221_spill] sm:$0xff] %v11346_v22  ;;  %v424_v22 = vld [vmem:[%s13223_s0 + $0xc98] sm:$0xff] }
 0x212   :  { %3693 = vmatmul.mubr.bf16.gmra.mrb[232].mxu1 %v13636_v7  ;;  %v425_v7 = vld [vmem:[%s13223_s0 + $0xca0] sm:$0xff]  ;;  %13638 = vst [vmem:[#allocation60_spill] sm:$0xff] %v11364_v0 }
 0x213   :  { %2987 = vmatmul.mubr.bf16.gmra.mrb[104].mxu0 %v11340_v6  ;;  %3702 = vmatprep.mubr.bf16.mxu1 %v13637_v8  ;;  %v11366_v37 = vpack.c.bf16 %v425_v7, %v418_v29  ;;  %v13640_v8 = vld [vmem:[#allocation66_spill] sm:$0xff]  ;;  %v11386_v7 = vpack.c.bf16 %v439_v59, %v432_v63 }
 0x214   :  { %2996 = vmatprep.mubr.bf16.mxu0 %v11344_v26  ;;  %v13641_v26 = vld [vmem:[#allocation69_spill] sm:$0xff]  ;;  %v417_v6 = vld [vmem:[%s13223_s0 + $0xc60] sm:$0xff] }
 0x215   :  { %13639 = vst [vmem:[#allocation62_spill] sm:$0xff] %v11366_v37  ;;  %v11384_v29 = vpack.c.bf16 %v424_v22, %v417_v6  ;;  %13643 = vst [vmem:[#allocation69_spill] sm:$0xff] %v11386_v7  ;;  %v446_v22 = vld [vmem:[%s13223_s0 + $0xd48] sm:$0xff]  ;;  %v453_v6 = vld [vmem:[%s13223_s0 + $0xd80] sm:$0xff] }
 0x216   :  { %v11406_v59 = vpack.c.bf16 %v453_v6, %v446_v22 }
 0x217   :  { %13642 = vst [vmem:[#allocation66_spill] sm:$0xff] %v11384_v29 }
 0x21a   :  { %3703 = vmatmul.mubr.bf16.gmra.mrb[236].mxu1 %v13640_v8  ;;  %v13645_v8 = vld [vmem:[#allocation77_spill] sm:$0xff] }
 0x21b   :  { %2997 = vmatmul.mubr.bf16.gmra.mrb[108].mxu0 %v11364_v0  ;;  %3712 = vmatprep.mubr.bf16.mxu1 %v13641_v26  ;;  %v13644_v26 = vld [vmem:[#allocation74_spill] sm:$0xff]  ;;  %v438_v0 = vld [vmem:[%s13223_s0 + $0xd08] sm:$0xff]  ;;  %13647 = vst [vmem:[#allocation77_spill] sm:$0xff] %v11406_v59 }
 0x21c   :  { %3006 = vmatprep.mubr.bf16.mxu0 %v11366_v37  ;;  %v431_v37 = vld [vmem:[%s13223_s0 + $0xcd0] sm:$0xff] }
 0x21d   :  { %v11404_v63 = vpack.c.bf16 %v438_v0, %v431_v37  ;;  %v460_v0 = vld [vmem:[%s13223_s0 + $0xdb8] sm:$0xff]  ;;  %v467_v37 = vld [vmem:[%s13223_s0 + $0xdf0] sm:$0xff] }
 0x21e   :  { %v11426_v6 = vpack.c.bf16 %v467_v37, %v460_v0  ;;  %v34_v0 = vld [vmem:[%s13223_s0 + $0x68] sm:$0xff] }
 0x21f   :  { %13646 = vst [vmem:[#allocation74_spill] sm:$0xff] %v11404_v63 }
 0x222   :  { %3713 = vmatmul.mubr.bf16.gmra.mrb[240].mxu1 %v13644_v26  ;;  %v13648_v26 = vld [vmem:[#allocation82_spill] sm:$0xff] }
 0x223   :  { %3007 = vmatmul.mubr.bf16.gmra.mrb[112].mxu0 %v11384_v29  ;;  %3722 = vmatprep.mubr.bf16.mxu1 %v13645_v8  ;;  %v13649_v8 = vld [vmem:[#allocation85_spill] sm:$0xff] }
 0x224   :  { %3016 = vmatprep.mubr.bf16.mxu0 %v11386_v7  ;;  %v445_v7 = vld [vmem:[%s13223_s0 + $0xd40] sm:$0xff]  ;;  %v452_v29 = vld [vmem:[%s13223_s0 + $0xd78] sm:$0xff]  ;;  %13651 = vst [vmem:[#allocation85_spill] sm:$0xff] %v11426_v6 }
 0x225   :  { %v11424_v22 = vpack.c.bf16 %v452_v29, %v445_v7  ;;  %v13364_v7 = vmov 0  }
 0x227   :  { %13650 = vst [vmem:[#allocation82_spill] sm:$0xff] %v11424_v22 }
 0x22a   :  { %3723 = vmatmul.mubr.bf16.gmra.mrb[244].mxu1 %v13648_v26  ;;  %v459_v26 = vld [vmem:[%s13223_s0 + $0xdb0] sm:$0xff] }
 0x22b   :  { %3017 = vmatmul.mubr.bf16.gmra.mrb[116].mxu0 %v11404_v63  ;;  %3732 = vmatprep.mubr.bf16.mxu1 %v13649_v8  ;;  %v466_v8 = vld [vmem:[%s13223_s0 + $0xde8] sm:$0xff]  ;;  %v13683_v63 = vld [vmem:[#allocation21_spill] sm:$0xff] }
 0x22c   :  { %3026 = vmatprep.mubr.bf16.mxu0 %v11406_v59  ;;  %v11438_v29 = vpack.c.bf16 %v466_v8, %v459_v26  ;;  %v8731_v26 = vld [vmem:[%s13222_s1 + $0x42c] ss:$16 sps:$4 sm:$0xff]   ;;  %v8771_v59 = vld [vmem:[%s13224_s3 + $0x20] ss:$8 sps:$4 sm:$0xff]  }
 0x22d   :  { %v13655_v8 = vld [vmem:[#allocation3_spill] sm:$0xff] }
 0x22e   :  { %13652 = vst [vmem:[#allocation222_spill] sm:$0xff] %v11438_v29 }
 0x232   :  { %3733 = vmatmul.mubr.bf16.gmra.mrb[248].mxu1 %v10442_v23  ;;  %v13653_v23 = vld [vmem:[#allocation2_spill] sm:$0xff] }
 0x233   :  { %3027 = vmatmul.mubr.bf16.gmra.mrb[120].mxu0 %v11424_v22  ;;  %3742 = vmatprep.mubr.bf16.mxu1 %v10448_v32  ;;  %v27_v32 = vld [vmem:[%s13223_s0 + $0x30] sm:$0xff] }
 0x234   :  { %3036 = vmatprep.mubr.bf16.mxu0 %v11426_v6  ;;  %v11450_v37 = vpack.c.bf16 %v34_v0, %v27_v32  ;;  %v48_v32 = vld [vmem:[%s13223_s0 + $0xd8] sm:$0xff]  ;;  %v13660_v6 = vld [vmem:[#allocation6_spill] sm:$0xff] }
 0x235   :  { %v8729_v0 = vld [vmem:[%s13222_s1 + $0x428] ss:$16 sps:$4 sm:$0xff]  }
 0x236   :  { %13654 = vst [vmem:[#allocation2_spill] sm:$0xff] %v11450_v37 }
 0x23a   :  { %3743 = vmatmul.mubr.bf16.gmra.mrb[252].mxu1 %v10480_v16  ;;  %v8726_v16 = vld [vmem:[%s13222_s1 + $0x408] ss:$16 sps:$4 sm:$0xff]  }
 0x23b   :  { %3037 = vmatmul.mubr.bf16.gmra.mrb[124].mxu0 %v11438_v29  ;;  %3785 = vmatprep.mubr.bf16.mxu1 %v13653_v23  ;;  %v41_v23 = vld [vmem:[%s13223_s0 + $0xa0] sm:$0xff]  ;;  %v13656_v29 = vld [vmem:[#allocation4_spill] sm:$0xff] }
 0x23c   :  { %3079 = vmatprep.mubr.bf16.mxu0 %v13364_v7 }
 0x242   :  { %3786 = vmatmul.mubr.bf16.vlgmr.msra.gmra.mrb[128].mxu1 %v13655_v8  ;;  %v11475_v8 = vpack.c.bf16 %v48_v32, %v41_v23  ;;  %v55_v23 = vld [vmem:[%s13223_s0 + $0x110] sm:$0xff]  ;;  %v62_v32 = vld [vmem:[%s13223_s0 + $0x148] sm:$0xff] }
 0x243   :  { %6946 = vmatmul.mubr.msk.bf16.vlgmr.msra.gmra.mrb[0].mxu0 %vm1891_vm0, %v11450_v37  ;;  %4107 = vmatpush1.bf16.msra.mxu1 %v8726_v16  ;;  %v8734_v16 = vld [vmem:[%s13222_s1 + $0x44c] ss:$16 sps:$4 sm:$0xff]  }
 0x244   :  { %3089 = vmatprep.mubr.bf16.mxu0 %v13364_v7  ;;  %3795 = vmatprep.mubr.bf16.mxu1 %v13656_v29  ;;  %13657 = vst [vmem:[#allocation3_spill] sm:$0xff] %v11475_v8  ;;  %v8732_v7 = vld [vmem:[%s13222_s1 + $0x448] ss:$16 sps:$4 sm:$0xff]   ;;  %v8737_v37 = vld [vmem:[%s13222_s1 + $0x46c] ss:$16 sps:$4 sm:$0xff]  }
 0x245   :  { %4108 = vmatprep.subr.bf16.mxu1 %v8731_v26  ;;  %v13658_v29 = vld [vmem:[#allocation5_spill] sm:$0xff]  ;;  %v13659_v26 = vmov 0  }
 0x247   :  { %4109 = vmatpush1.bf16.msra.mxu1 %v8729_v0  ;;  %v8735_v0 = vld [vmem:[%s13222_s1 + $0x468] ss:$16 sps:$4 sm:$0xff]  }
 0x248   :  { %4110 = vmatprep.subr.bf16.mxu1 %v8734_v16  ;;  %v8740_v16 = vld [vmem:[%s13222_s1 + $0x48c] ss:$16 sps:$4 sm:$0xff]  }
 0x24a   :  { %3796 = vmatmul.mubr.bf16.gmra.mrb[132].mxu1 %v13658_v29  ;;  %v11500_v29 = vpack.c.bf16 %v62_v32, %v55_v23  ;;  %v69_v23 = vld [vmem:[%s13223_s0 + $0x180] sm:$0xff]  ;;  %v76_v32 = vld [vmem:[%s13223_s0 + $0x1b8] sm:$0xff] }
 0x24b   :  { %6947 = vmatmul.mubr.msk.bf16.gmra.mrb[4].mxu0 %vm1891_vm0, %v11475_v8  ;;  %3805 = vmatprep.mubr.bf16.mxu1 %v13660_v6  ;;  %v8738_v6 = vld [vmem:[%s13222_s1 + $0x488] ss:$16 sps:$4 sm:$0xff]   ;;  %v13663_v8 = vld [vmem:[#allocation8_spill] sm:$0xff] }
 0x24c   :  { %3099 = vmatprep.mubr.bf16.mxu0 %v13659_v26  ;;  %4111 = vmatpush1.bf16.msra.mxu1 %v8732_v7  ;;  %13661 = vst [vmem:[#allocation4_spill] sm:$0xff] %v11500_v29  ;;  %v8743_v7 = vld [vmem:[%s13222_s1 + $0x4ac] ss:$16 sps:$4 sm:$0xff]  }
 0x24d   :  { %4112 = vmatprep.subr.bf16.mxu1 %v8737_v37  ;;  %v13662_v37 = vld [vmem:[#allocation7_spill] sm:$0xff] }
 0x250   :  { %4113 = vmatpush1.bf16.msra.mxu1 %v8735_v0  ;;  %v8741_v0 = vld [vmem:[%s13222_s1 + $0x4a8] ss:$16 sps:$4 sm:$0xff]  }
 0x251   :  { %4114 = vmatprep.subr.bf16.mxu1 %v8740_v16  ;;  %v8746_v16 = vld [vmem:[%s13222_s1 + $0x4cc] ss:$16 sps:$4 sm:$0xff]  }
 0x252   :  { %3806 = vmatmul.mubr.bf16.gmra.mrb[136].mxu1 %v13662_v37  ;;  %v11525_v37 = vpack.c.bf16 %v76_v32, %v69_v23  ;;  %v83_v23 = vld [vmem:[%s13223_s0 + $0x1f0] sm:$0xff]  ;;  %v90_v32 = vld [vmem:[%s13223_s0 + $0x228] sm:$0xff] }
 0x253   :  { %6948 = vmatmul.mubr.msk.bf16.gmra.mrb[8].mxu0 %vm1891_vm0, %v11500_v29  ;;  %3815 = vmatprep.mubr.bf16.mxu1 %v13663_v8  ;;  %v8744_v8 = vld [vmem:[%s13222_s1 + $0x4c8] ss:$16 sps:$4 sm:$0xff]   ;;  %v13666_v29 = vld [vmem:[#allocation10_spill] sm:$0xff] }
 0x254   :  { %3109 = vmatprep.mubr.bf16.mxu0 %v13659_v26  ;;  %4115 = vmatpush1.bf16.msra.mxu1 %v8738_v6  ;;  %13664 = vst [vmem:[#allocation5_spill] sm:$0xff] %v11525_v37  ;;  %v8749_v6 = vld [vmem:[%s13222_s1 + $0x4ec] ss:$16 sps:$4 sm:$0xff]  }
 0x255   :  { %4116 = vmatprep.subr.bf16.mxu1 %v8743_v7  ;;  %v13665_v7 = vld [vmem:[#allocation9_spill] sm:$0xff] }
 0x258   :  { %4117 = vmatpush1.bf16.msra.mxu1 %v8741_v0  ;;  %v8747_v0 = vld [vmem:[%s13222_s1 + $0x4e8] ss:$16 sps:$4 sm:$0xff]  }
 0x259   :  { %4118 = vmatprep.subr.bf16.mxu1 %v8746_v16  ;;  %v8752_v16 = vld [vmem:[%s13222_s1 + $0x50c] ss:$16 sps:$4 sm:$0xff]  }
 0x25a   :  { %3816 = vmatmul.mubr.bf16.gmra.mrb[140].mxu1 %v13665_v7  ;;  %v11550_v7 = vpack.c.bf16 %v90_v32, %v83_v23  ;;  %v97_v23 = vld [vmem:[%s13223_s0 + $0x260] sm:$0xff]  ;;  %v104_v32 = vld [vmem:[%s13223_s0 + $0x298] sm:$0xff] }
 0x25b   :  { %6949 = vmatmul.mubr.msk.bf16.gmra.mrb[12].mxu0 %vm1891_vm0, %v11525_v37  ;;  %3825 = vmatprep.mubr.bf16.mxu1 %v13666_v29  ;;  %v8750_v29 = vld [vmem:[%s13222_s1 + $0x508] ss:$16 sps:$4 sm:$0xff]   ;;  %v13669_v37 = vld [vmem:[#allocation12_spill] sm:$0xff] }
 0x25c   :  { %3119 = vmatprep.mubr.bf16.mxu0 %v13659_v26  ;;  %4119 = vmatpush1.bf16.msra.mxu1 %v8744_v8  ;;  %13667 = vst [vmem:[#allocation6_spill] sm:$0xff] %v11550_v7  ;;  %v8755_v8 = vld [vmem:[%s13222_s1 + $0x52c] ss:$16 sps:$4 sm:$0xff]  }
 0x25d   :  { %4120 = vmatprep.subr.bf16.mxu1 %v8749_v6  ;;  %v13668_v6 = vld [vmem:[#allocation11_spill] sm:$0xff] }
 0x260   :  { %4121 = vmatpush1.bf16.msra.mxu1 %v8747_v0  ;;  %v8753_v0 = vld [vmem:[%s13222_s1 + $0x528] ss:$16 sps:$4 sm:$0xff]  }
 0x261   :  { %4122 = vmatprep.subr.bf16.mxu1 %v8752_v16  ;;  %v8758_v16 = vld [vmem:[%s13222_s1 + $0x54c] ss:$16 sps:$4 sm:$0xff]  }
 0x262   :  { %3826 = vmatmul.mubr.bf16.gmra.mrb[144].mxu1 %v13668_v6  ;;  %v11575_v6 = vpack.c.bf16 %v104_v32, %v97_v23  ;;  %v111_v23 = vld [vmem:[%s13223_s0 + $0x2d0] sm:$0xff]  ;;  %v118_v32 = vld [vmem:[%s13223_s0 + $0x308] sm:$0xff] }
 0x263   :  { %6950 = vmatmul.mubr.msk.bf16.gmra.mrb[16].mxu0 %vm1891_vm0, %v11550_v7  ;;  %3835 = vmatprep.mubr.bf16.mxu1 %v13669_v37  ;;  %v8756_v37 = vld [vmem:[%s13222_s1 + $0x548] ss:$16 sps:$4 sm:$0xff]   ;;  %v8770_v7 = vld [vmem:[%s13224_s3 + $0x14] ss:$8 sps:$4 sm:$0xff]  }
 0x264   :  { %3129 = vmatprep.mubr.bf16.mxu0 %v13659_v26  ;;  %4123 = vmatpush1.bf16.msra.mxu1 %v8750_v29  ;;  %13670 = vst [vmem:[#allocation7_spill] sm:$0xff] %v11575_v6  ;;  %v13671_v29 = vld [vmem:[#allocation13_spill] sm:$0xff] }
 0x265   :  { %4124 = vmatprep.subr.bf16.mxu1 %v8755_v8  ;;  %v13672_v8 = vld [vmem:[#allocation14_spill] sm:$0xff] }
 0x268   :  { %4125 = vmatpush1.bf16.msra.mxu1 %v8753_v0  ;;  %v11591_v0 = vpack.c.bf16 %v118_v32, %v111_v23  ;;  %v132_v23 = vld [vmem:[%s13223_s0 + $0x378] sm:$0xff] }
 0x269   :  { %4126 = vmatprep.subr.bf16.mxu1 %v8758_v16  ;;  %v13674_v16 = vld [vmem:[#allocation15_spill] sm:$0xff] }
 0x26a   :  { %3836 = vmatmul.mubr.bf16.gmra.mrb[148].mxu1 %v13671_v29  ;;  %13673 = vst [vmem:[#allocation8_spill] sm:$0xff] %v11591_v0  ;;  %v8759_v29 = vld [vmem:[%s13222_s1 + $0x568] ss:$16 sps:$4 sm:$0xff]  }
 0x26b   :  { %6951 = vmatmul.mubr.msk.bf16.gmra.mrb[20].mxu0 %vm1891_vm0, %v11575_v6  ;;  %3845 = vmatprep.mubr.bf16.mxu1 %v13672_v8  ;;  %v8761_v8 = vld [vmem:[%s13222_s1 + $0x56c] ss:$16 sps:$4 sm:$0xff]   ;;  %v13675_v6 = vld [vmem:[#allocation16_spill] sm:$0xff] }
 0x26c   :  { %3139 = vmatprep.mubr.bf16.mxu0 %v13659_v26  ;;  %4127 = vmatpush1.bf16.msra.mxu1 %v8756_v37  ;;  %v125_v37 = vld [vmem:[%s13223_s0 + $0x340] sm:$0xff] }
 0x26d   :  { %4128 = vmatprep.subr.bf16.mxu1 %v8761_v8  ;;  %v11610_v32 = vpack.c.bf16 %v132_v23, %v125_v37  ;;  %v146_v8 = vld [vmem:[%s13223_s0 + $0x3e8] sm:$0xff] }
 0x26e   :  { %v8767_v37 = vld [vmem:[%s13224_s3 + $0x4] ss:$8 sps:$4 sm:$0xff]   ;;  %v8765_v23 = vld [vmem:[%s13224_s3] ss:$8 sps:$4 sm:$0xff]  }
 0x26f   :  { %13676 = vst [vmem:[#allocation9_spill] sm:$0xff] %v11610_v32  ;;  %5592 = vmatprep.subr.bf16.mxu0 %v8767_v37  ;;  %v167_v37 = vld [vmem:[%s13223_s0 + $0x490] sm:$0xff] }
 0x270   :  { %4129 = vmatpush1.bf16.msra.mxu1 %v8759_v29  ;;  %5593 = vmatpush1.bf16.msra.mxu0 %v8765_v23  ;;  %v174_v23 = vld [vmem:[%s13223_s0 + $0x4c8] sm:$0xff] }
 0x271   :  { %5594 = vmatprep.subr.bf16.mxu0 %v8770_v7  ;;  %v8776_v7 = vld [vmem:[%s13224_s3 + $0x34] ss:$8 sps:$4 sm:$0xff]  }
 0x272   :  { %3846 = vmatmul.mubr.bf16.gmra.mrb[152].mxu1 %v13674_v16  ;;  %v13677_v16 = vld [vmem:[#allocation17_spill] sm:$0xff] }
 0x273   :  { %6952 = vmatmul.mubr.msk.bf16.gmra.mrb[24].mxu0 %vm1891_vm0, %v11591_v0  ;;  %3855 = vmatprep.mubr.bf16.mxu1 %v13675_v6  ;;  %v13678_v6 = vld [vmem:[#allocation18_spill] sm:$0xff]  ;;  %v139_v0 = vld [vmem:[%s13223_s0 + $0x3b0] sm:$0xff] }
 0x274   :  { %3149 = vmatprep.mubr.bf16.mxu0 %v13659_v26  ;;  %v11623_v29 = vpack.c.bf16 %v146_v8, %v139_v0  ;;  %v8762_v0 = vld [vmem:[%s13222_s1 + $0x588] ss:$16 sps:$4 sm:$0xff]   ;;  %v8764_v8 = vld [vmem:[%s13222_s1 + $0x58c] ss:$16 sps:$4 sm:$0xff]  }
 0x275   :  { %4130 = vmatprep.subr.bf16.mxu1 %v8764_v8  ;;  %v181_v8 = vld [vmem:[%s13223_s0 + $0x500] sm:$0xff] }
 0x276   :  { %13679 = vst [vmem:[#allocation10_spill] sm:$0xff] %v11623_v29  ;;  %4131 = vmatpush1.bf16.msra.mxu1 %v8762_v0  ;;  %v8782_v0 = vld [vmem:[%s13224_s3 + $0x44] ss:$8 sps:$4 sm:$0xff]  }
 0x27a   :  { %3856 = vmatmul.mubr.bf16.gmra.mrb[156].mxu1 %v13677_v16  ;;  %v13680_v16 = vld [vmem:[#allocation19_spill] sm:$0xff] }
 0x27b   :  { %6953 = vmatmul.mubr.msk.bf16.gmra.mrb[28].mxu0 %vm1891_vm0, %v11610_v32  ;;  %3865 = vmatprep.mubr.bf16.mxu1 %v13678_v6  ;;  %v153_v6 = vld [vmem:[%s13223_s0 + $0x420] sm:$0xff]  ;;  %v13681_v32 = vld [vmem:[#allocation20_spill] sm:$0xff] }
 0x27c   :  { %3159 = vmatprep.mubr.bf16.mxu0 %v13659_v26 }
 0x282   :  { %3866 = vmatmul.mubr.bf16.gmra.mrb[160].mxu1 %v13680_v16  ;;  %v160_v16 = vld [vmem:[%s13223_s0 + $0x458] sm:$0xff] }
 0x283   :  { %6954 = vmatmul.mubr.msk.bf16.gmra.mrb[32].mxu0 %vm1891_vm0, %v11623_v29  ;;  %3875 = vmatprep.mubr.bf16.mxu1 %v13681_v32  ;;  %v8768_v29 = vld [vmem:[%s13224_s3 + $0x10] ss:$8 sps:$4 sm:$0xff]   ;;  %v11654_v22 = vpack.c.bf16 %v160_v16, %v153_v6  ;;  %v8773_v32 = vld [vmem:[%s13224_s3 + $0x24] ss:$8 sps:$4 sm:$0xff]   ;;  %v11679_v6 = vpack.c.bf16 %v174_v23, %v167_v37  ;;  %v8785_v23 = vld [vmem:[%s13224_s3 + $0x54] ss:$8 sps:$4 sm:$0xff]  }
 0x284   :  { %3169 = vmatprep.mubr.bf16.mxu0 %v13659_v26  ;;  %5595 = vmatpush1.bf16.msra.mxu0 %v8768_v29  ;;  %v13684_v29 = vld [vmem:[#allocation22_spill] sm:$0xff]  ;;  %v188_v16 = vld [vmem:[%s13223_s0 + $0x538] sm:$0xff] }
 0x285   :  { %13682 = vst [vmem:[#allocation11_spill] sm:$0xff] %v11654_v22  ;;  %5596 = vmatprep.subr.bf16.mxu0 %v8773_v32  ;;  %13685 = vst [vmem:[#allocation12_spill] sm:$0xff] %v11679_v6  ;;  %v13686_v32 = vld [vmem:[#allocation23_spill] sm:$0xff] }
 0x286   :  { %v8777_v37 = vld [vmem:[%s13222_s1 + $0x5a8] ss:$16 sps:$4 sm:$0xff]  }
 0x288   :  { %5597 = vmatpush1.bf16.msra.mxu0 %v8771_v59  ;;  %v8780_v59 = vld [vmem:[%s13224_s3 + $0x40] ss:$8 sps:$4 sm:$0xff]  }
 0x289   :  { %5598 = vmatprep.subr.bf16.mxu0 %v8776_v7  ;;  %v8779_v7 = vld [vmem:[%s13222_s1 + $0x5ac] ss:$16 sps:$4 sm:$0xff]  }
 0x28a   :  { %3876 = vmatmul.mubr.bf16.gmra.mrb[164].mxu1 %v13683_v63  ;;  %v8774_v63 = vld [vmem:[%s13224_s3 + $0x30] ss:$8 sps:$4 sm:$0xff]   ;;  %4132 = vmatprep.subr.bf16.mxu1 %v8779_v7  ;;  %v8791_v7 = vld [vmem:[%s13224_s3 + $0x74] ss:$8 sps:$4 sm:$0xff]  }
 0x28b   :  { %6955 = vmatmul.mubr.msk.bf16.gmra.mrb[36].mxu0 %vm1891_vm0, %v11654_v22  ;;  %3885 = vmatprep.mubr.bf16.mxu1 %v13684_v29  ;;  %v13687_v29 = vld [vmem:[#allocation24_spill] sm:$0xff] }
 0x28c   :  { %3179 = vmatprep.mubr.bf16.mxu0 %v13659_v26  ;;  %5599 = vmatpush1.bf16.msra.mxu0 %v8774_v63  ;;  %v8783_v63 = vld [vmem:[%s13224_s3 + $0x50] ss:$8 sps:$4 sm:$0xff]  }
 0x28d   :  { %5600 = vmatprep.subr.bf16.mxu0 %v8782_v0  ;;  %4133 = vmatpush1.bf16.msra.mxu1 %v8777_v37  ;;  %v195_v0 = vld [vmem:[%s13223_s0 + $0x570] sm:$0xff]  ;;  %v202_v37 = vld [vmem:[%s13223_s0 + $0x5a8] sm:$0xff] }
 0x290   :  { %5601 = vmatpush1.bf16.msra.mxu0 %v8780_v59  ;;  %v8786_v59 = vld [vmem:[%s13224_s3 + $0x60] ss:$8 sps:$4 sm:$0xff]  }
 0x291   :  { %5602 = vmatprep.subr.bf16.mxu0 %v8785_v23  ;;  %v11735_v23 = vpack.c.bf16 %v202_v37, %v195_v0  ;;  %v209_v0 = vld [vmem:[%s13223_s0 + $0x5e0] sm:$0xff]  ;;  %v216_v37 = vld [vmem:[%s13223_s0 + $0x618] sm:$0xff] }
 0x292   :  { %3886 = vmatmul.mubr.bf16.gmra.mrb[168].mxu1 %v13686_v32  ;;  %v11710_v32 = vpack.c.bf16 %v188_v16, %v181_v8  ;;  %v13689_v8 = vld [vmem:[#allocation25_spill] sm:$0xff]  ;;  %v13690_v16 = vld [vmem:[#allocation26_spill] sm:$0xff] }
 0x293   :  { %6956 = vmatmul.mubr.msk.bf16.gmra.mrb[40].mxu0 %vm1891_vm0, %v11679_v6  ;;  %3895 = vmatprep.mubr.bf16.mxu1 %v13687_v29  ;;  %v8788_v6 = vld [vmem:[%s13224_s3 + $0x64] ss:$8 sps:$4 sm:$0xff]   ;;  %v8789_v29 = vld [vmem:[%s13224_s3 + $0x70] ss:$8 sps:$4 sm:$0xff]   ;;  %13691 = vst [vmem:[#allocation14_spill] sm:$0xff] %v11735_v23 }
 0x294   :  { %3189 = vmatprep.mubr.bf16.mxu0 %v13659_v26  ;;  %13688 = vst [vmem:[#allocation13_spill] sm:$0xff] %v11710_v32  ;;  %5603 = vmatpush1.bf16.msra.mxu0 %v8783_v63  ;;  %v8797_v63 = vld [vmem:[%s13224_s3 + $0x84] ss:$8 sps:$4 sm:$0xff]  }
 0x295   :  { %5604 = vmatprep.subr.bf16.mxu0 %v8788_v6  ;;  %v8795_v6 = vld [vmem:[%s13224_s3 + $0x80] ss:$8 sps:$4 sm:$0xff]  }
 0x298   :  { %5605 = vmatpush1.bf16.msra.mxu0 %v8786_v59  ;;  %v13692_v59 = vld [vmem:[#allocation27_spill] sm:$0xff] }
 0x299   :  { %5606 = vmatprep.subr.bf16.mxu0 %v8791_v7  ;;  %v8792_v7 = vld [vmem:[%s13222_s1 + $0x5c8] ss:$16 sps:$4 sm:$0xff]  }
 0x29a   :  { %3896 = vmatmul.mubr.bf16.gmra.mrb[172].mxu1 %v13689_v8  ;;  %v13693_v8 = vld [vmem:[#allocation28_spill] sm:$0xff] }
 0x29b   :  { %6957 = vmatmul.mubr.msk.bf16.gmra.mrb[44].mxu0 %vm1891_vm0, %v11710_v32  ;;  %3905 = vmatprep.mubr.bf16.mxu1 %v13690_v16  ;;  %v8800_v16 = vld [vmem:[%s13224_s3 + $0x94] ss:$8 sps:$4 sm:$0xff]   ;;  %v13736_v32 = vld [vmem:[#allocation63_spill] sm:$0xff] }
 0x29c   :  { %3199 = vmatprep.mubr.bf16.mxu0 %v13659_v26  ;;  %5607 = vmatpush1.bf16.msra.mxu0 %v8789_v29  ;;  %v8794_v29 = vld [vmem:[%s13222_s1 + $0x5cc] ss:$16 sps:$4 sm:$0xff]  }
 0x29d   :  { %5608 = vmatprep.subr.bf16.mxu0 %v8797_v63  ;;  %4134 = vmatprep.subr.bf16.mxu1 %v8794_v29  ;;  %v8803_v63 = vld [vmem:[%s13224_s3 + $0xa4] ss:$8 sps:$4 sm:$0xff]   ;;  %v8804_v29 = vld [vmem:[%s13224_s3 + $0xb0] ss:$8 sps:$4 sm:$0xff]  }
 0x29e   :  { %4135 = vmatpush1.bf16.msra.mxu1 %v8792_v7  ;;  %v8806_v7 = vld [vmem:[%s13224_s3 + $0xb4] ss:$8 sps:$4 sm:$0xff]  }
 0x2a0   :  { %5609 = vmatpush1.bf16.msra.mxu0 %v8795_v6  ;;  %v13695_v6 = vld [vmem:[#allocation29_spill] sm:$0xff] }
 0x2a1   :  { %5610 = vmatprep.subr.bf16.mxu0 %v8800_v16  ;;  %v230_v16 = vld [vmem:[%s13223_s0 + $0x688] sm:$0xff] }
 0x2a2   :  { %3906 = vmatmul.mubr.bf16.gmra.mrb[176].mxu1 %v13692_v59  ;;  %v8798_v59 = vld [vmem:[%s13224_s3 + $0x90] ss:$8 sps:$4 sm:$0xff]  }
 0x2a3   :  { %6958 = vmatmul.mubr.msk.bf16.gmra.mrb[48].mxu0 %vm1891_vm0, %v11735_v23  ;;  %3915 = vmatprep.mubr.bf16.mxu1 %v13693_v8  ;;  %v11766_v8 = vpack.c.bf16 %v216_v37, %v209_v0  ;;  %v8801_v23 = vld [vmem:[%s13224_s3 + $0xa0] ss:$8 sps:$4 sm:$0xff]   ;;  %v223_v37 = vld [vmem:[%s13223_s0 + $0x650] sm:$0xff] }
 0x2a4   :  { %3209 = vmatprep.mubr.bf16.mxu0 %v13659_v26  ;;  %5611 = vmatpush1.bf16.msra.mxu0 %v8798_v59  ;;  %v13696_v0 = vld [vmem:[#allocation30_spill] sm:$0xff]  ;;  %v11791_v59 = vpack.c.bf16 %v230_v16, %v223_v37  ;;  %v244_v16 = vld [vmem:[%s13223_s0 + $0x6f8] sm:$0xff] }
 0x2a5   :  { %13694 = vst [vmem:[#allocation15_spill] sm:$0xff] %v11766_v8  ;;  %5612 = vmatprep.subr.bf16.mxu0 %v8803_v63  ;;  %v8810_v63 = vld [vmem:[%s13224_s3 + $0xc0] ss:$8 sps:$4 sm:$0xff]  }
 0x2a6   :  { %13697 = vst [vmem:[#allocation16_spill] sm:$0xff] %v11791_v59  ;;  %v237_v37 = vld [vmem:[%s13223_s0 + $0x6c0] sm:$0xff] }
 0x2a8   :  { %5613 = vmatpush1.bf16.msra.mxu0 %v8801_v23  ;;  %v13698_v23 = vld [vmem:[#allocation31_spill] sm:$0xff] }
 0x2a9   :  { %5614 = vmatprep.subr.bf16.mxu0 %v8806_v7  ;;  %v8815_v7 = vld [vmem:[%s13224_s3 + $0xd4] ss:$8 sps:$4 sm:$0xff]  }
 0x2aa   :  { %3916 = vmatmul.mubr.bf16.gmra.mrb[180].mxu1 %v13695_v6  ;;  %v8812_v6 = vld [vmem:[%s13224_s3 + $0xc4] ss:$8 sps:$4 sm:$0xff]  }
 0x2ab   :  { %6959 = vmatmul.mubr.msk.bf16.gmra.mrb[52].mxu0 %vm1891_vm0, %v11766_v8  ;;  %3925 = vmatprep.mubr.bf16.mxu1 %v13696_v0  ;;  %v13699_v0 = vld [vmem:[#allocation32_spill] sm:$0xff]  ;;  %v8816_v8 = vld [vmem:[%s13224_s3 + $0xe0] ss:$8 sps:$4 sm:$0xff]  }
 0x2ac   :  { %3219 = vmatprep.mubr.bf16.mxu0 %v13659_v26  ;;  %5615 = vmatpush1.bf16.msra.mxu0 %v8804_v29  ;;  %v8807_v29 = vld [vmem:[%s13222_s1 + $0x5e8] ss:$16 sps:$4 sm:$0xff]  }
 0x2ad   :  { %5616 = vmatprep.subr.bf16.mxu0 %v8812_v6  ;;  %v8818_v6 = vld [vmem:[%s13224_s3 + $0xe4] ss:$8 sps:$4 sm:$0xff]  }
 0x2b0   :  { %5617 = vmatpush1.bf16.msra.mxu0 %v8810_v63  ;;  %v13701_v63 = vld [vmem:[#allocation33_spill] sm:$0xff] }
 0x2b1   :  { %5618 = vmatprep.subr.bf16.mxu0 %v8815_v7  ;;  %v258_v7 = vld [vmem:[%s13223_s0 + $0x768] sm:$0xff] }
 0x2b2   :  { %3926 = vmatmul.mubr.bf16.gmra.mrb[184].mxu1 %v13698_v23  ;;  %v8809_v23 = vld [vmem:[%s13222_s1 + $0x5ec] ss:$16 sps:$4 sm:$0xff]  }
 0x2b3   :  { %6960 = vmatmul.mubr.msk.bf16.gmra.mrb[56].mxu0 %vm1891_vm0, %v11791_v59  ;;  %3935 = vmatprep.mubr.bf16.mxu1 %v13699_v0  ;;  %v8813_v0 = vld [vmem:[%s13224_s3 + $0xd0] ss:$8 sps:$4 sm:$0xff]   ;;  %v11822_v59 = vpack.c.bf16 %v244_v16, %v237_v37  ;;  %v13702_v37 = vld [vmem:[#allocation34_spill] sm:$0xff] }
 0x2b4   :  { %3229 = vmatprep.mubr.bf16.mxu0 %v13659_v26  ;;  %4136 = vmatprep.subr.bf16.mxu1 %v8809_v23  ;;  %v251_v16 = vld [vmem:[%s13223_s0 + $0x730] sm:$0xff] }
 0x2b5   :  { %13700 = vst [vmem:[#allocation17_spill] sm:$0xff] %v11822_v59  ;;  %4137 = vmatpush1.bf16.msra.mxu1 %v8807_v29  ;;  %5619 = vmatpush1.bf16.msra.mxu0 %v8813_v0  ;;  %v8821_v29 = vld [vmem:[%s13224_s3 + $0xf4] ss:$8 sps:$4 sm:$0xff]   ;;  %v8819_v23 = vld [vmem:[%s13224_s3 + $0xf0] ss:$8 sps:$4 sm:$0xff]   ;;  %v11847_v0 = vpack.c.bf16 %v258_v7, %v251_v16 }
 0x2b6   :  { %5620 = vmatprep.subr.bf16.mxu0 %v8818_v6  ;;  %v13705_v6 = vld [vmem:[#allocation36_spill] sm:$0xff]  ;;  %v8824_v16 = vld [vmem:[%s13222_s1 + $0x60c] ss:$16 sps:$4 sm:$0xff]  }
 0x2b7   :  { %13703 = vst [vmem:[#allocation18_spill] sm:$0xff] %v11847_v0  ;;  %4459 = vmatprep.subr.bf16.mxu1 %v8824_v16  ;;  %v13711_v16 = vld [vmem:[#allocation40_spill] sm:$0xff] }
 0x2b9   :  { %5621 = vmatpush1.bf16.msra.mxu0 %v8816_v8  ;;  %v265_v8 = vld [vmem:[%s13223_s0 + $0x7a0] sm:$0xff] }
 0x2ba   :  { %3936 = vmatmul.mubr.bf16.gmra.mrb[188].mxu1 %v13701_v63  ;;  %5622 = vmatprep.subr.bf16.mxu0 %v8821_v29  ;;  %v13704_v63 = vld [vmem:[#allocation35_spill] sm:$0xff]  ;;  %v13707_v29 = vld [vmem:[#allocation37_spill] sm:$0xff] }
 0x2bb   :  { %6961 = vmatmul.mubr.msk.bf16.gmra.mrb[60].mxu0 %vm1891_vm0, %v11822_v59  ;;  %3945 = vmatprep.mubr.bf16.mxu1 %v13702_v37  ;;  %v272_v37 = vld [vmem:[%s13223_s0 + $0x7d8] sm:$0xff] }
 0x2bc   :  { %3239 = vmatprep.mubr.bf16.mxu0 %v13659_v26  ;;  %v11863_v7 = vpack.c.bf16 %v272_v37, %v265_v8  ;;  %v13710_v37 = vld [vmem:[#allocation39_spill] sm:$0xff]  ;;  %v13735_v59 = vld [vmem:[#allocation61_spill] sm:$0xff] }
 0x2bd   :  { %5623 = vmatpush1.bf16.msra.mxu0 %v8819_v23  ;;  %v13708_v23 = vld [vmem:[#allocation38_spill] sm:$0xff] }
 0x2be   :  { %13706 = vst [vmem:[#allocation19_spill] sm:$0xff] %v11863_v7 }
 0x2c2   :  { %3946 = vmatmul.mubr.bf16.gmra.mrb[192].mxu1 %v13704_v63  ;;  %v279_v63 = vld [vmem:[%s13223_s0 + $0x810] sm:$0xff] }
 0x2c3   :  { %6962 = vmatmul.mubr.msk.bf16.gmra.mrb[64].mxu0 %vm1891_vm0, %v11847_v0  ;;  %3955 = vmatprep.mubr.bf16.mxu1 %v13705_v6  ;;  %v286_v6 = vld [vmem:[%s13223_s0 + $0x848] sm:$0xff] }
 0x2c4   :  { %3249 = vmatprep.mubr.bf16.mxu0 %v13659_v26  ;;  %v11876_v8 = vpack.c.bf16 %v286_v6, %v279_v63  ;;  %v13713_v63 = vld [vmem:[#allocation41_spill] sm:$0xff]  ;;  %v13714_v6 = vld [vmem:[#allocation42_spill] sm:$0xff] }
 0x2c6   :  { %13709 = vst [vmem:[#allocation20_spill] sm:$0xff] %v11876_v8 }
 0x2ca   :  { %3956 = vmatmul.mubr.bf16.gmra.mrb[196].mxu1 %v13707_v29  ;;  %v293_v29 = vld [vmem:[%s13223_s0 + $0x880] sm:$0xff] }
 0x2cb   :  { %6963 = vmatmul.mubr.msk.bf16.gmra.mrb[68].mxu0 %vm1891_vm0, %v11863_v7  ;;  %3965 = vmatprep.mubr.bf16.mxu1 %v13708_v23  ;;  %v300_v23 = vld [vmem:[%s13223_s0 + $0x8b8] sm:$0xff] }
 0x2cc   :  { %3259 = vmatprep.mubr.bf16.mxu0 %v13659_v26  ;;  %v11889_v7 = vpack.c.bf16 %v300_v23, %v293_v29  ;;  %v13716_v29 = vld [vmem:[#allocation43_spill] sm:$0xff]  ;;  %v13717_v23 = vld [vmem:[#allocation44_spill] sm:$0xff] }
 0x2ce   :  { %13712 = vst [vmem:[#allocation21_spill] sm:$0xff] %v11889_v7 }
 0x2d2   :  { %3966 = vmatmul.mubr.bf16.gmra.mrb[200].mxu1 %v13710_v37  ;;  %v307_v37 = vld [vmem:[%s13223_s0 + $0x8f0] sm:$0xff] }
 0x2d3   :  { %6964 = vmatmul.mubr.msk.bf16.gmra.mrb[72].mxu0 %vm1891_vm0, %v11876_v8  ;;  %3975 = vmatprep.mubr.bf16.mxu1 %v13711_v16  ;;  %v314_v16 = vld [vmem:[%s13223_s0 + $0x928] sm:$0xff] }
 0x2d4   :  { %3269 = vmatprep.mubr.bf16.mxu0 %v13659_v26  ;;  %v11902_v8 = vpack.c.bf16 %v314_v16, %v307_v37  ;;  %v13719_v37 = vld [vmem:[#allocation45_spill] sm:$0xff]  ;;  %v13720_v16 = vld [vmem:[#allocation46_spill] sm:$0xff] }
 0x2d6   :  { %13715 = vst [vmem:[#allocation22_spill] sm:$0xff] %v11902_v8 }
 0x2da   :  { %3976 = vmatmul.mubr.bf16.gmra.mrb[204].mxu1 %v13713_v63  ;;  %v321_v63 = vld [vmem:[%s13223_s0 + $0x960] sm:$0xff] }
 0x2db   :  { %6965 = vmatmul.mubr.msk.bf16.gmra.mrb[76].mxu0 %vm1891_vm0, %v11889_v7  ;;  %3985 = vmatprep.mubr.bf16.mxu1 %v13714_v6  ;;  %v328_v6 = vld [vmem:[%s13223_s0 + $0x998] sm:$0xff] }
 0x2dc   :  { %3279 = vmatprep.mubr.bf16.mxu0 %v13659_v26  ;;  %v11915_v7 = vpack.c.bf16 %v328_v6, %v321_v63  ;;  %v13722_v63 = vld [vmem:[#allocation47_spill] sm:$0xff]  ;;  %v13723_v6 = vld [vmem:[#allocation48_spill] sm:$0xff] }
 0x2de   :  { %13718 = vst [vmem:[#allocation23_spill] sm:$0xff] %v11915_v7 }
 0x2e2   :  { %3986 = vmatmul.mubr.bf16.gmra.mrb[208].mxu1 %v13716_v29  ;;  %v335_v29 = vld [vmem:[%s13223_s0 + $0x9d0] sm:$0xff] }
 0x2e3   :  { %6966 = vmatmul.mubr.msk.bf16.gmra.mrb[80].mxu0 %vm1891_vm0, %v11902_v8  ;;  %3995 = vmatprep.mubr.bf16.mxu1 %v13717_v23  ;;  %v342_v23 = vld [vmem:[%s13223_s0 + $0xa08] sm:$0xff] }
 0x2e4   :  { %3289 = vmatprep.mubr.bf16.mxu0 %v13659_v26  ;;  %v11928_v8 = vpack.c.bf16 %v342_v23, %v335_v29  ;;  %v13725_v29 = vld [vmem:[#allocation49_spill] sm:$0xff]  ;;  %v13726_v23 = vld [vmem:[#allocation51_spill] sm:$0xff] }
 0x2e6   :  { %13721 = vst [vmem:[#allocation24_spill] sm:$0xff] %v11928_v8 }
 0x2ea   :  { %3996 = vmatmul.mubr.bf16.gmra.mrb[212].mxu1 %v13719_v37  ;;  %v349_v37 = vld [vmem:[%s13223_s0 + $0xa40] sm:$0xff] }
 0x2eb   :  { %6967 = vmatmul.mubr.msk.bf16.gmra.mrb[84].mxu0 %vm1891_vm0, %v11915_v7  ;;  %4005 = vmatprep.mubr.bf16.mxu1 %v13720_v16  ;;  %v356_v16 = vld [vmem:[%s13223_s0 + $0xa78] sm:$0xff] }
 0x2ec   :  { %3299 = vmatprep.mubr.bf16.mxu0 %v13659_v26  ;;  %v11941_v7 = vpack.c.bf16 %v356_v16, %v349_v37  ;;  %v13728_v37 = vld [vmem:[#allocation53_spill] sm:$0xff]  ;;  %v13729_v16 = vld [vmem:[#allocation55_spill] sm:$0xff] }
 0x2ee   :  { %13724 = vst [vmem:[#allocation25_spill] sm:$0xff] %v11941_v7 }
 0x2f2   :  { %4006 = vmatmul.mubr.bf16.gmra.mrb[216].mxu1 %v13722_v63  ;;  %v363_v63 = vld [vmem:[%s13223_s0 + $0xab0] sm:$0xff] }
 0x2f3   :  { %6968 = vmatmul.mubr.msk.bf16.gmra.mrb[88].mxu0 %vm1891_vm0, %v11928_v8  ;;  %4015 = vmatprep.mubr.bf16.mxu1 %v13723_v6  ;;  %v370_v6 = vld [vmem:[%s13223_s0 + $0xae8] sm:$0xff] }
 0x2f4   :  { %3309 = vmatprep.mubr.bf16.mxu0 %v13659_v26  ;;  %v11954_v8 = vpack.c.bf16 %v370_v6, %v363_v63 }
 0x2f6   :  { %13727 = vst [vmem:[#allocation26_spill] sm:$0xff] %v11954_v8 }
 0x2fa   :  { %4016 = vmatmul.mubr.bf16.gmra.mrb[220].mxu1 %v13725_v29  ;;  %v377_v29 = vld [vmem:[%s13223_s0 + $0xb20] sm:$0xff] }
 0x2fb   :  { %6969 = vmatmul.mubr.msk.bf16.gmra.mrb[92].mxu0 %vm1891_vm0, %v11941_v7  ;;  %4025 = vmatprep.mubr.bf16.mxu1 %v13726_v23  ;;  %v384_v23 = vld [vmem:[%s13223_s0 + $0xb58] sm:$0xff]  ;;  %v891_v7 = vlaneseq }
 0x2fc   :  { %3319 = vmatprep.mubr.bf16.mxu0 %v13659_v26  ;;  %v11967_v63 = vpack.c.bf16 %v384_v23, %v377_v29  ;;  %v398_v29 = vld [vmem:[%s13223_s0 + $0xbc8] sm:$0xff]  ;;  %v889_v23 = vld [vmem:[%s13225_s2] sm:$0xf] }
 0x2fd   :  { %v11969_v6 = vshrl.u32 %v891_v7, 7 }
 0x2fe   :  { %13730 = vst [vmem:[#allocation27_spill] sm:$0xff] %v11967_v63 }
 0x2ff   :  { %13731 = vst [vmem:[#allocation28_spill] sm:$0xff] %v11969_v6  ;;  %v13396_v7 = vsub.s32 0, %v11969_v6 }
 0x302   :  { %4026 = vmatmul.mubr.bf16.gmra.mrb[224].mxu1 %v13728_v37  ;;  %v13732_v37 = vld [vmem:[#allocation57_spill] sm:$0xff] }
 0x303   :  { %6970 = vmatmul.mubr.msk.bf16.gmra.mrb[96].mxu0 %vm1891_vm0, %v11954_v8  ;;  %4035 = vmatprep.mubr.bf16.mxu1 %v13729_v16  ;;  %v13733_v16 = vld [vmem:[#allocation59_spill] sm:$0xff]  ;;  %v391_v8 = vld [vmem:[%s13223_s0 + $0xb90] sm:$0xff] }
 0x304   :  { %3329 = vmatprep.mubr.bf16.mxu0 %v13659_v26 }
 0x30a   :  { %4036 = vmatmul.mubr.bf16.gmra.mrb[228].mxu1 %v13732_v37  ;;  %v13395_v37 = vsub.s32 1, %v11969_v6 }
 0x30b   :  { %6971 = vmatmul.mubr.msk.bf16.gmra.mrb[100].mxu0 %vm1891_vm0, %v11967_v63  ;;  %4045 = vmatprep.mubr.bf16.mxu1 %v13733_v16  ;;  %v11987_v63 = vpack.c.bf16 %v398_v29, %v391_v8  ;;  %v11991_v16 = vrot.slane %v889_v23, %v13396_v7  ;;  %v405_v8 = vld [vmem:[%s13223_s0 + $0xc00] sm:$0xff]  ;;  %v412_v29 = vld [vmem:[%s13223_s0 + $0xc38] sm:$0xff] }
 0x30c   :  { %3339 = vmatprep.mubr.bf16.mxu0 %v13659_v26  ;;  %v11995_v0 = vrot.slane %v889_v23, %v13395_v37  ;;  %v13737_v23 = vld [vmem:[#allocation64_spill] sm:$0xff]  ;;  %v13738_v7 = vld [vmem:[#allocation65_spill] sm:$0xff]  ;;  %v12014_v35 = vpack.c.bf16 %v412_v29, %v405_v8 }
 0x30d   :  { %13734 = vst [vmem:[#allocation29_spill] sm:$0xff] %v11987_v63  ;;  %v2023_v37 = vadd.f32 %v13737_v23, %v11991_v16 }
 0x30e   :  { %13740 = vst [vmem:[#allocation30_spill] sm:$0xff] %v12014_v35  ;;  %v2029_v61 = vadd.f32 %v13741_v2, %v11995_v0  ;;  %v419_v2 = vld [vmem:[%s13223_s0 + $0xc70] sm:$0xff] }
 0x312   :  { %4046 = vmatmul.mubr.bf16.gmra.mrb[232].mxu1 %v13735_v59  ;;  %v13739_v59 = vld [vmem:[#allocation68_spill] sm:$0xff] }
 0x313   :  { %6972 = vmatmul.mubr.msk.bf16.gmra.mrb[104].mxu0 %vm1891_vm0, %v11987_v63  ;;  %4055 = vmatprep.mubr.bf16.mxu1 %v13736_v32  ;;  %v2025_v63 = vadd.f32 %v13738_v7, %v11995_v0  ;;  %v2027_v22 = vadd.f32 %v13739_v59, %v11991_v16  ;;  %v13742_v7 = vld [vmem:[#allocation67_spill] sm:$0xff] }
 0x314   :  { %3349 = vmatprep.mubr.bf16.mxu0 %v13659_v26 }
 0x316   :  { %v3081_v6 = vpop.f32.mrb[0].mxu0 }
 0x317   :  { %v7203_v55 = vadd.f32 %v3081_v6, %v2023_v37  ;;  %v3083_v32 = vpop.f32.mrb[1].mxu0  ;;  %v13743_v37 = vld [vmem:[#allocation70_spill] sm:$0xff] }
 0x318   :  { %v7205_v56 = vadd.f32 %v3083_v32, %v2025_v63  ;;  %v3085_v27 = vpop.f32.mrb[2].mxu0  ;;  %v13746_v63 = vld [vmem:[#allocation76_spill] sm:$0xff] }
 0x319   :  { %v7207_v3 = vadd.f32 %v3085_v27, %v2027_v22  ;;  %v3087_v41 = vpop.f32.mrb[3].mxu0  ;;  %v4812_v23 = vmax.f32 %v7203_v55, 0.0  ;;  %v13744_v27 = vld [vmem:[#allocation72_spill] sm:$0xff]  ;;  %v2037_v8 = vadd.f32 %v13746_v63, %v11991_v16 }
 0x31a   :  { %v7209_v46 = vadd.f32 %v3087_v41, %v2029_v61  ;;  %4056 = vmatmul.mubr.bf16.gmra.mrb[236].mxu1 %v13742_v7  ;;  %v4813_v59 = vmax.f32 %v7205_v56, 0.0  ;;  %v426_v41 = vld [vmem:[%s13223_s0 + $0xca8] sm:$0xff]  ;;  %v2033_v61 = vadd.f32 %v13744_v27, %v11991_v16  ;;  %v13745_v56 = vld [vmem:[#allocation73_spill] sm:$0xff] }
 0x31b   :  { %v4816_v14 = vmax.f32 %v7207_v3, 0.0  ;;  %6973 = vmatmul.mubr.msk.bf16.gmra.mrb[108].mxu0 %vm1891_vm0, %v12014_v35  ;;  %4065 = vmatprep.mubr.bf16.mxu1 %v13743_v37  ;;  %v12039_v7 = vpack.c.bf16 %v426_v41, %v419_v2  ;;  %v13748_v37 = vld [vmem:[#allocation79_spill] sm:$0xff]  ;;  %v13750_v2 = vld [vmem:[#allocation78_spill] sm:$0xff] }
 0x31c   :  { %v4817_v6 = vmax.f32 %v7209_v46, 0.0  ;;  %3359 = vmatprep.mubr.bf16.mxu0 %v13659_v26  ;;  %v2035_v46 = vadd.f32 %v13745_v56, %v11995_v0  ;;  %v2039_v35 = vadd.f32 %v13748_v37, %v11995_v0  ;;  %v433_v41 = vld [vmem:[%s13223_s0 + $0xce0] sm:$0xff] }
 0x31d   :  { %v12031_v3 = vpack.c.bf16 %v4816_v14, %v4812_v23  ;;  %13747 = vst [vmem:[#allocation31_spill] sm:$0xff] %v12039_v7 }
 0x31e   :  { %v12035_v55 = vpack.c.bf16 %v4817_v6, %v4813_v59  ;;  %v3091_v22 = vpop.f32.mrb[4].mxu0  ;;  %v13749_v59 = vld [vmem:[#allocation75_spill] sm:$0xff] }
 0x31f   :  { %v7211_v29 = vadd.f32 %v3091_v22, %v2033_v61  ;;  %v3093_v32 = vpop.f32.mrb[5].mxu0 }
 0x320   :  { %v7213_v28 = vadd.f32 %v3093_v32, %v2035_v46  ;;  %v3095_v27 = vpop.f32.mrb[6].mxu0  ;;  %v13751_v46 = vld [vmem:[#allocation80_spill] sm:$0xff] }
 0x321   :  { %v7215_v14 = vadd.f32 %v3095_v27, %v2037_v8  ;;  %v3097_v23 = vpop.f32.mrb[7].mxu0  ;;  %v4820_v25 = vmax.f32 %v7211_v29, 0.0  ;;  %v2043_v22 = vadd.f32 %v13751_v46, %v11991_v16  ;;  %v13753_v32 = vld [vmem:[#allocation84_spill] sm:$0xff] }
 0x322   :  { %v7217_v13 = vadd.f32 %v3097_v23, %v2039_v35  ;;  %4066 = vmatmul.mubr.bf16.gmra.mrb[240].mxu1 %v13749_v59  ;;  %v4821_v6 = vmax.f32 %v7213_v28, 0.0  ;;  %v440_v35 = vld [vmem:[%s13223_s0 + $0xd18] sm:$0xff]  ;;  %v2047_v37 = vadd.f32 %v13753_v32, %v11991_v16  ;;  %v13755_v59 = vld [vmem:[#allocation87_spill] sm:$0xff] }
 0x323   :  { %v4824_v56 = vmax.f32 %v7215_v14, 0.0  ;;  %6974 = vmatmul.mubr.msk.bf16.gmra.mrb[112].mxu0 %vm1891_vm0, %v12039_v7  ;;  %4075 = vmatprep.mubr.bf16.mxu1 %v13750_v2  ;;  %v13752_v28 = vld [vmem:[#allocation81_spill] sm:$0xff]  ;;  %v12064_v23 = vpack.c.bf16 %v440_v35, %v433_v41  ;;  %v2049_v2 = vadd.f32 %v13755_v59, %v11995_v0  ;;  %v13757_v41 = vld [vmem:[#allocation86_spill] sm:$0xff]  ;;  %v447_v35 = vld [vmem:[%s13223_s0 + $0xd50] sm:$0xff] }
 0x324   :  { %v4825_v61 = vmax.f32 %v7217_v13, 0.0  ;;  %3369 = vmatprep.mubr.bf16.mxu0 %v13659_v26  ;;  %v2045_v13 = vadd.f32 %v13752_v28, %v11995_v0 }
 0x325   :  { %v12056_v63 = vpack.c.bf16 %v4824_v56, %v4820_v25  ;;  %13754 = vst [vmem:[#allocation32_spill] sm:$0xff] %v12064_v23 }
 0x326   :  { %v12060_v8 = vpack.c.bf16 %v4825_v61, %v4821_v6  ;;  %v3101_v29 = vpop.f32.mrb[8].mxu0  ;;  %v13756_v6 = vld [vmem:[#allocation83_spill] sm:$0xff] }
 0x327   :  { %v7219_v27 = vadd.f32 %v3101_v29, %v2043_v22  ;;  %v3103_v14 = vpop.f32.mrb[9].mxu0  ;;  %v2053_v29 = vadd.f32 %v10438_v19, %v11991_v16 }
 0x328   :  { %v7221_v7 = vadd.f32 %v3103_v14, %v2045_v13  ;;  %v3105_v46 = vpop.f32.mrb[10].mxu0  ;;  %v454_v13 = vld [vmem:[%s13223_s0 + $0xd88] sm:$0xff]  ;;  %v13759_v14 = vld [vmem:[#allocation90_spill] sm:$0xff] }
 0x329   :  { %v7223_v25 = vadd.f32 %v3105_v46, %v2047_v37  ;;  %v3107_v56 = vpop.f32.mrb[11].mxu0  ;;  %v4828_v1 = vmax.f32 %v7219_v27, 0.0  ;;  %v2057_v59 = vadd.f32 %v13759_v14, %v11991_v16 }
 0x32a   :  { %v7225_v43 = vadd.f32 %v3107_v56, %v2049_v2  ;;  %4076 = vmatmul.mubr.bf16.gmra.mrb[244].mxu1 %v13756_v6  ;;  %v4829_v61 = vmax.f32 %v7221_v7, 0.0  ;;  %v13758_v7 = vld [vmem:[#allocation88_spill] sm:$0xff] }
 0x32b   :  { %v4832_v28 = vmax.f32 %v7223_v25, 0.0  ;;  %6975 = vmatmul.mubr.msk.bf16.gmra.mrb[116].mxu0 %vm1891_vm0, %v12064_v23  ;;  %4085 = vmatprep.mubr.bf16.mxu1 %v13757_v41  ;;  %v12089_v25 = vpack.c.bf16 %v454_v13, %v447_v35  ;;  %v13761_v56 = vld [vmem:[#allocation92_spill] sm:$0xff]  ;;  %v13763_v35 = vld [vmem:[#allocation91_spill] sm:$0xff]  ;;  %v461_v13 = vld [vmem:[%s13223_s0 + $0xdc0] sm:$0xff] }
 0x32c   :  { %v4833_v22 = vmax.f32 %v7225_v43, 0.0  ;;  %3379 = vmatprep.mubr.bf16.mxu0 %v13659_v26  ;;  %v2055_v43 = vadd.f32 %v13758_v7, %v11995_v0  ;;  %v2059_v6 = vadd.f32 %v13761_v56, %v11995_v0  ;;  %v13765_v56 = vld [vmem:[#allocation95_spill] sm:$0xff] }
 0x32d   :  { %v12081_v32 = vpack.c.bf16 %v4832_v28, %v4828_v1  ;;  %13760 = vst [vmem:[#allocation33_spill] sm:$0xff] %v12089_v25 }
 0x32e   :  { %v12085_v37 = vpack.c.bf16 %v4833_v22, %v4829_v61  ;;  %v3111_v27 = vpop.f32.mrb[12].mxu0  ;;  %v13762_v61 = vld [vmem:[#allocation89_spill] sm:$0xff] }
 0x32f   :  { %v7227_v2 = vadd.f32 %v3111_v27, %v2053_v29  ;;  %v3113_v46 = vpop.f32.mrb[13].mxu0  ;;  %v2063_v27 = vadd.f32 %v10476_v54, %v11991_v16 }
 0x330   :  { %v7229_v41 = vadd.f32 %v3113_v46, %v2055_v43  ;;  %v3115_v19 = vpop.f32.mrb[14].mxu0  ;;  %v468_v43 = vld [vmem:[%s13223_s0 + $0xdf8] sm:$0xff] }
 0x331   :  { %v7231_v1 = vadd.f32 %v3115_v19, %v2057_v59  ;;  %v3117_v28 = vpop.f32.mrb[15].mxu0  ;;  %v4836_v30 = vmax.f32 %v7227_v2, 0.0  ;;  %v13764_v59 = vld [vmem:[#allocation93_spill] sm:$0xff] }
 0x332   :  { %v7233_v23 = vadd.f32 %v3117_v28, %v2059_v6  ;;  %4086 = vmatmul.mubr.bf16.gmra.mrb[248].mxu1 %v13762_v61  ;;  %v4837_v22 = vmax.f32 %v7229_v41, 0.0  ;;  %v2067_v6 = vadd.f32 %v13765_v56, %v11991_v16  ;;  %v13766_v28 = vld [vmem:[#allocation97_spill] sm:$0xff] }
 0x333   :  { %v4840_v7 = vmax.f32 %v7231_v1, 0.0  ;;  %6976 = vmatmul.mubr.msk.bf16.gmra.mrb[120].mxu0 %vm1891_vm0, %v12089_v25  ;;  %4095 = vmatprep.mubr.bf16.mxu1 %v13763_v35  ;;  %v12114_v1 = vpack.c.bf16 %v468_v43, %v461_v13  ;;  %v2069_v61 = vadd.f32 %v13766_v28, %v11995_v0  ;;  %v13768_v13 = vld [vmem:[#allocation96_spill] sm:$0xff]  ;;  %v2073_v43 = vadd.f32 %v10506_v45, %v11991_v16  ;;  %v8822_v45 = vld [vmem:[%s13222_s1 + $0x608] ss:$16 sps:$4 sm:$0xff]  }
 0x334   :  { %v4841_v29 = vmax.f32 %v7233_v23, 0.0  ;;  %3389 = vmatprep.mubr.bf16.mxu0 %v13659_v26  ;;  %v2065_v23 = vadd.f32 %v13764_v59, %v11995_v0 }
 0x335   :  { %v12106_v14 = vpack.c.bf16 %v4840_v7, %v4836_v30 }
 0x336   :  { %v12110_v2 = vpack.c.bf16 %v4841_v29, %v4837_v22  ;;  %v3121_v46 = vpop.f32.mrb[16].mxu0  ;;  %v13767_v22 = vld [vmem:[#allocation94_spill] sm:$0xff] }
 0x337   :  { %v7235_v41 = vadd.f32 %v3121_v46, %v2063_v27  ;;  %v3123_v19 = vpop.f32.mrb[17].mxu0  ;;  %v13769_v46 = vld [vmem:[#allocation98_spill] sm:$0xff] }
 0x338   :  { %v7237_v35 = vadd.f32 %v3123_v19, %v2065_v23  ;;  %v3125_v54 = vpop.f32.mrb[18].mxu0  ;;  %v2075_v56 = vadd.f32 %v13769_v46, %v11995_v0  ;;  %v13770_v19 = vld [vmem:[#allocation100_spill] sm:$0xff]  ;;  %v13773_v46 = vld [vmem:[#allocation103_spill] sm:$0xff] }
 0x339   :  { %v7239_v30 = vadd.f32 %v3125_v54, %v2067_v6  ;;  %v3127_v7 = vpop.f32.mrb[19].mxu0  ;;  %v4844_v26 = vmax.f32 %v7235_v41, 0.0  ;;  %v2077_v28 = vadd.f32 %v13770_v19, %v11991_v16  ;;  %v13774_v19 = vld [vmem:[#allocation101_spill] sm:$0xff] }
 0x33a   :  { %v7241_v25 = vadd.f32 %v3127_v7, %v2069_v61  ;;  %4096 = vmatmul.mubr.bf16.gmra.mrb[252].mxu1 %v13767_v22  ;;  %v4845_v29 = vmax.f32 %v7237_v35, 0.0 }
 0x33b   :  { %v4848_v59 = vmax.f32 %v7239_v30, 0.0  ;;  %6977 = vmatmul.mubr.msk.bf16.gmra.mrb[124].mxu0 %vm1891_vm0, %v12114_v1  ;;  %4138 = vmatprep.mubr.bf16.mxu1 %v13768_v13 }
 0x33c   :  { %v4849_v27 = vmax.f32 %v7241_v25, 0.0  ;;  %5624 = vmatprep.mubr.bf16.mxu0 %v12035_v55  ;;  %v13771_v55 = vld [vmem:[#allocation102_spill] sm:$0xff] }
 0x33d   :  { %v12125_v23 = vpack.c.bf16 %v4848_v59, %v4844_v26  ;;  %v2079_v35 = vadd.f32 %v13771_v55, %v11995_v0 }
 0x33e   :  { %v12129_v6 = vpack.c.bf16 %v4849_v27, %v4845_v29  ;;  %v3131_v41 = vpop.f32.mrb[20].mxu0  ;;  %v13772_v27 = vld [vmem:[#allocation99_spill] sm:$0xff] }
 0x33f   :  { %v7243_v61 = vadd.f32 %v3131_v41, %v2073_v43  ;;  %v3133_v25 = vpop.f32.mrb[21].mxu0 }
 0x340   :  { %v7245_v54 = vadd.f32 %v3133_v25, %v2075_v56  ;;  %v3135_v30 = vpop.f32.mrb[22].mxu0  ;;  %v2083_v56 = vadd.f32 %v13773_v46, %v11991_v16 }
 0x341   :  { %v7247_v26 = vadd.f32 %v3135_v30, %v2077_v28  ;;  %v3137_v7 = vpop.f32.mrb[23].mxu0  ;;  %v4852_v22 = vmax.f32 %v7243_v61, 0.0  ;;  %v2085_v28 = vadd.f32 %v10548_v53, %v11995_v0 }
 0x342   :  { %v7249_v59 = vadd.f32 %v3137_v7, %v2079_v35  ;;  %4139 = vmatmul.mubr.bf16.vlgmr.msra.gmra.mrb[128].mxu1 %v13772_v27  ;;  %v4853_v13 = vmax.f32 %v7245_v54, 0.0  ;;  %v13776_v27 = vld [vmem:[#allocation104_spill] sm:$0xff] }
 0x343   :  { %v4856_v29 = vmax.f32 %v7247_v26, 0.0  ;;  %5625 = vmatmul.mubr.bf16.vlgmr.msra.gmra.mrb[128].mxu0 %v12031_v3  ;;  %4460 = vmatpush1.bf16.msra.mxu1 %v8822_v45  ;;  %v2087_v3 = vadd.f32 %v10552_v18, %v11991_v16  ;;  %v13777_v18 = vld [vmem:[#allocation105_spill] sm:$0xff] }
 0x344   :  { %v4857_v43 = vmax.f32 %v7249_v59, 0.0  ;;  %5634 = vmatprep.mubr.bf16.mxu0 %v12060_v8  ;;  %4148 = vmatprep.mubr.bf16.mxu1 %v13774_v19  ;;  %v13775_v8 = vld [vmem:[#allocation106_spill] sm:$0xff]  ;;  %v2095_v19 = vadd.f32 %v10588_v50, %v11995_v0 }
 0x345   :  { %v12143_v41 = vpack.c.bf16 %v4856_v29, %v4852_v22  ;;  %v2089_v54 = vadd.f32 %v13775_v8, %v11995_v0 }
 0x346   :  { %v12148_v61 = vpack.c.bf16 %v4857_v43, %v4853_v13  ;;  %v3141_v25 = vpop.f32.mrb[24].mxu0  ;;  %v13778_v43 = vld [vmem:[#allocation107_spill] sm:$0xff] }
 0x347   :  { %v7251_v55 = vadd.f32 %v3141_v25, %v2083_v56  ;;  %v3143_v35 = vpop.f32.mrb[25].mxu0  ;;  %v2093_v46 = vadd.f32 %v13778_v43, %v11991_v16 }
 0x348   :  { %v7253_v30 = vadd.f32 %v3143_v35, %v2085_v28  ;;  %v3145_v45 = vpop.f32.mrb[26].mxu0 }
 0x349   :  { %v7255_v26 = vadd.f32 %v3145_v45, %v2087_v3  ;;  %v3147_v7 = vpop.f32.mrb[27].mxu0  ;;  %v4860_v22 = vmax.f32 %v7251_v55, 0.0 }
 0x34a   :  { %v7257_v59 = vadd.f32 %v3147_v7, %v2089_v54  ;;  %4149 = vmatmul.mubr.bf16.gmra.mrb[132].mxu1 %v13776_v27  ;;  %v4861_v53 = vmax.f32 %v7253_v30, 0.0  ;;  %v13782_v27 = vld [vmem:[#allocation111_spill] sm:$0xff] }
 0x34b   :  { %v4864_v29 = vmax.f32 %v7255_v26, 0.0  ;;  %5635 = vmatmul.mubr.bf16.gmra.mrb[132].mxu0 %v12056_v63  ;;  %4158 = vmatprep.mubr.bf16.mxu1 %v13777_v18  ;;  %v2097_v63 = vadd.f32 %v10592_v4, %v11991_v16  ;;  %v13781_v4 = vld [vmem:[#allocation109_spill] sm:$0xff]  ;;  %v2105_v18 = vadd.f32 %v10628_v34, %v11995_v0 }
 0x34c   :  { %v4865_v13 = vmax.f32 %v7257_v59, 0.0  ;;  %5644 = vmatprep.mubr.bf16.mxu0 %v12085_v37  ;;  %v13779_v37 = vld [vmem:[#allocation110_spill] sm:$0xff] }
 0x34d   :  { %v12160_v56 = vpack.c.bf16 %v4864_v29, %v4860_v22  ;;  %v2099_v35 = vadd.f32 %v13779_v37, %v11995_v0  ;;  %v13780_v22 = vld [vmem:[#allocation108_spill] sm:$0xff] }
 0x34e   :  { %v12164_v28 = vpack.c.bf16 %v4865_v13, %v4861_v53  ;;  %v3151_v25 = vpop.f32.mrb[28].mxu0  ;;  %v2103_v53 = vadd.f32 %v13782_v27, %v11991_v16 }
 0x34f   :  { %v7259_v3 = vadd.f32 %v3151_v25, %v2093_v46  ;;  %v3153_v55 = vpop.f32.mrb[29].mxu0 }
 0x350   :  { %v7261_v8 = vadd.f32 %v3153_v55, %v2095_v19  ;;  %v3155_v54 = vpop.f32.mrb[30].mxu0 }
 0x351   :  { %v7263_v30 = vadd.f32 %v3155_v54, %v2097_v63  ;;  %v3157_v45 = vpop.f32.mrb[31].mxu0  ;;  %v4868_v7 = vmax.f32 %v7259_v3, 0.0 }
 0x352   :  { %v7265_v26 = vadd.f32 %v3157_v45, %v2099_v35  ;;  %4159 = vmatmul.mubr.bf16.gmra.mrb[136].mxu1 %v13780_v22  ;;  %v4869_v50 = vmax.f32 %v7261_v8, 0.0  ;;  %v13784_v45 = vld [vmem:[#allocation112_spill] sm:$0xff] }
 0x353   :  { %v4872_v59 = vmax.f32 %v7263_v30, 0.0  ;;  %5645 = vmatmul.mubr.bf16.gmra.mrb[136].mxu0 %v12081_v32  ;;  %4168 = vmatprep.mubr.bf16.mxu1 %v13781_v4  ;;  %v2107_v32 = vadd.f32 %v10632_v9, %v11991_v16  ;;  %v13785_v9 = vld [vmem:[#allocation113_spill] sm:$0xff] }
 0x354   :  { %v4873_v29 = vmax.f32 %v7265_v26, 0.0  ;;  %5654 = vmatprep.mubr.bf16.mxu0 %v12110_v2  ;;  %v13783_v2 = vld [vmem:[#allocation114_spill] sm:$0xff] }
 0x355   :  { %v12176_v13 = vpack.c.bf16 %v4872_v59, %v4868_v7  ;;  %v2109_v63 = vadd.f32 %v13783_v2, %v11995_v0  ;;  %v13786_v7 = vld [vmem:[#allocation115_spill] sm:$0xff] }
 0x356   :  { %v12180_v43 = vpack.c.bf16 %v4873_v29, %v4869_v50  ;;  %v3161_v46 = vpop.f32.mrb[32].mxu0  ;;  %v2113_v59 = vadd.f32 %v13786_v7, %v11991_v16  ;;  %v2115_v50 = vadd.f32 %v10668_v33, %v11995_v0 }
 0x357   :  { %v7267_v19 = vadd.f32 %v3161_v46, %v2103_v53  ;;  %v3163_v25 = vpop.f32.mrb[33].mxu0 }
 0x358   :  { %v7269_v3 = vadd.f32 %v3163_v25, %v2105_v18  ;;  %v3165_v55 = vpop.f32.mrb[34].mxu0 }
 0x359   :  { %v7271_v37 = vadd.f32 %v3165_v55, %v2107_v32  ;;  %v3167_v35 = vpop.f32.mrb[35].mxu0  ;;  %v4876_v54 = vmax.f32 %v7267_v19, 0.0  ;;  %v13788_v55 = vld [vmem:[#allocation116_spill] sm:$0xff] }
 0x35a   :  { %v7273_v8 = vadd.f32 %v3167_v35, %v2109_v63  ;;  %4169 = vmatmul.mubr.bf16.gmra.mrb[140].mxu1 %v13784_v45  ;;  %v4877_v34 = vmax.f32 %v7269_v3, 0.0  ;;  %v13790_v35 = vld [vmem:[#allocation119_spill] sm:$0xff] }
 0x35b   :  { %v4880_v30 = vmax.f32 %v7271_v37, 0.0  ;;  %5655 = vmatmul.mubr.bf16.gmra.mrb[140].mxu0 %v12106_v14  ;;  %4178 = vmatprep.mubr.bf16.mxu1 %v13785_v9  ;;  %v2117_v14 = vadd.f32 %v10672_v21, %v11991_v16  ;;  %v13789_v21 = vld [vmem:[#allocation117_spill] sm:$0xff] }
 0x35c   :  { %v4881_v26 = vmax.f32 %v7273_v8, 0.0  ;;  %5664 = vmatprep.mubr.bf16.mxu0 %v12129_v6  ;;  %v13787_v6 = vld [vmem:[#allocation118_spill] sm:$0xff]  ;;  %v2123_v8 = vadd.f32 %v13790_v35, %v11991_v16 }
 0x35d   :  { %v12192_v22 = vpack.c.bf16 %v4880_v30, %v4876_v54  ;;  %v2119_v18 = vadd.f32 %v13787_v6, %v11995_v0  ;;  %v2125_v30 = vadd.f32 %v10708_v49, %v11995_v0 }
 0x35e   :  { %v12196_v29 = vpack.c.bf16 %v4881_v26, %v4877_v34  ;;  %v3171_v4 = vpop.f32.mrb[36].mxu0 }
 0x35f   :  { %v7275_v27 = vadd.f32 %v3171_v4, %v2113_v59  ;;  %v3173_v53 = vpop.f32.mrb[37].mxu0 }
 0x360   :  { %v7277_v46 = vadd.f32 %v3173_v53, %v2115_v50  ;;  %v3175_v32 = vpop.f32.mrb[38].mxu0 }
 0x361   :  { %v7279_v19 = vadd.f32 %v3175_v32, %v2117_v14  ;;  %v3177_v25 = vpop.f32.mrb[39].mxu0  ;;  %v4884_v63 = vmax.f32 %v7275_v27, 0.0 }
 0x362   :  { %v7281_v2 = vadd.f32 %v3177_v25, %v2119_v18  ;;  %4179 = vmatmul.mubr.bf16.gmra.mrb[144].mxu1 %v13788_v55  ;;  %v4885_v33 = vmax.f32 %v7277_v46, 0.0  ;;  %v13792_v46 = vld [vmem:[#allocation121_spill] sm:$0xff] }
 0x363   :  { %v4888_v3 = vmax.f32 %v7279_v19, 0.0  ;;  %5665 = vmatmul.mubr.bf16.gmra.mrb[144].mxu0 %v12125_v23  ;;  %4188 = vmatprep.mubr.bf16.mxu1 %v13789_v21  ;;  %v2127_v23 = vadd.f32 %v10712_v5, %v11991_v16  ;;  %v13791_v5 = vld [vmem:[#allocation120_spill] sm:$0xff]  ;;  %v2135_v32 = vadd.f32 %v13792_v46, %v11995_v0 }
 0x364   :  { %v4889_v37 = vmax.f32 %v7281_v2, 0.0  ;;  %5674 = vmatprep.mubr.bf16.mxu0 %v12148_v61  ;;  %v2129_v61 = vadd.f32 %v10716_v47, %v11995_v0  ;;  %v2133_v47 = vadd.f32 %v10737_v39, %v11991_v16 }
 0x365   :  { %v12208_v54 = vpack.c.bf16 %v4888_v3, %v4884_v63 }
 0x366   :  { %v12212_v45 = vpack.c.bf16 %v4889_v37, %v4885_v33  ;;  %v3181_v34 = vpop.f32.mrb[40].mxu0 }
 0x367   :  { %v7283_v26 = vadd.f32 %v3181_v34, %v2123_v8  ;;  %v3183_v9 = vpop.f32.mrb[41].mxu0 }
 0x368   :  { %v7285_v7 = vadd.f32 %v3183_v9, %v2125_v30  ;;  %v3185_v59 = vpop.f32.mrb[42].mxu0  ;;  %v13795_v30 = vld [vmem:[#allocation122_spill] sm:$0xff]  ;;  %v2143_v9 = vadd.f32 %v10771_v38, %v11991_v16 }
 0x369   :  { %v7287_v50 = vadd.f32 %v3185_v59, %v2127_v23  ;;  %v3187_v4 = vpop.f32.mrb[43].mxu0  ;;  %v4892_v27 = vmax.f32 %v7283_v26, 0.0  ;;  %v13796_v26 = vld [vmem:[#allocation124_spill] sm:$0xff] }
 0x36a   :  { %v7289_v14 = vadd.f32 %v3187_v4, %v2129_v61  ;;  %4189 = vmatmul.mubr.bf16.gmra.mrb[148].mxu1 %v10710_v15  ;;  %v4893_v49 = vmax.f32 %v7285_v7, 0.0  ;;  %v13793_v15 = vld [vmem:[#allocation123_spill] sm:$0xff]  ;;  %v2145_v7 = vadd.f32 %v10773_v60, %v11995_v0 }
 0x36b   :  { %v4896_v53 = vmax.f32 %v7287_v50, 0.0  ;;  %5675 = vmatmul.mubr.bf16.gmra.mrb[148].mxu0 %v12143_v41  ;;  %4198 = vmatprep.mubr.bf16.mxu1 %v13791_v5  ;;  %v2137_v41 = vadd.f32 %v13793_v15, %v11991_v16  ;;  %v2153_v15 = vadd.f32 %v10799_v58, %v11991_v16 }
 0x36c   :  { %v4897_v6 = vmax.f32 %v7289_v14, 0.0  ;;  %5684 = vmatprep.mubr.bf16.mxu0 %v12164_v28  ;;  %v13794_v28 = vld [vmem:[#allocation125_spill] sm:$0xff] }
 0x36d   :  { %v12224_v18 = vpack.c.bf16 %v4896_v53, %v4892_v27  ;;  %v2139_v3 = vadd.f32 %v13794_v28, %v11995_v0 }
 0x36e   :  { %v12228_v19 = vpack.c.bf16 %v4897_v6, %v4893_v49  ;;  %v3191_v25 = vpop.f32.mrb[44].mxu0 }
 0x36f   :  { %v7291_v2 = vadd.f32 %v3191_v25, %v2133_v47  ;;  %v3193_v63 = vpop.f32.mrb[45].mxu0 }
 0x370   :  { %v7293_v55 = vadd.f32 %v3193_v63, %v2135_v32  ;;  %v3195_v33 = vpop.f32.mrb[46].mxu0  ;;  %v13798_v32 = vld [vmem:[#allocation126_spill] sm:$0xff] }
 0x371   :  { %v7295_v37 = vadd.f32 %v3195_v33, %v2137_v41  ;;  %v3197_v39 = vpop.f32.mrb[47].mxu0  ;;  %v4900_v35 = vmax.f32 %v7291_v2, 0.0  ;;  %v13800_v2 = vld [vmem:[#allocation129_spill] sm:$0xff] }
 0x372   :  { %v7297_v21 = vadd.f32 %v3197_v39, %v2139_v3  ;;  %4199 = vmatmul.mubr.bf16.gmra.mrb[152].mxu1 %v13795_v30  ;;  %v4901_v34 = vmax.f32 %v7293_v55, 0.0  ;;  %v2155_v63 = vadd.f32 %v13800_v2, %v11995_v0  ;;  %v13801_v55 = vld [vmem:[#allocation131_spill] sm:$0xff] }
 0x373   :  { %v4904_v8 = vmax.f32 %v7295_v37, 0.0  ;;  %5685 = vmatmul.mubr.bf16.gmra.mrb[152].mxu0 %v12160_v56  ;;  %4208 = vmatprep.mubr.bf16.mxu1 %v13796_v26  ;;  %v2147_v56 = vadd.f32 %v10777_v20, %v11991_v16  ;;  %v13799_v20 = vld [vmem:[#allocation127_spill] sm:$0xff]  ;;  %v13803_v26 = vld [vmem:[#allocation130_spill] sm:$0xff] }
 0x374   :  { %v4905_v23 = vmax.f32 %v7297_v21, 0.0  ;;  %5694 = vmatprep.mubr.bf16.mxu0 %v12180_v43  ;;  %v13797_v43 = vld [vmem:[#allocation128_spill] sm:$0xff] }
 0x375   :  { %v12240_v61 = vpack.c.bf16 %v4904_v8, %v4900_v35  ;;  %v2149_v27 = vadd.f32 %v13797_v43, %v11995_v0 }
 0x376   :  { %v12244_v59 = vpack.c.bf16 %v4905_v23, %v4901_v34  ;;  %v3201_v50 = vpop.f32.mrb[48].mxu0 }
 0x377   :  { %v7299_v4 = vadd.f32 %v3201_v50, %v2143_v9  ;;  %v3203_v14 = vpop.f32.mrb[49].mxu0  ;;  %v13804_v50 = vld [vmem:[#allocation132_spill] sm:$0xff] }
 0x378   :  { %v7301_v53 = vadd.f32 %v3203_v14, %v2145_v7  ;;  %v3205_v49 = vpop.f32.mrb[50].mxu0  ;;  %v2165_v14 = vadd.f32 %v10835_v44, %v11995_v0 }
 0x379   :  { %v7303_v6 = vadd.f32 %v3205_v49, %v2147_v56  ;;  %v3207_v38 = vpop.f32.mrb[51].mxu0  ;;  %v4908_v47 = vmax.f32 %v7299_v4, 0.0  ;;  %v2163_v56 = vadd.f32 %v10833_v12, %v11991_v16 }
 0x37a   :  { %v7305_v5 = vadd.f32 %v3207_v38, %v2149_v27  ;;  %4209 = vmatmul.mubr.bf16.gmra.mrb[156].mxu1 %v13798_v32  ;;  %v4909_v60 = vmax.f32 %v7301_v53, 0.0 }
 0x37b   :  { %v4912_v46 = vmax.f32 %v7303_v6, 0.0  ;;  %5695 = vmatmul.mubr.bf16.gmra.mrb[156].mxu0 %v12176_v13  ;;  %4218 = vmatprep.mubr.bf16.mxu1 %v13799_v20  ;;  %v2157_v13 = vadd.f32 %v13801_v55, %v11991_v16 }
 0x37c   :  { %v4913_v25 = vmax.f32 %v7305_v5, 0.0  ;;  %5704 = vmatprep.mubr.bf16.mxu0 %v12196_v29  ;;  %v13802_v29 = vld [vmem:[#allocation133_spill] sm:$0xff] }
 0x37d   :  { %v12256_v41 = vpack.c.bf16 %v4912_v46, %v4908_v47  ;;  %v2159_v39 = vadd.f32 %v13802_v29, %v11995_v0 }
 0x37e   :  { %v12260_v28 = vpack.c.bf16 %v4913_v25, %v4909_v60  ;;  %v3211_v3 = vpop.f32.mrb[52].mxu0  ;;  %v13806_v25 = vld [vmem:[#allocation134_spill] sm:$0xff] }
 0x37f   :  { %v7307_v33 = vadd.f32 %v3211_v3, %v2153_v15  ;;  %v3213_v37 = vpop.f32.mrb[53].mxu0  ;;  %v2173_v15 = vadd.f32 %v10861_v42, %v11991_v16 }
 0x380   :  { %v7309_v21 = vadd.f32 %v3213_v37, %v2155_v63  ;;  %v3215_v35 = vpop.f32.mrb[54].mxu0  ;;  %v13808_v63 = vld [vmem:[#allocation137_spill] sm:$0xff] }
 0x381   :  { %v7311_v8 = vadd.f32 %v3215_v35, %v2157_v13  ;;  %v3217_v58 = vpop.f32.mrb[55].mxu0  ;;  %v4916_v34 = vmax.f32 %v7307_v33, 0.0  ;;  %v2175_v3 = vadd.f32 %v13808_v63, %v11995_v0  ;;  %v13809_v33 = vld [vmem:[#allocation139_spill] sm:$0xff] }
 0x382   :  { %v7313_v30 = vadd.f32 %v3217_v58, %v2159_v39  ;;  %4219 = vmatmul.mubr.bf16.gmra.mrb[160].mxu1 %v13803_v26  ;;  %v4917_v9 = vmax.f32 %v7309_v21, 0.0 }
 0x383   :  { %v4920_v23 = vmax.f32 %v7311_v8, 0.0  ;;  %5705 = vmatmul.mubr.bf16.gmra.mrb[160].mxu0 %v12192_v22  ;;  %4228 = vmatprep.mubr.bf16.mxu1 %v13804_v50  ;;  %v2167_v22 = vadd.f32 %v10839_v24, %v11991_v16  ;;  %v13807_v24 = vld [vmem:[#allocation135_spill] sm:$0xff]  ;;  %v2183_v50 = vadd.f32 %v10895_v10, %v11991_v16 }
 0x384   :  { %v4921_v7 = vmax.f32 %v7313_v30, 0.0  ;;  %5714 = vmatprep.mubr.bf16.mxu0 %v12212_v45  ;;  %v13805_v45 = vld [vmem:[#allocation136_spill] sm:$0xff] }
 0x385   :  { %v12272_v4 = vpack.c.bf16 %v4920_v23, %v4916_v34  ;;  %v2169_v6 = vadd.f32 %v13805_v45, %v11995_v0  ;;  %v13811_v23 = vld [vmem:[#allocation138_spill] sm:$0xff] }
 0x386   :  { %v12276_v43 = vpack.c.bf16 %v4921_v7, %v4917_v9  ;;  %v3221_v27 = vpop.f32.mrb[56].mxu0  ;;  %v13812_v7 = vld [vmem:[#allocation140_spill] sm:$0xff] }
 0x387   :  { %v7315_v53 = vadd.f32 %v3221_v27, %v2163_v56  ;;  %v3223_v49 = vpop.f32.mrb[57].mxu0 }
 0x388   :  { %v7317_v38 = vadd.f32 %v3223_v49, %v2165_v14  ;;  %v3225_v5 = vpop.f32.mrb[58].mxu0  ;;  %v2185_v14 = vadd.f32 %v10897_v62, %v11995_v0 }
 0x389   :  { %v7319_v47 = vadd.f32 %v3225_v5, %v2167_v22  ;;  %v3227_v12 = vpop.f32.mrb[59].mxu0  ;;  %v4924_v32 = vmax.f32 %v7315_v53, 0.0  ;;  %v13813_v53 = vld [vmem:[#allocation143_spill] sm:$0xff] }
 0x38a   :  { %v7321_v46 = vadd.f32 %v3227_v12, %v2169_v6  ;;  %4229 = vmatmul.mubr.bf16.gmra.mrb[164].mxu1 %v13806_v25  ;;  %v4925_v44 = vmax.f32 %v7317_v38, 0.0 }
 0x38b   :  { %v4928_v60 = vmax.f32 %v7319_v47, 0.0  ;;  %5715 = vmatmul.mubr.bf16.gmra.mrb[164].mxu0 %v12208_v54  ;;  %4238 = vmatprep.mubr.bf16.mxu1 %v13807_v24  ;;  %v2177_v54 = vadd.f32 %v13809_v33, %v11991_v16  ;;  %v8827_v24 = vld [vmem:[%s13224_s3 + $0x104] ss:$8 sps:$4 sm:$0xff]  }
 0x38c   :  { %v4929_v20 = vmax.f32 %v7321_v46, 0.0  ;;  %5724 = vmatprep.mubr.bf16.mxu0 %v12228_v19  ;;  %v13810_v19 = vld [vmem:[#allocation141_spill] sm:$0xff]  ;;  %5945 = vmatprep.subr.bf16.mxu0 %v8827_v24 }
 0x38d   :  { %v12288_v2 = vpack.c.bf16 %v4928_v60, %v4924_v32  ;;  %v2179_v39 = vadd.f32 %v13810_v19, %v11995_v0  ;;  %v13815_v60 = vld [vmem:[#allocation142_spill] sm:$0xff] }
 0x38e   :  { %v12292_v55 = vpack.c.bf16 %v4929_v20, %v4925_v44  ;;  %v3231_v13 = vpop.f32.mrb[60].mxu0  ;;  %v13816_v44 = vld [vmem:[#allocation144_spill] sm:$0xff]  ;;  %v8825_v20 = vld [vmem:[%s13224_s3 + $0x100] ss:$8 sps:$4 sm:$0xff]  }
 0x38f   :  { %v7323_v37 = vadd.f32 %v3231_v13, %v2173_v15  ;;  %v3233_v29 = vpop.f32.mrb[61].mxu0  ;;  %v2193_v15 = vadd.f32 %v10929_v40, %v11991_v16  ;;  %v13817_v13 = vld [vmem:[#allocation147_spill] sm:$0xff]  ;;  %5946 = vmatpush1.bf16.msra.mxu0 %v8825_v20 }
 0x390   :  { %v7325_v21 = vadd.f32 %v3233_v29, %v2175_v3  ;;  %v3235_v35 = vpop.f32.mrb[62].mxu0  ;;  %v2197_v33 = vadd.f32 %v13817_v13, %v11991_v16  ;;  %v13818_v29 = vld [vmem:[#allocation149_spill] sm:$0xff] }
 0x391   :  { %v7327_v8 = vadd.f32 %v3235_v35, %v2177_v54  ;;  %v3237_v42 = vpop.f32.mrb[63].mxu0  ;;  %v4932_v30 = vmax.f32 %v7323_v37, 0.0  ;;  %v2199_v19 = vadd.f32 %v13818_v29, %v11995_v0 }
 0x392   :  { %v7329_v58 = vadd.f32 %v3237_v42, %v2179_v39  ;;  %4239 = vmatmul.mubr.bf16.gmra.mrb[168].mxu1 %v13811_v23  ;;  %v4933_v26 = vmax.f32 %v7325_v21, 0.0  ;;  %v13820_v23 = vld [vmem:[#allocation148_spill] sm:$0xff] }
 0x393   :  { %v4936_v34 = vmax.f32 %v7327_v8, 0.0  ;;  %5725 = vmatmul.mubr.bf16.gmra.mrb[168].mxu0 %v12224_v18  ;;  %4248 = vmatprep.mubr.bf16.mxu1 %v13812_v7  ;;  %v2187_v18 = vadd.f32 %v13813_v53, %v11991_v16  ;;  %v2205_v7 = vadd.f32 %v10965_v51, %v11995_v0 }
 0x394   :  { %v4937_v9 = vmax.f32 %v7329_v58, 0.0  ;;  %5734 = vmatprep.mubr.bf16.mxu0 %v12244_v59  ;;  %v13814_v59 = vld [vmem:[#allocation145_spill] sm:$0xff]  ;;  %v13819_v58 = vld [vmem:[#allocation146_spill] sm:$0xff] }
 0x395   :  { %v12304_v56 = vpack.c.bf16 %v4936_v34, %v4932_v30  ;;  %v2189_v6 = vadd.f32 %v13814_v59, %v11995_v0 }
 0x396   :  { %v12308_v27 = vpack.c.bf16 %v4937_v9, %v4933_v26  ;;  %v3241_v22 = vpop.f32.mrb[64].mxu0  ;;  %v2203_v26 = vadd.f32 %v10963_v48, %v11991_v16 }
 0x397   :  { %v7331_v49 = vadd.f32 %v3241_v22, %v2183_v50  ;;  %v3243_v45 = vpop.f32.mrb[65].mxu0 }
 0x398   :  { %v7333_v38 = vadd.f32 %v3243_v45, %v2185_v14  ;;  %v3245_v5 = vpop.f32.mrb[66].mxu0 }
 0x399   :  { %v7335_v47 = vadd.f32 %v3245_v5, %v2187_v18  ;;  %v3247_v10 = vpop.f32.mrb[67].mxu0  ;;  %v4940_v46 = vmax.f32 %v7331_v49, 0.0 }
 0x39a   :  { %v7337_v12 = vadd.f32 %v3247_v10, %v2189_v6  ;;  %4249 = vmatmul.mubr.bf16.gmra.mrb[172].mxu1 %v13815_v60  ;;  %v4941_v62 = vmax.f32 %v7333_v38, 0.0 }
 0x39b   :  { %v4944_v32 = vmax.f32 %v7335_v47, 0.0  ;;  %5735 = vmatmul.mubr.bf16.gmra.mrb[172].mxu0 %v12240_v61  ;;  %4258 = vmatprep.mubr.bf16.mxu1 %v13816_v44  ;;  %v2195_v61 = vadd.f32 %v10931_v52, %v11995_v0  ;;  %v13822_v47 = vld [vmem:[#allocation150_spill] sm:$0xff]  ;;  %v13825_v44 = vld [vmem:[#allocation155_spill] sm:$0xff] }
 0x39c   :  { %v4945_v25 = vmax.f32 %v7337_v12, 0.0  ;;  %5744 = vmatprep.mubr.bf16.mxu0 %v12260_v28  ;;  %v8828_v12 = vld [vmem:[%s13224_s3 + $0x110] ss:$8 sps:$4 sm:$0xff]   ;;  %v2217_v20 = vadd.f32 %v13825_v44, %v11991_v16 }
 0x39d   :  { %v12326_v63 = vpack.c.bf16 %v4944_v32, %v4940_v46  ;;  %v8830_v46 = vld [vmem:[%s13224_s3 + $0x114] ss:$8 sps:$4 sm:$0xff]   ;;  %v2213_v32 = vadd.f32 %v10991_v36, %v11991_v16 }
 0x39e   :  { %v12330_v3 = vpack.c.bf16 %v4945_v25, %v4941_v62  ;;  %v3251_v28 = vpop.f32.mrb[68].mxu0  ;;  %5947 = vmatprep.subr.bf16.mxu0 %v8830_v46  ;;  %v13835_v46 = vld [vmem:[#allocation166_spill] sm:$0xff] }
 0x39f   :  { %v7339_v54 = vadd.f32 %v3251_v28, %v2193_v15  ;;  %v3253_v37 = vpop.f32.mrb[69].mxu0  ;;  %5948 = vmatpush1.bf16.msra.mxu0 %v8828_v12 }
 0x3a0   :  { %v7341_v39 = vadd.f32 %v3253_v37, %v2195_v61  ;;  %v3255_v40 = vpop.f32.mrb[70].mxu0  ;;  %v13826_v61 = vld [vmem:[#allocation157_spill] sm:$0xff] }
 0x3a1   :  { %v7343_v21 = vadd.f32 %v3255_v40, %v2197_v33  ;;  %v3257_v35 = vpop.f32.mrb[71].mxu0  ;;  %v4948_v42 = vmax.f32 %v7339_v54, 0.0  ;;  %v2219_v28 = vadd.f32 %v13826_v61, %v11995_v0  ;;  %v13836_v61 = vld [vmem:[#allocation163_spill] sm:$0xff] }
 0x3a2   :  { %v7345_v8 = vadd.f32 %v3257_v35, %v2199_v19  ;;  %4259 = vmatmul.mubr.bf16.gmra.mrb[176].mxu1 %v13819_v58  ;;  %v4949_v30 = vmax.f32 %v7341_v39, 0.0  ;;  %v13827_v39 = vld [vmem:[#allocation154_spill] sm:$0xff]  ;;  %v13828_v35 = vld [vmem:[#allocation156_spill] sm:$0xff] }
 0x3a3   :  { %v4952_v52 = vmax.f32 %v7343_v21, 0.0  ;;  %5745 = vmatmul.mubr.bf16.gmra.mrb[176].mxu0 %v12256_v41  ;;  %4268 = vmatprep.mubr.bf16.mxu1 %v13820_v23  ;;  %v2207_v41 = vadd.f32 %v10969_v31, %v11991_v16  ;;  %v13823_v31 = vld [vmem:[#allocation151_spill] sm:$0xff] }
 0x3a4   :  { %v4953_v34 = vmax.f32 %v7345_v8, 0.0  ;;  %5754 = vmatprep.mubr.bf16.mxu0 %v12276_v43  ;;  %v13821_v43 = vld [vmem:[#allocation152_spill] sm:$0xff]  ;;  %v2223_v8 = vadd.f32 %v11025_v57, %v11991_v16 }
 0x3a5   :  { %v12342_v9 = vpack.c.bf16 %v4952_v52, %v4948_v42  ;;  %v2209_v18 = vadd.f32 %v13821_v43, %v11995_v0  ;;  %v2225_v52 = vadd.f32 %v11027_v17, %v11995_v0  ;;  %v8833_v17 = vld [vmem:[%s13224_s3 + $0x124] ss:$8 sps:$4 sm:$0xff]  }
 0x3a6   :  { %v12346_v50 = vpack.c.bf16 %v4953_v34, %v4949_v30  ;;  %v3261_v14 = vpop.f32.mrb[72].mxu0  ;;  %5949 = vmatprep.subr.bf16.mxu0 %v8833_v17 }
 0x3a7   :  { %v7347_v22 = vadd.f32 %v3261_v14, %v2203_v26  ;;  %v3263_v53 = vpop.f32.mrb[73].mxu0 }
 0x3a8   :  { %v7349_v49 = vadd.f32 %v3263_v53, %v2205_v7  ;;  %v3265_v45 = vpop.f32.mrb[74].mxu0 }
 0x3a9   :  { %v7351_v59 = vadd.f32 %v3265_v45, %v2207_v41  ;;  %v3267_v48 = vpop.f32.mrb[75].mxu0  ;;  %v4956_v38 = vmax.f32 %v7347_v22, 0.0 }
 0x3aa   :  { %v7353_v6 = vadd.f32 %v3267_v48, %v2209_v18  ;;  %4269 = vmatmul.mubr.bf16.gmra.mrb[180].mxu1 %v13822_v47  ;;  %v4957_v51 = vmax.f32 %v7349_v49, 0.0  ;;  %v13830_v18 = vld [vmem:[#allocation158_spill] sm:$0xff]  ;;  %v13832_v48 = vld [vmem:[#allocation161_spill] sm:$0xff] }
 0x3ab   :  { %v4960_v5 = vmax.f32 %v7351_v59, 0.0  ;;  %5755 = vmatmul.mubr.bf16.gmra.mrb[180].mxu0 %v12272_v4  ;;  %4278 = vmatprep.mubr.bf16.mxu1 %v13823_v31  ;;  %v13824_v4 = vld [vmem:[#allocation153_spill] sm:$0xff]  ;;  %v13831_v59 = vld [vmem:[#allocation159_spill] sm:$0xff] }
 0x3ac   :  { %v4961_v10 = vmax.f32 %v7353_v6, 0.0  ;;  %5764 = vmatprep.mubr.bf16.mxu0 %v12292_v55  ;;  %v2215_v62 = vadd.f32 %v13824_v4, %v11995_v0  ;;  %v2233_v6 = vadd.f32 %v13832_v48, %v11991_v16  ;;  %v13846_v48 = vld [vmem:[#allocation176_spill] sm:$0xff] }
 0x3ad   :  { %v12364_v60 = vpack.c.bf16 %v4960_v5, %v4956_v38 }
 0x3ae   :  { %v12368_v25 = vpack.c.bf16 %v4961_v10, %v4957_v51  ;;  %v3271_v55 = vpop.f32.mrb[76].mxu0  ;;  %v13834_v10 = vld [vmem:[#allocation164_spill] sm:$0xff] }
 0x3af   :  { %v7355_v24 = vadd.f32 %v3271_v55, %v2213_v32  ;;  %v3273_v15 = vpop.f32.mrb[77].mxu0  ;;  %v2237_v31 = vadd.f32 %v13834_v10, %v11991_v16  ;;  %v2239_v32 = vadd.f32 %v13835_v46, %v11995_v0 }
 0x3b0   :  { %v7357_v13 = vadd.f32 %v3273_v15, %v2215_v62  ;;  %v3275_v36 = vpop.f32.mrb[78].mxu0 }
 0x3b1   :  { %v7359_v33 = vadd.f32 %v3275_v36, %v2217_v20  ;;  %v3277_v54 = vpop.f32.mrb[79].mxu0  ;;  %v4964_v29 = vmax.f32 %v7355_v24, 0.0  ;;  %v13837_v36 = vld [vmem:[#allocation165_spill] sm:$0xff] }
 0x3b2   :  { %v7361_v37 = vadd.f32 %v3277_v54, %v2219_v28  ;;  %4279 = vmatmul.mubr.bf16.gmra.mrb[184].mxu1 %v13827_v39  ;;  %v4965_v40 = vmax.f32 %v7357_v13, 0.0 }
 0x3b3   :  { %v4968_v19 = vmax.f32 %v7359_v33, 0.0  ;;  %5765 = vmatmul.mubr.bf16.gmra.mrb[184].mxu0 %v12288_v2  ;;  %4288 = vmatprep.mubr.bf16.mxu1 %v13828_v35  ;;  %v2227_v2 = vadd.f32 %v11031_v11, %v11991_v16  ;;  %v8831_v11 = vld [vmem:[%s13224_s3 + $0x120] ss:$8 sps:$4 sm:$0xff]  }
 0x3b4   :  { %v4969_v21 = vmax.f32 %v7361_v37, 0.0  ;;  %5774 = vmatprep.mubr.bf16.mxu0 %v12308_v27  ;;  %v13829_v27 = vld [vmem:[#allocation160_spill] sm:$0xff]  ;;  %5950 = vmatpush1.bf16.msra.mxu0 %v8831_v11  ;;  %v13838_v33 = vld [vmem:[#allocation167_spill] sm:$0xff] }
 0x3b5   :  { %v12380_v42 = vpack.c.bf16 %v4968_v19, %v4964_v29  ;;  %v2229_v26 = vadd.f32 %v13829_v27, %v11995_v0  ;;  %v2243_v54 = vadd.f32 %v13838_v33, %v11991_v16  ;;  %v13839_v29 = vld [vmem:[#allocation168_spill] sm:$0xff] }
 0x3b6   :  { %v12384_v58 = vpack.c.bf16 %v4969_v21, %v4965_v40  ;;  %v3281_v30 = vpop.f32.mrb[80].mxu0  ;;  %v2245_v19 = vadd.f32 %v13839_v29, %v11995_v0  ;;  %v13840_v21 = vld [vmem:[#allocation170_spill] sm:$0xff] }
 0x3b7   :  { %v7363_v34 = vadd.f32 %v3281_v30, %v2223_v8  ;;  %v3283_v23 = vpop.f32.mrb[81].mxu0 }
 0x3b8   :  { %v7365_v7 = vadd.f32 %v3283_v23, %v2225_v52  ;;  %v3285_v14 = vpop.f32.mrb[82].mxu0 }
 0x3b9   :  { %v7367_v41 = vadd.f32 %v3285_v14, %v2227_v2  ;;  %v3287_v57 = vpop.f32.mrb[83].mxu0  ;;  %v4972_v53 = vmax.f32 %v7363_v34, 0.0  ;;  %v13842_v14 = vld [vmem:[#allocation169_spill] sm:$0xff] }
 0x3ba   :  { %v7369_v22 = vadd.f32 %v3287_v57, %v2229_v26  ;;  %4289 = vmatmul.mubr.bf16.gmra.mrb[188].mxu1 %v13830_v18  ;;  %v4973_v49 = vmax.f32 %v7365_v7, 0.0  ;;  %v8836_v57 = vld [vmem:[%s13224_s3 + $0x134] ss:$8 sps:$4 sm:$0xff]  }
 0x3bb   :  { %v4976_v43 = vmax.f32 %v7367_v41, 0.0  ;;  %5775 = vmatmul.mubr.bf16.gmra.mrb[188].mxu0 %v12304_v56  ;;  %4298 = vmatprep.mubr.bf16.mxu1 %v13831_v59  ;;  %v13833_v56 = vld [vmem:[#allocation162_spill] sm:$0xff]  ;;  %v8834_v41 = vld [vmem:[%s13224_s3 + $0x130] ss:$8 sps:$4 sm:$0xff]  }
 0x3bc   :  { %v4977_v45 = vmax.f32 %v7369_v22, 0.0  ;;  %5784 = vmatprep.mubr.bf16.mxu0 %v12330_v3  ;;  %v2235_v5 = vadd.f32 %v13833_v56, %v11995_v0  ;;  %v13844_v18 = vld [vmem:[#allocation173_spill] sm:$0xff]  ;;  %5951 = vmatprep.subr.bf16.mxu0 %v8836_v57 }
 0x3bd   :  { %v12402_v38 = vpack.c.bf16 %v4976_v43, %v4972_v53  ;;  %v13843_v43 = vld [vmem:[#allocation171_spill] sm:$0xff]  ;;  %v2253_v11 = vadd.f32 %v13844_v18, %v11991_v16  ;;  %5952 = vmatpush1.bf16.msra.mxu0 %v8834_v41  ;;  %v13858_v18 = vld [vmem:[#allocation188_spill] sm:$0xff] }
 0x3be   :  { %v12406_v47 = vpack.c.bf16 %v4977_v45, %v4973_v49  ;;  %v3291_v51 = vpop.f32.mrb[84].mxu0 }
 0x3bf   :  { %v7371_v12 = vadd.f32 %v3291_v51, %v2233_v6  ;;  %v3293_v3 = vpop.f32.mrb[85].mxu0  ;;  %v2257_v6 = vadd.f32 %v13846_v48, %v11991_v16 }
 0x3c0   :  { %v7373_v4 = vadd.f32 %v3293_v3, %v2235_v5  ;;  %v3295_v62 = vpop.f32.mrb[86].mxu0  ;;  %v13847_v5 = vld [vmem:[#allocation178_spill] sm:$0xff] }
 0x3c1   :  { %v7375_v55 = vadd.f32 %v3295_v62, %v2237_v31  ;;  %v3297_v44 = vpop.f32.mrb[87].mxu0  ;;  %v4980_v24 = vmax.f32 %v7371_v12, 0.0  ;;  %v2259_v51 = vadd.f32 %v13847_v5, %v11995_v0  ;;  %v13848_v62 = vld [vmem:[#allocation175_spill] sm:$0xff] }
 0x3c2   :  { %v7377_v20 = vadd.f32 %v3297_v44, %v2239_v32  ;;  %4299 = vmatmul.mubr.bf16.gmra.mrb[192].mxu1 %v13836_v61  ;;  %v4981_v28 = vmax.f32 %v7373_v4, 0.0 }
 0x3c3   :  { %v4984_v15 = vmax.f32 %v7375_v55, 0.0  ;;  %5785 = vmatmul.mubr.bf16.gmra.mrb[192].mxu0 %v12326_v63  ;;  %4308 = vmatprep.mubr.bf16.mxu1 %v13837_v36  ;;  %v2247_v63 = vadd.f32 %v13840_v21, %v11991_v16 }
 0x3c4   :  { %v4985_v13 = vmax.f32 %v7377_v20, 0.0  ;;  %5794 = vmatprep.mubr.bf16.mxu0 %v12346_v50  ;;  %v13841_v50 = vld [vmem:[#allocation172_spill] sm:$0xff]  ;;  %v13849_v20 = vld [vmem:[#allocation177_spill] sm:$0xff] }
 0x3c5   :  { %v12418_v37 = vpack.c.bf16 %v4984_v15, %v4980_v24  ;;  %v2249_v52 = vadd.f32 %v13841_v50, %v11995_v0  ;;  %v13850_v24 = vld [vmem:[#allocation179_spill] sm:$0xff] }
 0x3c6   :  { %v12422_v39 = vpack.c.bf16 %v4985_v13, %v4981_v28  ;;  %v3301_v40 = vpop.f32.mrb[88].mxu0  ;;  %v2263_v15 = vadd.f32 %v13850_v24, %v11991_v16  ;;  %v13851_v28 = vld [vmem:[#allocation180_spill] sm:$0xff] }
 0x3c7   :  { %v7379_v35 = vadd.f32 %v3301_v40, %v2243_v54  ;;  %v3303_v8 = vpop.f32.mrb[89].mxu0  ;;  %v2265_v13 = vadd.f32 %v13851_v28, %v11995_v0  ;;  %v13852_v54 = vld [vmem:[#allocation182_spill] sm:$0xff] }
 0x3c8   :  { %v7381_v30 = vadd.f32 %v3303_v8, %v2245_v19  ;;  %v3305_v2 = vpop.f32.mrb[90].mxu0 }
 0x3c9   :  { %v7383_v34 = vadd.f32 %v3305_v2, %v2247_v63  ;;  %v3307_v23 = vpop.f32.mrb[91].mxu0  ;;  %v4988_v26 = vmax.f32 %v7379_v35, 0.0  ;;  %v13854_v2 = vld [vmem:[#allocation181_spill] sm:$0xff] }
 0x3ca   :  { %v7385_v27 = vadd.f32 %v3307_v23, %v2249_v52  ;;  %4309 = vmatmul.mubr.bf16.gmra.mrb[196].mxu1 %v13842_v14  ;;  %v4989_v22 = vmax.f32 %v7381_v30, 0.0  ;;  %v8839_v23 = vld [vmem:[%s13224_s3 + $0x144] ss:$8 sps:$4 sm:$0xff]   ;;  %v13856_v14 = vld [vmem:[#allocation185_spill] sm:$0xff] }
 0x3cb   :  { %v4992_v7 = vmax.f32 %v7383_v34, 0.0  ;;  %5795 = vmatmul.mubr.bf16.gmra.mrb[196].mxu0 %v12342_v9  ;;  %4318 = vmatprep.mubr.bf16.mxu1 %v13843_v43  ;;  %v13845_v9 = vld [vmem:[#allocation174_spill] sm:$0xff]  ;;  %v2273_v41 = vadd.f32 %v13856_v14, %v11991_v16  ;;  %v13870_v14 = vld [vmem:[#allocation200_spill] sm:$0xff] }
 0x3cc   :  { %v4993_v53 = vmax.f32 %v7385_v27, 0.0  ;;  %5804 = vmatprep.mubr.bf16.mxu0 %v12368_v25  ;;  %v2255_v49 = vadd.f32 %v13845_v9, %v11995_v0  ;;  %v8837_v34 = vld [vmem:[%s13224_s3 + $0x140] ss:$8 sps:$4 sm:$0xff]   ;;  %5953 = vmatprep.subr.bf16.mxu0 %v8839_v23 }
 0x3cd   :  { %v12440_v17 = vpack.c.bf16 %v4992_v7, %v4988_v26  ;;  %v13855_v7 = vld [vmem:[#allocation183_spill] sm:$0xff]  ;;  %5954 = vmatpush1.bf16.msra.mxu0 %v8837_v34 }
 0x3ce   :  { %v12444_v45 = vpack.c.bf16 %v4993_v53, %v4989_v22  ;;  %v3311_v59 = vpop.f32.mrb[92].mxu0 }
 0x3cf   :  { %v7387_v56 = vadd.f32 %v3311_v59, %v2253_v11  ;;  %v3313_v25 = vpop.f32.mrb[93].mxu0  ;;  %v2277_v11 = vadd.f32 %v13858_v18, %v11991_v16 }
 0x3d0   :  { %v7389_v10 = vadd.f32 %v3313_v25, %v2255_v49  ;;  %v3315_v31 = vpop.f32.mrb[94].mxu0  ;;  %v13859_v49 = vld [vmem:[#allocation190_spill] sm:$0xff] }
 0x3d1   :  { %v7391_v12 = vadd.f32 %v3315_v31, %v2257_v6  ;;  %v3317_v3 = vpop.f32.mrb[95].mxu0  ;;  %v4996_v32 = vmax.f32 %v7387_v56, 0.0  ;;  %v2279_v59 = vadd.f32 %v13859_v49, %v11995_v0  ;;  %v13860_v31 = vld [vmem:[#allocation187_spill] sm:$0xff] }
 0x3d2   :  { %v7393_v46 = vadd.f32 %v3317_v3, %v2259_v51  ;;  %4319 = vmatmul.mubr.bf16.gmra.mrb[200].mxu1 %v13848_v62  ;;  %v4997_v55 = vmax.f32 %v7389_v10, 0.0 }
 0x3d3   :  { %v5000_v4 = vmax.f32 %v7391_v12, 0.0  ;;  %5805 = vmatmul.mubr.bf16.gmra.mrb[200].mxu0 %v12364_v60  ;;  %4328 = vmatprep.mubr.bf16.mxu1 %v13849_v20  ;;  %v2267_v60 = vadd.f32 %v13852_v54, %v11991_v16 }
 0x3d4   :  { %v5001_v44 = vmax.f32 %v7393_v46, 0.0  ;;  %5814 = vmatprep.mubr.bf16.mxu0 %v12384_v58  ;;  %v13853_v58 = vld [vmem:[#allocation184_spill] sm:$0xff]  ;;  %v13861_v46 = vld [vmem:[#allocation189_spill] sm:$0xff] }
 0x3d5   :  { %v12456_v61 = vpack.c.bf16 %v5000_v4, %v4996_v32  ;;  %v2269_v40 = vadd.f32 %v13853_v58, %v11995_v0  ;;  %v13862_v32 = vld [vmem:[#allocation191_spill] sm:$0xff] }
 0x3d6   :  { %v12460_v36 = vpack.c.bf16 %v5001_v44, %v4997_v55  ;;  %v3321_v33 = vpop.f32.mrb[96].mxu0  ;;  %v2283_v4 = vadd.f32 %v13862_v32, %v11991_v16  ;;  %v13863_v55 = vld [vmem:[#allocation192_spill] sm:$0xff] }
 0x3d7   :  { %v7395_v29 = vadd.f32 %v3321_v33, %v2263_v15  ;;  %v3323_v19 = vpop.f32.mrb[97].mxu0  ;;  %v2285_v44 = vadd.f32 %v13863_v55, %v11995_v0  ;;  %v13864_v15 = vld [vmem:[#allocation194_spill] sm:$0xff] }
 0x3d8   :  { %v7397_v21 = vadd.f32 %v3323_v19, %v2265_v13  ;;  %v3325_v63 = vpop.f32.mrb[98].mxu0 }
 0x3d9   :  { %v7399_v35 = vadd.f32 %v3325_v63, %v2267_v60  ;;  %v3327_v8 = vpop.f32.mrb[99].mxu0  ;;  %v5004_v52 = vmax.f32 %v7395_v29, 0.0  ;;  %v13866_v63 = vld [vmem:[#allocation193_spill] sm:$0xff] }
 0x3da   :  { %v7401_v50 = vadd.f32 %v3327_v8, %v2269_v40  ;;  %4329 = vmatmul.mubr.bf16.gmra.mrb[204].mxu1 %v13854_v2  ;;  %v5005_v27 = vmax.f32 %v7397_v21, 0.0  ;;  %v8842_v8 = vld [vmem:[%s13224_s3 + $0x154] ss:$8 sps:$4 sm:$0xff]  }
 0x3db   :  { %v5008_v30 = vmax.f32 %v7399_v35, 0.0  ;;  %5815 = vmatmul.mubr.bf16.gmra.mrb[204].mxu0 %v12380_v42  ;;  %4338 = vmatprep.mubr.bf16.mxu1 %v13855_v7  ;;  %v13857_v42 = vld [vmem:[#allocation186_spill] sm:$0xff]  ;;  %v8840_v35 = vld [vmem:[%s13224_s3 + $0x150] ss:$8 sps:$4 sm:$0xff]  }
 0x3dc   :  { %v5009_v26 = vmax.f32 %v7401_v50, 0.0  ;;  %5824 = vmatprep.mubr.bf16.mxu0 %v12406_v47  ;;  %v2275_v22 = vadd.f32 %v13857_v42, %v11995_v0  ;;  %v13868_v2 = vld [vmem:[#allocation197_spill] sm:$0xff]  ;;  %5955 = vmatprep.subr.bf16.mxu0 %v8842_v8 }
 0x3dd   :  { %v12478_v57 = vpack.c.bf16 %v5008_v30, %v5004_v52  ;;  %v13867_v30 = vld [vmem:[#allocation195_spill] sm:$0xff]  ;;  %v2293_v34 = vadd.f32 %v13868_v2, %v11991_v16  ;;  %5956 = vmatpush1.bf16.msra.mxu0 %v8840_v35 }
 0x3de   :  { %v12482_v53 = vpack.c.bf16 %v5009_v26, %v5005_v27  ;;  %v3331_v43 = vpop.f32.mrb[100].mxu0  ;;  %v13882_v2 = vld [vmem:[#allocation211_spill] sm:$0xff] }
 0x3df   :  { %v7403_v9 = vadd.f32 %v3331_v43, %v2273_v41  ;;  %v3333_v47 = vpop.f32.mrb[101].mxu0  ;;  %v2297_v41 = vadd.f32 %v13870_v14, %v11991_v16 }
 0x3e0   :  { %v7405_v48 = vadd.f32 %v3333_v47, %v2275_v22  ;;  %v3335_v6 = vpop.f32.mrb[102].mxu0  ;;  %v13871_v22 = vld [vmem:[#allocation202_spill] sm:$0xff] }
 0x3e1   :  { %v7407_v56 = vadd.f32 %v3335_v6, %v2277_v11  ;;  %v3337_v25 = vpop.f32.mrb[103].mxu0  ;;  %v5012_v51 = vmax.f32 %v7403_v9, 0.0  ;;  %v2299_v43 = vadd.f32 %v13871_v22, %v11995_v0  ;;  %v13872_v6 = vld [vmem:[#allocation199_spill] sm:$0xff] }
 0x3e2   :  { %v7409_v5 = vadd.f32 %v3337_v25, %v2279_v59  ;;  %4339 = vmatmul.mubr.bf16.gmra.mrb[208].mxu1 %v13860_v31  ;;  %v5013_v12 = vmax.f32 %v7405_v48, 0.0 }
 0x3e3   :  { %v5016_v10 = vmax.f32 %v7407_v56, 0.0  ;;  %5825 = vmatmul.mubr.bf16.gmra.mrb[208].mxu0 %v12402_v38  ;;  %4348 = vmatprep.mubr.bf16.mxu1 %v13861_v46  ;;  %v2287_v38 = vadd.f32 %v13864_v15, %v11991_v16 }
 0x3e4   :  { %v5017_v3 = vmax.f32 %v7409_v5, 0.0  ;;  %5834 = vmatprep.mubr.bf16.mxu0 %v12422_v39  ;;  %v13865_v39 = vld [vmem:[#allocation196_spill] sm:$0xff]  ;;  %v13873_v5 = vld [vmem:[#allocation201_spill] sm:$0xff] }
 0x3e5   :  { %v12494_v62 = vpack.c.bf16 %v5016_v10, %v5012_v51  ;;  %v2289_v33 = vadd.f32 %v13865_v39, %v11995_v0  ;;  %v13874_v51 = vld [vmem:[#allocation203_spill] sm:$0xff] }
 0x3e6   :  { %v12498_v20 = vpack.c.bf16 %v5017_v3, %v5013_v12  ;;  %v3341_v24 = vpop.f32.mrb[104].mxu0  ;;  %v2303_v10 = vadd.f32 %v13874_v51, %v11991_v16  ;;  %v13875_v12 = vld [vmem:[#allocation204_spill] sm:$0xff] }
 0x3e7   :  { %v7411_v28 = vadd.f32 %v3341_v24, %v2283_v4  ;;  %v3343_v13 = vpop.f32.mrb[105].mxu0  ;;  %v2305_v3 = vadd.f32 %v13875_v12, %v11995_v0  ;;  %v13876_v4 = vld [vmem:[#allocation206_spill] sm:$0xff] }
 0x3e8   :  { %v7413_v54 = vadd.f32 %v3343_v13, %v2285_v44  ;;  %v3345_v60 = vpop.f32.mrb[106].mxu0 }
 0x3e9   :  { %v7415_v29 = vadd.f32 %v3345_v60, %v2287_v38  ;;  %v3347_v19 = vpop.f32.mrb[107].mxu0  ;;  %v5020_v40 = vmax.f32 %v7411_v28, 0.0  ;;  %v13878_v60 = vld [vmem:[#allocation205_spill] sm:$0xff] }
 0x3ea   :  { %v7417_v58 = vadd.f32 %v3347_v19, %v2289_v33  ;;  %4349 = vmatmul.mubr.bf16.gmra.mrb[212].mxu1 %v13866_v63  ;;  %v5021_v50 = vmax.f32 %v7413_v54, 0.0  ;;  %v8845_v19 = vld [vmem:[%s13224_s3 + $0x164] ss:$8 sps:$4 sm:$0xff]  }
 0x3eb   :  { %v5024_v21 = vmax.f32 %v7415_v29, 0.0  ;;  %5835 = vmatmul.mubr.bf16.gmra.mrb[212].mxu0 %v12418_v37  ;;  %4358 = vmatprep.mubr.bf16.mxu1 %v13867_v30  ;;  %v13869_v37 = vld [vmem:[#allocation198_spill] sm:$0xff] }
 0x3ec   :  { %v5025_v52 = vmax.f32 %v7417_v58, 0.0  ;;  %5844 = vmatprep.mubr.bf16.mxu0 %v12444_v45  ;;  %v2295_v27 = vadd.f32 %v13869_v37, %v11995_v0  ;;  %v8843_v29 = vld [vmem:[%s13224_s3 + $0x160] ss:$8 sps:$4 sm:$0xff]   ;;  %5957 = vmatprep.subr.bf16.mxu0 %v8845_v19 }
 0x3ed   :  { %v12516_v23 = vpack.c.bf16 %v5024_v21, %v5020_v40  ;;  %v13879_v21 = vld [vmem:[#allocation207_spill] sm:$0xff]  ;;  %v13880_v63 = vld [vmem:[#allocation50_spill] sm:$0xff]  ;;  %5958 = vmatpush1.bf16.msra.mxu0 %v8843_v29 }
 0x3ee   :  { %v12520_v26 = vpack.c.bf16 %v5025_v52, %v5021_v50  ;;  %v3351_v7 = vpop.f32.mrb[108].mxu0  ;;  %v2313_v35 = vadd.f32 %v13880_v63, %v11991_v16  ;;  %v13894_v63 = vld [vmem:[#allocation219_spill] sm:$0xff] }
 0x3ef   :  { %v7419_v42 = vadd.f32 %v3351_v7, %v2293_v34  ;;  %v3353_v45 = vpop.f32.mrb[109].mxu0  ;;  %v2317_v34 = vadd.f32 %v13882_v2, %v11991_v16 }
 0x3f0   :  { %v7421_v18 = vadd.f32 %v3353_v45, %v2295_v27  ;;  %v3355_v11 = vpop.f32.mrb[110].mxu0  ;;  %v13883_v27 = vld [vmem:[#allocation213_spill] sm:$0xff] }
 0x3f1   :  { %v7423_v9 = vadd.f32 %v3355_v11, %v2297_v41  ;;  %v3357_v47 = vpop.f32.mrb[111].mxu0  ;;  %v5028_v59 = vmax.f32 %v7419_v42, 0.0  ;;  %v2319_v7 = vadd.f32 %v13883_v27, %v11995_v0  ;;  %v13884_v11 = vld [vmem:[#allocation210_spill] sm:$0xff] }
 0x3f2   :  { %v7425_v49 = vadd.f32 %v3357_v47, %v2299_v43  ;;  %4359 = vmatmul.mubr.bf16.gmra.mrb[216].mxu1 %v13872_v6  ;;  %v5029_v56 = vmax.f32 %v7421_v18, 0.0 }
 0x3f3   :  { %v5032_v48 = vmax.f32 %v7423_v9, 0.0  ;;  %5845 = vmatmul.mubr.bf16.gmra.mrb[216].mxu0 %v12440_v17  ;;  %4368 = vmatprep.mubr.bf16.mxu1 %v13873_v5  ;;  %v2307_v17 = vadd.f32 %v13876_v4, %v11991_v16 }
 0x3f4   :  { %v5033_v25 = vmax.f32 %v7425_v49, 0.0  ;;  %5854 = vmatprep.mubr.bf16.mxu0 %v12460_v36  ;;  %v13877_v36 = vld [vmem:[#allocation208_spill] sm:$0xff] }
 0x3f5   :  { %v12532_v31 = vpack.c.bf16 %v5032_v48, %v5028_v59  ;;  %v2309_v24 = vadd.f32 %v13877_v36, %v11995_v0  ;;  %v13885_v49 = vld [vmem:[#allocation212_spill] sm:$0xff] }
 0x3f6   :  { %v12536_v46 = vpack.c.bf16 %v5033_v25, %v5029_v56  ;;  %v3361_v32 = vpop.f32.mrb[112].mxu0  ;;  %v13886_v59 = vld [vmem:[#allocation52_spill] sm:$0xff]  ;;  %v13887_v56 = vld [vmem:[#allocation54_spill] sm:$0xff] }
 0x3f7   :  { %v7427_v55 = vadd.f32 %v3361_v32, %v2303_v10  ;;  %v3363_v44 = vpop.f32.mrb[113].mxu0  ;;  %v2323_v48 = vadd.f32 %v13886_v59, %v11991_v16  ;;  %v2325_v25 = vadd.f32 %v13887_v56, %v11995_v0  ;;  %v13888_v10 = vld [vmem:[#allocation215_spill] sm:$0xff]  ;;  %v13889_v32 = vld [vmem:[#allocation217_spill] sm:$0xff] }
 0x3f8   :  { %v7429_v15 = vadd.f32 %v3363_v44, %v2305_v3  ;;  %v3365_v38 = vpop.f32.mrb[114].mxu0  ;;  %v2327_v12 = vadd.f32 %v13888_v10, %v11991_v16  ;;  %v2329_v4 = vadd.f32 %v13889_v32, %v11995_v0  ;;  %v13905_v59 = vld [vmem:[#allocation85_spill] sm:$0xff]  ;;  %v8857_v56 = vld [vmem:[%s13224_s3 + $0x1a4] ss:$8 sps:$4 sm:$0xff]   ;;  %v8861_v32 = vld [vmem:[%s13224_s3 + $0x1c0] ss:$8 sps:$4 sm:$0xff]  }
 0x3f9   :  { %v7431_v28 = vadd.f32 %v3365_v38, %v2307_v17  ;;  %v3367_v13 = vpop.f32.mrb[115].mxu0  ;;  %v5036_v33 = vmax.f32 %v7427_v55, 0.0  ;;  %v13890_v38 = vld [vmem:[#allocation214_spill] sm:$0xff]  ;;  %v8858_v10 = vld [vmem:[%s13224_s3 + $0x1b0] ss:$8 sps:$4 sm:$0xff]  }
 0x3fa   :  { %v7433_v39 = vadd.f32 %v3367_v13, %v2309_v24  ;;  %4369 = vmatmul.mubr.bf16.gmra.mrb[220].mxu1 %v13878_v60  ;;  %v5037_v58 = vmax.f32 %v7429_v15, 0.0  ;;  %v8848_v13 = vld [vmem:[%s13224_s3 + $0x174] ss:$8 sps:$4 sm:$0xff]  }
 0x3fb   :  { %v5040_v54 = vmax.f32 %v7431_v28, 0.0  ;;  %5855 = vmatmul.mubr.bf16.gmra.mrb[220].mxu0 %v12456_v61  ;;  %4378 = vmatprep.mubr.bf16.mxu1 %v13879_v21  ;;  %v13881_v61 = vld [vmem:[#allocation209_spill] sm:$0xff]  ;;  %v13892_v60 = vld [vmem:[#allocation56_spill] sm:$0xff] }
 0x3fc   :  { %v5041_v40 = vmax.f32 %v7433_v39, 0.0  ;;  %5864 = vmatprep.mubr.bf16.mxu0 %v12482_v53  ;;  %v2315_v50 = vadd.f32 %v13881_v61, %v11995_v0  ;;  %v8846_v28 = vld [vmem:[%s13224_s3 + $0x170] ss:$8 sps:$4 sm:$0xff]   ;;  %v2333_v29 = vadd.f32 %v13892_v60, %v11991_v16  ;;  %5959 = vmatprep.subr.bf16.mxu0 %v8848_v13  ;;  %v13917_v13 = vld [vmem:[#allocation11_spill] sm:$0xff] }
 0x3fd   :  { %v12554_v8 = vpack.c.bf16 %v5040_v54, %v5036_v33  ;;  %v13891_v54 = vld [vmem:[#allocation216_spill] sm:$0xff]  ;;  %5960 = vmatpush1.bf16.msra.mxu0 %v8846_v28  ;;  %v13916_v28 = vld [vmem:[#allocation10_spill] sm:$0xff]  ;;  %v13919_v60 = vld [vmem:[#allocation13_spill] sm:$0xff] }
 0x3fe   :  { %v12558_v52 = vpack.c.bf16 %v5041_v40, %v5037_v58  ;;  %v3371_v30 = vpop.f32.mrb[116].mxu0 }
 0x3ff   :  { %v7435_v37 = vadd.f32 %v3371_v30, %v2313_v35  ;;  %v3373_v53 = vpop.f32.mrb[117].mxu0  ;;  %v2337_v35 = vadd.f32 %v13894_v63, %v11991_v16  ;;  %v13897_v16 = vld [vmem:[#allocation220_spill] sm:$0xff] }
 0x400   :  { %v7437_v14 = vadd.f32 %v3373_v53, %v2315_v50  ;;  %v3375_v41 = vpop.f32.mrb[118].mxu0  ;;  %v13926_v63 = vld [vmem:[#allocation20_spill] sm:$0xff] }
 0x401   :  { %v7439_v42 = vadd.f32 %v3375_v41, %v2317_v34  ;;  %v3377_v45 = vpop.f32.mrb[119].mxu0  ;;  %v5044_v43 = vmax.f32 %v7435_v37, 0.0  ;;  %v13896_v41 = vld [vmem:[#allocation218_spill] sm:$0xff] }
 0x402   :  { %v7441_v22 = vadd.f32 %v3377_v45, %v2319_v7  ;;  %4379 = vmatmul.mubr.bf16.gmra.mrb[224].mxu1 %v13884_v11  ;;  %v5045_v9 = vmax.f32 %v7437_v14, 0.0  ;;  %v13899_v11 = vld [vmem:[#allocation62_spill] sm:$0xff] }
 0x403   :  { %v5048_v18 = vmax.f32 %v7439_v42, 0.0  ;;  %5865 = vmatmul.mubr.bf16.gmra.mrb[224].mxu0 %v12478_v57  ;;  %4388 = vmatprep.mubr.bf16.mxu1 %v13885_v49  ;;  %v13903_v49 = vld [vmem:[#allocation77_spill] sm:$0xff] }
 0x404   :  { %v5049_v47 = vmax.f32 %v7441_v22, 0.0  ;;  %5874 = vmatprep.mubr.bf16.mxu0 %v12498_v20 }
 0x405   :  { %v5184_v6 = vpack.c.bf16 %v5048_v18, %v5044_v43  ;;  %v8849_v18 = vld [vmem:[%s13224_s3 + $0x180] ss:$8 sps:$4 sm:$0xff]  }
 0x406   :  { %v5185_v5 = vpack.c.bf16 %v5049_v47, %v5045_v9  ;;  %v3381_v51 = vpop.f32.mrb[120].mxu0  ;;  %v13902_v9 = vld [vmem:[#allocation74_spill] sm:$0xff]  ;;  %v8852_v47 = vld [vmem:[%s13224_s3 + $0x190] ss:$8 sps:$4 sm:$0xff]  }
 0x407   :  { %v7443_v3 = vadd.f32 %v3381_v51, %v2323_v48  ;;  %v3383_v57 = vpop.f32.mrb[121].mxu0  ;;  %v13906_v48 = vld [vmem:[#allocation222_spill] sm:$0xff]  ;;  %v13909_v51 = vld [vmem:[#allocation3_spill] sm:$0xff] }
 0x408   :  { %v7445_v20 = vadd.f32 %v3383_v57, %v2325_v25  ;;  %v3385_v17 = vpop.f32.mrb[122].mxu0  ;;  %v13907_v25 = vmov 0   ;;  %v13911_v57 = vld [vmem:[#allocation5_spill] sm:$0xff] }
 0x409   :  { %v7447_v55 = vadd.f32 %v3385_v17, %v2327_v12  ;;  %v3387_v44 = vpop.f32.mrb[123].mxu0  ;;  %v5052_v24 = vmax.f32 %v7443_v3, 0.0  ;;  %v8860_v12 = vld [vmem:[%s13224_s3 + $0x1b4] ss:$8 sps:$4 sm:$0xff]   ;;  %v13913_v17 = vld [vmem:[#allocation7_spill] sm:$0xff] }
 0x40a   :  { %v7449_v36 = vadd.f32 %v3387_v44, %v2329_v4  ;;  %4389 = vmatmul.mubr.bf16.gmra.mrb[228].mxu1 %v13890_v38  ;;  %v5053_v39 = vmax.f32 %v7445_v20, 0.0  ;;  %v13910_v3 = vld [vmem:[#allocation4_spill] sm:$0xff]  ;;  %v8863_v4 = vld [vmem:[%s13224_s3 + $0x1c4] ss:$8 sps:$4 sm:$0xff]  }
 0x40b   :  { %v5056_v15 = vmax.f32 %v7447_v55, 0.0  ;;  %5875 = vmatmul.mubr.bf16.gmra.mrb[228].mxu0 %v12494_v62  ;;  %4398 = vmatprep.mubr.bf16.mxu1 %v13891_v54  ;;  %v13893_v62 = vld [vmem:[#allocation58_spill] sm:$0xff]  ;;  %v8864_v55 = vld [vmem:[%s13224_s3 + $0x1d0] ss:$8 sps:$4 sm:$0xff]   ;;  %v8866_v44 = vld [vmem:[%s13224_s3 + $0x1d4] ss:$8 sps:$4 sm:$0xff]  }
 0x40c   :  { %v5057_v33 = vmax.f32 %v7449_v36, 0.0  ;;  %5884 = vmatprep.mubr.bf16.mxu0 %v12520_v26  ;;  %v2335_v58 = vadd.f32 %v13893_v62, %v11995_v0  ;;  %v13895_v26 = vld [vmem:[#allocation221_spill] sm:$0xff]  ;;  %v13912_v20 = vld [vmem:[#allocation6_spill] sm:$0xff]  ;;  %v13914_v36 = vld [vmem:[#allocation8_spill] sm:$0xff] }
 0x40d   :  { %v5188_v19 = vpack.c.bf16 %v5056_v15, %v5052_v24  ;;  %v2339_v30 = vadd.f32 %v13895_v26, %v11995_v0  ;;  %v13898_v0 = vld [vmem:[#allocation60_spill] sm:$0xff]  ;;  %v13915_v24 = vld [vmem:[#allocation9_spill] sm:$0xff]  ;;  %v8867_v15 = vld [vmem:[%s13224_s3 + $0x1e0] ss:$8 sps:$4 sm:$0xff]  }
 0x40e   :  { %v5189_v40 = vpack.c.bf16 %v5057_v33, %v5053_v39  ;;  %v3391_v21 = vpop.f32.mrb[124].mxu0  ;;  %v8869_v38 = vld [vmem:[%s13224_s3 + $0x1e4] ss:$8 sps:$4 sm:$0xff]   ;;  %v8870_v39 = vld [vmem:[%s13224_s3 + $0x1f0] ss:$8 sps:$4 sm:$0xff]  }
 0x40f   :  { %v7451_v61 = vadd.f32 %v3391_v21, %v2333_v29  ;;  %v3393_v50 = vpop.f32.mrb[125].mxu0  ;;  %v8872_v33 = vld [vmem:[%s13224_s3 + $0x1f4] ss:$8 sps:$4 sm:$0xff]   ;;  %v13920_v29 = vld [vmem:[#allocation14_spill] sm:$0xff]  ;;  %v13925_v21 = vld [vmem:[#allocation19_spill] sm:$0xff] }
 0x410   :  { %v7453_v2 = vadd.f32 %v3393_v50, %v2335_v58  ;;  %v3395_v34 = vpop.f32.mrb[126].mxu0  ;;  %v13918_v54 = vld [vmem:[#allocation12_spill] sm:$0xff]  ;;  %v13923_v58 = vld [vmem:[#allocation17_spill] sm:$0xff]  ;;  %v13929_v50 = vld [vmem:[#allocation23_spill] sm:$0xff] }
 0x411   :  { %v7455_v37 = vadd.f32 %v3395_v34, %v2337_v35  ;;  %v3397_v53 = vpop.f32.mrb[127].mxu0  ;;  %v5060_v7 = vmax.f32 %v7451_v61, 0.0  ;;  %v13922_v62 = vld [vmem:[#allocation16_spill] sm:$0xff]  ;;  %v13927_v35 = vld [vmem:[#allocation21_spill] sm:$0xff]  ;;  %v13928_v61 = vld [vmem:[#allocation22_spill] sm:$0xff] }
 0x412   :  { %v7457_v27 = vadd.f32 %v3397_v53, %v2339_v30  ;;  %4399 = vmatmul.mubr.bf16.gmra.mrb[232].mxu1 %v13896_v41  ;;  %v5061_v42 = vmax.f32 %v7453_v2, 0.0  ;;  %v13930_v26 = vld [vmem:[#allocation24_spill] sm:$0xff]  ;;  %v13931_v30 = vld [vmem:[#allocation25_spill] sm:$0xff]  ;;  %v13932_v2 = vld [vmem:[#allocation26_spill] sm:$0xff] }
 0x413   :  { %v5064_v14 = vmax.f32 %v7455_v37, 0.0  ;;  %5885 = vmatmul.mubr.bf16.gmra.mrb[232].mxu0 %v12516_v23  ;;  %4408 = vmatprep.mubr.bf16.mxu1 %v13897_v16  ;;  %v8851_v23 = vld [vmem:[%s13224_s3 + $0x184] ss:$8 sps:$4 sm:$0xff]   ;;  %v13934_v37 = vld [vmem:[#allocation28_spill] sm:$0xff] }
 0x414   :  { %v5065_v45 = vmax.f32 %v7457_v27, 0.0  ;;  %5894 = vmatprep.mubr.bf16.mxu0 %v12536_v46  ;;  %5961 = vmatprep.subr.bf16.mxu0 %v8851_v23  ;;  %v13900_v46 = vld [vmem:[#allocation66_spill] sm:$0xff]  ;;  %v13933_v34 = vld [vmem:[#allocation27_spill] sm:$0xff]  ;;  %v901_v53 = vsub.s32 2, %v13934_v37  ;;  %v905_v27 = vsub.s32 3, %v13934_v37 }
 0x415   :  { %v5192_v22 = vpack.c.bf16 %v5064_v14, %v5060_v7  ;;  %5962 = vmatpush1.bf16.msra.mxu0 %v8849_v18  ;;  %v13935_v7 = vld [vmem:[#allocation29_spill] sm:$0xff]  ;;  %v8873_v14 = vld [vmem:[%s13225_s2] sm:$0xf] }
 0x416   :  { %v5193_v43 = vpack.c.bf16 %v5065_v45, %v5061_v42  ;;  %v12744_v41 = vrot.slane %v8873_v14, %v901_v53  ;;  %v12746_v42 = vrot.slane %v8873_v14, %v905_v27  ;;  %v13939_v53 = vld [vmem:[#allocation33_spill] sm:$0xff] }
 0x41a   :  { %4409 = vmatmul.mubr.bf16.gmra.mrb[236].mxu1 %v13898_v0 }
 0x41b   :  { %5895 = vmatmul.mubr.bf16.gmra.mrb[236].mxu0 %v12532_v31  ;;  %4418 = vmatprep.mubr.bf16.mxu1 %v13899_v11  ;;  %v13901_v31 = vld [vmem:[#allocation69_spill] sm:$0xff] }
 0x41c   :  { %5904 = vmatprep.mubr.bf16.mxu0 %v12558_v52  ;;  %v8854_v52 = vld [vmem:[%s13224_s3 + $0x194] ss:$8 sps:$4 sm:$0xff]  }
 0x41d   :  { %5963 = vmatprep.subr.bf16.mxu0 %v8854_v52 }
 0x41e   :  { %5964 = vmatpush1.bf16.msra.mxu0 %v8852_v47 }
 0x41f   :  { %5965 = vmatprep.subr.bf16.mxu0 %v8857_v56 }
 0x422   :  { %4419 = vmatmul.mubr.bf16.gmra.mrb[240].mxu1 %v13900_v46 }
 0x423   :  { %5905 = vmatmul.mubr.bf16.gmra.mrb[240].mxu0 %v12554_v8  ;;  %4428 = vmatprep.mubr.bf16.mxu1 %v13901_v31  ;;  %v13904_v8 = vld [vmem:[#allocation82_spill] sm:$0xff] }
 0x424   :  { %5914 = vmatprep.mubr.bf16.mxu0 %v5185_v5  ;;  %v13908_v5 = vld [vmem:[#allocation2_spill] sm:$0xff] }
 0x42a   :  { %4429 = vmatmul.mubr.bf16.gmra.mrb[244].mxu1 %v13902_v9  ;;  %v13936_v9 = vld [vmem:[#allocation30_spill] sm:$0xff] }
 0x42b   :  { %5915 = vmatmul.mubr.bf16.gmra.mrb[244].mxu0 %v5184_v6  ;;  %4438 = vmatprep.mubr.bf16.mxu1 %v13903_v49  ;;  %v8855_v6 = vld [vmem:[%s13224_s3 + $0x1a0] ss:$8 sps:$4 sm:$0xff]  }
 0x42c   :  { %5924 = vmatprep.mubr.bf16.mxu0 %v5189_v40  ;;  %5966 = vmatpush1.bf16.msra.mxu0 %v8855_v6  ;;  %v13924_v40 = vld [vmem:[#allocation18_spill] sm:$0xff] }
 0x42d   :  { %5967 = vmatprep.subr.bf16.mxu0 %v8860_v12 }
 0x430   :  { %5968 = vmatpush1.bf16.msra.mxu0 %v8858_v10 }
 0x431   :  { %5969 = vmatprep.subr.bf16.mxu0 %v8863_v4 }
 0x432   :  { %4439 = vmatmul.mubr.bf16.gmra.mrb[248].mxu1 %v13904_v8 }
 0x433   :  { %5925 = vmatmul.mubr.bf16.gmra.mrb[248].mxu0 %v5188_v19  ;;  %4448 = vmatprep.mubr.bf16.mxu1 %v13905_v59  ;;  %v13921_v19 = vld [vmem:[#allocation15_spill] sm:$0xff] }
 0x434   :  { %5934 = vmatprep.mubr.bf16.mxu0 %v5193_v43  ;;  %5970 = vmatpush1.bf16.msra.mxu0 %v8861_v32  ;;  %v13937_v32 = vld [vmem:[#allocation31_spill] sm:$0xff] }
 0x435   :  { %5971 = vmatprep.subr.bf16.mxu0 %v8866_v44 }
 0x438   :  { %5972 = vmatpush1.bf16.msra.mxu0 %v8864_v55 }
 0x439   :  { %5973 = vmatprep.subr.bf16.mxu0 %v8869_v38 }
 0x43a   :  { %4449 = vmatmul.mubr.bf16.gmra.mrb[252].mxu1 %v13906_v48 }
 0x43b   :  { %5935 = vmatmul.mubr.bf16.gmra.mrb[252].mxu0 %v5192_v22  ;;  %4491 = vmatprep.mubr.bf16.mxu1 %v13907_v25 }
 0x43c   :  { %5974 = vmatpush1.bf16.msra.mxu0 %v8867_v15 }
 0x43d   :  { %5975 = vmatprep.subr.bf16.mxu0 %v8872_v33 }
 0x440   :  { %5976 = vmatpush1.bf16.msra.mxu0 %v8870_v39 }
 0x442   :  { %6978 = vmatmul.mubr.msk.bf16.vlgmr.msra.gmra.mrb[128].mxu1 %vm1891_vm0, %v13908_v5 }
 0x443   :  { %4501 = vmatprep.mubr.bf16.mxu1 %v13907_v25 }
 0x44a   :  { %6979 = vmatmul.mubr.msk.bf16.gmra.mrb[132].mxu1 %vm1891_vm0, %v13909_v51 }
 0x44b   :  { %4511 = vmatprep.mubr.bf16.mxu1 %v13907_v25 }
 0x452   :  { %6980 = vmatmul.mubr.msk.bf16.gmra.mrb[136].mxu1 %vm1891_vm0, %v13910_v3 }
 0x453   :  { %4521 = vmatprep.mubr.bf16.mxu1 %v13907_v25 }
 0x45a   :  { %6981 = vmatmul.mubr.msk.bf16.gmra.mrb[140].mxu1 %vm1891_vm0, %v13911_v57 }
 0x45b   :  { %4531 = vmatprep.mubr.bf16.mxu1 %v13907_v25 }
 0x462   :  { %6982 = vmatmul.mubr.msk.bf16.gmra.mrb[144].mxu1 %vm1891_vm0, %v13912_v20 }
 0x463   :  { %4541 = vmatprep.mubr.bf16.mxu1 %v13907_v25 }
 0x46a   :  { %6983 = vmatmul.mubr.msk.bf16.gmra.mrb[148].mxu1 %vm1891_vm0, %v13913_v17 }
 0x46b   :  { %4551 = vmatprep.mubr.bf16.mxu1 %v13907_v25 }
 0x472   :  { %6984 = vmatmul.mubr.msk.bf16.gmra.mrb[152].mxu1 %vm1891_vm0, %v13914_v36 }
 0x473   :  { %4561 = vmatprep.mubr.bf16.mxu1 %v13907_v25 }
 0x47a   :  { %6985 = vmatmul.mubr.msk.bf16.gmra.mrb[156].mxu1 %vm1891_vm0, %v13915_v24 }
 0x47b   :  { %4571 = vmatprep.mubr.bf16.mxu1 %v13907_v25 }
 0x482   :  { %6986 = vmatmul.mubr.msk.bf16.gmra.mrb[160].mxu1 %vm1891_vm0, %v13916_v28 }
 0x483   :  { %4581 = vmatprep.mubr.bf16.mxu1 %v13907_v25 }
 0x48a   :  { %6987 = vmatmul.mubr.msk.bf16.gmra.mrb[164].mxu1 %vm1891_vm0, %v13917_v13 }
 0x48b   :  { %4591 = vmatprep.mubr.bf16.mxu1 %v13907_v25 }
 0x492   :  { %6988 = vmatmul.mubr.msk.bf16.gmra.mrb[168].mxu1 %vm1891_vm0, %v13918_v54 }
 0x493   :  { %4601 = vmatprep.mubr.bf16.mxu1 %v13907_v25 }
 0x49a   :  { %6989 = vmatmul.mubr.msk.bf16.gmra.mrb[172].mxu1 %vm1891_vm0, %v13919_v60  ;;  %v13938_v60 = vld [vmem:[#allocation32_spill] sm:$0xff] }
 0x49b   :  { %4611 = vmatprep.mubr.bf16.mxu1 %v13907_v25 }
 0x4a2   :  { %6990 = vmatmul.mubr.msk.bf16.gmra.mrb[176].mxu1 %vm1891_vm0, %v13920_v29 }
 0x4a3   :  { %4621 = vmatprep.mubr.bf16.mxu1 %v13907_v25 }
 0x4aa   :  { %6991 = vmatmul.mubr.msk.bf16.gmra.mrb[180].mxu1 %vm1891_vm0, %v13921_v19 }
 0x4ab   :  { %4631 = vmatprep.mubr.bf16.mxu1 %v13907_v25 }
 0x4b2   :  { %6992 = vmatmul.mubr.msk.bf16.gmra.mrb[184].mxu1 %vm1891_vm0, %v13922_v62 }
 0x4b3   :  { %4641 = vmatprep.mubr.bf16.mxu1 %v13907_v25 }
 0x4ba   :  { %6993 = vmatmul.mubr.msk.bf16.gmra.mrb[188].mxu1 %vm1891_vm0, %v13923_v58 }
 0x4bb   :  { %4651 = vmatprep.mubr.bf16.mxu1 %v13907_v25 }
 0x4c2   :  { %6994 = vmatmul.mubr.msk.bf16.gmra.mrb[192].mxu1 %vm1891_vm0, %v13924_v40 }
 0x4c3   :  { %4661 = vmatprep.mubr.bf16.mxu1 %v13907_v25 }
 0x4ca   :  { %6995 = vmatmul.mubr.msk.bf16.gmra.mrb[196].mxu1 %vm1891_vm0, %v13925_v21 }
 0x4cb   :  { %4671 = vmatprep.mubr.bf16.mxu1 %v13907_v25 }
 0x4d2   :  { %6996 = vmatmul.mubr.msk.bf16.gmra.mrb[200].mxu1 %vm1891_vm0, %v13926_v63 }
 0x4d3   :  { %4681 = vmatprep.mubr.bf16.mxu1 %v13907_v25 }
 0x4da   :  { %6997 = vmatmul.mubr.msk.bf16.gmra.mrb[204].mxu1 %vm1891_vm0, %v13927_v35 }
 0x4db   :  { %4691 = vmatprep.mubr.bf16.mxu1 %v13907_v25 }
 0x4e2   :  { %6998 = vmatmul.mubr.msk.bf16.gmra.mrb[208].mxu1 %vm1891_vm0, %v13928_v61 }
 0x4e3   :  { %4701 = vmatprep.mubr.bf16.mxu1 %v13907_v25 }
 0x4ea   :  { %6999 = vmatmul.mubr.msk.bf16.gmra.mrb[212].mxu1 %vm1891_vm0, %v13929_v50 }
 0x4eb   :  { %4711 = vmatprep.mubr.bf16.mxu1 %v13907_v25 }
 0x4f2   :  { %7000 = vmatmul.mubr.msk.bf16.gmra.mrb[216].mxu1 %vm1891_vm0, %v13930_v26 }
 0x4f3   :  { %4721 = vmatprep.mubr.bf16.mxu1 %v13907_v25 }
 0x4fa   :  { %7001 = vmatmul.mubr.msk.bf16.gmra.mrb[220].mxu1 %vm1891_vm0, %v13931_v30 }
 0x4fb   :  { %4731 = vmatprep.mubr.bf16.mxu1 %v13907_v25 }
 0x502   :  { %7002 = vmatmul.mubr.msk.bf16.gmra.mrb[224].mxu1 %vm1891_vm0, %v13932_v2 }
 0x503   :  { %4741 = vmatprep.mubr.bf16.mxu1 %v13907_v25 }
 0x50a   :  { %7003 = vmatmul.mubr.msk.bf16.gmra.mrb[228].mxu1 %vm1891_vm0, %v13933_v34 }
 0x50b   :  { %4751 = vmatprep.mubr.bf16.mxu1 %v13907_v25 }
 0x512   :  { %7004 = vmatmul.mubr.msk.bf16.gmra.mrb[232].mxu1 %vm1891_vm0, %v13935_v7 }
 0x513   :  { %4761 = vmatprep.mubr.bf16.mxu1 %v13907_v25 }
 0x515   :  { %v4493_v45 = vpop.f32.mrb[128].mxu1 }
 0x516   :  { %v7458_v16 = vadd.f32 %v4493_v45, %v12744_v41  ;;  %v4495_v22 = vpop.f32.mrb[129].mxu1 }
 0x517   :  { %v7459_v43 = vadd.f32 %v4495_v22, %v12746_v42  ;;  %v4497_v0 = vpop.f32.mrb[130].mxu1 }
 0x518   :  { %v7460_v18 = vadd.f32 %v4497_v0, %v12744_v41  ;;  %v4499_v23 = vpop.f32.mrb[131].mxu1  ;;  %v4814_v46 = vmax.f32 %v7458_v16, 0.0 }
 0x519   :  { %v7461_v11 = vadd.f32 %v4499_v23, %v12746_v42  ;;  %v4815_v47 = vmax.f32 %v7459_v43, 0.0 }
 0x51a   :  { %v4818_v31 = vmax.f32 %v7460_v18, 0.0  ;;  %7005 = vmatmul.mubr.msk.bf16.gmra.mrb[236].mxu1 %vm1891_vm0, %v13936_v9 }
 0x51b   :  { %v4819_v52 = vmax.f32 %v7461_v11, 0.0  ;;  %4771 = vmatprep.mubr.bf16.mxu1 %v13907_v25 }
 0x51c   :  { %v5070_v49 = vpack.c.bf16 %v4818_v31, %v4814_v46 }
 0x51d   :  { %v5071_v8 = vpack.c.bf16 %v4819_v52, %v4815_v47  ;;  %v4503_v59 = vpop.f32.mrb[132].mxu1 }
 0x51e   :  { %v7462_v48 = vadd.f32 %v4503_v59, %v12744_v41  ;;  %v4505_v6 = vpop.f32.mrb[133].mxu1 }
 0x51f   :  { %v7463_v56 = vadd.f32 %v4505_v6, %v12746_v42  ;;  %v4507_v5 = vpop.f32.mrb[134].mxu1  ;;  %5977 = vmatprep.mubr.bf16.mxu0 %v5071_v8 }
 0x520   :  { %v7464_v51 = vadd.f32 %v4507_v5, %v12744_v41  ;;  %v4509_v10 = vpop.f32.mrb[135].mxu1  ;;  %5978 = vmatmul.mubr.bf16.vlgmr.msra.gmra.mrb[128].mxu0 %v5070_v49  ;;  %v4822_v3 = vmax.f32 %v7462_v48, 0.0 }
 0x521   :  { %v7465_v12 = vadd.f32 %v4509_v10, %v12746_v42  ;;  %v4823_v4 = vmax.f32 %v7463_v56, 0.0 }
 0x522   :  { %v4826_v57 = vmax.f32 %v7464_v51, 0.0  ;;  %7006 = vmatmul.mubr.msk.bf16.gmra.mrb[240].mxu1 %vm1891_vm0, %v13937_v32 }
 0x523   :  { %v4827_v20 = vmax.f32 %v7465_v12, 0.0  ;;  %4781 = vmatprep.mubr.bf16.mxu1 %v13907_v25 }
 0x524   :  { %v5074_v17 = vpack.c.bf16 %v4826_v57, %v4822_v3 }
 0x525   :  { %v5075_v55 = vpack.c.bf16 %v4827_v20, %v4823_v4  ;;  %v4513_v44 = vpop.f32.mrb[136].mxu1 }
 0x526   :  { %v7466_v36 = vadd.f32 %v4513_v44, %v12744_v41  ;;  %v4515_v24 = vpop.f32.mrb[137].mxu1 }
 0x527   :  { %v7467_v15 = vadd.f32 %v4515_v24, %v12746_v42  ;;  %v4517_v38 = vpop.f32.mrb[138].mxu1  ;;  %5987 = vmatprep.mubr.bf16.mxu0 %v5075_v55 }
 0x528   :  { %v7468_v28 = vadd.f32 %v4517_v38, %v12744_v41  ;;  %v4519_v13 = vpop.f32.mrb[139].mxu1  ;;  %5988 = vmatmul.mubr.bf16.gmra.mrb[132].mxu0 %v5074_v17  ;;  %v4830_v33 = vmax.f32 %v7466_v36, 0.0 }
 0x529   :  { %v7469_v39 = vadd.f32 %v4519_v13, %v12746_v42  ;;  %v4831_v29 = vmax.f32 %v7467_v15, 0.0 }
 0x52a   :  { %v4834_v54 = vmax.f32 %v7468_v28, 0.0  ;;  %7007 = vmatmul.mubr.msk.bf16.gmra.mrb[244].mxu1 %vm1891_vm0, %v13938_v60 }
 0x52b   :  { %v4835_v19 = vmax.f32 %v7469_v39, 0.0  ;;  %4791 = vmatprep.mubr.bf16.mxu1 %v13907_v25 }
 0x52c   :  { %v5078_v62 = vpack.c.bf16 %v4834_v54, %v4830_v33 }
 0x52d   :  { %v5079_v58 = vpack.c.bf16 %v4835_v19, %v4831_v29  ;;  %v4523_v40 = vpop.f32.mrb[140].mxu1 }
 0x52e   :  { %v7470_v21 = vadd.f32 %v4523_v40, %v12744_v41  ;;  %v4525_v63 = vpop.f32.mrb[141].mxu1 }
 0x52f   :  { %v7471_v35 = vadd.f32 %v4525_v63, %v12746_v42  ;;  %v4527_v61 = vpop.f32.mrb[142].mxu1  ;;  %5997 = vmatprep.mubr.bf16.mxu0 %v5079_v58 }
 0x530   :  { %v7472_v50 = vadd.f32 %v4527_v61, %v12744_v41  ;;  %v4529_v26 = vpop.f32.mrb[143].mxu1  ;;  %5998 = vmatmul.mubr.bf16.gmra.mrb[136].mxu0 %v5078_v62  ;;  %v4838_v2 = vmax.f32 %v7470_v21, 0.0 }
 0x531   :  { %v7473_v30 = vadd.f32 %v4529_v26, %v12746_v42  ;;  %v4839_v27 = vmax.f32 %v7471_v35, 0.0 }
 0x532   :  { %v4842_v34 = vmax.f32 %v7472_v50, 0.0  ;;  %7008 = vmatmul.mubr.msk.bf16.gmra.mrb[248].mxu1 %vm1891_vm0, %v13939_v53 }
 0x533   :  { %v4843_v7 = vmax.f32 %v7473_v30, 0.0  ;;  %4801 = vmatprep.mubr.bf16.mxu1 %v13907_v25 }
 0x534   :  { %v5082_v14 = vpack.c.bf16 %v4842_v34, %v4838_v2 }
 0x535   :  { %v5083_v45 = vpack.c.bf16 %v4843_v7, %v4839_v27  ;;  %v4533_v16 = vpop.f32.mrb[144].mxu1 }
 0x536   :  { %v7474_v22 = vadd.f32 %v4533_v16, %v12744_v41  ;;  %v4535_v43 = vpop.f32.mrb[145].mxu1 }
 0x537   :  { %v7475_v0 = vadd.f32 %v4535_v43, %v12746_v42  ;;  %v4537_v18 = vpop.f32.mrb[146].mxu1  ;;  %6007 = vmatprep.mubr.bf16.mxu0 %v5083_v45 }
 0x538   :  { %v7476_v23 = vadd.f32 %v4537_v18, %v12744_v41  ;;  %v4539_v11 = vpop.f32.mrb[147].mxu1  ;;  %6008 = vmatmul.mubr.bf16.gmra.mrb[140].mxu0 %v5082_v14  ;;  %v4846_v31 = vmax.f32 %v7474_v22, 0.0 }
 0x539   :  { %v7477_v46 = vadd.f32 %v4539_v11, %v12746_v42  ;;  %v4847_v25 = vmax.f32 %v7475_v0, 0.0 }
 0x53a   :  { %v4850_v9 = vmax.f32 %v7476_v23, 0.0  ;;  %7009 = vmatmul.mubr.msk.bf16.gmra.mrb[252].mxu1 %vm1891_vm0, %v12114_v1 }
 0x53b   :  { %v4851_v47 = vmax.f32 %v7477_v46, 0.0 }
 0x53c   :  { %v5086_v52 = vpack.c.bf16 %v4850_v9, %v4846_v31 }
 0x53d   :  { %v5087_v49 = vpack.c.bf16 %v4851_v47, %v4847_v25  ;;  %v4543_v8 = vpop.f32.mrb[148].mxu1 }
 0x53e   :  { %v7478_v59 = vadd.f32 %v4543_v8, %v12744_v41  ;;  %v4545_v48 = vpop.f32.mrb[149].mxu1 }
 0x53f   :  { %v7479_v6 = vadd.f32 %v4545_v48, %v12746_v42  ;;  %v4547_v56 = vpop.f32.mrb[150].mxu1  ;;  %6017 = vmatprep.mubr.bf16.mxu0 %v5087_v49 }
 0x540   :  { %v7480_v5 = vadd.f32 %v4547_v56, %v12744_v41  ;;  %v4549_v51 = vpop.f32.mrb[151].mxu1  ;;  %6018 = vmatmul.mubr.bf16.gmra.mrb[144].mxu0 %v5086_v52  ;;  %v4854_v12 = vmax.f32 %v7478_v59, 0.0 }
 0x541   :  { %v7481_v10 = vadd.f32 %v4549_v51, %v12746_v42  ;;  %v4855_v3 = vmax.f32 %v7479_v6, 0.0 }
 0x542   :  { %v4858_v1 = vmax.f32 %v7480_v5, 0.0 }
 0x543   :  { %v4859_v57 = vmax.f32 %v7481_v10, 0.0 }
 0x544   :  { %v5090_v32 = vpack.c.bf16 %v4858_v1, %v4854_v12 }
 0x545   :  { %v5091_v4 = vpack.c.bf16 %v4859_v57, %v4855_v3  ;;  %v4553_v20 = vpop.f32.mrb[152].mxu1 }
 0x546   :  { %v7482_v17 = vadd.f32 %v4553_v20, %v12744_v41  ;;  %v4555_v55 = vpop.f32.mrb[153].mxu1 }
 0x547   :  { %v7483_v44 = vadd.f32 %v4555_v55, %v12746_v42  ;;  %v4557_v36 = vpop.f32.mrb[154].mxu1  ;;  %6027 = vmatprep.mubr.bf16.mxu0 %v5091_v4 }
 0x548   :  { %v7484_v24 = vadd.f32 %v4557_v36, %v12744_v41  ;;  %v4559_v15 = vpop.f32.mrb[155].mxu1  ;;  %6028 = vmatmul.mubr.bf16.gmra.mrb[148].mxu0 %v5090_v32  ;;  %v4862_v28 = vmax.f32 %v7482_v17, 0.0 }
 0x549   :  { %v7485_v38 = vadd.f32 %v4559_v15, %v12746_v42  ;;  %v4863_v39 = vmax.f32 %v7483_v44, 0.0 }
 0x54a   :  { %v4866_v13 = vmax.f32 %v7484_v24, 0.0 }
 0x54b   :  { %v4867_v33 = vmax.f32 %v7485_v38, 0.0 }
 0x54c   :  { %v5094_v54 = vpack.c.bf16 %v4866_v13, %v4862_v28 }
 0x54d   :  { %v5095_v60 = vpack.c.bf16 %v4867_v33, %v4863_v39  ;;  %v4563_v29 = vpop.f32.mrb[156].mxu1 }
 0x54e   :  { %v7486_v19 = vadd.f32 %v4563_v29, %v12744_v41  ;;  %v4565_v62 = vpop.f32.mrb[157].mxu1 }
 0x54f   :  { %v7487_v58 = vadd.f32 %v4565_v62, %v12746_v42  ;;  %v4567_v40 = vpop.f32.mrb[158].mxu1  ;;  %6037 = vmatprep.mubr.bf16.mxu0 %v5095_v60 }
 0x550   :  { %v7488_v21 = vadd.f32 %v4567_v40, %v12744_v41  ;;  %v4569_v63 = vpop.f32.mrb[159].mxu1  ;;  %6038 = vmatmul.mubr.bf16.gmra.mrb[152].mxu0 %v5094_v54  ;;  %v4870_v61 = vmax.f32 %v7486_v19, 0.0 }
 0x551   :  { %v7489_v35 = vadd.f32 %v4569_v63, %v12746_v42  ;;  %v4871_v26 = vmax.f32 %v7487_v58, 0.0 }
 0x552   :  { %v4874_v50 = vmax.f32 %v7488_v21, 0.0 }
 0x553   :  { %v4875_v30 = vmax.f32 %v7489_v35, 0.0 }
 0x554   :  { %v5098_v2 = vpack.c.bf16 %v4874_v50, %v4870_v61 }
 0x555   :  { %v5099_v34 = vpack.c.bf16 %v4875_v30, %v4871_v26  ;;  %v4573_v53 = vpop.f32.mrb[160].mxu1 }
 0x556   :  { %v7490_v27 = vadd.f32 %v4573_v53, %v12744_v41  ;;  %v4575_v7 = vpop.f32.mrb[161].mxu1 }
 0x557   :  { %v7491_v14 = vadd.f32 %v4575_v7, %v12746_v42  ;;  %v4577_v45 = vpop.f32.mrb[162].mxu1  ;;  %6047 = vmatprep.mubr.bf16.mxu0 %v5099_v34 }
 0x558   :  { %v7492_v16 = vadd.f32 %v4577_v45, %v12744_v41  ;;  %v4579_v22 = vpop.f32.mrb[163].mxu1  ;;  %6048 = vmatmul.mubr.bf16.gmra.mrb[156].mxu0 %v5098_v2  ;;  %v4878_v0 = vmax.f32 %v7490_v27, 0.0 }
 0x559   :  { %v7493_v43 = vadd.f32 %v4579_v22, %v12746_v42  ;;  %v4879_v23 = vmax.f32 %v7491_v14, 0.0 }
 0x55a   :  { %v4882_v18 = vmax.f32 %v7492_v16, 0.0 }
 0x55b   :  { %v4883_v11 = vmax.f32 %v7493_v43, 0.0 }
 0x55c   :  { %v5102_v46 = vpack.c.bf16 %v4882_v18, %v4878_v0 }
 0x55d   :  { %v5103_v31 = vpack.c.bf16 %v4883_v11, %v4879_v23  ;;  %v4583_v9 = vpop.f32.mrb[164].mxu1 }
 0x55e   :  { %v7494_v25 = vadd.f32 %v4583_v9, %v12744_v41  ;;  %v4585_v47 = vpop.f32.mrb[165].mxu1 }
 0x55f   :  { %v7495_v52 = vadd.f32 %v4585_v47, %v12746_v42  ;;  %v4587_v49 = vpop.f32.mrb[166].mxu1  ;;  %6057 = vmatprep.mubr.bf16.mxu0 %v5103_v31 }
 0x560   :  { %v7496_v8 = vadd.f32 %v4587_v49, %v12744_v41  ;;  %v4589_v59 = vpop.f32.mrb[167].mxu1  ;;  %6058 = vmatmul.mubr.bf16.gmra.mrb[160].mxu0 %v5102_v46  ;;  %v4886_v6 = vmax.f32 %v7494_v25, 0.0 }
 0x561   :  { %v7497_v48 = vadd.f32 %v4589_v59, %v12746_v42  ;;  %v4887_v5 = vmax.f32 %v7495_v52, 0.0 }
 0x562   :  { %v4890_v56 = vmax.f32 %v7496_v8, 0.0 }
 0x563   :  { %v4891_v51 = vmax.f32 %v7497_v48, 0.0 }
 0x564   :  { %v5106_v10 = vpack.c.bf16 %v4890_v56, %v4886_v6 }
 0x565   :  { %v5107_v12 = vpack.c.bf16 %v4891_v51, %v4887_v5  ;;  %v4593_v1 = vpop.f32.mrb[168].mxu1 }
 0x566   :  { %v7498_v3 = vadd.f32 %v4593_v1, %v12744_v41  ;;  %v4595_v57 = vpop.f32.mrb[169].mxu1 }
 0x567   :  { %v7499_v32 = vadd.f32 %v4595_v57, %v12746_v42  ;;  %v4597_v4 = vpop.f32.mrb[170].mxu1  ;;  %6067 = vmatprep.mubr.bf16.mxu0 %v5107_v12 }
 0x568   :  { %v7500_v20 = vadd.f32 %v4597_v4, %v12744_v41  ;;  %v4599_v17 = vpop.f32.mrb[171].mxu1  ;;  %6068 = vmatmul.mubr.bf16.gmra.mrb[164].mxu0 %v5106_v10  ;;  %v4894_v44 = vmax.f32 %v7498_v3, 0.0 }
 0x569   :  { %v7501_v55 = vadd.f32 %v4599_v17, %v12746_v42  ;;  %v4895_v24 = vmax.f32 %v7499_v32, 0.0 }
 0x56a   :  { %v4898_v36 = vmax.f32 %v7500_v20, 0.0 }
 0x56b   :  { %v4899_v15 = vmax.f32 %v7501_v55, 0.0 }
 0x56c   :  { %v5110_v38 = vpack.c.bf16 %v4898_v36, %v4894_v44 }
 0x56d   :  { %v5111_v28 = vpack.c.bf16 %v4899_v15, %v4895_v24  ;;  %v4603_v13 = vpop.f32.mrb[172].mxu1 }
 0x56e   :  { %v7502_v39 = vadd.f32 %v4603_v13, %v12744_v41  ;;  %v4605_v33 = vpop.f32.mrb[173].mxu1 }
 0x56f   :  { %v7503_v54 = vadd.f32 %v4605_v33, %v12746_v42  ;;  %v4607_v60 = vpop.f32.mrb[174].mxu1  ;;  %6077 = vmatprep.mubr.bf16.mxu0 %v5111_v28 }
 0x570   :  { %v7504_v29 = vadd.f32 %v4607_v60, %v12744_v41  ;;  %v4609_v19 = vpop.f32.mrb[175].mxu1  ;;  %6078 = vmatmul.mubr.bf16.gmra.mrb[168].mxu0 %v5110_v38  ;;  %v4902_v58 = vmax.f32 %v7502_v39, 0.0 }
 0x571   :  { %v7505_v62 = vadd.f32 %v4609_v19, %v12746_v42  ;;  %v4903_v21 = vmax.f32 %v7503_v54, 0.0 }
 0x572   :  { %v4906_v40 = vmax.f32 %v7504_v29, 0.0 }
 0x573   :  { %v4907_v63 = vmax.f32 %v7505_v62, 0.0 }
 0x574   :  { %v5114_v35 = vpack.c.bf16 %v4906_v40, %v4902_v58 }
 0x575   :  { %v5115_v61 = vpack.c.bf16 %v4907_v63, %v4903_v21  ;;  %v4613_v50 = vpop.f32.mrb[176].mxu1 }
 0x576   :  { %v7506_v26 = vadd.f32 %v4613_v50, %v12744_v41  ;;  %v4615_v30 = vpop.f32.mrb[177].mxu1 }
 0x577   :  { %v7507_v2 = vadd.f32 %v4615_v30, %v12746_v42  ;;  %v4617_v34 = vpop.f32.mrb[178].mxu1  ;;  %6087 = vmatprep.mubr.bf16.mxu0 %v5115_v61 }
 0x578   :  { %v7508_v53 = vadd.f32 %v4617_v34, %v12744_v41  ;;  %v4619_v27 = vpop.f32.mrb[179].mxu1  ;;  %6088 = vmatmul.mubr.bf16.gmra.mrb[172].mxu0 %v5114_v35  ;;  %v4910_v14 = vmax.f32 %v7506_v26, 0.0 }
 0x579   :  { %v7509_v7 = vadd.f32 %v4619_v27, %v12746_v42  ;;  %v4911_v16 = vmax.f32 %v7507_v2, 0.0 }
 0x57a   :  { %v4914_v45 = vmax.f32 %v7508_v53, 0.0 }
 0x57b   :  { %v4915_v22 = vmax.f32 %v7509_v7, 0.0 }
 0x57c   :  { %v5118_v43 = vpack.c.bf16 %v4914_v45, %v4910_v14 }
 0x57d   :  { %v5119_v0 = vpack.c.bf16 %v4915_v22, %v4911_v16  ;;  %v4623_v18 = vpop.f32.mrb[180].mxu1 }
 0x57e   :  { %v7510_v23 = vadd.f32 %v4623_v18, %v12744_v41  ;;  %v4625_v11 = vpop.f32.mrb[181].mxu1 }
 0x57f   :  { %v7511_v46 = vadd.f32 %v4625_v11, %v12746_v42  ;;  %v4627_v31 = vpop.f32.mrb[182].mxu1  ;;  %6097 = vmatprep.mubr.bf16.mxu0 %v5119_v0 }
 0x580   :  { %v7512_v9 = vadd.f32 %v4627_v31, %v12744_v41  ;;  %v4629_v25 = vpop.f32.mrb[183].mxu1  ;;  %6098 = vmatmul.mubr.bf16.gmra.mrb[176].mxu0 %v5118_v43  ;;  %v4918_v52 = vmax.f32 %v7510_v23, 0.0 }
 0x581   :  { %v7513_v47 = vadd.f32 %v4629_v25, %v12746_v42  ;;  %v4919_v8 = vmax.f32 %v7511_v46, 0.0 }
 0x582   :  { %v4922_v49 = vmax.f32 %v7512_v9, 0.0 }
 0x583   :  { %v4923_v59 = vmax.f32 %v7513_v47, 0.0 }
 0x584   :  { %v5122_v48 = vpack.c.bf16 %v4922_v49, %v4918_v52 }
 0x585   :  { %v5123_v6 = vpack.c.bf16 %v4923_v59, %v4919_v8  ;;  %v4633_v56 = vpop.f32.mrb[184].mxu1 }
 0x586   :  { %v7514_v5 = vadd.f32 %v4633_v56, %v12744_v41  ;;  %v4635_v51 = vpop.f32.mrb[185].mxu1 }
 0x587   :  { %v7515_v10 = vadd.f32 %v4635_v51, %v12746_v42  ;;  %v4637_v12 = vpop.f32.mrb[186].mxu1  ;;  %6107 = vmatprep.mubr.bf16.mxu0 %v5123_v6 }
 0x588   :  { %v7516_v1 = vadd.f32 %v4637_v12, %v12744_v41  ;;  %v4639_v3 = vpop.f32.mrb[187].mxu1  ;;  %6108 = vmatmul.mubr.bf16.gmra.mrb[180].mxu0 %v5122_v48  ;;  %v4926_v32 = vmax.f32 %v7514_v5, 0.0 }
 0x589   :  { %v7517_v57 = vadd.f32 %v4639_v3, %v12746_v42  ;;  %v4927_v20 = vmax.f32 %v7515_v10, 0.0 }
 0x58a   :  { %v4930_v4 = vmax.f32 %v7516_v1, 0.0 }
 0x58b   :  { %v4931_v17 = vmax.f32 %v7517_v57, 0.0 }
 0x58c   :  { %v5126_v55 = vpack.c.bf16 %v4930_v4, %v4926_v32 }
 0x58d   :  { %v5127_v44 = vpack.c.bf16 %v4931_v17, %v4927_v20  ;;  %v4643_v36 = vpop.f32.mrb[188].mxu1 }
 0x58e   :  { %v7518_v24 = vadd.f32 %v4643_v36, %v12744_v41  ;;  %v4645_v15 = vpop.f32.mrb[189].mxu1 }
 0x58f   :  { %v7519_v38 = vadd.f32 %v4645_v15, %v12746_v42  ;;  %v4647_v28 = vpop.f32.mrb[190].mxu1  ;;  %6117 = vmatprep.mubr.bf16.mxu0 %v5127_v44 }
 0x590   :  { %v7520_v13 = vadd.f32 %v4647_v28, %v12744_v41  ;;  %v4649_v39 = vpop.f32.mrb[191].mxu1  ;;  %6118 = vmatmul.mubr.bf16.gmra.mrb[184].mxu0 %v5126_v55  ;;  %v4934_v54 = vmax.f32 %v7518_v24, 0.0 }
 0x591   :  { %v7521_v33 = vadd.f32 %v4649_v39, %v12746_v42  ;;  %v4935_v29 = vmax.f32 %v7519_v38, 0.0 }
 0x592   :  { %v4938_v60 = vmax.f32 %v7520_v13, 0.0 }
 0x593   :  { %v4939_v19 = vmax.f32 %v7521_v33, 0.0 }
 0x594   :  { %v5130_v62 = vpack.c.bf16 %v4938_v60, %v4934_v54 }
 0x595   :  { %v5131_v58 = vpack.c.bf16 %v4939_v19, %v4935_v29  ;;  %v4653_v40 = vpop.f32.mrb[192].mxu1 }
 0x596   :  { %v7522_v21 = vadd.f32 %v4653_v40, %v12744_v41  ;;  %v4655_v63 = vpop.f32.mrb[193].mxu1 }
 0x597   :  { %v7523_v35 = vadd.f32 %v4655_v63, %v12746_v42  ;;  %v4657_v61 = vpop.f32.mrb[194].mxu1  ;;  %6127 = vmatprep.mubr.bf16.mxu0 %v5131_v58 }
 0x598   :  { %v7524_v50 = vadd.f32 %v4657_v61, %v12744_v41  ;;  %v4659_v26 = vpop.f32.mrb[195].mxu1  ;;  %6128 = vmatmul.mubr.bf16.gmra.mrb[188].mxu0 %v5130_v62  ;;  %v4942_v2 = vmax.f32 %v7522_v21, 0.0 }
 0x599   :  { %v7525_v30 = vadd.f32 %v4659_v26, %v12746_v42  ;;  %v4943_v53 = vmax.f32 %v7523_v35, 0.0 }
 0x59a   :  { %v4946_v34 = vmax.f32 %v7524_v50, 0.0 }
 0x59b   :  { %v4947_v27 = vmax.f32 %v7525_v30, 0.0 }
 0x59c   :  { %v5134_v7 = vpack.c.bf16 %v4946_v34, %v4942_v2 }
 0x59d   :  { %v5135_v14 = vpack.c.bf16 %v4947_v27, %v4943_v53  ;;  %v4663_v45 = vpop.f32.mrb[196].mxu1 }
 0x59e   :  { %v7526_v16 = vadd.f32 %v4663_v45, %v12744_v41  ;;  %v4665_v22 = vpop.f32.mrb[197].mxu1 }
 0x59f   :  { %v7527_v43 = vadd.f32 %v4665_v22, %v12746_v42  ;;  %v4667_v0 = vpop.f32.mrb[198].mxu1  ;;  %6137 = vmatprep.mubr.bf16.mxu0 %v5135_v14 }
 0x5a0   :  { %v7528_v18 = vadd.f32 %v4667_v0, %v12744_v41  ;;  %v4669_v23 = vpop.f32.mrb[199].mxu1  ;;  %6138 = vmatmul.mubr.bf16.gmra.mrb[192].mxu0 %v5134_v7  ;;  %v4950_v46 = vmax.f32 %v7526_v16, 0.0 }
 0x5a1   :  { %v7529_v11 = vadd.f32 %v4669_v23, %v12746_v42  ;;  %v4951_v9 = vmax.f32 %v7527_v43, 0.0 }
 0x5a2   :  { %v4954_v31 = vmax.f32 %v7528_v18, 0.0 }
 0x5a3   :  { %v4955_v25 = vmax.f32 %v7529_v11, 0.0 }
 0x5a4   :  { %v5138_v47 = vpack.c.bf16 %v4954_v31, %v4950_v46 }
 0x5a5   :  { %v5139_v52 = vpack.c.bf16 %v4955_v25, %v4951_v9  ;;  %v4673_v49 = vpop.f32.mrb[200].mxu1 }
 0x5a6   :  { %v7530_v8 = vadd.f32 %v4673_v49, %v12744_v41  ;;  %v4675_v59 = vpop.f32.mrb[201].mxu1 }
 0x5a7   :  { %v7531_v48 = vadd.f32 %v4675_v59, %v12746_v42  ;;  %v4677_v6 = vpop.f32.mrb[202].mxu1  ;;  %6147 = vmatprep.mubr.bf16.mxu0 %v5139_v52 }
 0x5a8   :  { %v7532_v56 = vadd.f32 %v4677_v6, %v12744_v41  ;;  %v4679_v5 = vpop.f32.mrb[203].mxu1  ;;  %6148 = vmatmul.mubr.bf16.gmra.mrb[196].mxu0 %v5138_v47  ;;  %v4958_v10 = vmax.f32 %v7530_v8, 0.0 }
 0x5a9   :  { %v7533_v51 = vadd.f32 %v4679_v5, %v12746_v42  ;;  %v4959_v1 = vmax.f32 %v7531_v48, 0.0 }
 0x5aa   :  { %v4962_v12 = vmax.f32 %v7532_v56, 0.0 }
 0x5ab   :  { %v4963_v3 = vmax.f32 %v7533_v51, 0.0 }
 0x5ac   :  { %v5142_v57 = vpack.c.bf16 %v4962_v12, %v4958_v10 }
 0x5ad   :  { %v5143_v32 = vpack.c.bf16 %v4963_v3, %v4959_v1  ;;  %v4683_v4 = vpop.f32.mrb[204].mxu1 }
 0x5ae   :  { %v7534_v20 = vadd.f32 %v4683_v4, %v12744_v41  ;;  %v4685_v17 = vpop.f32.mrb[205].mxu1 }
 0x5af   :  { %v7535_v55 = vadd.f32 %v4685_v17, %v12746_v42  ;;  %v4687_v44 = vpop.f32.mrb[206].mxu1  ;;  %6157 = vmatprep.mubr.bf16.mxu0 %v5143_v32 }
 0x5b0   :  { %v7536_v36 = vadd.f32 %v4687_v44, %v12744_v41  ;;  %v4689_v24 = vpop.f32.mrb[207].mxu1  ;;  %6158 = vmatmul.mubr.bf16.gmra.mrb[200].mxu0 %v5142_v57  ;;  %v4966_v38 = vmax.f32 %v7534_v20, 0.0 }
 0x5b1   :  { %v7537_v15 = vadd.f32 %v4689_v24, %v12746_v42  ;;  %v4967_v13 = vmax.f32 %v7535_v55, 0.0 }
 0x5b2   :  { %v4970_v28 = vmax.f32 %v7536_v36, 0.0 }
 0x5b3   :  { %v4971_v39 = vmax.f32 %v7537_v15, 0.0 }
 0x5b4   :  { %v5146_v33 = vpack.c.bf16 %v4970_v28, %v4966_v38 }
 0x5b5   :  { %v5147_v54 = vpack.c.bf16 %v4971_v39, %v4967_v13  ;;  %v4693_v60 = vpop.f32.mrb[208].mxu1 }
 0x5b6   :  { %v7538_v29 = vadd.f32 %v4693_v60, %v12744_v41  ;;  %v4695_v19 = vpop.f32.mrb[209].mxu1 }
 0x5b7   :  { %v7539_v62 = vadd.f32 %v4695_v19, %v12746_v42  ;;  %v4697_v58 = vpop.f32.mrb[210].mxu1  ;;  %6167 = vmatprep.mubr.bf16.mxu0 %v5147_v54 }
 0x5b8   :  { %v7540_v40 = vadd.f32 %v4697_v58, %v12744_v41  ;;  %v4699_v21 = vpop.f32.mrb[211].mxu1  ;;  %6168 = vmatmul.mubr.bf16.gmra.mrb[204].mxu0 %v5146_v33  ;;  %v4974_v35 = vmax.f32 %v7538_v29, 0.0 }
 0x5b9   :  { %v7541_v63 = vadd.f32 %v4699_v21, %v12746_v42  ;;  %v4975_v50 = vmax.f32 %v7539_v62, 0.0 }
 0x5ba   :  { %v4978_v61 = vmax.f32 %v7540_v40, 0.0 }
 0x5bb   :  { %v4979_v26 = vmax.f32 %v7541_v63, 0.0 }
 0x5bc   :  { %v5150_v30 = vpack.c.bf16 %v4978_v61, %v4974_v35 }
 0x5bd   :  { %v5151_v2 = vpack.c.bf16 %v4979_v26, %v4975_v50  ;;  %v4703_v34 = vpop.f32.mrb[212].mxu1 }
 0x5be   :  { %v7542_v53 = vadd.f32 %v4703_v34, %v12744_v41  ;;  %v4705_v27 = vpop.f32.mrb[213].mxu1 }
 0x5bf   :  { %v7543_v7 = vadd.f32 %v4705_v27, %v12746_v42  ;;  %v4707_v14 = vpop.f32.mrb[214].mxu1  ;;  %6177 = vmatprep.mubr.bf16.mxu0 %v5151_v2 }
 0x5c0   :  { %v7544_v45 = vadd.f32 %v4707_v14, %v12744_v41  ;;  %v4709_v16 = vpop.f32.mrb[215].mxu1  ;;  %6178 = vmatmul.mubr.bf16.gmra.mrb[208].mxu0 %v5150_v30  ;;  %v4982_v43 = vmax.f32 %v7542_v53, 0.0 }
 0x5c1   :  { %v7545_v22 = vadd.f32 %v4709_v16, %v12746_v42  ;;  %v4983_v18 = vmax.f32 %v7543_v7, 0.0 }
 0x5c2   :  { %v4986_v0 = vmax.f32 %v7544_v45, 0.0 }
 0x5c3   :  { %v4987_v23 = vmax.f32 %v7545_v22, 0.0 }
 0x5c4   :  { %v5154_v11 = vpack.c.bf16 %v4986_v0, %v4982_v43 }
 0x5c5   :  { %v5155_v46 = vpack.c.bf16 %v4987_v23, %v4983_v18  ;;  %v4713_v31 = vpop.f32.mrb[216].mxu1 }
 0x5c6   :  { %v7546_v9 = vadd.f32 %v4713_v31, %v12744_v41  ;;  %v4715_v25 = vpop.f32.mrb[217].mxu1 }
 0x5c7   :  { %v7547_v47 = vadd.f32 %v4715_v25, %v12746_v42  ;;  %v4717_v52 = vpop.f32.mrb[218].mxu1  ;;  %6187 = vmatprep.mubr.bf16.mxu0 %v5155_v46 }
 0x5c8   :  { %v7548_v49 = vadd.f32 %v4717_v52, %v12744_v41  ;;  %v4719_v8 = vpop.f32.mrb[219].mxu1  ;;  %6188 = vmatmul.mubr.bf16.gmra.mrb[212].mxu0 %v5154_v11  ;;  %v4990_v48 = vmax.f32 %v7546_v9, 0.0 }
 0x5c9   :  { %v7549_v59 = vadd.f32 %v4719_v8, %v12746_v42  ;;  %v4991_v56 = vmax.f32 %v7547_v47, 0.0 }
 0x5ca   :  { %v4994_v6 = vmax.f32 %v7548_v49, 0.0 }
 0x5cb   :  { %v4995_v5 = vmax.f32 %v7549_v59, 0.0 }
 0x5cc   :  { %v5158_v51 = vpack.c.bf16 %v4994_v6, %v4990_v48 }
 0x5cd   :  { %v5159_v10 = vpack.c.bf16 %v4995_v5, %v4991_v56  ;;  %v4723_v12 = vpop.f32.mrb[220].mxu1  ;;  %v5260_v56 = vld [vmem:[%s13226_s4] sm:$0x3] }
 0x5ce   :  { %v7550_v1 = vadd.f32 %v4723_v12, %v12744_v41  ;;  %v4725_v3 = vpop.f32.mrb[221].mxu1 }
 0x5cf   :  { %v7551_v57 = vadd.f32 %v4725_v3, %v12746_v42  ;;  %v4727_v32 = vpop.f32.mrb[222].mxu1  ;;  %6197 = vmatprep.mubr.bf16.mxu0 %v5159_v10 }
 0x5d0   :  { %v7552_v4 = vadd.f32 %v4727_v32, %v12744_v41  ;;  %v4729_v20 = vpop.f32.mrb[223].mxu1  ;;  %6198 = vmatmul.mubr.bf16.gmra.mrb[216].mxu0 %v5158_v51  ;;  %v4998_v55 = vmax.f32 %v7550_v1, 0.0 }
 0x5d1   :  { %v7553_v17 = vadd.f32 %v4729_v20, %v12746_v42  ;;  %v4999_v36 = vmax.f32 %v7551_v57, 0.0  ;;  %v13940_v57 = vsub.s32 0, %v13934_v37  ;;  %v13941_v20 = vsub.s32 1, %v13934_v37 }
 0x5d2   :  { %v5002_v44 = vmax.f32 %v7552_v4, 0.0 }
 0x5d3   :  { %v5003_v24 = vmax.f32 %v7553_v17, 0.0  ;;  %v12879_v32 = vrot.slane %v5260_v56, %v13940_v57  ;;  %v12884_v17 = vrot.slane %v5260_v56, %v13941_v20 }
 0x5d4   :  { %v5162_v15 = vpack.c.bf16 %v5002_v44, %v4998_v55 }
 0x5d5   :  { %v5163_v38 = vpack.c.bf16 %v5003_v24, %v4999_v36  ;;  %v4733_v28 = vpop.f32.mrb[224].mxu1 }
 0x5d6   :  { %v7554_v13 = vadd.f32 %v4733_v28, %v12744_v41  ;;  %v4735_v39 = vpop.f32.mrb[225].mxu1 }
 0x5d7   :  { %v7555_v33 = vadd.f32 %v4735_v39, %v12746_v42  ;;  %v4737_v54 = vpop.f32.mrb[226].mxu1  ;;  %6207 = vmatprep.mubr.bf16.mxu0 %v5163_v38 }
 0x5d8   :  { %v7556_v60 = vadd.f32 %v4737_v54, %v12744_v41  ;;  %v4739_v29 = vpop.f32.mrb[227].mxu1  ;;  %6208 = vmatmul.mubr.bf16.gmra.mrb[220].mxu0 %v5162_v15  ;;  %v5006_v62 = vmax.f32 %v7554_v13, 0.0 }
 0x5d9   :  { %v7557_v19 = vadd.f32 %v4739_v29, %v12746_v42  ;;  %v5007_v40 = vmax.f32 %v7555_v33, 0.0 }
 0x5da   :  { %v5010_v58 = vmax.f32 %v7556_v60, 0.0 }
 0x5db   :  { %v5011_v21 = vmax.f32 %v7557_v19, 0.0 }
 0x5dc   :  { %v5166_v63 = vpack.c.bf16 %v5010_v58, %v5006_v62 }
 0x5dd   :  { %v5167_v35 = vpack.c.bf16 %v5011_v21, %v5007_v40  ;;  %v4743_v61 = vpop.f32.mrb[228].mxu1 }
 0x5de   :  { %v7558_v50 = vadd.f32 %v4743_v61, %v12744_v41  ;;  %v4745_v26 = vpop.f32.mrb[229].mxu1 }
 0x5df   :  { %v7559_v30 = vadd.f32 %v4745_v26, %v12746_v42  ;;  %v4747_v2 = vpop.f32.mrb[230].mxu1  ;;  %6217 = vmatprep.mubr.bf16.mxu0 %v5167_v35 }
 0x5e0   :  { %v7560_v34 = vadd.f32 %v4747_v2, %v12744_v41  ;;  %v4749_v53 = vpop.f32.mrb[231].mxu1  ;;  %6218 = vmatmul.mubr.bf16.gmra.mrb[224].mxu0 %v5166_v63  ;;  %v5014_v7 = vmax.f32 %v7558_v50, 0.0 }
 0x5e1   :  { %v7561_v27 = vadd.f32 %v4749_v53, %v12746_v42  ;;  %v5015_v45 = vmax.f32 %v7559_v30, 0.0 }
 0x5e2   :  { %v5018_v14 = vmax.f32 %v7560_v34, 0.0 }
 0x5e3   :  { %v5019_v16 = vmax.f32 %v7561_v27, 0.0 }
 0x5e4   :  { %v5170_v22 = vpack.c.bf16 %v5018_v14, %v5014_v7 }
 0x5e5   :  { %v5171_v43 = vpack.c.bf16 %v5019_v16, %v5015_v45  ;;  %v4753_v0 = vpop.f32.mrb[232].mxu1 }
 0x5e6   :  { %v7562_v18 = vadd.f32 %v4753_v0, %v12744_v41  ;;  %v4755_v23 = vpop.f32.mrb[233].mxu1 }
 0x5e7   :  { %v7563_v11 = vadd.f32 %v4755_v23, %v12746_v42  ;;  %v4757_v46 = vpop.f32.mrb[234].mxu1  ;;  %6227 = vmatprep.mubr.bf16.mxu0 %v5171_v43 }
 0x5e8   :  { %v7564_v31 = vadd.f32 %v4757_v46, %v12744_v41  ;;  %v4759_v9 = vpop.f32.mrb[235].mxu1  ;;  %6228 = vmatmul.mubr.bf16.gmra.mrb[228].mxu0 %v5170_v22  ;;  %v5022_v47 = vmax.f32 %v7562_v18, 0.0 }
 0x5e9   :  { %v7565_v25 = vadd.f32 %v4759_v9, %v12746_v42  ;;  %v5023_v49 = vmax.f32 %v7563_v11, 0.0 }
 0x5ea   :  { %v5026_v52 = vmax.f32 %v7564_v31, 0.0 }
 0x5eb   :  { %v5027_v8 = vmax.f32 %v7565_v25, 0.0 }
 0x5ec   :  { %v5174_v59 = vpack.c.bf16 %v5026_v52, %v5022_v47 }
 0x5ed   :  { %v5175_v48 = vpack.c.bf16 %v5027_v8, %v5023_v49  ;;  %v4763_v6 = vpop.f32.mrb[236].mxu1 }
 0x5ee   :  { %v7566_v5 = vadd.f32 %v4763_v6, %v12744_v41  ;;  %v4765_v51 = vpop.f32.mrb[237].mxu1 }
 0x5ef   :  { %v7567_v10 = vadd.f32 %v4765_v51, %v12746_v42  ;;  %v4767_v12 = vpop.f32.mrb[238].mxu1  ;;  %6237 = vmatprep.mubr.bf16.mxu0 %v5175_v48 }
 0x5f0   :  { %v7568_v1 = vadd.f32 %v4767_v12, %v12744_v41  ;;  %v4769_v3 = vpop.f32.mrb[239].mxu1  ;;  %6238 = vmatmul.mubr.bf16.gmra.mrb[232].mxu0 %v5174_v59  ;;  %v5030_v55 = vmax.f32 %v7566_v5, 0.0 }
 0x5f1   :  { %v7569_v4 = vadd.f32 %v4769_v3, %v12746_v42  ;;  %v5031_v36 = vmax.f32 %v7567_v10, 0.0 }
 0x5f2   :  { %v5034_v44 = vmax.f32 %v7568_v1, 0.0 }
 0x5f3   :  { %v5035_v24 = vmax.f32 %v7569_v4, 0.0  ;;  %v5979_v15 = vpop.f32.mrb[128].mxu0 }
 0x5f4   :  { %v5178_v38 = vpack.c.bf16 %v5034_v44, %v5030_v55  ;;  %v7586_v28 = vadd.f32 %v5979_v15, %v12879_v32  ;;  %v5981_v13 = vpop.f32.mrb[129].mxu0 }
 0x5f5   :  { %v5179_v39 = vpack.c.bf16 %v5035_v24, %v5031_v36  ;;  %v7587_v33 = vadd.f32 %v5981_v13, %v12884_v17  ;;  %v4773_v54 = vpop.f32.mrb[240].mxu1  ;;  %v5983_v60 = vpop.f32.mrb[130].mxu0 }
 0x5f6   :  { %v7570_v29 = vadd.f32 %v4773_v54, %v12744_v41  ;;  %v7588_v37 = vadd.f32 %v5983_v60, %v12879_v32  ;;  %v4775_v19 = vpop.f32.mrb[241].mxu1  ;;  %v5985_v62 = vpop.f32.mrb[131].mxu0 }
 0x5f7   :  { %v7138_v58 = vpack.c.bf16 %v7587_v33, %v7586_v28  ;;  %v7571_v40 = vadd.f32 %v4775_v19, %v12746_v42  ;;  %v7589_v21 = vadd.f32 %v5985_v62, %v12884_v17  ;;  %v4777_v63 = vpop.f32.mrb[242].mxu1  ;;  %6247 = vmatprep.mubr.bf16.mxu0 %v5179_v39 }
 0x5f8   :  { %v7572_v35 = vadd.f32 %v4777_v63, %v12744_v41  ;;  %v4779_v61 = vpop.f32.mrb[243].mxu1  ;;  %6248 = vmatmul.mubr.bf16.gmra.mrb[236].mxu0 %v5178_v38  ;;  %v5038_v30 = vmax.f32 %v7570_v29, 0.0 }
 0x5f9   :  { %6682 = vst [vmem:[%s13227_s5] sm:$0xff] %v7138_v58  ;;  %v7139_v50 = vpack.c.bf16 %v7589_v21, %v7588_v37  ;;  %v7573_v26 = vadd.f32 %v4779_v61, %v12746_v42  ;;  %v5039_v34 = vmax.f32 %v7571_v40, 0.0 }
 0x5fa   :  { %v5042_v2 = vmax.f32 %v7572_v35, 0.0 }
 0x5fb   :  { %6683 = vst [vmem:[%s13227_s5 + $0x8] sm:$0xff] %v7139_v50  ;;  %v5043_v53 = vmax.f32 %v7573_v26, 0.0  ;;  %v5989_v27 = vpop.f32.mrb[132].mxu0 }
 0x5fc   :  { %v5182_v7 = vpack.c.bf16 %v5042_v2, %v5038_v30  ;;  %v7590_v14 = vadd.f32 %v5989_v27, %v12879_v32  ;;  %v5991_v45 = vpop.f32.mrb[133].mxu0 }
 0x5fd   :  { %v5183_v16 = vpack.c.bf16 %v5043_v53, %v5039_v34  ;;  %v7591_v22 = vadd.f32 %v5991_v45, %v12884_v17  ;;  %v4783_v43 = vpop.f32.mrb[244].mxu1  ;;  %v5993_v0 = vpop.f32.mrb[134].mxu0 }
 0x5fe   :  { %v7574_v18 = vadd.f32 %v4783_v43, %v12744_v41  ;;  %v7592_v23 = vadd.f32 %v5993_v0, %v12879_v32  ;;  %v4785_v11 = vpop.f32.mrb[245].mxu1  ;;  %v5995_v46 = vpop.f32.mrb[135].mxu0 }
 0x5ff   :  { %v7140_v31 = vpack.c.bf16 %v7591_v22, %v7590_v14  ;;  %v7575_v9 = vadd.f32 %v4785_v11, %v12746_v42  ;;  %v7593_v25 = vadd.f32 %v5995_v46, %v12884_v17  ;;  %v4787_v47 = vpop.f32.mrb[246].mxu1  ;;  %6257 = vmatprep.mubr.bf16.mxu0 %v5183_v16 }
 0x600   :  { %v7576_v52 = vadd.f32 %v4787_v47, %v12744_v41  ;;  %v4789_v49 = vpop.f32.mrb[247].mxu1  ;;  %6258 = vmatmul.mubr.bf16.gmra.mrb[240].mxu0 %v5182_v7  ;;  %v5046_v48 = vmax.f32 %v7574_v18, 0.0 }
 0x601   :  { %6684 = vst [vmem:[%s13227_s5 + $0x10] sm:$0xff] %v7140_v31  ;;  %v7141_v8 = vpack.c.bf16 %v7593_v25, %v7592_v23  ;;  %v7577_v59 = vadd.f32 %v4789_v49, %v12746_v42  ;;  %v5047_v56 = vmax.f32 %v7575_v9, 0.0 }
 0x602   :  { %v5050_v6 = vmax.f32 %v7576_v52, 0.0 }
 0x603   :  { %6685 = vst [vmem:[%s13227_s5 + $0x18] sm:$0xff] %v7141_v8  ;;  %v5051_v5 = vmax.f32 %v7577_v59, 0.0  ;;  %v5999_v51 = vpop.f32.mrb[136].mxu0 }
 0x604   :  { %v5186_v10 = vpack.c.bf16 %v5050_v6, %v5046_v48  ;;  %v7594_v12 = vadd.f32 %v5999_v51, %v12879_v32  ;;  %v6001_v1 = vpop.f32.mrb[137].mxu0 }
 0x605   :  { %v5187_v3 = vpack.c.bf16 %v5051_v5, %v5047_v56  ;;  %v7595_v57 = vadd.f32 %v6001_v1, %v12884_v17  ;;  %v4793_v4 = vpop.f32.mrb[248].mxu1  ;;  %v6003_v20 = vpop.f32.mrb[138].mxu0 }
 0x606   :  { %v7578_v55 = vadd.f32 %v4793_v4, %v12744_v41  ;;  %v7596_v44 = vadd.f32 %v6003_v20, %v12879_v32  ;;  %v4795_v36 = vpop.f32.mrb[249].mxu1  ;;  %v6005_v24 = vpop.f32.mrb[139].mxu0 }
 0x607   :  { %v7142_v15 = vpack.c.bf16 %v7595_v57, %v7594_v12  ;;  %v7579_v38 = vadd.f32 %v4795_v36, %v12746_v42  ;;  %v7597_v28 = vadd.f32 %v6005_v24, %v12884_v17  ;;  %v4797_v13 = vpop.f32.mrb[250].mxu1  ;;  %6267 = vmatprep.mubr.bf16.mxu0 %v5187_v3 }
 0x608   :  { %v7580_v39 = vadd.f32 %v4797_v13, %v12744_v41  ;;  %v4799_v33 = vpop.f32.mrb[251].mxu1  ;;  %6268 = vmatmul.mubr.bf16.gmra.mrb[244].mxu0 %v5186_v10  ;;  %v5054_v29 = vmax.f32 %v7578_v55, 0.0 }
 0x609   :  { %6686 = vst [vmem:[%s13227_s5 + $0x20] sm:$0xff] %v7142_v15  ;;  %v7143_v54 = vpack.c.bf16 %v7597_v28, %v7596_v44  ;;  %v7581_v60 = vadd.f32 %v4799_v33, %v12746_v42  ;;  %v5055_v19 = vmax.f32 %v7579_v38, 0.0 }
 0x60a   :  { %v5058_v37 = vmax.f32 %v7580_v39, 0.0 }
 0x60b   :  { %6687 = vst [vmem:[%s13227_s5 + $0x28] sm:$0xff] %v7143_v54  ;;  %v5059_v62 = vmax.f32 %v7581_v60, 0.0  ;;  %v6009_v58 = vpop.f32.mrb[140].mxu0 }
 0x60c   :  { %v5190_v40 = vpack.c.bf16 %v5058_v37, %v5054_v29  ;;  %v7598_v21 = vadd.f32 %v6009_v58, %v12879_v32  ;;  %v6011_v63 = vpop.f32.mrb[141].mxu0 }
 0x60d   :  { %v5191_v35 = vpack.c.bf16 %v5059_v62, %v5055_v19  ;;  %v7599_v61 = vadd.f32 %v6011_v63, %v12884_v17  ;;  %v4803_v50 = vpop.f32.mrb[252].mxu1  ;;  %v6013_v26 = vpop.f32.mrb[142].mxu0 }
 0x60e   :  { %v7582_v30 = vadd.f32 %v4803_v50, %v12744_v41  ;;  %v7600_v2 = vadd.f32 %v6013_v26, %v12879_v32  ;;  %v4805_v34 = vpop.f32.mrb[253].mxu1  ;;  %v6015_v53 = vpop.f32.mrb[143].mxu0 }
 0x60f   :  { %v7144_v27 = vpack.c.bf16 %v7599_v61, %v7598_v21  ;;  %v7583_v7 = vadd.f32 %v4805_v34, %v12746_v42  ;;  %v7601_v14 = vadd.f32 %v6015_v53, %v12884_v17  ;;  %v4807_v45 = vpop.f32.mrb[254].mxu1  ;;  %6277 = vmatprep.mubr.bf16.mxu0 %v5191_v35 }
 0x610   :  { %v7584_v16 = vadd.f32 %v4807_v45, %v12744_v41  ;;  %v4809_v22 = vpop.f32.mrb[255].mxu1  ;;  %6278 = vmatmul.mubr.bf16.gmra.mrb[248].mxu0 %v5190_v40  ;;  %v5062_v18 = vmax.f32 %v7582_v30, 0.0 }
 0x611   :  { %6688 = vst [vmem:[%s13227_s5 + $0x30] sm:$0xff] %v7144_v27  ;;  %v7145_v43 = vpack.c.bf16 %v7601_v14, %v7600_v2  ;;  %v7585_v0 = vadd.f32 %v4809_v22, %v12746_v42  ;;  %v5063_v11 = vmax.f32 %v7583_v7, 0.0 }
 0x612   :  { %v5066_v23 = vmax.f32 %v7584_v16, 0.0 }
 0x613   :  { %6689 = vst [vmem:[%s13227_s5 + $0x38] sm:$0xff] %v7145_v43  ;;  %v5067_v46 = vmax.f32 %v7585_v0, 0.0  ;;  %v6019_v31 = vpop.f32.mrb[144].mxu0 }
 0x614   :  { %v5194_v9 = vpack.c.bf16 %v5066_v23, %v5062_v18  ;;  %v7602_v41 = vadd.f32 %v6019_v31, %v12879_v32  ;;  %v6021_v25 = vpop.f32.mrb[145].mxu0 }
 0x615   :  { %v5195_v47 = vpack.c.bf16 %v5067_v46, %v5063_v11  ;;  %v7603_v52 = vadd.f32 %v6021_v25, %v12884_v17  ;;  %v6023_v49 = vpop.f32.mrb[146].mxu0 }
 0x616   :  { %v7604_v8 = vadd.f32 %v6023_v49, %v12879_v32  ;;  %v6025_v42 = vpop.f32.mrb[147].mxu0 }
 0x617   :  { %v7146_v59 = vpack.c.bf16 %v7603_v52, %v7602_v41  ;;  %v7605_v48 = vadd.f32 %v6025_v42, %v12884_v17  ;;  %6287 = vmatprep.mubr.bf16.mxu0 %v5195_v47 }
 0x618   :  { %6288 = vmatmul.mubr.bf16.gmra.mrb[252].mxu0 %v5194_v9 }
 0x619   :  { %6690 = vst [vmem:[%s13227_s5 + $0x40] sm:$0xff] %v7146_v59  ;;  %v7147_v6 = vpack.c.bf16 %v7605_v48, %v7604_v8 }
 0x61b   :  { %6691 = vst [vmem:[%s13227_s5 + $0x48] sm:$0xff] %v7147_v6  ;;  %v6029_v56 = vpop.f32.mrb[148].mxu0 }
 0x61c   :  { %v7606_v5 = vadd.f32 %v6029_v56, %v12879_v32  ;;  %v6031_v51 = vpop.f32.mrb[149].mxu0 }
 0x61d   :  { %v7607_v10 = vadd.f32 %v6031_v51, %v12884_v17  ;;  %v6033_v12 = vpop.f32.mrb[150].mxu0 }
 0x61e   :  { %v7608_v1 = vadd.f32 %v6033_v12, %v12879_v32  ;;  %v6035_v3 = vpop.f32.mrb[151].mxu0 }
 0x61f   :  { %v7148_v57 = vpack.c.bf16 %v7607_v10, %v7606_v5  ;;  %v7609_v4 = vadd.f32 %v6035_v3, %v12884_v17 }
 0x621   :  { %6692 = vst [vmem:[%s13227_s5 + $0x50] sm:$0xff] %v7148_v57  ;;  %v7149_v20 = vpack.c.bf16 %v7609_v4, %v7608_v1 }
 0x623   :  { %6693 = vst [vmem:[%s13227_s5 + $0x58] sm:$0xff] %v7149_v20  ;;  %v6039_v55 = vpop.f32.mrb[152].mxu0 }
 0x624   :  { %v7610_v44 = vadd.f32 %v6039_v55, %v12879_v32  ;;  %v6041_v36 = vpop.f32.mrb[153].mxu0 }
 0x625   :  { %v7611_v24 = vadd.f32 %v6041_v36, %v12884_v17  ;;  %v6043_v15 = vpop.f32.mrb[154].mxu0 }
 0x626   :  { %v7612_v38 = vadd.f32 %v6043_v15, %v12879_v32  ;;  %v6045_v28 = vpop.f32.mrb[155].mxu0 }
 0x627   :  { %v7150_v13 = vpack.c.bf16 %v7611_v24, %v7610_v44  ;;  %v7613_v39 = vadd.f32 %v6045_v28, %v12884_v17 }
 0x629   :  { %6694 = vst [vmem:[%s13227_s5 + $0x60] sm:$0xff] %v7150_v13  ;;  %v7151_v33 = vpack.c.bf16 %v7613_v39, %v7612_v38 }
 0x62b   :  { %6695 = vst [vmem:[%s13227_s5 + $0x68] sm:$0xff] %v7151_v33  ;;  %v6049_v54 = vpop.f32.mrb[156].mxu0 }
 0x62c   :  { %v7614_v60 = vadd.f32 %v6049_v54, %v12879_v32  ;;  %v6051_v29 = vpop.f32.mrb[157].mxu0 }
 0x62d   :  { %v7615_v37 = vadd.f32 %v6051_v29, %v12884_v17  ;;  %v6053_v19 = vpop.f32.mrb[158].mxu0 }
 0x62e   :  { %v7616_v62 = vadd.f32 %v6053_v19, %v12879_v32  ;;  %v6055_v58 = vpop.f32.mrb[159].mxu0 }
 0x62f   :  { %v7152_v40 = vpack.c.bf16 %v7615_v37, %v7614_v60  ;;  %v7617_v21 = vadd.f32 %v6055_v58, %v12884_v17 }
 0x631   :  { %6696 = vst [vmem:[%s13227_s5 + $0x70] sm:$0xff] %v7152_v40  ;;  %v7153_v63 = vpack.c.bf16 %v7617_v21, %v7616_v62 }
 0x633   :  { %6697 = vst [vmem:[%s13227_s5 + $0x78] sm:$0xff] %v7153_v63  ;;  %v6059_v35 = vpop.f32.mrb[160].mxu0 }
 0x634   :  { %v7618_v61 = vadd.f32 %v6059_v35, %v12879_v32  ;;  %v6061_v50 = vpop.f32.mrb[161].mxu0 }
 0x635   :  { %v7619_v26 = vadd.f32 %v6061_v50, %v12884_v17  ;;  %v6063_v30 = vpop.f32.mrb[162].mxu0 }
 0x636   :  { %v7620_v2 = vadd.f32 %v6063_v30, %v12879_v32  ;;  %v6065_v34 = vpop.f32.mrb[163].mxu0 }
 0x637   :  { %v7154_v53 = vpack.c.bf16 %v7619_v26, %v7618_v61  ;;  %v7621_v27 = vadd.f32 %v6065_v34, %v12884_v17 }
 0x639   :  { %6698 = vst [vmem:[%s13227_s5 + $0x80] sm:$0xff] %v7154_v53  ;;  %v7155_v7 = vpack.c.bf16 %v7621_v27, %v7620_v2 }
 0x63b   :  { %6699 = vst [vmem:[%s13227_s5 + $0x88] sm:$0xff] %v7155_v7  ;;  %v6069_v14 = vpop.f32.mrb[164].mxu0 }
 0x63c   :  { %v7622_v45 = vadd.f32 %v6069_v14, %v12879_v32  ;;  %v6071_v16 = vpop.f32.mrb[165].mxu0 }
 0x63d   :  { %v7623_v22 = vadd.f32 %v6071_v16, %v12884_v17  ;;  %v6073_v43 = vpop.f32.mrb[166].mxu0 }
 0x63e   :  { %v7624_v0 = vadd.f32 %v6073_v43, %v12879_v32  ;;  %v6075_v18 = vpop.f32.mrb[167].mxu0 }
 0x63f   :  { %v7156_v23 = vpack.c.bf16 %v7623_v22, %v7622_v45  ;;  %v7625_v11 = vadd.f32 %v6075_v18, %v12884_v17 }
 0x641   :  { %6700 = vst [vmem:[%s13227_s5 + $0x90] sm:$0xff] %v7156_v23  ;;  %v7157_v46 = vpack.c.bf16 %v7625_v11, %v7624_v0 }
 0x643   :  { %6701 = vst [vmem:[%s13227_s5 + $0x98] sm:$0xff] %v7157_v46  ;;  %v6079_v31 = vpop.f32.mrb[168].mxu0 }
 0x644   :  { %v7626_v9 = vadd.f32 %v6079_v31, %v12879_v32  ;;  %v6081_v41 = vpop.f32.mrb[169].mxu0 }
 0x645   :  { %v7627_v25 = vadd.f32 %v6081_v41, %v12884_v17  ;;  %v6083_v47 = vpop.f32.mrb[170].mxu0 }
 0x646   :  { %v7628_v52 = vadd.f32 %v6083_v47, %v12879_v32  ;;  %v6085_v49 = vpop.f32.mrb[171].mxu0 }
 0x647   :  { %v7158_v8 = vpack.c.bf16 %v7627_v25, %v7626_v9  ;;  %v7629_v42 = vadd.f32 %v6085_v49, %v12884_v17 }
 0x649   :  { %6702 = vst [vmem:[%s13227_s5 + $0xa0] sm:$0xff] %v7158_v8  ;;  %v7159_v59 = vpack.c.bf16 %v7629_v42, %v7628_v52 }
 0x64b   :  { %6703 = vst [vmem:[%s13227_s5 + $0xa8] sm:$0xff] %v7159_v59  ;;  %v6089_v48 = vpop.f32.mrb[172].mxu0 }
 0x64c   :  { %v7630_v6 = vadd.f32 %v6089_v48, %v12879_v32  ;;  %v6091_v56 = vpop.f32.mrb[173].mxu0 }
 0x64d   :  { %v7631_v5 = vadd.f32 %v6091_v56, %v12884_v17  ;;  %v6093_v51 = vpop.f32.mrb[174].mxu0 }
 0x64e   :  { %v7632_v10 = vadd.f32 %v6093_v51, %v12879_v32  ;;  %v6095_v12 = vpop.f32.mrb[175].mxu0 }
 0x64f   :  { %v7160_v1 = vpack.c.bf16 %v7631_v5, %v7630_v6  ;;  %v7633_v3 = vadd.f32 %v6095_v12, %v12884_v17 }
 0x651   :  { %6704 = vst [vmem:[%s13227_s5 + $0xb0] sm:$0xff] %v7160_v1  ;;  %v7161_v57 = vpack.c.bf16 %v7633_v3, %v7632_v10 }
 0x653   :  { %6705 = vst [vmem:[%s13227_s5 + $0xb8] sm:$0xff] %v7161_v57  ;;  %v6099_v4 = vpop.f32.mrb[176].mxu0 }
 0x654   :  { %v7634_v20 = vadd.f32 %v6099_v4, %v12879_v32  ;;  %v6101_v55 = vpop.f32.mrb[177].mxu0 }
 0x655   :  { %v7635_v44 = vadd.f32 %v6101_v55, %v12884_v17  ;;  %v6103_v36 = vpop.f32.mrb[178].mxu0 }
 0x656   :  { %v7636_v24 = vadd.f32 %v6103_v36, %v12879_v32  ;;  %v6105_v15 = vpop.f32.mrb[179].mxu0 }
 0x657   :  { %v7162_v38 = vpack.c.bf16 %v7635_v44, %v7634_v20  ;;  %v7637_v28 = vadd.f32 %v6105_v15, %v12884_v17 }
 0x659   :  { %6706 = vst [vmem:[%s13227_s5 + $0xc0] sm:$0xff] %v7162_v38  ;;  %v7163_v13 = vpack.c.bf16 %v7637_v28, %v7636_v24 }
 0x65b   :  { %6707 = vst [vmem:[%s13227_s5 + $0xc8] sm:$0xff] %v7163_v13  ;;  %v6109_v39 = vpop.f32.mrb[180].mxu0 }
 0x65c   :  { %v7638_v33 = vadd.f32 %v6109_v39, %v12879_v32  ;;  %v6111_v54 = vpop.f32.mrb[181].mxu0 }
 0x65d   :  { %v7639_v60 = vadd.f32 %v6111_v54, %v12884_v17  ;;  %v6113_v29 = vpop.f32.mrb[182].mxu0 }
 0x65e   :  { %v7640_v37 = vadd.f32 %v6113_v29, %v12879_v32  ;;  %v6115_v19 = vpop.f32.mrb[183].mxu0 }
 0x65f   :  { %v7164_v62 = vpack.c.bf16 %v7639_v60, %v7638_v33  ;;  %v7641_v58 = vadd.f32 %v6115_v19, %v12884_v17 }
 0x661   :  { %6708 = vst [vmem:[%s13227_s5 + $0xd0] sm:$0xff] %v7164_v62  ;;  %v7165_v40 = vpack.c.bf16 %v7641_v58, %v7640_v37 }
 0x663   :  { %6709 = vst [vmem:[%s13227_s5 + $0xd8] sm:$0xff] %v7165_v40  ;;  %v6119_v21 = vpop.f32.mrb[184].mxu0 }
 0x664   :  { %v7642_v63 = vadd.f32 %v6119_v21, %v12879_v32  ;;  %v6121_v35 = vpop.f32.mrb[185].mxu0 }
 0x665   :  { %v7643_v61 = vadd.f32 %v6121_v35, %v12884_v17  ;;  %v6123_v50 = vpop.f32.mrb[186].mxu0 }
 0x666   :  { %v7644_v26 = vadd.f32 %v6123_v50, %v12879_v32  ;;  %v6125_v30 = vpop.f32.mrb[187].mxu0 }
 0x667   :  { %v7166_v2 = vpack.c.bf16 %v7643_v61, %v7642_v63  ;;  %v7645_v34 = vadd.f32 %v6125_v30, %v12884_v17 }
 0x669   :  { %6710 = vst [vmem:[%s13227_s5 + $0xe0] sm:$0xff] %v7166_v2  ;;  %v7167_v53 = vpack.c.bf16 %v7645_v34, %v7644_v26 }
 0x66b   :  { %6711 = vst [vmem:[%s13227_s5 + $0xe8] sm:$0xff] %v7167_v53  ;;  %v6129_v27 = vpop.f32.mrb[188].mxu0 }
 0x66c   :  { %v7646_v7 = vadd.f32 %v6129_v27, %v12879_v32  ;;  %v6131_v14 = vpop.f32.mrb[189].mxu0 }
 0x66d   :  { %v7647_v45 = vadd.f32 %v6131_v14, %v12884_v17  ;;  %v6133_v16 = vpop.f32.mrb[190].mxu0 }
 0x66e   :  { %v7648_v22 = vadd.f32 %v6133_v16, %v12879_v32  ;;  %v6135_v43 = vpop.f32.mrb[191].mxu0 }
 0x66f   :  { %v7168_v0 = vpack.c.bf16 %v7647_v45, %v7646_v7  ;;  %v7649_v18 = vadd.f32 %v6135_v43, %v12884_v17 }
 0x671   :  { %6712 = vst [vmem:[%s13227_s5 + $0xf0] sm:$0xff] %v7168_v0  ;;  %v7169_v23 = vpack.c.bf16 %v7649_v18, %v7648_v22 }
 0x673   :  { %6713 = vst [vmem:[%s13227_s5 + $0xf8] sm:$0xff] %v7169_v23  ;;  %v6139_v11 = vpop.f32.mrb[192].mxu0 }
 0x674   :  { %v7650_v46 = vadd.f32 %v6139_v11, %v12879_v32  ;;  %v6141_v31 = vpop.f32.mrb[193].mxu0 }
 0x675   :  { %v7651_v9 = vadd.f32 %v6141_v31, %v12884_v17  ;;  %v6143_v41 = vpop.f32.mrb[194].mxu0 }
 0x676   :  { %v7652_v25 = vadd.f32 %v6143_v41, %v12879_v32  ;;  %v6145_v47 = vpop.f32.mrb[195].mxu0 }
 0x677   :  { %v7170_v52 = vpack.c.bf16 %v7651_v9, %v7650_v46  ;;  %v7653_v49 = vadd.f32 %v6145_v47, %v12884_v17 }
 0x679   :  { %6714 = vst [vmem:[%s13227_s5 + $0x100] sm:$0xff] %v7170_v52  ;;  %v7171_v8 = vpack.c.bf16 %v7653_v49, %v7652_v25 }
 0x67b   :  { %6715 = vst [vmem:[%s13227_s5 + $0x108] sm:$0xff] %v7171_v8  ;;  %v6149_v42 = vpop.f32.mrb[196].mxu0 }
 0x67c   :  { %v7654_v59 = vadd.f32 %v6149_v42, %v12879_v32  ;;  %v6151_v48 = vpop.f32.mrb[197].mxu0 }
 0x67d   :  { %v7655_v6 = vadd.f32 %v6151_v48, %v12884_v17  ;;  %v6153_v56 = vpop.f32.mrb[198].mxu0 }
 0x67e   :  { %v7656_v5 = vadd.f32 %v6153_v56, %v12879_v32  ;;  %v6155_v51 = vpop.f32.mrb[199].mxu0 }
 0x67f   :  { %v7172_v10 = vpack.c.bf16 %v7655_v6, %v7654_v59  ;;  %v7657_v12 = vadd.f32 %v6155_v51, %v12884_v17 }
 0x681   :  { %6716 = vst [vmem:[%s13227_s5 + $0x110] sm:$0xff] %v7172_v10  ;;  %v7173_v1 = vpack.c.bf16 %v7657_v12, %v7656_v5 }
 0x683   :  { %6717 = vst [vmem:[%s13227_s5 + $0x118] sm:$0xff] %v7173_v1  ;;  %v6159_v3 = vpop.f32.mrb[200].mxu0 }
 0x684   :  { %v7658_v57 = vadd.f32 %v6159_v3, %v12879_v32  ;;  %v6161_v4 = vpop.f32.mrb[201].mxu0 }
 0x685   :  { %v7659_v20 = vadd.f32 %v6161_v4, %v12884_v17  ;;  %v6163_v55 = vpop.f32.mrb[202].mxu0 }
 0x686   :  { %v7660_v44 = vadd.f32 %v6163_v55, %v12879_v32  ;;  %v6165_v36 = vpop.f32.mrb[203].mxu0 }
 0x687   :  { %v7174_v24 = vpack.c.bf16 %v7659_v20, %v7658_v57  ;;  %v7661_v15 = vadd.f32 %v6165_v36, %v12884_v17 }
 0x689   :  { %6718 = vst [vmem:[%s13227_s5 + $0x120] sm:$0xff] %v7174_v24  ;;  %v7175_v38 = vpack.c.bf16 %v7661_v15, %v7660_v44 }
 0x68b   :  { %6719 = vst [vmem:[%s13227_s5 + $0x128] sm:$0xff] %v7175_v38  ;;  %v6169_v28 = vpop.f32.mrb[204].mxu0 }
 0x68c   :  { %v7662_v13 = vadd.f32 %v6169_v28, %v12879_v32  ;;  %v6171_v39 = vpop.f32.mrb[205].mxu0 }
 0x68d   :  { %v7663_v33 = vadd.f32 %v6171_v39, %v12884_v17  ;;  %v6173_v54 = vpop.f32.mrb[206].mxu0 }
 0x68e   :  { %v7664_v60 = vadd.f32 %v6173_v54, %v12879_v32  ;;  %v6175_v29 = vpop.f32.mrb[207].mxu0 }
 0x68f   :  { %v7176_v37 = vpack.c.bf16 %v7663_v33, %v7662_v13  ;;  %v7665_v19 = vadd.f32 %v6175_v29, %v12884_v17 }
 0x691   :  { %6720 = vst [vmem:[%s13227_s5 + $0x130] sm:$0xff] %v7176_v37  ;;  %v7177_v62 = vpack.c.bf16 %v7665_v19, %v7664_v60 }
 0x693   :  { %6721 = vst [vmem:[%s13227_s5 + $0x138] sm:$0xff] %v7177_v62  ;;  %v6179_v58 = vpop.f32.mrb[208].mxu0 }
 0x694   :  { %v7666_v40 = vadd.f32 %v6179_v58, %v12879_v32  ;;  %v6181_v21 = vpop.f32.mrb[209].mxu0 }
 0x695   :  { %v7667_v63 = vadd.f32 %v6181_v21, %v12884_v17  ;;  %v6183_v35 = vpop.f32.mrb[210].mxu0 }
 0x696   :  { %v7668_v61 = vadd.f32 %v6183_v35, %v12879_v32  ;;  %v6185_v50 = vpop.f32.mrb[211].mxu0 }
 0x697   :  { %v7178_v26 = vpack.c.bf16 %v7667_v63, %v7666_v40  ;;  %v7669_v30 = vadd.f32 %v6185_v50, %v12884_v17 }
 0x699   :  { %6722 = vst [vmem:[%s13227_s5 + $0x140] sm:$0xff] %v7178_v26  ;;  %v7179_v2 = vpack.c.bf16 %v7669_v30, %v7668_v61 }
 0x69b   :  { %6723 = vst [vmem:[%s13227_s5 + $0x148] sm:$0xff] %v7179_v2  ;;  %v6189_v34 = vpop.f32.mrb[212].mxu0 }
 0x69c   :  { %v7670_v53 = vadd.f32 %v6189_v34, %v12879_v32  ;;  %v6191_v27 = vpop.f32.mrb[213].mxu0 }
 0x69d   :  { %v7671_v7 = vadd.f32 %v6191_v27, %v12884_v17  ;;  %v6193_v14 = vpop.f32.mrb[214].mxu0 }
 0x69e   :  { %v7672_v45 = vadd.f32 %v6193_v14, %v12879_v32  ;;  %v6195_v16 = vpop.f32.mrb[215].mxu0 }
 0x69f   :  { %v7180_v22 = vpack.c.bf16 %v7671_v7, %v7670_v53  ;;  %v7673_v43 = vadd.f32 %v6195_v16, %v12884_v17 }
 0x6a1   :  { %6724 = vst [vmem:[%s13227_s5 + $0x150] sm:$0xff] %v7180_v22  ;;  %v7181_v0 = vpack.c.bf16 %v7673_v43, %v7672_v45 }
 0x6a3   :  { %6725 = vst [vmem:[%s13227_s5 + $0x158] sm:$0xff] %v7181_v0  ;;  %v6199_v18 = vpop.f32.mrb[216].mxu0 }
 0x6a4   :  { %v7674_v23 = vadd.f32 %v6199_v18, %v12879_v32  ;;  %v6201_v11 = vpop.f32.mrb[217].mxu0 }
 0x6a5   :  { %v7675_v46 = vadd.f32 %v6201_v11, %v12884_v17  ;;  %v6203_v31 = vpop.f32.mrb[218].mxu0 }
 0x6a6   :  { %v7676_v9 = vadd.f32 %v6203_v31, %v12879_v32  ;;  %v6205_v41 = vpop.f32.mrb[219].mxu0 }
 0x6a7   :  { %v7182_v25 = vpack.c.bf16 %v7675_v46, %v7674_v23  ;;  %v7677_v47 = vadd.f32 %v6205_v41, %v12884_v17 }
 0x6a9   :  { %6726 = vst [vmem:[%s13227_s5 + $0x160] sm:$0xff] %v7182_v25  ;;  %v7183_v52 = vpack.c.bf16 %v7677_v47, %v7676_v9 }
 0x6ab   :  { %6727 = vst [vmem:[%s13227_s5 + $0x168] sm:$0xff] %v7183_v52  ;;  %v6209_v49 = vpop.f32.mrb[220].mxu0 }
 0x6ac   :  { %v7678_v8 = vadd.f32 %v6209_v49, %v12879_v32  ;;  %v6211_v42 = vpop.f32.mrb[221].mxu0 }
 0x6ad   :  { %v7679_v59 = vadd.f32 %v6211_v42, %v12884_v17  ;;  %v6213_v48 = vpop.f32.mrb[222].mxu0 }
 0x6ae   :  { %v7680_v6 = vadd.f32 %v6213_v48, %v12879_v32  ;;  %v6215_v56 = vpop.f32.mrb[223].mxu0 }
 0x6af   :  { %v7184_v5 = vpack.c.bf16 %v7679_v59, %v7678_v8  ;;  %v7681_v51 = vadd.f32 %v6215_v56, %v12884_v17 }
 0x6b1   :  { %6728 = vst [vmem:[%s13227_s5 + $0x170] sm:$0xff] %v7184_v5  ;;  %v7185_v10 = vpack.c.bf16 %v7681_v51, %v7680_v6 }
 0x6b3   :  { %6729 = vst [vmem:[%s13227_s5 + $0x178] sm:$0xff] %v7185_v10  ;;  %v6219_v12 = vpop.f32.mrb[224].mxu0 }
 0x6b4   :  { %v7682_v1 = vadd.f32 %v6219_v12, %v12879_v32  ;;  %v6221_v3 = vpop.f32.mrb[225].mxu0 }
 0x6b5   :  { %v7683_v57 = vadd.f32 %v6221_v3, %v12884_v17  ;;  %v6223_v4 = vpop.f32.mrb[226].mxu0 }
 0x6b6   :  { %v7684_v20 = vadd.f32 %v6223_v4, %v12879_v32  ;;  %v6225_v55 = vpop.f32.mrb[227].mxu0 }
 0x6b7   :  { %v7186_v44 = vpack.c.bf16 %v7683_v57, %v7682_v1  ;;  %v7685_v36 = vadd.f32 %v6225_v55, %v12884_v17 }
 0x6b9   :  { %6730 = vst [vmem:[%s13227_s5 + $0x180] sm:$0xff] %v7186_v44  ;;  %v7187_v24 = vpack.c.bf16 %v7685_v36, %v7684_v20 }
 0x6bb   :  { %6731 = vst [vmem:[%s13227_s5 + $0x188] sm:$0xff] %v7187_v24  ;;  %v6229_v15 = vpop.f32.mrb[228].mxu0 }
 0x6bc   :  { %v7686_v38 = vadd.f32 %v6229_v15, %v12879_v32  ;;  %v6231_v28 = vpop.f32.mrb[229].mxu0 }
 0x6bd   :  { %v7687_v13 = vadd.f32 %v6231_v28, %v12884_v17  ;;  %v6233_v39 = vpop.f32.mrb[230].mxu0 }
 0x6be   :  { %v7688_v33 = vadd.f32 %v6233_v39, %v12879_v32  ;;  %v6235_v54 = vpop.f32.mrb[231].mxu0 }
 0x6bf   :  { %v7188_v60 = vpack.c.bf16 %v7687_v13, %v7686_v38  ;;  %v7689_v29 = vadd.f32 %v6235_v54, %v12884_v17 }
 0x6c1   :  { %6732 = vst [vmem:[%s13227_s5 + $0x190] sm:$0xff] %v7188_v60  ;;  %v7189_v37 = vpack.c.bf16 %v7689_v29, %v7688_v33 }
 0x6c3   :  { %6733 = vst [vmem:[%s13227_s5 + $0x198] sm:$0xff] %v7189_v37  ;;  %v6239_v19 = vpop.f32.mrb[232].mxu0 }
 0x6c4   :  { %v7690_v62 = vadd.f32 %v6239_v19, %v12879_v32  ;;  %v6241_v58 = vpop.f32.mrb[233].mxu0 }
 0x6c5   :  { %v7691_v40 = vadd.f32 %v6241_v58, %v12884_v17  ;;  %v6243_v21 = vpop.f32.mrb[234].mxu0 }
 0x6c6   :  { %v7692_v63 = vadd.f32 %v6243_v21, %v12879_v32  ;;  %v6245_v35 = vpop.f32.mrb[235].mxu0 }
 0x6c7   :  { %v7190_v61 = vpack.c.bf16 %v7691_v40, %v7690_v62  ;;  %v7693_v50 = vadd.f32 %v6245_v35, %v12884_v17 }
 0x6c9   :  { %6734 = vst [vmem:[%s13227_s5 + $0x1a0] sm:$0xff] %v7190_v61  ;;  %v7191_v26 = vpack.c.bf16 %v7693_v50, %v7692_v63 }
 0x6cb   :  { %6735 = vst [vmem:[%s13227_s5 + $0x1a8] sm:$0xff] %v7191_v26  ;;  %v6249_v30 = vpop.f32.mrb[236].mxu0 }
 0x6cc   :  { %v7694_v2 = vadd.f32 %v6249_v30, %v12879_v32  ;;  %v6251_v34 = vpop.f32.mrb[237].mxu0 }
 0x6cd   :  { %v7695_v53 = vadd.f32 %v6251_v34, %v12884_v17  ;;  %v6253_v27 = vpop.f32.mrb[238].mxu0 }
 0x6ce   :  { %v7696_v7 = vadd.f32 %v6253_v27, %v12879_v32  ;;  %v6255_v14 = vpop.f32.mrb[239].mxu0 }
 0x6cf   :  { %v7192_v45 = vpack.c.bf16 %v7695_v53, %v7694_v2  ;;  %v7697_v16 = vadd.f32 %v6255_v14, %v12884_v17 }
 0x6d1   :  { %6736 = vst [vmem:[%s13227_s5 + $0x1b0] sm:$0xff] %v7192_v45  ;;  %v7193_v22 = vpack.c.bf16 %v7697_v16, %v7696_v7 }
 0x6d3   :  { %6737 = vst [vmem:[%s13227_s5 + $0x1b8] sm:$0xff] %v7193_v22  ;;  %v6259_v43 = vpop.f32.mrb[240].mxu0 }
 0x6d4   :  { %v7698_v0 = vadd.f32 %v6259_v43, %v12879_v32  ;;  %v6261_v18 = vpop.f32.mrb[241].mxu0 }
 0x6d5   :  { %v7699_v23 = vadd.f32 %v6261_v18, %v12884_v17  ;;  %v6263_v11 = vpop.f32.mrb[242].mxu0 }
 0x6d6   :  { %v7700_v46 = vadd.f32 %v6263_v11, %v12879_v32  ;;  %v6265_v31 = vpop.f32.mrb[243].mxu0 }
 0x6d7   :  { %v7194_v9 = vpack.c.bf16 %v7699_v23, %v7698_v0  ;;  %v7701_v41 = vadd.f32 %v6265_v31, %v12884_v17 }
 0x6d9   :  { %6738 = vst [vmem:[%s13227_s5 + $0x1c0] sm:$0xff] %v7194_v9  ;;  %v7195_v25 = vpack.c.bf16 %v7701_v41, %v7700_v46 }
 0x6db   :  { %6739 = vst [vmem:[%s13227_s5 + $0x1c8] sm:$0xff] %v7195_v25  ;;  %v6269_v47 = vpop.f32.mrb[244].mxu0 }
 0x6dc   :  { %v7702_v52 = vadd.f32 %v6269_v47, %v12879_v32  ;;  %v6271_v49 = vpop.f32.mrb[245].mxu0 }
 0x6dd   :  { %v7703_v8 = vadd.f32 %v6271_v49, %v12884_v17  ;;  %v6273_v42 = vpop.f32.mrb[246].mxu0 }
 0x6de   :  { %v7704_v59 = vadd.f32 %v6273_v42, %v12879_v32  ;;  %v6275_v48 = vpop.f32.mrb[247].mxu0 }
 0x6df   :  { %v7196_v6 = vpack.c.bf16 %v7703_v8, %v7702_v52  ;;  %v7705_v56 = vadd.f32 %v6275_v48, %v12884_v17 }
 0x6e1   :  { %6740 = vst [vmem:[%s13227_s5 + $0x1d0] sm:$0xff] %v7196_v6  ;;  %v7197_v5 = vpack.c.bf16 %v7705_v56, %v7704_v59 }
 0x6e3   :  { %6741 = vst [vmem:[%s13227_s5 + $0x1d8] sm:$0xff] %v7197_v5  ;;  %v6279_v51 = vpop.f32.mrb[248].mxu0 }
 0x6e4   :  { %v7706_v10 = vadd.f32 %v6279_v51, %v12879_v32  ;;  %v6281_v12 = vpop.f32.mrb[249].mxu0 }
 0x6e5   :  { %v7707_v1 = vadd.f32 %v6281_v12, %v12884_v17  ;;  %v6283_v3 = vpop.f32.mrb[250].mxu0 }
 0x6e6   :  { %v7708_v57 = vadd.f32 %v6283_v3, %v12879_v32  ;;  %v6285_v4 = vpop.f32.mrb[251].mxu0 }
 0x6e7   :  { %v7198_v20 = vpack.c.bf16 %v7707_v1, %v7706_v10  ;;  %v7709_v55 = vadd.f32 %v6285_v4, %v12884_v17 }
 0x6e9   :  { %6742 = vst [vmem:[%s13227_s5 + $0x1e0] sm:$0xff] %v7198_v20  ;;  %v7199_v44 = vpack.c.bf16 %v7709_v55, %v7708_v57 }
 0x6eb   :  { %6743 = vst [vmem:[%s13227_s5 + $0x1e8] sm:$0xff] %v7199_v44  ;;  %v6289_v36 = vpop.f32.mrb[252].mxu0 }
 0x6ec   :  { %v7710_v24 = vadd.f32 %v6289_v36, %v12879_v32  ;;  %v6291_v15 = vpop.f32.mrb[253].mxu0 }
 0x6ed   :  { %v7711_v38 = vadd.f32 %v6291_v15, %v12884_v17  ;;  %v6293_v28 = vpop.f32.mrb[254].mxu0 }
 0x6ee   :  { %v7712_v13 = vadd.f32 %v6293_v28, %v12879_v32  ;;  %v6295_v39 = vpop.f32.mrb[255].mxu0 }
 0x6ef   :  { %v7200_v33 = vpack.c.bf16 %v7711_v38, %v7710_v24  ;;  %v7713_v54 = vadd.f32 %v6295_v39, %v12884_v17 }
 0x6f1   :  { %6744 = vst [vmem:[%s13227_s5 + $0x1f0] sm:$0xff] %v7200_v33  ;;  %v7201_v60 = vpack.c.bf16 %v7713_v54, %v7712_v13 }
 0x6f3   :  { %6745 = vst [vmem:[%s13227_s5 + $0x1f8] sm:$0xff] %v7201_v60 }

</bundles_post_ra>
